<compile_context>
chip_gen: v5e
topology: v5e:2x2
jax: 0.10.0
libtpu: 0.0.40
codegen_flags: <defaults>
</compile_context>

<pallas_src>
import functools
import numpy as np
import jax
import jax.numpy as jnp
from jax.experimental import pallas as pl
from jax.experimental.pallas import tpu as pltpu

_VMEM_LIMIT = 32 * 1024 * 1024  # explicit, safe on v5e/v6e/v7x (tiles are tiny)


# ----------------------------- Pallas kernels ------------------------------

def _caamsft_kernel(x0_ref, x1_ref, w0_ref, b0_ref, ws1_ref, bs1_ref,
                    wt1_ref, bt1_ref, o_ref, *, C, relu):
    """Fused CAAMSFT: scale/shift 1x1-conv chains + affine (+ optional ReLU).

    x0_ref/x1_ref: (TM, C).  w0: (C, 2C) = [scale_conv0 | shift_conv0] (bf16).
    ws1/wt1: (C, C) (bf16).  Biases: (1, 2C) / (1, C) in f32.
    """
    x1 = x1_ref[...].astype(jnp.bfloat16)
    # lane-dense first layer: one (TM, C) x (C, 2C) dot, f32 accumulation
    h = jnp.dot(x1, w0_ref[...], preferred_element_type=jnp.float32)
    h = h + b0_ref[...]
    h = jnp.where(h >= 0.0, h, 0.1 * h)            # leaky_relu(0.1), f32 on VPU
    hb = h.astype(jnp.bfloat16)
    scale = jnp.dot(hb[:, :C], ws1_ref[...],
                    preferred_element_type=jnp.float32) + bs1_ref[...]
    shift = jnp.dot(hb[:, C:], wt1_ref[...],
                    preferred_element_type=jnp.float32) + bt1_ref[...]
    y = x0_ref[...].astype(jnp.float32) * (scale + 1.0) + shift
    if relu:
        y = jnp.maximum(y, 0.0)
    o_ref[...] = y.astype(o_ref.dtype)


def _conv_kernel(x_ref, w_ref, b_ref, *rest, ksize, h, w, relu, has_res):
    """kxk conv (pad k//2) with in-VMEM tap accumulation.

    x_ref: (1, h+2p, w+2p, Cin) f32 padded image tile (whole image resident).
    w_ref: (k, k, Cin, Cout) bf16.  b_ref: (1, Cout) f32.
    Optional residual r_ref: (1, h*w, Cout).  Output o_ref: (1, h*w, Cout).
    """
    if has_res:
        r_ref, o_ref = rest
    else:
        (o_ref,) = rest
    cin = x_ref.shape[3]
    cout = o_ref.shape[2]
    acc = jnp.zeros((h * w, cout), jnp.float32)
    for dy in range(ksize):
        for dx in range(ksize):
            # static-offset window load straight from the VMEM block (no HBM im2col)
            patch = x_ref[0, dy:dy + h, dx:dx + w, :].reshape(h * w, cin)
            acc = acc + jnp.dot(patch.astype(jnp.bfloat16), w_ref[dy, dx],
                                preferred_element_type=jnp.float32)
    y = acc + b_ref[...]
    if relu:
        y = jnp.maximum(y, 0.0)
    if has_res:
        y = y + r_ref[0].astype(jnp.float32)       # fused residual epilogue
    o_ref[0] = y.astype(o_ref.dtype)


# ------------------------------ wrappers ------------------------------------

def _row_tile(m):
    # Prefer large row tiles (HBM roofline) but keep >= 2 grid steps so the
    # "parallel" axis can still use both TensorCores on v7x.
    for t in (1024, 512, 256):
        if m >= 2 * t:
            return t
    return 128


def caamsft(x0, x1, p, *, relu, out_dtype):
    """x0, x1: (N, H, W, C) -> CAAMSFT(x0 | x1) (+ ReLU)."""
    n, h, w, c = x0.shape
    m = n * h * w
    tm = _row_tile(m)
    mp = ((m + tm - 1) // tm) * tm
    x0f = x0.reshape(m, c)
    x1f = x1.reshape(m, c)
    if mp != m:
        x0f = jnp.pad(x0f, ((0, mp - m), (0, 0)))
        x1f = jnp.pad(x1f, ((0, mp - m), (0, 0)))

    row_spec = pl.BlockSpec((tm, c), lambda i: (i, 0))
    full = lambda shape: pl.BlockSpec(shape, lambda i: tuple(0 for _ in shape))

    out = pl.pallas_call(
        functools.partial(_caamsft_kernel, C=c, relu=relu),
        out_shape=jax.ShapeDtypeStruct((mp, c), out_dtype),
        grid=(mp // tm,),
        in_specs=[row_spec, row_spec,
                  full((c, 2 * c)), full((1, 2 * c)),
                  full((c, c)), full((1, c)),
                  full((c, c)), full((1, c))],
        out_specs=row_spec,
        compiler_params=pltpu.CompilerParams(
            dimension_semantics=("parallel",),
            vmem_limit_bytes=_VMEM_LIMIT),
    )(x0f, x1f, p["w0"], p["b0"], p["ws1"], p["bs1"], p["wt1"], p["bt1"])
    return out[:m].reshape(n, h, w, c)


def conv_kxk(x, wgt, bias, *, relu, residual=None, out_dtype):
    """x: (N, H, W, Cin) f32; wgt: (k, k, Cin, Cout) bf16; bias: (1, Cout) f32."""
    n, h, w, cin = x.shape
    k = wgt.shape[0]
    cout = wgt.shape[-1]
    pad = k // 2
    xp = jnp.pad(x, ((0, 0), (pad, pad), (pad, pad), (0, 0)))
    hp, wp = h + 2 * pad, w + 2 * pad

    in_specs = [
        pl.BlockSpec((1, hp, wp, cin), lambda i: (i, 0, 0, 0)),
        pl.BlockSpec((k, k, cin, cout), lambda i: (0, 0, 0, 0)),
        pl.BlockSpec((1, cout), lambda i: (0, 0)),
    ]
    args = [xp, wgt, bias]
    if residual is not None:
        in_specs.append(pl.BlockSpec((1, h * w, cout), lambda i: (i, 0, 0)))
        args.append(residual.reshape(n, h * w, cout))

    out = pl.pallas_call(
        functools.partial(_conv_kernel, ksize=k, h=h, w=w, relu=relu,
                          has_res=residual is not None),
        out_shape=jax.ShapeDtypeStruct((n, h * w, cout), out_dtype),
        grid=(n,),
        in_specs=in_specs,
        out_specs=pl.BlockSpec((1, h * w, cout), lambda i: (i, 0, 0)),
        compiler_params=pltpu.CompilerParams(
            dimension_semantics=("parallel",),
            vmem_limit_bytes=_VMEM_LIMIT),
    )(*args)
    return out.reshape(n, h, w, cout)


# ------------------------------ parameters ----------------------------------

def _uniform(key, shape, fan_in, dtype=jnp.float32):
    s = 1.0 / np.sqrt(fan_in)
    return jax.random.uniform(key, shape, jnp.float32, -s, s).astype(dtype)


def init_caamsft(key, c):
    ks = jax.random.split(key, 8)
    ws0 = _uniform(ks[0], (c, c), c)
    bs0 = _uniform(ks[1], (c,), c)
    wt0 = _uniform(ks[2], (c, c), c)
    bt0 = _uniform(ks[3], (c,), c)
    return {
        # first-layer (scale|shift) 1x1 weights concatenated -> lane-dense (C, 2C) dot
        "w0": jnp.concatenate([ws0, wt0], axis=1).astype(jnp.bfloat16),
        "b0": jnp.concatenate([bs0, bt0]).reshape(1, 2 * c),
        "ws1": _uniform(ks[4], (c, c), c, jnp.bfloat16),
        "bs1": _uniform(ks[5], (1, c), c),
        "wt1": _uniform(ks[6], (c, c), c, jnp.bfloat16),
        "bt1": _uniform(ks[7], (1, c), c),
    }


def init_caamb(key, n_feat, ksize):
    k1, k2, k3, k4, k5, k6 = jax.random.split(key, 6)
    fan = n_feat * ksize * ksize
    return {
        "daam1": init_caamsft(k1, n_feat),
        "daam2": init_caamsft(k2, n_feat),
        "conv1_w": _uniform(k3, (ksize, ksize, n_feat, n_feat), fan, jnp.bfloat16),
        "conv1_b": _uniform(k4, (1, n_feat), fan),
        "conv2_w": _uniform(k5, (ksize, ksize, n_feat, n_feat), fan, jnp.bfloat16),
        "conv2_b": _uniform(k6, (1, n_feat), fan),
    }


# ------------------------------ forward pass ---------------------------------

def caamb_forward(x0_nchw, x1_nchw, params):
    """CAAMB.forward([x0, x1]) — returns NCHW like the PyTorch module."""
    x0 = jnp.transpose(x0_nchw, (0, 2, 3, 1)).astype(jnp.float32)   # NHWC
    x1 = jnp.transpose(x1_nchw, (0, 2, 3, 1)).astype(jnp.float32)

    out = caamsft(x0, x1, params["daam1"], relu=True, out_dtype=jnp.float32)
    out = conv_kxk(out, params["conv1_w"], params["conv1_b"],
                   relu=True, out_dtype=jnp.bfloat16)
    out = caamsft(out, x1, params["daam2"], relu=True, out_dtype=jnp.float32)
    out = conv_kxk(out, params["conv2_w"], params["conv2_b"],
                   relu=False, residual=x0, out_dtype=jnp.float32)
    return jnp.transpose(out, (0, 3, 1, 2))                          # NCHW


# --------------------------- pure-JAX f32 reference --------------------------

def _ref_caamsft(x0, x1, p):
    c = x0.shape[-1]
    h = jnp.tensordot(x1, p["w0"].astype(jnp.float32), axes=1) + p["b0"][0]
    h = jnp.where(h >= 0.0, h, 0.1 * h)
    scale = jnp.tensordot(h[..., :c], p["ws1"].astype(jnp.float32), axes=1) + p["bs1"][0]
    shift = jnp.tensordot(h[..., c:], p["wt1"].astype(jnp.float32), axes=1) + p["bt1"][0]
    return x0 * (scale + 1.0) + shift


def _ref_conv(x, wgt, bias):
    k = wgt.shape[0]
    pad = k // 2
    n, h, w, _ = x.shape
    wf = wgt.astype(jnp.float32)
    xp = jnp.pad(x, ((0, 0), (pad, pad), (pad, pad), (0, 0)))
    out = jnp.zeros((n, h, w, wgt.shape[-1]), jnp.float32)
    for dy in range(k):
        for dx in range(k):
            out = out + jnp.tensordot(xp[:, dy:dy + h, dx:dx + w, :], wf[dy, dx], axes=1)
    return out + bias[0]


def _ref_forward(x0_nchw, x1_nchw, params):
    x0 = jnp.transpose(x0_nchw, (0, 2, 3, 1)).astype(jnp.float32)
    x1 = jnp.transpose(x1_nchw, (0, 2, 3, 1)).astype(jnp.float32)
    out = jnp.maximum(_ref_caamsft(x0, x1, params["daam1"]), 0.0)
    out = jnp.maximum(_ref_conv(out, params["conv1_w"], params["conv1_b"]), 0.0)
    out = jnp.maximum(_ref_caamsft(out, x1, params["daam2"]), 0.0)
    out = _ref_conv(out, params["conv2_w"], params["conv2_b"]) + x0
    return jnp.transpose(out, (0, 3, 1, 2))


# ----------------------------------- main ------------------------------------

if __name__ == "__main__":
    N, C, H, W = 2, 64, 16, 16     # batch=2, n_feat=64, spatial=16
    KSIZE = 3                      # default_conv kernel size

    key = jax.random.PRNGKey(0)
    kx0, kx1, kp = jax.random.split(key, 3)
    x0 = jax.random.normal(kx0, (N, C, H, W), jnp.float32)
    x1 = jax.random.normal(kx1, (N, C, H, W), jnp.float32)
    params = init_caamb(kp, C, KSIZE)

    fwd = jax.jit(caamb_forward)
    out = jax.block_until_ready(fwd(x0, x1, params))

    assert out.shape == (N, C, H, W), out.shape
    assert bool(jnp.all(jnp.isfinite(out)))

    # numeric check against a pure-JAX f32 reference (bf16 matmul operands in the
    # Pallas path -> loose-ish tolerance)
    ref = _ref_forward(x0, x1, params)
    err = float(jnp.max(jnp.abs(out - ref)))
    assert err < 1e-1, f"max abs err vs reference: {err}"

    print("KERNEL_OK")
</pallas_src>

<mosaic_0001>
module attributes {stable_mosaic.version = 11 : i64} {
  func.func @_caamsft_kernel(%arg0: i32, %arg1: memref<256x64xbf16, #tpu.memory_space<vmem>>, %arg2: memref<256x64xf32, #tpu.memory_space<vmem>>, %arg3: memref<64x128xbf16, #tpu.memory_space<vmem>>, %arg4: memref<1x128xf32, #tpu.memory_space<vmem>>, %arg5: memref<64x64xbf16, #tpu.memory_space<vmem>>, %arg6: memref<1x64xf32, #tpu.memory_space<vmem>>, %arg7: memref<64x64xbf16, #tpu.memory_space<vmem>>, %arg8: memref<1x64xf32, #tpu.memory_space<vmem>>, %arg9: memref<256x64xf32, #tpu.memory_space<vmem>>) attributes {dimension_semantics = [#tpu.dimension_semantics<parallel>], iteration_bounds = array<i64: 2>, scalar_prefetch = 0 : i64, scratch_operands = 0 : i64, tpu.core_type = #tpu.core_type<tc>, window_params = [{transform_indices = @transform_0, window_bounds = array<i64: 256, 64>}, {transform_indices = @transform_1, window_bounds = array<i64: 256, 64>}, {pipeline_mode = #tpu.pipeline_mode<synchronous>, transform_indices = @transform_2, window_bounds = array<i64: 64, 128>}, {pipeline_mode = #tpu.pipeline_mode<synchronous>, transform_indices = @transform_3, window_bounds = array<i64: 1, 128>}, {pipeline_mode = #tpu.pipeline_mode<synchronous>, transform_indices = @transform_4, window_bounds = array<i64: 64, 64>}, {pipeline_mode = #tpu.pipeline_mode<synchronous>, transform_indices = @transform_5, window_bounds = array<i64: 1, 64>}, {pipeline_mode = #tpu.pipeline_mode<synchronous>, transform_indices = @transform_6, window_bounds = array<i64: 64, 64>}, {pipeline_mode = #tpu.pipeline_mode<synchronous>, transform_indices = @transform_7, window_bounds = array<i64: 1, 64>}, {transform_indices = @transform_8, window_bounds = array<i64: 256, 64>}]} {
    %c0 = arith.constant 0 : index
    %c0_0 = arith.constant 0 : index
    %0 = vector.load %arg2[%c0, %c0_0] : memref<256x64xf32, #tpu.memory_space<vmem>>, vector<256x64xf32>
    %1 = arith.truncf %0 : vector<256x64xf32> to vector<256x64xbf16>
    %c0_1 = arith.constant 0 : index
    %c0_2 = arith.constant 0 : index
    %2 = vector.load %arg3[%c0_1, %c0_2] : memref<64x128xbf16, #tpu.memory_space<vmem>>, vector<64x128xbf16>
    %cst = arith.constant dense<0.000000e+00> : vector<256x128xf32>
    %3 = tpu.matmul %1, %2, %cst {dimension_numbers = #tpu.dot_dimension_numbers<[1], [0], [0], [1], [0, 0, 1, 1], [], []>} : vector<256x64xbf16>, vector<64x128xbf16>, vector<256x128xf32> -> vector<256x128xf32>
    %c0_3 = arith.constant 0 : index
    %c0_4 = arith.constant 0 : index
    %4 = vector.load %arg4[%c0_3, %c0_4] : memref<1x128xf32, #tpu.memory_space<vmem>>, vector<1x128xf32>
    %5 = vector.broadcast %4 : vector<1x128xf32> to vector<256x128xf32>
    %6 = arith.addf %3, %5 : vector<256x128xf32>
    %cst_5 = arith.constant 0.000000e+00 : f32
    %7 = vector.broadcast %cst_5 : f32 to vector<256x128xf32>
    %8 = arith.cmpf oge, %6, %7 : vector<256x128xf32>
    %cst_6 = arith.constant 1.000000e-01 : f32
    %9 = vector.broadcast %cst_6 : f32 to vector<256x128xf32>
    %10 = arith.mulf %9, %6 : vector<256x128xf32>
    %11 = arith.select %8, %6, %10 : vector<256x128xi1>, vector<256x128xf32>
    %12 = arith.truncf %11 : vector<256x128xf32> to vector<256x128xbf16>
    %13 = vector.extract_strided_slice %12 {offsets = [0, 0], sizes = [256, 64], strides = [1, 1]} : vector<256x128xbf16> to vector<256x64xbf16>
    %c0_7 = arith.constant 0 : index
    %c0_8 = arith.constant 0 : index
    %14 = vector.load %arg5[%c0_7, %c0_8] : memref<64x64xbf16, #tpu.memory_space<vmem>>, vector<64x64xbf16>
    %cst_9 = arith.constant dense<0.000000e+00> : vector<256x64xf32>
    %15 = tpu.matmul %13, %14, %cst_9 {dimension_numbers = #tpu.dot_dimension_numbers<[1], [0], [0], [1], [0, 0, 1, 1], [], []>} : vector<256x64xbf16>, vector<64x64xbf16>, vector<256x64xf32> -> vector<256x64xf32>
    %c0_10 = arith.constant 0 : index
    %c0_11 = arith.constant 0 : index
    %16 = vector.load %arg6[%c0_10, %c0_11] : memref<1x64xf32, #tpu.memory_space<vmem>>, vector<1x64xf32>
    %17 = vector.broadcast %16 : vector<1x64xf32> to vector<256x64xf32>
    %18 = arith.addf %15, %17 : vector<256x64xf32>
    %19 = vector.extract_strided_slice %12 {offsets = [0, 64], sizes = [256, 64], strides = [1, 1]} : vector<256x128xbf16> to vector<256x64xbf16>
    %c0_12 = arith.constant 0 : index
    %c0_13 = arith.constant 0 : index
    %20 = vector.load %arg7[%c0_12, %c0_13] : memref<64x64xbf16, #tpu.memory_space<vmem>>, vector<64x64xbf16>
    %cst_14 = arith.constant dense<0.000000e+00> : vector<256x64xf32>
    %21 = tpu.matmul %19, %20, %cst_14 {dimension_numbers = #tpu.dot_dimension_numbers<[1], [0], [0], [1], [0, 0, 1, 1], [], []>} : vector<256x64xbf16>, vector<64x64xbf16>, vector<256x64xf32> -> vector<256x64xf32>
    %c0_15 = arith.constant 0 : index
    %c0_16 = arith.constant 0 : index
    %22 = vector.load %arg8[%c0_15, %c0_16] : memref<1x64xf32, #tpu.memory_space<vmem>>, vector<1x64xf32>
    %23 = vector.broadcast %22 : vector<1x64xf32> to vector<256x64xf32>
    %24 = arith.addf %21, %23 : vector<256x64xf32>
    %c0_17 = arith.constant 0 : index
    %c0_18 = arith.constant 0 : index
    %25 = vector.load %arg1[%c0_17, %c0_18] : memref<256x64xbf16, #tpu.memory_space<vmem>>, vector<256x64xbf16>
    %26 = arith.extf %25 : vector<256x64xbf16> to vector<256x64xf32>
    %cst_19 = arith.constant 1.000000e+00 : f32
    %27 = vector.broadcast %cst_19 : f32 to vector<256x64xf32>
    %28 = arith.addf %18, %27 : vector<256x64xf32>
    %29 = arith.mulf %26, %28 : vector<256x64xf32>
    %30 = arith.addf %29, %24 : vector<256x64xf32>
    %cst_20 = arith.constant 0.000000e+00 : f32
    %31 = vector.broadcast %cst_20 : f32 to vector<256x64xf32>
    %32 = arith.maximumf %30, %31 : vector<256x64xf32>
    %c0_21 = arith.constant 0 : index
    %c0_22 = arith.constant 0 : index
    %33 = vector.load %arg9[%c0_21, %c0_22] : memref<256x64xf32, #tpu.memory_space<vmem>>, vector<256x64xf32>
    tpu.vector_store %arg9[%c0_21, %c0_22], %32 {strides = array<i32>} : memref<256x64xf32, #tpu.memory_space<vmem>>, vector<256x64xf32>,
    return
  }
  func.func @transform_0(%arg0: i32) -> (i32, i32) {
    %c0_i32 = arith.constant 0 : i32
    %c0_i32_0 = arith.constant 0 : i32
    return %arg0, %c0_i32 : i32, i32
  }
  func.func @transform_1(%arg0: i32) -> (i32, i32) {
    %c0_i32 = arith.constant 0 : i32
    %c0_i32_0 = arith.constant 0 : i32
    return %arg0, %c0_i32 : i32, i32
  }
  func.func @transform_2(%arg0: i32) -> (i32, i32) {
    %c0_i32 = arith.constant 0 : i32
    %c0_i32_0 = arith.constant 0 : i32
    %c0_i32_1 = arith.constant 0 : i32
    return %c0_i32, %c0_i32_0 : i32, i32
  }
  func.func @transform_3(%arg0: i32) -> (i32, i32) {
    %c0_i32 = arith.constant 0 : i32
    %c0_i32_0 = arith.constant 0 : i32
    %c0_i32_1 = arith.constant 0 : i32
    return %c0_i32, %c0_i32_0 : i32, i32
  }
  func.func @transform_4(%arg0: i32) -> (i32, i32) {
    %c0_i32 = arith.constant 0 : i32
    %c0_i32_0 = arith.constant 0 : i32
    %c0_i32_1 = arith.constant 0 : i32
    return %c0_i32, %c0_i32_0 : i32, i32
  }
  func.func @transform_5(%arg0: i32) -> (i32, i32) {
    %c0_i32 = arith.constant 0 : i32
    %c0_i32_0 = arith.constant 0 : i32
    %c0_i32_1 = arith.constant 0 : i32
    return %c0_i32, %c0_i32_0 : i32, i32
  }
  func.func @transform_6(%arg0: i32) -> (i32, i32) {
    %c0_i32 = arith.constant 0 : i32
    %c0_i32_0 = arith.constant 0 : i32
    %c0_i32_1 = arith.constant 0 : i32
    return %c0_i32, %c0_i32_0 : i32, i32
  }
  func.func @transform_7(%arg0: i32) -> (i32, i32) {
    %c0_i32 = arith.constant 0 : i32
    %c0_i32_0 = arith.constant 0 : i32
    %c0_i32_1 = arith.constant 0 : i32
    return %c0_i32, %c0_i32_0 : i32, i32
  }
  func.func @transform_8(%arg0: i32) -> (i32, i32) {
    %c0_i32 = arith.constant 0 : i32
    %c0_i32_0 = arith.constant 0 : i32
    return %arg0, %c0_i32 : i32, i32
  }
}

module attributes {stable_mosaic.version = 11 : i64} {
  func.func @_caamsft_kernel(%arg0: i32, %arg1: memref<256x64xf32, #tpu.memory_space<vmem>>, %arg2: memref<256x64xf32, #tpu.memory_space<vmem>>, %arg3: memref<64x128xbf16, #tpu.memory_space<vmem>>, %arg4: memref<1x128xf32, #tpu.memory_space<vmem>>, %arg5: memref<64x64xbf16, #tpu.memory_space<vmem>>, %arg6: memref<1x64xf32, #tpu.memory_space<vmem>>, %arg7: memref<64x64xbf16, #tpu.memory_space<vmem>>, %arg8: memref<1x64xf32, #tpu.memory_space<vmem>>, %arg9: memref<256x64xf32, #tpu.memory_space<vmem>>) attributes {dimension_semantics = [#tpu.dimension_semantics<parallel>], iteration_bounds = array<i64: 2>, scalar_prefetch = 0 : i64, scratch_operands = 0 : i64, tpu.core_type = #tpu.core_type<tc>, window_params = [{transform_indices = @transform_0, window_bounds = array<i64: 256, 64>}, {transform_indices = @transform_1, window_bounds = array<i64: 256, 64>}, {pipeline_mode = #tpu.pipeline_mode<synchronous>, transform_indices = @transform_2, window_bounds = array<i64: 64, 128>}, {pipeline_mode = #tpu.pipeline_mode<synchronous>, transform_indices = @transform_3, window_bounds = array<i64: 1, 128>}, {pipeline_mode = #tpu.pipeline_mode<synchronous>, transform_indices = @transform_4, window_bounds = array<i64: 64, 64>}, {pipeline_mode = #tpu.pipeline_mode<synchronous>, transform_indices = @transform_5, window_bounds = array<i64: 1, 64>}, {pipeline_mode = #tpu.pipeline_mode<synchronous>, transform_indices = @transform_6, window_bounds = array<i64: 64, 64>}, {pipeline_mode = #tpu.pipeline_mode<synchronous>, transform_indices = @transform_7, window_bounds = array<i64: 1, 64>}, {transform_indices = @transform_8, window_bounds = array<i64: 256, 64>}]} {
    %c0 = arith.constant 0 : index
    %c0_0 = arith.constant 0 : index
    %0 = vector.load %arg2[%c0, %c0_0] : memref<256x64xf32, #tpu.memory_space<vmem>>, vector<256x64xf32>
    %1 = arith.truncf %0 : vector<256x64xf32> to vector<256x64xbf16>
    %c0_1 = arith.constant 0 : index
    %c0_2 = arith.constant 0 : index
    %2 = vector.load %arg3[%c0_1, %c0_2] : memref<64x128xbf16, #tpu.memory_space<vmem>>, vector<64x128xbf16>
    %cst = arith.constant dense<0.000000e+00> : vector<256x128xf32>
    %3 = tpu.matmul %1, %2, %cst {dimension_numbers = #tpu.dot_dimension_numbers<[1], [0], [0], [1], [0, 0, 1, 1], [], []>} : vector<256x64xbf16>, vector<64x128xbf16>, vector<256x128xf32> -> vector<256x128xf32>
    %c0_3 = arith.constant 0 : index
    %c0_4 = arith.constant 0 : index
    %4 = vector.load %arg4[%c0_3, %c0_4] : memref<1x128xf32, #tpu.memory_space<vmem>>, vector<1x128xf32>
    %5 = vector.broadcast %4 : vector<1x128xf32> to vector<256x128xf32>
    %6 = arith.addf %3, %5 : vector<256x128xf32>
    %cst_5 = arith.constant 0.000000e+00 : f32
    %7 = vector.broadcast %cst_5 : f32 to vector<256x128xf32>
    %8 = arith.cmpf oge, %6, %7 : vector<256x128xf32>
    %cst_6 = arith.constant 1.000000e-01 : f32
    %9 = vector.broadcast %cst_6 : f32 to vector<256x128xf32>
    %10 = arith.mulf %9, %6 : vector<256x128xf32>
    %11 = arith.select %8, %6, %10 : vector<256x128xi1>, vector<256x128xf32>
    %12 = arith.truncf %11 : vector<256x128xf32> to vector<256x128xbf16>
    %13 = vector.extract_strided_slice %12 {offsets = [0, 0], sizes = [256, 64], strides = [1, 1]} : vector<256x128xbf16> to vector<256x64xbf16>
    %c0_7 = arith.constant 0 : index
    %c0_8 = arith.constant 0 : index
    %14 = vector.load %arg5[%c0_7, %c0_8] : memref<64x64xbf16, #tpu.memory_space<vmem>>, vector<64x64xbf16>
    %cst_9 = arith.constant dense<0.000000e+00> : vector<256x64xf32>
    %15 = tpu.matmul %13, %14, %cst_9 {dimension_numbers = #tpu.dot_dimension_numbers<[1], [0], [0], [1], [0, 0, 1, 1], [], []>} : vector<256x64xbf16>, vector<64x64xbf16>, vector<256x64xf32> -> vector<256x64xf32>
    %c0_10 = arith.constant 0 : index
    %c0_11 = arith.constant 0 : index
    %16 = vector.load %arg6[%c0_10, %c0_11] : memref<1x64xf32, #tpu.memory_space<vmem>>, vector<1x64xf32>
    %17 = vector.broadcast %16 : vector<1x64xf32> to vector<256x64xf32>
    %18 = arith.addf %15, %17 : vector<256x64xf32>
    %19 = vector.extract_strided_slice %12 {offsets = [0, 64], sizes = [256, 64], strides = [1, 1]} : vector<256x128xbf16> to vector<256x64xbf16>
    %c0_12 = arith.constant 0 : index
    %c0_13 = arith.constant 0 : index
    %20 = vector.load %arg7[%c0_12, %c0_13] : memref<64x64xbf16, #tpu.memory_space<vmem>>, vector<64x64xbf16>
    %cst_14 = arith.constant dense<0.000000e+00> : vector<256x64xf32>
    %21 = tpu.matmul %19, %20, %cst_14 {dimension_numbers = #tpu.dot_dimension_numbers<[1], [0], [0], [1], [0, 0, 1, 1], [], []>} : vector<256x64xbf16>, vector<64x64xbf16>, vector<256x64xf32> -> vector<256x64xf32>
    %c0_15 = arith.constant 0 : index
    %c0_16 = arith.constant 0 : index
    %22 = vector.load %arg8[%c0_15, %c0_16] : memref<1x64xf32, #tpu.memory_space<vmem>>, vector<1x64xf32>
    %23 = vector.broadcast %22 : vector<1x64xf32> to vector<256x64xf32>
    %24 = arith.addf %21, %23 : vector<256x64xf32>
    %c0_17 = arith.constant 0 : index
    %c0_18 = arith.constant 0 : index
    %25 = vector.load %arg1[%c0_17, %c0_18] : memref<256x64xf32, #tpu.memory_space<vmem>>, vector<256x64xf32>
    %cst_19 = arith.constant 1.000000e+00 : f32
    %26 = vector.broadcast %cst_19 : f32 to vector<256x64xf32>
    %27 = arith.addf %18, %26 : vector<256x64xf32>
    %28 = arith.mulf %25, %27 : vector<256x64xf32>
    %29 = arith.addf %28, %24 : vector<256x64xf32>
    %cst_20 = arith.constant 0.000000e+00 : f32
    %30 = vector.broadcast %cst_20 : f32 to vector<256x64xf32>
    %31 = arith.maximumf %29, %30 : vector<256x64xf32>
    %c0_21 = arith.constant 0 : index
    %c0_22 = arith.constant 0 : index
    %32 = vector.load %arg9[%c0_21, %c0_22] : memref<256x64xf32, #tpu.memory_space<vmem>>, vector<256x64xf32>
    tpu.vector_store %arg9[%c0_21, %c0_22], %31 {strides = array<i32>} : memref<256x64xf32, #tpu.memory_space<vmem>>, vector<256x64xf32>,
    return
  }
  func.func @transform_0(%arg0: i32) -> (i32, i32) {
    %c0_i32 = arith.constant 0 : i32
    %c0_i32_0 = arith.constant 0 : i32
    return %arg0, %c0_i32 : i32, i32
  }
  func.func @transform_1(%arg0: i32) -> (i32, i32) {
    %c0_i32 = arith.constant 0 : i32
    %c0_i32_0 = arith.constant 0 : i32
    return %arg0, %c0_i32 : i32, i32
  }
  func.func @transform_2(%arg0: i32) -> (i32, i32) {
    %c0_i32 = arith.constant 0 : i32
    %c0_i32_0 = arith.constant 0 : i32
    %c0_i32_1 = arith.constant 0 : i32
    return %c0_i32, %c0_i32_0 : i32, i32
  }
  func.func @transform_3(%arg0: i32) -> (i32, i32) {
    %c0_i32 = arith.constant 0 : i32
    %c0_i32_0 = arith.constant 0 : i32
    %c0_i32_1 = arith.constant 0 : i32
    return %c0_i32, %c0_i32_0 : i32, i32
  }
  func.func @transform_4(%arg0: i32) -> (i32, i32) {
    %c0_i32 = arith.constant 0 : i32
    %c0_i32_0 = arith.constant 0 : i32
    %c0_i32_1 = arith.constant 0 : i32
    return %c0_i32, %c0_i32_0 : i32, i32
  }
  func.func @transform_5(%arg0: i32) -> (i32, i32) {
    %c0_i32 = arith.constant 0 : i32
    %c0_i32_0 = arith.constant 0 : i32
    %c0_i32_1 = arith.constant 0 : i32
    return %c0_i32, %c0_i32_0 : i32, i32
  }
  func.func @transform_6(%arg0: i32) -> (i32, i32) {
    %c0_i32 = arith.constant 0 : i32
    %c0_i32_0 = arith.constant 0 : i32
    %c0_i32_1 = arith.constant 0 : i32
    return %c0_i32, %c0_i32_0 : i32, i32
  }
  func.func @transform_7(%arg0: i32) -> (i32, i32) {
    %c0_i32 = arith.constant 0 : i32
    %c0_i32_0 = arith.constant 0 : i32
    %c0_i32_1 = arith.constant 0 : i32
    return %c0_i32, %c0_i32_0 : i32, i32
  }
  func.func @transform_8(%arg0: i32) -> (i32, i32) {
    %c0_i32 = arith.constant 0 : i32
    %c0_i32_0 = arith.constant 0 : i32
    return %arg0, %c0_i32 : i32, i32
  }
}

module attributes {stable_mosaic.version = 11 : i64} {
  func.func @_conv_kernel(%arg0: i32, %arg1: memref<1x18x18x64xf32, #tpu.memory_space<vmem>>, %arg2: memref<3x3x64x64xbf16, #tpu.memory_space<vmem>>, %arg3: memref<1x64xf32, #tpu.memory_space<vmem>>, %arg4: memref<1x256x64xbf16, #tpu.memory_space<vmem>>) attributes {dimension_semantics = [#tpu.dimension_semantics<parallel>], iteration_bounds = array<i64: 2>, scalar_prefetch = 0 : i64, scratch_operands = 0 : i64, tpu.core_type = #tpu.core_type<tc>, window_params = [{transform_indices = @transform_0, window_bounds = array<i64: 1, 18, 18, 64>}, {pipeline_mode = #tpu.pipeline_mode<synchronous>, transform_indices = @transform_1, window_bounds = array<i64: 3, 3, 64, 64>}, {pipeline_mode = #tpu.pipeline_mode<synchronous>, transform_indices = @transform_2, window_bounds = array<i64: 1, 64>}, {transform_indices = @transform_3, window_bounds = array<i64: 1, 256, 64>}]} {
    %cst = arith.constant 0.000000e+00 : f32
    %0 = vector.broadcast %cst : f32 to vector<256x64xf32>
    %c0 = arith.constant 0 : index
    %c0_0 = arith.constant 0 : index
    %c0_1 = arith.constant 0 : index
    %c0_2 = arith.constant 0 : index
    %1 = vector.load %arg1[%c0, %c0_0, %c0_1, %c0_2] : memref<1x18x18x64xf32, #tpu.memory_space<vmem>>, vector<1x16x16x64xf32>
    %2 = vector.shape_cast %1 : vector<1x16x16x64xf32> to vector<16x16x64xf32>
    %3 = vector.shape_cast %2 : vector<16x16x64xf32> to vector<256x64xf32>
    %4 = arith.truncf %3 : vector<256x64xf32> to vector<256x64xbf16>
    %c0_3 = arith.constant 0 : index
    %c0_4 = arith.constant 0 : index
    %c0_5 = arith.constant 0 : index
    %c0_6 = arith.constant 0 : index
    %5 = vector.load %arg2[%c0_3, %c0_4, %c0_5, %c0_6] : memref<3x3x64x64xbf16, #tpu.memory_space<vmem>>, vector<1x1x64x64xbf16>
    %6 = vector.shape_cast %5 : vector<1x1x64x64xbf16> to vector<64x64xbf16>
    %cst_7 = arith.constant dense<0.000000e+00> : vector<256x64xf32>
    %7 = tpu.matmul %4, %6, %cst_7 {dimension_numbers = #tpu.dot_dimension_numbers<[1], [0], [0], [1], [0, 0, 1, 1], [], []>} : vector<256x64xbf16>, vector<64x64xbf16>, vector<256x64xf32> -> vector<256x64xf32>
    %8 = arith.addf %0, %7 : vector<256x64xf32>
    %c0_8 = arith.constant 0 : index
    %c0_9 = arith.constant 0 : index
    %c1 = arith.constant 1 : index
    %c0_10 = arith.constant 0 : index
    %9 = vector.load %arg1[%c0_8, %c0_9, %c1, %c0_10] : memref<1x18x18x64xf32, #tpu.memory_space<vmem>>, vector<1x16x16x64xf32>
    %10 = vector.shape_cast %9 : vector<1x16x16x64xf32> to vector<16x16x64xf32>
    %11 = vector.shape_cast %10 : vector<16x16x64xf32> to vector<256x64xf32>
    %12 = arith.truncf %11 : vector<256x64xf32> to vector<256x64xbf16>
    %c0_11 = arith.constant 0 : index
    %c1_12 = arith.constant 1 : index
    %c0_13 = arith.constant 0 : index
    %c0_14 = arith.constant 0 : index
    %13 = vector.load %arg2[%c0_11, %c1_12, %c0_13, %c0_14] : memref<3x3x64x64xbf16, #tpu.memory_space<vmem>>, vector<1x1x64x64xbf16>
    %14 = vector.shape_cast %13 : vector<1x1x64x64xbf16> to vector<64x64xbf16>
    %cst_15 = arith.constant dense<0.000000e+00> : vector<256x64xf32>
    %15 = tpu.matmul %12, %14, %cst_15 {dimension_numbers = #tpu.dot_dimension_numbers<[1], [0], [0], [1], [0, 0, 1, 1], [], []>} : vector<256x64xbf16>, vector<64x64xbf16>, vector<256x64xf32> -> vector<256x64xf32>
    %16 = arith.addf %8, %15 : vector<256x64xf32>
    %c0_16 = arith.constant 0 : index
    %c0_17 = arith.constant 0 : index
    %c2 = arith.constant 2 : index
    %c0_18 = arith.constant 0 : index
    %17 = vector.load %arg1[%c0_16, %c0_17, %c2, %c0_18] : memref<1x18x18x64xf32, #tpu.memory_space<vmem>>, vector<1x16x16x64xf32>
    %18 = vector.shape_cast %17 : vector<1x16x16x64xf32> to vector<16x16x64xf32>
    %19 = vector.shape_cast %18 : vector<16x16x64xf32> to vector<256x64xf32>
    %20 = arith.truncf %19 : vector<256x64xf32> to vector<256x64xbf16>
    %c0_19 = arith.constant 0 : index
    %c2_20 = arith.constant 2 : index
    %c0_21 = arith.constant 0 : index
    %c0_22 = arith.constant 0 : index
    %21 = vector.load %arg2[%c0_19, %c2_20, %c0_21, %c0_22] : memref<3x3x64x64xbf16, #tpu.memory_space<vmem>>, vector<1x1x64x64xbf16>
    %22 = vector.shape_cast %21 : vector<1x1x64x64xbf16> to vector<64x64xbf16>
    %cst_23 = arith.constant dense<0.000000e+00> : vector<256x64xf32>
    %23 = tpu.matmul %20, %22, %cst_23 {dimension_numbers = #tpu.dot_dimension_numbers<[1], [0], [0], [1], [0, 0, 1, 1], [], []>} : vector<256x64xbf16>, vector<64x64xbf16>, vector<256x64xf32> -> vector<256x64xf32>
    %24 = arith.addf %16, %23 : vector<256x64xf32>
    %c0_24 = arith.constant 0 : index
    %c1_25 = arith.constant 1 : index
    %c0_26 = arith.constant 0 : index
    %c0_27 = arith.constant 0 : index
    %25 = vector.load %arg1[%c0_24, %c1_25, %c0_26, %c0_27] : memref<1x18x18x64xf32, #tpu.memory_space<vmem>>, vector<1x16x16x64xf32>
    %26 = vector.shape_cast %25 : vector<1x16x16x64xf32> to vector<16x16x64xf32>
    %27 = vector.shape_cast %26 : vector<16x16x64xf32> to vector<256x64xf32>
    %28 = arith.truncf %27 : vector<256x64xf32> to vector<256x64xbf16>
    %c1_28 = arith.constant 1 : index
    %c0_29 = arith.constant 0 : index
    %c0_30 = arith.constant 0 : index
    %c0_31 = arith.constant 0 : index
    %29 = vector.load %arg2[%c1_28, %c0_29, %c0_30, %c0_31] : memref<3x3x64x64xbf16, #tpu.memory_space<vmem>>, vector<1x1x64x64xbf16>
    %30 = vector.shape_cast %29 : vector<1x1x64x64xbf16> to vector<64x64xbf16>
    %cst_32 = arith.constant dense<0.000000e+00> : vector<256x64xf32>
    %31 = tpu.matmul %28, %30, %cst_32 {dimension_numbers = #tpu.dot_dimension_numbers<[1], [0], [0], [1], [0, 0, 1, 1], [], []>} : vector<256x64xbf16>, vector<64x64xbf16>, vector<256x64xf32> -> vector<256x64xf32>
    %32 = arith.addf %24, %31 : vector<256x64xf32>
    %c0_33 = arith.constant 0 : index
    %c1_34 = arith.constant 1 : index
    %c1_35 = arith.constant 1 : index
    %c0_36 = arith.constant 0 : index
    %33 = vector.load %arg1[%c0_33, %c1_34, %c1_35, %c0_36] : memref<1x18x18x64xf32, #tpu.memory_space<vmem>>, vector<1x16x16x64xf32>
    %34 = vector.shape_cast %33 : vector<1x16x16x64xf32> to vector<16x16x64xf32>
    %35 = vector.shape_cast %34 : vector<16x16x64xf32> to vector<256x64xf32>
    %36 = arith.truncf %35 : vector<256x64xf32> to vector<256x64xbf16>
    %c1_37 = arith.constant 1 : index
    %c1_38 = arith.constant 1 : index
    %c0_39 = arith.constant 0 : index
    %c0_40 = arith.constant 0 : index
    %37 = vector.load %arg2[%c1_37, %c1_38, %c0_39, %c0_40] : memref<3x3x64x64xbf16, #tpu.memory_space<vmem>>, vector<1x1x64x64xbf16>
    %38 = vector.shape_cast %37 : vector<1x1x64x64xbf16> to vector<64x64xbf16>
    %cst_41 = arith.constant dense<0.000000e+00> : vector<256x64xf32>
    %39 = tpu.matmul %36, %38, %cst_41 {dimension_numbers = #tpu.dot_dimension_numbers<[1], [0], [0], [1], [0, 0, 1, 1], [], []>} : vector<256x64xbf16>, vector<64x64xbf16>, vector<256x64xf32> -> vector<256x64xf32>
    %40 = arith.addf %32, %39 : vector<256x64xf32>
    %c0_42 = arith.constant 0 : index
    %c1_43 = arith.constant 1 : index
    %c2_44 = arith.constant 2 : index
    %c0_45 = arith.constant 0 : index
    %41 = vector.load %arg1[%c0_42, %c1_43, %c2_44, %c0_45] : memref<1x18x18x64xf32, #tpu.memory_space<vmem>>, vector<1x16x16x64xf32>
    %42 = vector.shape_cast %41 : vector<1x16x16x64xf32> to vector<16x16x64xf32>
    %43 = vector.shape_cast %42 : vector<16x16x64xf32> to vector<256x64xf32>
    %44 = arith.truncf %43 : vector<256x64xf32> to vector<256x64xbf16>
    %c1_46 = arith.constant 1 : index
    %c2_47 = arith.constant 2 : index
    %c0_48 = arith.constant 0 : index
    %c0_49 = arith.constant 0 : index
    %45 = vector.load %arg2[%c1_46, %c2_47, %c0_48, %c0_49] : memref<3x3x64x64xbf16, #tpu.memory_space<vmem>>, vector<1x1x64x64xbf16>
    %46 = vector.shape_cast %45 : vector<1x1x64x64xbf16> to vector<64x64xbf16>
    %cst_50 = arith.constant dense<0.000000e+00> : vector<256x64xf32>
    %47 = tpu.matmul %44, %46, %cst_50 {dimension_numbers = #tpu.dot_dimension_numbers<[1], [0], [0], [1], [0, 0, 1, 1], [], []>} : vector<256x64xbf16>, vector<64x64xbf16>, vector<256x64xf32> -> vector<256x64xf32>
    %48 = arith.addf %40, %47 : vector<256x64xf32>
    %c0_51 = arith.constant 0 : index
    %c2_52 = arith.constant 2 : index
    %c0_53 = arith.constant 0 : index
    %c0_54 = arith.constant 0 : index
    %49 = vector.load %arg1[%c0_51, %c2_52, %c0_53, %c0_54] : memref<1x18x18x64xf32, #tpu.memory_space<vmem>>, vector<1x16x16x64xf32>
    %50 = vector.shape_cast %49 : vector<1x16x16x64xf32> to vector<16x16x64xf32>
    %51 = vector.shape_cast %50 : vector<16x16x64xf32> to vector<256x64xf32>
    %52 = arith.truncf %51 : vector<256x64xf32> to vector<256x64xbf16>
    %c2_55 = arith.constant 2 : index
    %c0_56 = arith.constant 0 : index
    %c0_57 = arith.constant 0 : index
    %c0_58 = arith.constant 0 : index
    %53 = vector.load %arg2[%c2_55, %c0_56, %c0_57, %c0_58] : memref<3x3x64x64xbf16, #tpu.memory_space<vmem>>, vector<1x1x64x64xbf16>
    %54 = vector.shape_cast %53 : vector<1x1x64x64xbf16> to vector<64x64xbf16>
    %cst_59 = arith.constant dense<0.000000e+00> : vector<256x64xf32>
    %55 = tpu.matmul %52, %54, %cst_59 {dimension_numbers = #tpu.dot_dimension_numbers<[1], [0], [0], [1], [0, 0, 1, 1], [], []>} : vector<256x64xbf16>, vector<64x64xbf16>, vector<256x64xf32> -> vector<256x64xf32>
    %56 = arith.addf %48, %55 : vector<256x64xf32>
    %c0_60 = arith.constant 0 : index
    %c2_61 = arith.constant 2 : index
    %c1_62 = arith.constant 1 : index
    %c0_63 = arith.constant 0 : index
    %57 = vector.load %arg1[%c0_60, %c2_61, %c1_62, %c0_63] : memref<1x18x18x64xf32, #tpu.memory_space<vmem>>, vector<1x16x16x64xf32>
    %58 = vector.shape_cast %57 : vector<1x16x16x64xf32> to vector<16x16x64xf32>
    %59 = vector.shape_cast %58 : vector<16x16x64xf32> to vector<256x64xf32>
    %60 = arith.truncf %59 : vector<256x64xf32> to vector<256x64xbf16>
    %c2_64 = arith.constant 2 : index
    %c1_65 = arith.constant 1 : index
    %c0_66 = arith.constant 0 : index
    %c0_67 = arith.constant 0 : index
    %61 = vector.load %arg2[%c2_64, %c1_65, %c0_66, %c0_67] : memref<3x3x64x64xbf16, #tpu.memory_space<vmem>>, vector<1x1x64x64xbf16>
    %62 = vector.shape_cast %61 : vector<1x1x64x64xbf16> to vector<64x64xbf16>
    %cst_68 = arith.constant dense<0.000000e+00> : vector<256x64xf32>
    %63 = tpu.matmul %60, %62, %cst_68 {dimension_numbers = #tpu.dot_dimension_numbers<[1], [0], [0], [1], [0, 0, 1, 1], [], []>} : vector<256x64xbf16>, vector<64x64xbf16>, vector<256x64xf32> -> vector<256x64xf32>
    %64 = arith.addf %56, %63 : vector<256x64xf32>
    %c0_69 = arith.constant 0 : index
    %c2_70 = arith.constant 2 : index
    %c2_71 = arith.constant 2 : index
    %c0_72 = arith.constant 0 : index
    %65 = vector.load %arg1[%c0_69, %c2_70, %c2_71, %c0_72] : memref<1x18x18x64xf32, #tpu.memory_space<vmem>>, vector<1x16x16x64xf32>
    %66 = vector.shape_cast %65 : vector<1x16x16x64xf32> to vector<16x16x64xf32>
    %67 = vector.shape_cast %66 : vector<16x16x64xf32> to vector<256x64xf32>
    %68 = arith.truncf %67 : vector<256x64xf32> to vector<256x64xbf16>
    %c2_73 = arith.constant 2 : index
    %c2_74 = arith.constant 2 : index
    %c0_75 = arith.constant 0 : index
    %c0_76 = arith.constant 0 : index
    %69 = vector.load %arg2[%c2_73, %c2_74, %c0_75, %c0_76] : memref<3x3x64x64xbf16, #tpu.memory_space<vmem>>, vector<1x1x64x64xbf16>
    %70 = vector.shape_cast %69 : vector<1x1x64x64xbf16> to vector<64x64xbf16>
    %cst_77 = arith.constant dense<0.000000e+00> : vector<256x64xf32>
    %71 = tpu.matmul %68, %70, %cst_77 {dimension_numbers = #tpu.dot_dimension_numbers<[1], [0], [0], [1], [0, 0, 1, 1], [], []>} : vector<256x64xbf16>, vector<64x64xbf16>, vector<256x64xf32> -> vector<256x64xf32>
    %72 = arith.addf %64, %71 : vector<256x64xf32>
    %c0_78 = arith.constant 0 : index
    %c0_79 = arith.constant 0 : index
    %73 = vector.load %arg3[%c0_78, %c0_79] : memref<1x64xf32, #tpu.memory_space<vmem>>, vector<1x64xf32>
    %74 = vector.broadcast %73 : vector<1x64xf32> to vector<256x64xf32>
    %75 = arith.addf %72, %74 : vector<256x64xf32>
    %cst_80 = arith.constant 0.000000e+00 : f32
    %76 = vector.broadcast %cst_80 : f32 to vector<256x64xf32>
    %77 = arith.maximumf %75, %76 : vector<256x64xf32>
    %78 = arith.truncf %77 : vector<256x64xf32> to vector<256x64xbf16>
    %c0_81 = arith.constant 0 : index
    %c0_82 = arith.constant 0 : index
    %c0_83 = arith.constant 0 : index
    %79 = vector.load %arg4[%c0_81, %c0_82, %c0_83] : memref<1x256x64xbf16, #tpu.memory_space<vmem>>, vector<1x256x64xbf16>
    %80 = vector.shape_cast %79 : vector<1x256x64xbf16> to vector<256x64xbf16>
    %81 = vector.shape_cast %78 : vector<256x64xbf16> to vector<1x256x64xbf16>
    tpu.vector_store %arg4[%c0_81, %c0_82, %c0_83], %81 {strides = array<i32>} : memref<1x256x64xbf16, #tpu.memory_space<vmem>>, vector<1x256x64xbf16>,
    return
  }
  func.func @transform_0(%arg0: i32) -> (i32, i32, i32, i32) {
    %c0_i32 = arith.constant 0 : i32
    %c0_i32_0 = arith.constant 0 : i32
    %c0_i32_1 = arith.constant 0 : i32
    %c0_i32_2 = arith.constant 0 : i32
    return %arg0, %c0_i32, %c0_i32_0, %c0_i32_1 : i32, i32, i32, i32
  }
  func.func @transform_1(%arg0: i32) -> (i32, i32, i32, i32) {
    %c0_i32 = arith.constant 0 : i32
    %c0_i32_0 = arith.constant 0 : i32
    %c0_i32_1 = arith.constant 0 : i32
    %c0_i32_2 = arith.constant 0 : i32
    %c0_i32_3 = arith.constant 0 : i32
    return %c0_i32, %c0_i32_0, %c0_i32_1, %c0_i32_2 : i32, i32, i32, i32
  }
  func.func @transform_2(%arg0: i32) -> (i32, i32) {
    %c0_i32 = arith.constant 0 : i32
    %c0_i32_0 = arith.constant 0 : i32
    %c0_i32_1 = arith.constant 0 : i32
    return %c0_i32, %c0_i32_0 : i32, i32
  }
  func.func @transform_3(%arg0: i32) -> (i32, i32, i32) {
    %c0_i32 = arith.constant 0 : i32
    %c0_i32_0 = arith.constant 0 : i32
    %c0_i32_1 = arith.constant 0 : i32
    return %arg0, %c0_i32, %c0_i32_0 : i32, i32, i32
  }
}

module attributes {stable_mosaic.version = 11 : i64} {
  func.func @_conv_kernel(%arg0: i32, %arg1: memref<1x18x18x64xf32, #tpu.memory_space<vmem>>, %arg2: memref<3x3x64x64xbf16, #tpu.memory_space<vmem>>, %arg3: memref<1x64xf32, #tpu.memory_space<vmem>>, %arg4: memref<1x256x64xf32, #tpu.memory_space<vmem>>, %arg5: memref<1x256x64xf32, #tpu.memory_space<vmem>>) attributes {dimension_semantics = [#tpu.dimension_semantics<parallel>], iteration_bounds = array<i64: 2>, scalar_prefetch = 0 : i64, scratch_operands = 0 : i64, tpu.core_type = #tpu.core_type<tc>, window_params = [{transform_indices = @transform_0, window_bounds = array<i64: 1, 18, 18, 64>}, {pipeline_mode = #tpu.pipeline_mode<synchronous>, transform_indices = @transform_1, window_bounds = array<i64: 3, 3, 64, 64>}, {pipeline_mode = #tpu.pipeline_mode<synchronous>, transform_indices = @transform_2, window_bounds = array<i64: 1, 64>}, {transform_indices = @transform_3, window_bounds = array<i64: 1, 256, 64>}, {transform_indices = @transform_4, window_bounds = array<i64: 1, 256, 64>}]} {
    %cst = arith.constant 0.000000e+00 : f32
    %0 = vector.broadcast %cst : f32 to vector<256x64xf32>
    %c0 = arith.constant 0 : index
    %c0_0 = arith.constant 0 : index
    %c0_1 = arith.constant 0 : index
    %c0_2 = arith.constant 0 : index
    %1 = vector.load %arg1[%c0, %c0_0, %c0_1, %c0_2] : memref<1x18x18x64xf32, #tpu.memory_space<vmem>>, vector<1x16x16x64xf32>
    %2 = vector.shape_cast %1 : vector<1x16x16x64xf32> to vector<16x16x64xf32>
    %3 = vector.shape_cast %2 : vector<16x16x64xf32> to vector<256x64xf32>
    %4 = arith.truncf %3 : vector<256x64xf32> to vector<256x64xbf16>
    %c0_3 = arith.constant 0 : index
    %c0_4 = arith.constant 0 : index
    %c0_5 = arith.constant 0 : index
    %c0_6 = arith.constant 0 : index
    %5 = vector.load %arg2[%c0_3, %c0_4, %c0_5, %c0_6] : memref<3x3x64x64xbf16, #tpu.memory_space<vmem>>, vector<1x1x64x64xbf16>
    %6 = vector.shape_cast %5 : vector<1x1x64x64xbf16> to vector<64x64xbf16>
    %cst_7 = arith.constant dense<0.000000e+00> : vector<256x64xf32>
    %7 = tpu.matmul %4, %6, %cst_7 {dimension_numbers = #tpu.dot_dimension_numbers<[1], [0], [0], [1], [0, 0, 1, 1], [], []>} : vector<256x64xbf16>, vector<64x64xbf16>, vector<256x64xf32> -> vector<256x64xf32>
    %8 = arith.addf %0, %7 : vector<256x64xf32>
    %c0_8 = arith.constant 0 : index
    %c0_9 = arith.constant 0 : index
    %c1 = arith.constant 1 : index
    %c0_10 = arith.constant 0 : index
    %9 = vector.load %arg1[%c0_8, %c0_9, %c1, %c0_10] : memref<1x18x18x64xf32, #tpu.memory_space<vmem>>, vector<1x16x16x64xf32>
    %10 = vector.shape_cast %9 : vector<1x16x16x64xf32> to vector<16x16x64xf32>
    %11 = vector.shape_cast %10 : vector<16x16x64xf32> to vector<256x64xf32>
    %12 = arith.truncf %11 : vector<256x64xf32> to vector<256x64xbf16>
    %c0_11 = arith.constant 0 : index
    %c1_12 = arith.constant 1 : index
    %c0_13 = arith.constant 0 : index
    %c0_14 = arith.constant 0 : index
    %13 = vector.load %arg2[%c0_11, %c1_12, %c0_13, %c0_14] : memref<3x3x64x64xbf16, #tpu.memory_space<vmem>>, vector<1x1x64x64xbf16>
    %14 = vector.shape_cast %13 : vector<1x1x64x64xbf16> to vector<64x64xbf16>
    %cst_15 = arith.constant dense<0.000000e+00> : vector<256x64xf32>
    %15 = tpu.matmul %12, %14, %cst_15 {dimension_numbers = #tpu.dot_dimension_numbers<[1], [0], [0], [1], [0, 0, 1, 1], [], []>} : vector<256x64xbf16>, vector<64x64xbf16>, vector<256x64xf32> -> vector<256x64xf32>
    %16 = arith.addf %8, %15 : vector<256x64xf32>
    %c0_16 = arith.constant 0 : index
    %c0_17 = arith.constant 0 : index
    %c2 = arith.constant 2 : index
    %c0_18 = arith.constant 0 : index
    %17 = vector.load %arg1[%c0_16, %c0_17, %c2, %c0_18] : memref<1x18x18x64xf32, #tpu.memory_space<vmem>>, vector<1x16x16x64xf32>
    %18 = vector.shape_cast %17 : vector<1x16x16x64xf32> to vector<16x16x64xf32>
    %19 = vector.shape_cast %18 : vector<16x16x64xf32> to vector<256x64xf32>
    %20 = arith.truncf %19 : vector<256x64xf32> to vector<256x64xbf16>
    %c0_19 = arith.constant 0 : index
    %c2_20 = arith.constant 2 : index
    %c0_21 = arith.constant 0 : index
    %c0_22 = arith.constant 0 : index
    %21 = vector.load %arg2[%c0_19, %c2_20, %c0_21, %c0_22] : memref<3x3x64x64xbf16, #tpu.memory_space<vmem>>, vector<1x1x64x64xbf16>
    %22 = vector.shape_cast %21 : vector<1x1x64x64xbf16> to vector<64x64xbf16>
    %cst_23 = arith.constant dense<0.000000e+00> : vector<256x64xf32>
    %23 = tpu.matmul %20, %22, %cst_23 {dimension_numbers = #tpu.dot_dimension_numbers<[1], [0], [0], [1], [0, 0, 1, 1], [], []>} : vector<256x64xbf16>, vector<64x64xbf16>, vector<256x64xf32> -> vector<256x64xf32>
    %24 = arith.addf %16, %23 : vector<256x64xf32>
    %c0_24 = arith.constant 0 : index
    %c1_25 = arith.constant 1 : index
    %c0_26 = arith.constant 0 : index
    %c0_27 = arith.constant 0 : index
    %25 = vector.load %arg1[%c0_24, %c1_25, %c0_26, %c0_27] : memref<1x18x18x64xf32, #tpu.memory_space<vmem>>, vector<1x16x16x64xf32>
    %26 = vector.shape_cast %25 : vector<1x16x16x64xf32> to vector<16x16x64xf32>
    %27 = vector.shape_cast %26 : vector<16x16x64xf32> to vector<256x64xf32>
    %28 = arith.truncf %27 : vector<256x64xf32> to vector<256x64xbf16>
    %c1_28 = arith.constant 1 : index
    %c0_29 = arith.constant 0 : index
    %c0_30 = arith.constant 0 : index
    %c0_31 = arith.constant 0 : index
    %29 = vector.load %arg2[%c1_28, %c0_29, %c0_30, %c0_31] : memref<3x3x64x64xbf16, #tpu.memory_space<vmem>>, vector<1x1x64x64xbf16>
    %30 = vector.shape_cast %29 : vector<1x1x64x64xbf16> to vector<64x64xbf16>
    %cst_32 = arith.constant dense<0.000000e+00> : vector<256x64xf32>
    %31 = tpu.matmul %28, %30, %cst_32 {dimension_numbers = #tpu.dot_dimension_numbers<[1], [0], [0], [1], [0, 0, 1, 1], [], []>} : vector<256x64xbf16>, vector<64x64xbf16>, vector<256x64xf32> -> vector<256x64xf32>
    %32 = arith.addf %24, %31 : vector<256x64xf32>
    %c0_33 = arith.constant 0 : index
    %c1_34 = arith.constant 1 : index
    %c1_35 = arith.constant 1 : index
    %c0_36 = arith.constant 0 : index
    %33 = vector.load %arg1[%c0_33, %c1_34, %c1_35, %c0_36] : memref<1x18x18x64xf32, #tpu.memory_space<vmem>>, vector<1x16x16x64xf32>
    %34 = vector.shape_cast %33 : vector<1x16x16x64xf32> to vector<16x16x64xf32>
    %35 = vector.shape_cast %34 : vector<16x16x64xf32> to vector<256x64xf32>
    %36 = arith.truncf %35 : vector<256x64xf32> to vector<256x64xbf16>
    %c1_37 = arith.constant 1 : index
    %c1_38 = arith.constant 1 : index
    %c0_39 = arith.constant 0 : index
    %c0_40 = arith.constant 0 : index
    %37 = vector.load %arg2[%c1_37, %c1_38, %c0_39, %c0_40] : memref<3x3x64x64xbf16, #tpu.memory_space<vmem>>, vector<1x1x64x64xbf16>
    %38 = vector.shape_cast %37 : vector<1x1x64x64xbf16> to vector<64x64xbf16>
    %cst_41 = arith.constant dense<0.000000e+00> : vector<256x64xf32>
    %39 = tpu.matmul %36, %38, %cst_41 {dimension_numbers = #tpu.dot_dimension_numbers<[1], [0], [0], [1], [0, 0, 1, 1], [], []>} : vector<256x64xbf16>, vector<64x64xbf16>, vector<256x64xf32> -> vector<256x64xf32>
    %40 = arith.addf %32, %39 : vector<256x64xf32>
    %c0_42 = arith.constant 0 : index
    %c1_43 = arith.constant 1 : index
    %c2_44 = arith.constant 2 : index
    %c0_45 = arith.constant 0 : index
    %41 = vector.load %arg1[%c0_42, %c1_43, %c2_44, %c0_45] : memref<1x18x18x64xf32, #tpu.memory_space<vmem>>, vector<1x16x16x64xf32>
    %42 = vector.shape_cast %41 : vector<1x16x16x64xf32> to vector<16x16x64xf32>
    %43 = vector.shape_cast %42 : vector<16x16x64xf32> to vector<256x64xf32>
    %44 = arith.truncf %43 : vector<256x64xf32> to vector<256x64xbf16>
    %c1_46 = arith.constant 1 : index
    %c2_47 = arith.constant 2 : index
    %c0_48 = arith.constant 0 : index
    %c0_49 = arith.constant 0 : index
    %45 = vector.load %arg2[%c1_46, %c2_47, %c0_48, %c0_49] : memref<3x3x64x64xbf16, #tpu.memory_space<vmem>>, vector<1x1x64x64xbf16>
    %46 = vector.shape_cast %45 : vector<1x1x64x64xbf16> to vector<64x64xbf16>
    %cst_50 = arith.constant dense<0.000000e+00> : vector<256x64xf32>
    %47 = tpu.matmul %44, %46, %cst_50 {dimension_numbers = #tpu.dot_dimension_numbers<[1], [0], [0], [1], [0, 0, 1, 1], [], []>} : vector<256x64xbf16>, vector<64x64xbf16>, vector<256x64xf32> -> vector<256x64xf32>
    %48 = arith.addf %40, %47 : vector<256x64xf32>
    %c0_51 = arith.constant 0 : index
    %c2_52 = arith.constant 2 : index
    %c0_53 = arith.constant 0 : index
    %c0_54 = arith.constant 0 : index
    %49 = vector.load %arg1[%c0_51, %c2_52, %c0_53, %c0_54] : memref<1x18x18x64xf32, #tpu.memory_space<vmem>>, vector<1x16x16x64xf32>
    %50 = vector.shape_cast %49 : vector<1x16x16x64xf32> to vector<16x16x64xf32>
    %51 = vector.shape_cast %50 : vector<16x16x64xf32> to vector<256x64xf32>
    %52 = arith.truncf %51 : vector<256x64xf32> to vector<256x64xbf16>
    %c2_55 = arith.constant 2 : index
    %c0_56 = arith.constant 0 : index
    %c0_57 = arith.constant 0 : index
    %c0_58 = arith.constant 0 : index
    %53 = vector.load %arg2[%c2_55, %c0_56, %c0_57, %c0_58] : memref<3x3x64x64xbf16, #tpu.memory_space<vmem>>, vector<1x1x64x64xbf16>
    %54 = vector.shape_cast %53 : vector<1x1x64x64xbf16> to vector<64x64xbf16>
    %cst_59 = arith.constant dense<0.000000e+00> : vector<256x64xf32>
    %55 = tpu.matmul %52, %54, %cst_59 {dimension_numbers = #tpu.dot_dimension_numbers<[1], [0], [0], [1], [0, 0, 1, 1], [], []>} : vector<256x64xbf16>, vector<64x64xbf16>, vector<256x64xf32> -> vector<256x64xf32>
    %56 = arith.addf %48, %55 : vector<256x64xf32>
    %c0_60 = arith.constant 0 : index
    %c2_61 = arith.constant 2 : index
    %c1_62 = arith.constant 1 : index
    %c0_63 = arith.constant 0 : index
    %57 = vector.load %arg1[%c0_60, %c2_61, %c1_62, %c0_63] : memref<1x18x18x64xf32, #tpu.memory_space<vmem>>, vector<1x16x16x64xf32>
    %58 = vector.shape_cast %57 : vector<1x16x16x64xf32> to vector<16x16x64xf32>
    %59 = vector.shape_cast %58 : vector<16x16x64xf32> to vector<256x64xf32>
    %60 = arith.truncf %59 : vector<256x64xf32> to vector<256x64xbf16>
    %c2_64 = arith.constant 2 : index
    %c1_65 = arith.constant 1 : index
    %c0_66 = arith.constant 0 : index
    %c0_67 = arith.constant 0 : index
    %61 = vector.load %arg2[%c2_64, %c1_65, %c0_66, %c0_67] : memref<3x3x64x64xbf16, #tpu.memory_space<vmem>>, vector<1x1x64x64xbf16>
    %62 = vector.shape_cast %61 : vector<1x1x64x64xbf16> to vector<64x64xbf16>
    %cst_68 = arith.constant dense<0.000000e+00> : vector<256x64xf32>
    %63 = tpu.matmul %60, %62, %cst_68 {dimension_numbers = #tpu.dot_dimension_numbers<[1], [0], [0], [1], [0, 0, 1, 1], [], []>} : vector<256x64xbf16>, vector<64x64xbf16>, vector<256x64xf32> -> vector<256x64xf32>
    %64 = arith.addf %56, %63 : vector<256x64xf32>
    %c0_69 = arith.constant 0 : index
    %c2_70 = arith.constant 2 : index
    %c2_71 = arith.constant 2 : index
    %c0_72 = arith.constant 0 : index
    %65 = vector.load %arg1[%c0_69, %c2_70, %c2_71, %c0_72] : memref<1x18x18x64xf32, #tpu.memory_space<vmem>>, vector<1x16x16x64xf32>
    %66 = vector.shape_cast %65 : vector<1x16x16x64xf32> to vector<16x16x64xf32>
    %67 = vector.shape_cast %66 : vector<16x16x64xf32> to vector<256x64xf32>
    %68 = arith.truncf %67 : vector<256x64xf32> to vector<256x64xbf16>
    %c2_73 = arith.constant 2 : index
    %c2_74 = arith.constant 2 : index
    %c0_75 = arith.constant 0 : index
    %c0_76 = arith.constant 0 : index
    %69 = vector.load %arg2[%c2_73, %c2_74, %c0_75, %c0_76] : memref<3x3x64x64xbf16, #tpu.memory_space<vmem>>, vector<1x1x64x64xbf16>
    %70 = vector.shape_cast %69 : vector<1x1x64x64xbf16> to vector<64x64xbf16>
    %cst_77 = arith.constant dense<0.000000e+00> : vector<256x64xf32>
    %71 = tpu.matmul %68, %70, %cst_77 {dimension_numbers = #tpu.dot_dimension_numbers<[1], [0], [0], [1], [0, 0, 1, 1], [], []>} : vector<256x64xbf16>, vector<64x64xbf16>, vector<256x64xf32> -> vector<256x64xf32>
    %72 = arith.addf %64, %71 : vector<256x64xf32>
    %c0_78 = arith.constant 0 : index
    %c0_79 = arith.constant 0 : index
    %73 = vector.load %arg3[%c0_78, %c0_79] : memref<1x64xf32, #tpu.memory_space<vmem>>, vector<1x64xf32>
    %74 = vector.broadcast %73 : vector<1x64xf32> to vector<256x64xf32>
    %75 = arith.addf %72, %74 : vector<256x64xf32>
    %c0_80 = arith.constant 0 : index
    %c0_81 = arith.constant 0 : index
    %c0_82 = arith.constant 0 : index
    %76 = vector.load %arg4[%c0_80, %c0_81, %c0_82] : memref<1x256x64xf32, #tpu.memory_space<vmem>>, vector<1x256x64xf32>
    %77 = vector.shape_cast %76 : vector<1x256x64xf32> to vector<256x64xf32>
    %78 = arith.addf %75, %77 : vector<256x64xf32>
    %c0_83 = arith.constant 0 : index
    %c0_84 = arith.constant 0 : index
    %c0_85 = arith.constant 0 : index
    %79 = vector.load %arg5[%c0_83, %c0_84, %c0_85] : memref<1x256x64xf32, #tpu.memory_space<vmem>>, vector<1x256x64xf32>
    %80 = vector.shape_cast %79 : vector<1x256x64xf32> to vector<256x64xf32>
    %81 = vector.shape_cast %78 : vector<256x64xf32> to vector<1x256x64xf32>
    tpu.vector_store %arg5[%c0_83, %c0_84, %c0_85], %81 {strides = array<i32>} : memref<1x256x64xf32, #tpu.memory_space<vmem>>, vector<1x256x64xf32>,
    return
  }
  func.func @transform_0(%arg0: i32) -> (i32, i32, i32, i32) {
    %c0_i32 = arith.constant 0 : i32
    %c0_i32_0 = arith.constant 0 : i32
    %c0_i32_1 = arith.constant 0 : i32
    %c0_i32_2 = arith.constant 0 : i32
    return %arg0, %c0_i32, %c0_i32_0, %c0_i32_1 : i32, i32, i32, i32
  }
  func.func @transform_1(%arg0: i32) -> (i32, i32, i32, i32) {
    %c0_i32 = arith.constant 0 : i32
    %c0_i32_0 = arith.constant 0 : i32
    %c0_i32_1 = arith.constant 0 : i32
    %c0_i32_2 = arith.constant 0 : i32
    %c0_i32_3 = arith.constant 0 : i32
    return %c0_i32, %c0_i32_0, %c0_i32_1, %c0_i32_2 : i32, i32, i32, i32
  }
  func.func @transform_2(%arg0: i32) -> (i32, i32) {
    %c0_i32 = arith.constant 0 : i32
    %c0_i32_0 = arith.constant 0 : i32
    %c0_i32_1 = arith.constant 0 : i32
    return %c0_i32, %c0_i32_0 : i32, i32
  }
  func.func @transform_3(%arg0: i32) -> (i32, i32, i32) {
    %c0_i32 = arith.constant 0 : i32
    %c0_i32_0 = arith.constant 0 : i32
    %c0_i32_1 = arith.constant 0 : i32
    return %arg0, %c0_i32, %c0_i32_0 : i32, i32, i32
  }
  func.func @transform_4(%arg0: i32) -> (i32, i32, i32) {
    %c0_i32 = arith.constant 0 : i32
    %c0_i32_0 = arith.constant 0 : i32
    %c0_i32_1 = arith.constant 0 : i32
    return %arg0, %c0_i32, %c0_i32_0 : i32, i32, i32
  }
}

</mosaic_0001>

<bundles_post_ra>
// kernel: caamb_forward.4
= control target key start
LH: loop header
LB: loop body
LE: loop exit
PB: predicated region body
PF: predicated region fallthrough
CT: control target
= control target key end

     0   :  { %s2518_s0 = inlined_call_operand.hbm [shape: f32[512,64], index: 0, kind: input, shape index: {}]   ;;  %s2519_s1 = inlined_call_operand.hbm [shape: f32[512,64], index: 1, kind: input, shape index: {}]   ;;  %s2520_s2 = inlined_call_operand.hbm [shape: bf16[64,128], index: 2, kind: input, shape index: {}]   ;;  %s2521_s3 = inlined_call_operand.vmem [shape: f32[1,128], index: 3, kind: input, shape index: {}]   ;;  %s2522_s4 = inlined_call_operand.hbm [shape: bf16[64,64], index: 4, kind: input, shape index: {}]   ;;  %s2523_s5 = inlined_call_operand.vmem [shape: f32[1,64], index: 5, kind: input, shape index: {}]   ;;  %s2524_s6 = inlined_call_operand.hbm [shape: bf16[64,64], index: 6, kind: input, shape index: {}]   ;;  %s2525_s7 = inlined_call_operand.vmem [shape: f32[1,64], index: 7, kind: input, shape index: {}]   ;;  %s2526_s8 = inlined_call_operand.vmem [shape: f32[512,64], index: 8, kind: output, shape index: {}]  }
   0x1   :  { %2528 = sst [smem:[#allocation14_spill]] %s2518_s0 }
   0x2   :  { %2529 = sst [smem:[#allocation15_spill]] %s2520_s2 }
   0x3   :  { %2530 = sst [smem:[#allocation16_spill]] %s2522_s4 }
   0x4   :  { %2531 = sst [smem:[#allocation17_spill]] %s2524_s6 }
   0x5   :  { %13 = vsyncpa [#allocation3], 0 }
   0x6   :  { %15 = vsyncpa [#allocation3 + $0x1], 0 }
   0x7   :  { %16 = vsyncpa [#allocation5], 0 }
   0x8   :  { %18 = vsyncpa [#allocation5 + $0x1], 0 }
   0x9   :  { %19 = vsyncpa [#allocation8], 0  ;;  %s2020_s27 = smov 0   ;;  %s2022_s28 = smov 0  }
   0xa   :  { %s2024_s29 = smov 0   ;;  %s2026_s30 = smov 0  }
   0xb LB: > { %s2039_s9 = sadd.s32 4294967295, %s1965_s30   ;;  %p45_p0 = scmp.ne.s32.totalorder %s1957_s28, %s1953_s27  ;;  %s1965_s30 = sphi %s2026_s30, %s2544_s30   ;;  %s1961_s29 = sphi %s2024_s29, %s2543_s29   ;;  %s1957_s28 = sphi %s2022_s28, %s2542_s28   ;;  %s1953_s27 = sphi %s2020_s27, %s2541_s27  }
   0xc   : > { %p46_p1 = scmp.eq.s32.totalorder %s2039_s9, 0  ;;  %p1543_p2 = scmp.ge.s32.totalorder %s1965_s30, 1 }
   0xd   : > { %p234_p3 = scmp.lt.s32.totalorder %s1965_s30, 3  ;;  %s2533_s2 = sld [smem:[#allocation15_spill]] }
   0xe   : > { %p2047_p4 = por %p46_p1, %p45_p0  ;;  %s1967_s15 = smov [#allocation6]  }
   0xf   : > { %p2054_p5 = pnand %p1543_p2, %p234_p3  ;;  %s247_s16 = sshll.u32 %s1967_s15, 4  ;;  %s248_s16 = int_to_ptr.vmem [resolvable:$true] %s247_s16 }
  0x10   : > { %s2536_s4 = sld [smem:[#allocation16_spill]]  ;;  %s1968_s21 = smov 64  }
  0x11   : > { %p1702_p6 = pneg %p2054_p5  ;;  %s1969_s22 = smov 4  }
  0x12   : > { %s1970_s23 = smov [#allocation7]   ;;  %s2537_s6 = sld [smem:[#allocation17_spill]] }
  0x13   : > { %s245_s13 = sshll.u32 %s2533_s2, 4  ;;  %p2062_p7 = pnand %p1702_p6, %p46_p1  ;;  %s246_s13 = int_to_ptr.hbm [resolvable:$true] %s245_s13 }
  0x14   : > { %s264_s24 = sshll.u32 %s1970_s23, 4  ;;  %s1971_s11 = smov [#allocation9]   ;;  %s265_s24 = int_to_ptr.vmem [resolvable:$true] %s264_s24 }
  0x15   : > { %1705 = dma.hbm_to_vmem [thread:$0]  (!%p2062_p7), %s246_s13, 512, %s248_s16, [#allocation5], %s1968_s21, %s1968_s21, %s1969_s22  }
  0x16   : > { %s262_s20 = sshll.u32 %s2536_s4, 4  ;;  %s281_s12 = sshll.u32 %s1971_s11, 4  ;;  %s263_s20 = int_to_ptr.hbm [resolvable:$true] %s262_s20  ;;  %s282_s12 = int_to_ptr.vmem [resolvable:$true] %s281_s12 }
  0x17   : > { %1708 = dma.hbm_to_vmem [thread:$0]  (!%p2062_p7), %s263_s20, 512, %s265_s24, [#allocation8], %s1968_s21, %s1968_s21, %s1969_s22  }
  0x18   : > { %s279_s27 = sshll.u32 %s2537_s6, 4  ;;  %s2077_s13 = sadd.s32 1, %s1965_s30   ;;  %s280_s27 = int_to_ptr.hbm [resolvable:$true] %s279_s27 }
  0x19   : > { %1711 = dma.hbm_to_vmem [thread:$0]  (!%p2062_p7), %s280_s27, 512, %s282_s12, [#allocation8], %s1968_s21, %s1968_s21, %s1969_s22  }
  0x1a   : > { %s29_s15 = ssub.s32 %s1965_s30, %s2077_s13  ;;  %s32_s16 = sadd.s32 1, %s1961_s29 }
  0x1b   : > { %p30_p8 = scmp.eq.s32.totalorder %s29_s15, 0  ;;  %p39_p9 = scmp.ne.s32.totalorder %s1961_s29, %s1957_s28 }
  0x1c   : > { %p40_p10 = scmp.eq.s32.totalorder %s1965_s30, 0  ;;  %p1722_p11 = scmp.lt.s32.totalorder %s1965_s30, 2 }
  0x1d   : > { %s2089_s18 = scalar_select %p30_p8, %s1961_s29, %s32_s16  }
  0x1e   : > { %p41_p12 = por %p40_p10, %p39_p9  ;;  %s298_s19 = sand.u32 1, %s1961_s29  }
  0x1f   : > { %s2092_s20 = sshll.u32 %s298_s19, 8  ;;  %s2527_s23 = sshll.u32 %s1965_s30, 8 }
  0x20   : > { %s2538_s0 = sld [smem:[#allocation14_spill]]  ;;  %s302_s21 = scalar_lea.vmem [#allocation2], %s2092_s20 }
  0x21   : > { %s310_s22 = sshll.u32 %s302_s21, 4  ;;  %p2101_p13 = pnand %p1722_p11, %p41_p12  ;;  %s311_s22 = int_to_ptr.vmem [resolvable:$true] %s310_s22 }
  0x22   : > { %s299_s11 = scalar_lea.sflag [#allocation3], %s298_s19 }
  0x23   : > { %p1863_p2 = pneg %p2101_p13 }
  0x26   : > { %s307_s17 = scalar_lea.hbm %s2538_s0, %s2527_s23  ;;  %s1866_s25 = scalar_lea.hbm %s2538_s0, 512 }
  0x27   : > { %s308_s26 = sshll.u32 %s307_s17, 4  ;;  %s309_s26 = int_to_ptr.hbm [resolvable:$true] %s308_s26 }
  0x28   : > { %s1859_s12 = sshra.s32 %s309_s26, 4  ;;  %s1860_s12 = int_to_ptr.hbm [resolvable:$true] %s1859_s12 }
  0x29   : > { %s1861_s15 = scalar_lea.hbm %s1860_s12, 256  ;;  %p1867_p7 = scmp.lt.s32.totalorder %s1860_s12, %s2538_s0 }
  0x2a   : > { %p1862_p0 = scmp.ne.s32.totalorder %s1860_s12, %s1861_s15  ;;  %p1868_p8 = scmp.lt.s32.totalorder %s1866_s25, %s1861_s15 }
  0x2c   : > { %p1864_p3 = pnand %p1863_p2, %p1862_p0  ;;  %p1869_p9 = por %p1868_p8, %p1867_p7 }
  0x2e   : > { %p1865_p6 = pneg %p1864_p3 }
  0x30   : > { %p1870_p10 = pnand %p1869_p9, %p1865_p6 }
  0x32   : > { %1873 = shalt.err (!%p1870_p10)
}
  0x33   : > { %s1972_s19 = smov 128   ;;  %s1973_s23 = smov 8  }
  0x34   : > { %1715 = dma.hbm_to_vmem [thread:$0]  (!%p2101_p13), %s309_s26, 4096, %s311_s22, %s299_s11, %s1972_s19, %s1972_s19, %s1973_s23  }
  0x35   : > { %s2540_s2 = sshll.u32 %s1965_s30, 8  ;;  %s324_s17 = scalar_lea.vmem [#allocation4], %s2092_s20 }
  0x36   : > { %s329_s4 = scalar_lea.hbm %s2519_s1, %s2540_s2  ;;  %s332_s12 = sshll.u32 %s324_s17, 4  ;;  %s333_s12 = int_to_ptr.vmem [resolvable:$true] %s332_s12 }
  0x37   : > { %s330_s15 = sshll.u32 %s329_s4, 4  ;;  %s320_s25 = sand.u32 1, %s1965_s30   ;;  %s331_s15 = int_to_ptr.hbm [resolvable:$true] %s330_s15 }
  0x38   : > { %s321_s21 = scalar_lea.sflag [#allocation5], %s320_s25  ;;  %s1889_s0 = sshra.s32 %s331_s15, 4  ;;  %s1890_s0 = int_to_ptr.hbm [resolvable:$true] %s1889_s0 }
  0x39   : > { %s1891_s6 = scalar_lea.hbm %s1890_s0, 256  ;;  %s1896_s11 = scalar_lea.hbm %s2519_s1, 512 }
  0x3a   : > { %p1892_p11 = scmp.ne.s32.totalorder %s1890_s0, %s1891_s6  ;;  %p1897_p3 = scmp.lt.s32.totalorder %s1890_s0, %s2519_s1 }
  0x3b   : > { %p1898_p6 = scmp.lt.s32.totalorder %s1896_s11, %s1891_s6 }
  0x3c   : > { %p1894_p12 = pnand %p1892_p11, %p1863_p2 }
  0x3d   : > { %p1899_p7 = por %p1898_p6, %p1897_p3 }
  0x3e   : > { %p1895_p0 = pneg %p1894_p12 }
  0x40   : > { %p1900_p8 = pnand %p1899_p7, %p1895_p0 }
  0x42   : > { %1903 = shalt.err (!%p1900_p8)
}
  0x43   : > { %1718 = dma.hbm_to_vmem [thread:$0]  (!%p2101_p13), %s331_s15, 4096, %s333_s12, %s321_s21, %s1972_s19, %s1972_s19, %s1973_s23  }
  0x44   : > { %344 = sbr.rel (%p2054_p5) target bundleno = 680 (0x2a8), region = 52  ;;  %s346_s4 = sand.u32 (!%p2054_p5), 1, %s1957_s28  }
  0x45   : > { %s1555_s30 = sshll.u32 (!%p2054_p5), %s346_s4, 8  ;;  %s347_s16 = scalar_lea.sflag (!%p2054_p5), [#allocation3], %s346_s4 }
  0x46   : > { %s2139_s24 = scalar_lea.vmem (!%p2054_p5), [#allocation2], %s1555_s30 }
  0x49   : > { %1936 = dma.done.wait (%p2047_p4), %s347_s16, 4096  }
  0x4a   : > { %1938 = vsyncadd (%p2047_p4), %s347_s16, 4294963200  ;;  %s356_s0 = sand.u32 1, %s2039_s9   ;;  %s2146_s23 = scalar_lea.vmem [#allocation4], %s1555_s30 }
  0x4b   : > { %s357_s6 = scalar_lea.sflag [#allocation5], %s356_s0 }
  0x4c   : > { %1940 = dma.done.wait (%p2047_p4), %s357_s6, 4096  }
  0x4d   : > { %1942 = vsyncadd (%p2047_p4), %s357_s6, 4294963200 }
  0x4e   : > { %1944 = dma.done.wait (%p46_p1), [#allocation5], 512  }
  0x4f   : > { %1946 = vsyncadd (%p46_p1), [#allocation5], 4294966784 }
  0x50   : > { %1948 = dma.done.wait (%p46_p1), [#allocation8], 1024  }
  0x51   : > { %1950 = vsyncadd (%p46_p1), [#allocation8], 4294966272  ;;  %v1665_v0 = vld [vmem:[#allocation6 + $0x18] sm:$0xff]  ;;  %v1664_v1 = vld [vmem:[#allocation6 + $0x10] sm:$0xff]  ;;  %vm507_vm0 = vcmask 523264   ;;  %s1974_s27 = smov 64  }
  0x52   : > { %560 = vmatpush.bf16.msra.mxu0 %v1665_v0  ;;  %1674 = vmatpush.bf16.msra.mxu3 %v1665_v0  ;;  %v1663_v2 = vld [vmem:[#allocation6 + $0x8] sm:$0xff]  ;;  %v1662_v3 = vld [vmem:[#allocation6] sm:$0xff]  ;;  %v425_v7 = vld [vmem:[%s2146_s23 + $0x10] sm:$0xff]  ;;  %s1560_s12 = sshll.u32 %s2039_s9, 5 }
  0x53   : > { %v423_v4 = vld [vmem:[%s2146_s23] sm:$0xff]  ;;  %v424_v5 = vld [vmem:[%s2146_s23 + $0x8] sm:$0xff]  ;;  %v426_v8 = vld [vmem:[%s2146_s23 + $0x18] sm:$0xff]  ;;  %p417_p1 = scmp.lt.s32.totalorder %s1560_s12, 63 }
  0x54   : > { %v455_v6 = vpack.c.bf16 %v424_v5, %v423_v4  ;;  %v456_v9 = vpack.c.bf16 %v426_v8, %v425_v7  ;;  %v427_v10 = vld [vmem:[%s2146_s23 + $0x20] sm:$0xff]  ;;  %v428_v11 = vld [vmem:[%s2146_s23 + $0x28] sm:$0xff]  ;;  %v429_v13 = vld [vmem:[%s2146_s23 + $0x30] sm:$0xff] }
  0x55   : > { %v457_v12 = vpack.c.bf16 %v428_v11, %v427_v10  ;;  %v430_v14 = vld [vmem:[%s2146_s23 + $0x38] sm:$0xff]  ;;  %v431_v16 = vld [vmem:[%s2146_s23 + $0x40] sm:$0xff]  ;;  %v432_v17 = vld [vmem:[%s2146_s23 + $0x48] sm:$0xff]  ;;  %s2546_s12 = smov (!%p417_p1, %s1560_s12), 63 }
  0x56   : > { %561 = vmatpush.bf16.msra.mxu0 %v1664_v1  ;;  %1675 = vmatpush.bf16.msra.mxu3 %v1664_v1  ;;  %v458_v15 = vpack.c.bf16 %v430_v14, %v429_v13  ;;  %v459_v18 = vpack.c.bf16 %v432_v17, %v431_v16  ;;  %v447_v19 = vld [vmem:[%s2146_s23 + $0xc0] sm:$0xff]  ;;  %v448_v20 = vld [vmem:[%s2146_s23 + $0xc8] sm:$0xff]  ;;  %v433_v22 = vld [vmem:[%s2146_s23 + $0x50] sm:$0xff]  ;;  %s1561_s9 = sshll.u32 %s2546_s12, 3 }
  0x57   : > { %v467_v21 = vpack.c.bf16 %v448_v20, %v447_v19  ;;  %v434_v23 = vld [vmem:[%s2146_s23 + $0x58] sm:$0xff]  ;;  %v449_v25 = vld [vmem:[%s2146_s23 + $0xd0] sm:$0xff]  ;;  %v435_v28 = vld [vmem:[%s2146_s23 + $0x60] sm:$0xff]  ;;  %s2318_s26 = scalar_lea.vmem %s2526_s8, %s1561_s9 }
  0x58   : > { %v460_v24 = vpack.c.bf16 %v434_v23, %v433_v22  ;;  %v450_v26 = vld [vmem:[%s2146_s23 + $0xd8] sm:$0xff]  ;;  %v436_v29 = vld [vmem:[%s2146_s23 + $0x68] sm:$0xff]  ;;  %v1668_v32 = vld [vmem:[#allocation7 + $0x10] sm:$0xff] }
  0x59   : > { %v468_v27 = vpack.c.bf16 %v450_v26, %v449_v25  ;;  %v461_v30 = vpack.c.bf16 %v436_v29, %v435_v28  ;;  %v1669_v31 = vld [vmem:[#allocation7 + $0x18] sm:$0xff]  ;;  %v451_v33 = vld [vmem:[%s2146_s23 + $0xe0] sm:$0xff]  ;;  %v452_v34 = vld [vmem:[%s2146_s23 + $0xe8] sm:$0xff] }
  0x5a   : > { %562 = vmatpush.bf16.msra.mxu0 %v1663_v2  ;;  %1676 = vmatpush.bf16.msra.mxu3 %v1663_v2  ;;  %v469_v35 = vpack.c.bf16 %v452_v34, %v451_v33  ;;  %v1667_v36 = vld [vmem:[#allocation7 + $0x8] sm:$0xff]  ;;  %v437_v37 = vld [vmem:[%s2146_s23 + $0x70] sm:$0xff]  ;;  %v438_v38 = vld [vmem:[%s2146_s23 + $0x78] sm:$0xff] }
  0x5b   : > { %941 = vmatpush.bf16.msra.mxu1 %v1669_v31  ;;  %v462_v39 = vpack.c.bf16 %v438_v38, %v437_v37  ;;  %v1666_v40 = vld [vmem:[#allocation7] sm:$0xff]  ;;  %v453_v41 = vld [vmem:[%s2146_s23 + $0xf0] sm:$0xff]  ;;  %v454_v42 = vld [vmem:[%s2146_s23 + $0xf8] sm:$0xff] }
  0x5c   : > { %v470_v43 = vpack.c.bf16 %v454_v42, %v453_v41  ;;  %v439_v44 = vld [vmem:[%s2146_s23 + $0x80] sm:$0xff]  ;;  %v440_v45 = vld [vmem:[%s2146_s23 + $0x88] sm:$0xff]  ;;  %v441_v55 = vld [vmem:[%s2146_s23 + $0x90] sm:$0xff] }
  0x5d   : > { %v2201_v46 = vld [vmem:[%s2521_s3] ss:$0 sm:$0xff]  ;;  %v463_v47 = vpack.c.bf16 %v440_v45, %v439_v44  ;;  %v442_v56 = vld [vmem:[%s2146_s23 + $0x98] sm:$0xff] }
  0x5e   : > { %563 = vmatpush.bf16.msra.mxu0 %v1662_v3  ;;  %1677 = vmatpush.bf16.msra.mxu3 %v1662_v3  ;;  %v464_v60 = vpack.c.bf16 %v442_v56, %v441_v55  ;;  %v443_v8 = vld [vmem:[%s2146_s23 + $0xa0] sm:$0xff]  ;;  %v446_v25 = vld [vmem:[%s2146_s23 + $0xb8] sm:$0xff] }
  0x5f   : > { %942 = vmatpush.bf16.msra.mxu1 %v1668_v32 }
  0x61   : > { %1578 = vmatmul.msk.bf16.vlgmr.msra.gmra.mxu0 %vm507_vm0, %v455_v6  ;;  %1590 = vmatmul.msk.bf16.vlgmr.msra.gmra.mxu3 %vm507_vm0, %v467_v21 }
  0x62   : > { %1678 = vmatpush.bf16.msrb.mxu3 %v1669_v31 }
  0x63   : > { %943 = vmatpush.bf16.msra.mxu1 %v1667_v36 }
  0x66   : > { %1679 = vmatpush.bf16.msrb.mxu3 %v1668_v32 }
  0x67   : > { %944 = vmatpush.bf16.msra.mxu1 %v1666_v40 }
  0x6a   : > { %1680 = vmatpush.bf16.msrb.mxu3 %v1667_v36 }
  0x6e   : > { %1681 = vmatpush.bf16.msrb.mxu3 %v1666_v40 }
  0x71   : > { %1579 = vmatmul.msk.bf16.gmra.mxu0 %vm507_vm0, %v456_v9  ;;  %1591 = vmatmul.msk.bf16.gmra.mxu3 %vm507_vm0, %v468_v27  ;;  %v444_v9 = vld [vmem:[%s2146_s23 + $0xa8] sm:$0xff] }
  0x81   : > { %1580 = vmatmul.msk.bf16.gmra.mxu0 %vm507_vm0, %v457_v12  ;;  %1592 = vmatmul.msk.bf16.gmra.mxu3 %vm507_vm0, %v469_v35  ;;  %v465_v12 = vpack.c.bf16 %v444_v9, %v443_v8  ;;  %v1673_v8 = vld [vmem:[#allocation9 + $0x18] sm:$0xff] }
  0x82   : > { %1146 = vmatpush.bf16.msra.mxu2 %v1673_v8  ;;  %1682 = vmatpush.bf16.msra.mxu3 %v1673_v8 }
  0x91   : > { %1581 = vmatmul.msk.bf16.gmra.mxu0 %vm507_vm0, %v458_v15  ;;  %1593 = vmatmul.msk.bf16.gmra.mxu3 %vm507_vm0, %v470_v43 }
  0xa1   : > { %1582 = vmatmul.msk.bf16.gmra.mxu0 %vm507_vm0, %v459_v18 }
  0xb1   : > { %1583 = vmatmul.msk.bf16.gmra.mxu0 %vm507_vm0, %v460_v24  ;;  %v445_v24 = vld [vmem:[%s2146_s23 + $0xb0] sm:$0xff] }
  0xb2   : > { %v466_v28 = vpack.c.bf16 %v446_v25, %v445_v24 }
  0xc1   : > { %1584 = vmatmul.msk.bf16.gmra.mxu0 %vm507_vm0, %v461_v30 }
  0xd1   : > { %1585 = vmatmul.msk.bf16.gmra.mxu0 %vm507_vm0, %v462_v39 }
  0xde   : > { %v565_v48 = vpop.f32.mrf.mxu0 }
  0xdf   : > { %v566_v49 = vadd.f32 %v2201_v46, %v565_v48 }
  0xe1   : > { %1586 = vmatmul.msk.bf16.gmra.mxu0 %vm507_vm0, %v463_v47  ;;  %v677_v50 = vmul.f32 0.1, %v566_v49  ;;  %vm645_vm1 = vcmp.ge.f32.partialorder %v566_v49, 0.0 }
  0xe3   : > { %v709_v53 = vsel %vm645_vm1, %v566_v49, %v677_v50 }
  0xe4   : > { %v741_v57 = vpack.c.bf16 %v709_v53, %v709_v53  ;;  %v625_v50 = vpop.f32.mrf.mxu3 }
  0xe6   : > { %v567_v51 = vpop.f32.mrf.mxu0  ;;  %v817_v62 = vunpack.c.l.b16 %v741_v57 }
  0xe7   : > { %v568_v52 = vadd.f32 %v2201_v46, %v567_v51 }
  0xe9   : > { %vm646_vm2 = vcmp.ge.f32.partialorder %v568_v52, 0.0  ;;  %v678_v54 = vmul.f32 0.1, %v568_v52 }
  0xeb   : > { %v710_v58 = vsel %vm646_vm2, %v568_v52, %v678_v54 }
  0xec   : > { %v742_v59 = vpack.c.bf16 %v710_v58, %v710_v58 }
  0xee   : > { %v570_v61 = vpop.f32.mrf.mxu0  ;;  %v818_v63 = vunpack.c.l.b16 %v742_v59 }
  0xef   : > { %v571_v0 = vadd.f32 %v2201_v46, %v570_v61  ;;  %v627_v61 = vpop.f32.mrf.mxu3 }
  0xf0   : > { %v849_v1 = vpack.c.b16 %v818_v63, %v817_v62  ;;  %v628_v63 = vadd.f32 %v2201_v46, %v627_v61 }
  0xf1   : > { %1587 = vmatmul.msk.bf16.gmra.mxu0 %vm507_vm0, %v464_v60  ;;  %v679_v2 = vmul.f32 0.1, %v571_v0  ;;  %vm647_vm3 = vcmp.ge.f32.partialorder %v571_v0, 0.0  ;;  %v626_v60 = vadd.f32 %v2201_v46, %v625_v50 }
  0xf2   : > { %1038 = vrot.lane.b32.xlu0 %v849_v1, %s1974_s27  ;;  %1610 = vmatmul.msk.bf16.vlgmr.msra.gmra.mxu1 %vm507_vm0, %v849_v1  ;;  %vm670_vm12 = vcmp.ge.f32.partialorder %v628_v63, 0.0 }
  0xf3   : > { %v711_v4 = vsel %vm647_vm3, %v571_v0, %v679_v2  ;;  %vm669_vm11 = vcmp.ge.f32.partialorder %v626_v60, 0.0  ;;  %v701_v1 = vmul.f32 0.1, %v626_v60  ;;  %v702_v2 = vmul.f32 0.1, %v628_v63 }
  0xf4   : > { %v743_v7 = vpack.c.bf16 %v711_v4, %v711_v4 }
  0xf6   : > { %v572_v3 = vpop.f32.mrf.mxu0  ;;  %v819_v13 = vunpack.c.l.b16 %v743_v7 }
  0xf7   : > { %v573_v5 = vadd.f32 %v2201_v46, %v572_v3  ;;  %v733_v3 = vsel %vm669_vm11, %v626_v60, %v701_v1 }
  0xf9   : > { %vm648_vm4 = vcmp.ge.f32.partialorder %v573_v5, 0.0  ;;  %v680_v6 = vmul.f32 0.1, %v573_v5 }
  0xfb   : > { %v712_v10 = vsel %vm648_vm4, %v573_v5, %v680_v6  ;;  %v765_v5 = vpack.c.bf16 %v733_v3, %v733_v3  ;;  %v734_v6 = vsel %vm670_vm12, %v628_v63, %v702_v2 }
  0xfc   : > { %v744_v11 = vpack.c.bf16 %v712_v10, %v712_v10  ;;  %v766_v7 = vpack.c.bf16 %v734_v6, %v734_v6 }
  0xfd   : > { %v841_v9 = vunpack.c.l.b16 %v765_v5 }
  0xfe   : > { %v820_v14 = vunpack.c.l.b16 %v744_v11  ;;  %v575_v15 = vpop.f32.mrf.mxu0  ;;  %v842_v11 = vunpack.c.l.b16 %v766_v7 }
  0xff   : > { %v576_v16 = vadd.f32 %v2201_v46, %v575_v15 }
 0x100   : > { %v850_v17 = vpack.c.b16 %v820_v14, %v819_v13  ;;  %v1672_v14 = vld [vmem:[#allocation9 + $0x10] sm:$0xff]  ;;  %v2237_v15 = vpack.c.b16 %v842_v11, %v841_v9 }
 0x101   : > { %1588 = vmatmul.msk.bf16.gmra.mxu0 %vm507_vm0, %v465_v12  ;;  %v681_v18 = vmul.f32 0.1, %v576_v16  ;;  %vm649_vm5 = vcmp.ge.f32.partialorder %v576_v16, 0.0  ;;  %1147 = vmatpush.bf16.msra.mxu2 %v1672_v14 }
 0x102   : > { %1040 = vrot.lane.b32.xlu0 %v850_v17, %s1974_s27  ;;  %1611 = vmatmul.msk.bf16.gmra.mxu1 %vm507_vm0, %v850_v17 }
 0x103   : > { %v713_v21 = vsel %vm649_vm5, %v576_v16, %v681_v18  ;;  %1622 = vmatmul.msk.bf16.vlgmr.msrb.gmra.mxu3 %vm507_vm0, %v2237_v15 }
 0x104   : > { %v745_v23 = vpack.c.bf16 %v713_v21, %v713_v21  ;;  %1683 = vmatpush.bf16.msra.mxu3 %v1672_v14  ;;  %v1671_v21 = vld [vmem:[#allocation9 + $0x8] sm:$0xff] }
 0x105   : > { %1148 = vmatpush.bf16.msra.mxu2 %v1671_v21 }
 0x106   : > { %v577_v19 = vpop.f32.mrf.mxu0  ;;  %v821_v30 = vunpack.c.l.b16 %v745_v23 }
 0x107   : > { %v578_v20 = vadd.f32 %v2201_v46, %v577_v19 }
 0x108   : > { %1684 = vmatpush.bf16.msra.mxu3 %v1671_v21 }
 0x109   : > { %vm650_vm6 = vcmp.ge.f32.partialorder %v578_v20, 0.0  ;;  %v682_v22 = vmul.f32 0.1, %v578_v20 }
 0x10b   : > { %v714_v26 = vsel %vm650_vm6, %v578_v20, %v682_v22  ;;  %v630_v20 = vpop.f32.mrf.mxu3 }
 0x10c   : > { %v746_v27 = vpack.c.bf16 %v714_v26, %v714_v26  ;;  %v631_v25 = vadd.f32 %v2201_v46, %v630_v20 }
 0x10e   : > { %v580_v29 = vpop.f32.mrf.mxu0  ;;  %v822_v31 = vunpack.c.l.b16 %v746_v27  ;;  %vm671_vm15 = vcmp.ge.f32.partialorder %v631_v25, 0.0 }
 0x10f   : > { %v581_v32 = vadd.f32 %v2201_v46, %v580_v29  ;;  %v1670_v29 = vld [vmem:[#allocation9] sm:$0xff] }
 0x110   : > { %v851_v33 = vpack.c.b16 %v822_v31, %v821_v30  ;;  %1149 = vmatpush.bf16.msra.mxu2 %v1670_v29  ;;  %1685 = vmatpush.bf16.msra.mxu3 %v1670_v29 }
 0x111   : > { %1589 = vmatmul.msk.bf16.gmra.mxu0 %vm507_vm0, %v466_v28  ;;  %v683_v34 = vmul.f32 0.1, %v581_v32  ;;  %vm651_vm7 = vcmp.ge.f32.partialorder %v581_v32, 0.0  ;;  %v703_v28 = vmul.f32 0.1, %v631_v25 }
 0x112   : > { %1042 = vrot.lane.b32.xlu1 %v851_v33, %s1974_s27  ;;  %1612 = vmatmul.msk.bf16.gmra.mxu1 %vm507_vm0, %v851_v33 }
 0x113   : > { %v715_v36 = vsel %vm651_vm7, %v581_v32, %v683_v34  ;;  %v735_v31 = vsel %vm671_vm15, %v631_v25, %v703_v28  ;;  %v632_v32 = vpop.f32.mrf.mxu3 }
 0x114   : > { %v747_v39 = vpack.c.bf16 %v715_v36, %v715_v36  ;;  %v633_v33 = vadd.f32 %v2201_v46, %v632_v32 }
 0x116   : > { %v582_v35 = vpop.f32.mrf.mxu0  ;;  %v823_v42 = vunpack.c.l.b16 %v747_v39  ;;  %vm672_vm2 = vcmp.ge.f32.partialorder %v633_v33, 0.0 }
 0x117   : > { %v583_v37 = vadd.f32 %v2201_v46, %v582_v35  ;;  %v767_v35 = vpack.c.bf16 %v735_v31, %v735_v31 }
 0x119   : > { %vm652_vm8 = vcmp.ge.f32.partialorder %v583_v37, 0.0  ;;  %v684_v38 = vmul.f32 0.1, %v583_v37 }
 0x11b   : > { %v716_v40 = vsel %vm652_vm8, %v583_v37, %v684_v38  ;;  %v704_v38 = vmul.f32 0.1, %v633_v33 }
 0x11c   : > { %v748_v41 = vpack.c.bf16 %v716_v40, %v716_v40 }
 0x11d   : > { %v736_v40 = vsel %vm672_vm2, %v633_v33, %v704_v38 }
 0x11e   : > { %v824_v43 = vunpack.c.l.b16 %v748_v41  ;;  %v585_v44 = vpop.f32.mrf.mxu0 }
 0x11f   : > { %v586_v45 = vadd.f32 %v2201_v46, %v585_v44 }
 0x120   : > { %v852_v47 = vpack.c.b16 %v824_v43, %v823_v42  ;;  %v843_v42 = vunpack.c.l.b16 %v767_v35  ;;  %v768_v43 = vpack.c.bf16 %v736_v40, %v736_v40 }
 0x121   : > { %v685_v48 = vmul.f32 0.1, %v586_v45  ;;  %vm653_vm9 = vcmp.ge.f32.partialorder %v586_v45, 0.0 }
 0x122   : > { %1044 = vrot.lane.b32.xlu1 %v852_v47, %s1974_s27  ;;  %1613 = vmatmul.msk.bf16.gmra.mxu1 %vm507_vm0, %v852_v47  ;;  %v844_v47 = vunpack.c.l.b16 %v768_v43 }
 0x123   : > { %v717_v52 = vsel %vm653_vm9, %v586_v45, %v685_v48  ;;  %v635_v48 = vpop.f32.mrf.mxu3 }
 0x124   : > { %v749_v54 = vpack.c.bf16 %v717_v52, %v717_v52  ;;  %v636_v52 = vadd.f32 %v2201_v46, %v635_v48 }
 0x126   : > { %v587_v49 = vpop.f32.mrf.mxu0  ;;  %v825_v58 = vunpack.c.l.b16 %v749_v54  ;;  %vm673_vm4 = vcmp.ge.f32.partialorder %v636_v52, 0.0 }
 0x127   : > { %v588_v51 = vadd.f32 %v2201_v46, %v587_v49 }
 0x129   : > { %vm654_vm10 = vcmp.ge.f32.partialorder %v588_v51, 0.0  ;;  %v686_v53 = vmul.f32 0.1, %v588_v51 }
 0x12b   : > { %v718_v55 = vsel %vm654_vm10, %v588_v51, %v686_v53  ;;  %v2248_v53 = vpack.c.b16 %v844_v47, %v843_v42 }
 0x12c   : > { %v750_v56 = vpack.c.bf16 %v718_v55, %v718_v55 }
 0x12d   : > { %1623 = vmatmul.msk.bf16.gmra.mxu3 %vm507_vm0, %v2248_v53 }
 0x12e   : > { %v590_v57 = vpop.f32.mrf.mxu0  ;;  %v826_v59 = vunpack.c.l.b16 %v750_v56  ;;  %v705_v56 = vmul.f32 0.1, %v636_v52 }
 0x12f   : > { %v591_v62 = vadd.f32 %v2201_v46, %v590_v57 }
 0x130   : > { %v853_v0 = vpack.c.b16 %v826_v59, %v825_v58  ;;  %v737_v58 = vsel %vm673_vm4, %v636_v52, %v705_v56  ;;  %v637_v59 = vpop.f32.mrf.mxu3 }
 0x131   : > { %v687_v4 = vmul.f32 0.1, %v591_v62  ;;  %vm655_vm13 = vcmp.ge.f32.partialorder %v591_v62, 0.0  ;;  %v638_v60 = vadd.f32 %v2201_v46, %v637_v59 }
 0x132   : > { %1046 = vrot.lane.b32.xlu2 %v853_v0, %s1974_s27  ;;  %1614 = vmatmul.msk.bf16.gmra.mxu1 %vm507_vm0, %v853_v0 }
 0x133   : > { %v719_v12 = vsel %vm655_vm13, %v591_v62, %v687_v4  ;;  %v769_v62 = vpack.c.bf16 %v737_v58, %v737_v58  ;;  %vm674_vm6 = vcmp.ge.f32.partialorder %v638_v60, 0.0  ;;  %v706_v1 = vmul.f32 0.1, %v638_v60 }
 0x134   : > { %v751_v17 = vpack.c.bf16 %v719_v12, %v719_v12 }
 0x135   : > { %v738_v3 = vsel %vm674_vm6, %v638_v60, %v706_v1  ;;  %v845_v5 = vunpack.c.l.b16 %v769_v62 }
 0x136   : > { %v592_v10 = vpop.f32.mrf.mxu0  ;;  %v827_v22 = vunpack.c.l.b16 %v751_v17  ;;  %v770_v6 = vpack.c.bf16 %v738_v3, %v738_v3 }
 0x137   : > { %v593_v13 = vadd.f32 %v2201_v46, %v592_v10 }
 0x138   : > { %v846_v9 = vunpack.c.l.b16 %v770_v6  ;;  %v640_v10 = vpop.f32.mrf.mxu3 }
 0x139   : > { %vm656_vm14 = vcmp.ge.f32.partialorder %v593_v13, 0.0  ;;  %v688_v16 = vmul.f32 0.1, %v593_v13  ;;  %v641_v14 = vadd.f32 %v2201_v46, %v640_v10 }
 0x13b   : > { %v720_v18 = vsel %vm656_vm14, %v593_v13, %v688_v16  ;;  %v2260_v16 = vpack.c.b16 %v846_v9, %v845_v5  ;;  %vm675_vm8 = vcmp.ge.f32.partialorder %v641_v14, 0.0 }
 0x13c   : > { %v752_v19 = vpack.c.bf16 %v720_v18, %v720_v18 }
 0x13d   : > { %1624 = vmatmul.msk.bf16.gmra.mxu3 %vm507_vm0, %v2260_v16 }
 0x13e   : > { %v828_v23 = vunpack.c.l.b16 %v752_v19  ;;  %v595_v24 = vpop.f32.mrf.mxu0  ;;  %v707_v19 = vmul.f32 0.1, %v641_v14 }
 0x13f   : > { %v596_v26 = vadd.f32 %v2201_v46, %v595_v24 }
 0x140   : > { %v854_v27 = vpack.c.b16 %v828_v23, %v827_v22  ;;  %v739_v20 = vsel %vm675_vm8, %v641_v14, %v707_v19  ;;  %v642_v22 = vpop.f32.mrf.mxu3 }
 0x141   : > { %v689_v30 = vmul.f32 0.1, %v596_v26  ;;  %vm657_vm1 = vcmp.ge.f32.partialorder %v596_v26, 0.0  ;;  %v643_v23 = vadd.f32 %v2201_v46, %v642_v22  ;;  %v771_v25 = vpack.c.bf16 %v739_v20, %v739_v20 }
 0x142   : > { %1048 = vrot.lane.b32.xlu2 %v854_v27, %s1974_s27  ;;  %1615 = vmatmul.msk.bf16.gmra.mxu1 %vm507_vm0, %v854_v27 }
 0x143   : > { %v721_v36 = vsel %vm657_vm1, %v596_v26, %v689_v30  ;;  %vm676_vm10 = vcmp.ge.f32.partialorder %v643_v23, 0.0  ;;  %v708_v28 = vmul.f32 0.1, %v643_v23  ;;  %v847_v32 = vunpack.c.l.b16 %v771_v25 }
 0x144   : > { %v753_v41 = vpack.c.bf16 %v721_v36, %v721_v36 }
 0x145   : > { %v740_v30 = vsel %vm676_vm10, %v643_v23, %v708_v28 }
 0x146   : > { %v597_v34 = vpop.f32.mrf.mxu0  ;;  %v829_v49 = vunpack.c.l.b16 %v753_v41  ;;  %v772_v33 = vpack.c.bf16 %v740_v30, %v740_v30 }
 0x147   : > { %v598_v37 = vadd.f32 %v2201_v46, %v597_v34 }
 0x148   : > { %v848_v36 = vunpack.c.l.b16 %v772_v33 }
 0x149   : > { %vm658_vm3 = vcmp.ge.f32.partialorder %v598_v37, 0.0  ;;  %v690_v39 = vmul.f32 0.1, %v598_v37 }
 0x14a   : > { %v864_v40 = vpack.c.b16 %v848_v36, %v847_v32  ;;  %v1231_v36 = vld [vmem:[%s2139_s24] sm:$0xff] }
 0x14b   : > { %v722_v44 = vsel %vm658_vm3, %v598_v37, %v690_v39 }
 0x14c   : > { %v754_v45 = vpack.c.bf16 %v722_v44, %v722_v44 }
 0x14d   : > { %1625 = vmatmul.msk.bf16.gmra.mxu3 %vm507_vm0, %v864_v40 }
 0x14e   : > { %v830_v50 = vunpack.c.l.b16 %v754_v45  ;;  %v600_v51 = vpop.f32.mrf.mxu0 }
 0x14f   : > { %v601_v54 = vadd.f32 %v2201_v46, %v600_v51 }
 0x150   : > { %v855_v55 = vpack.c.b16 %v830_v50, %v829_v49 }
 0x151   : > { %v691_v57 = vmul.f32 0.1, %v601_v54  ;;  %vm659_vm5 = vcmp.ge.f32.partialorder %v601_v54, 0.0 }
 0x152   : > { %1050 = vrot.lane.b32.xlu0 %v855_v55, %s1974_s27  ;;  %1616 = vmatmul.msk.bf16.gmra.mxu1 %vm507_vm0, %v855_v55 }
 0x153   : > { %v723_v63 = vsel %vm659_vm5, %v601_v54, %v691_v57 }
 0x154   : > { %v755_v4 = vpack.c.bf16 %v723_v63, %v723_v63 }
 0x156   : > { %v602_v61 = vpop.f32.mrf.mxu0  ;;  %v831_v11 = vunpack.c.l.b16 %v755_v4 }
 0x157   : > { %v603_v0 = vadd.f32 %v2201_v46, %v602_v61 }
 0x159   : > { %vm660_vm7 = vcmp.ge.f32.partialorder %v603_v0, 0.0  ;;  %v692_v2 = vmul.f32 0.1, %v603_v0 }
 0x15a   : > { %1062 = vrot.lane.b32.xlu0 %v2237_v15, %s1974_s27 }
 0x15b   : > { %v724_v7 = vsel %vm660_vm7, %v603_v0, %v692_v2 }
 0x15c   : > { %v756_v8 = vpack.c.bf16 %v724_v7, %v724_v7 }
 0x15e   : > { %v832_v12 = vunpack.c.l.b16 %v756_v8  ;;  %v605_v13 = vpop.f32.mrf.mxu0 }
 0x15f   : > { %v606_v17 = vadd.f32 %v2201_v46, %v605_v13 }
 0x160   : > { %v856_v18 = vpack.c.b16 %v832_v12, %v831_v11 }
 0x161   : > { %v693_v15 = vmul.f32 0.1, %v606_v17  ;;  %vm661_vm9 = vcmp.ge.f32.partialorder %v606_v17, 0.0 }
 0x162   : > { %1052 = vrot.lane.b32.xlu1 %v856_v18, %s1974_s27  ;;  %1617 = vmatmul.msk.bf16.gmra.mxu1 %vm507_vm0, %v856_v18 }
 0x163   : > { %v725_v26 = vsel %vm661_vm9, %v606_v17, %v693_v15 }
 0x164   : > { %v1039_v21 = vpop.permute.xlu0 %1038  ;;  %v757_v31 = vpack.c.bf16 %v725_v26, %v725_v26 }
 0x165   : > { %1642 = vmatmul.msk.bf16.vlgmr.msra.gmra.mxu2 %vm507_vm0, %v1039_v21 }
 0x166   : > { %v607_v24 = vpop.f32.mrf.mxu0  ;;  %v833_v37 = vunpack.c.l.b16 %v757_v31  ;;  %v2301_v31 = vld [vmem:[%s2523_s5] ss:$0 sm:$0xff] }
 0x167   : > { %v608_v27 = vadd.f32 %v2201_v46, %v607_v24 }
 0x169   : > { %vm662_vm11 = vcmp.ge.f32.partialorder %v608_v27, 0.0  ;;  %v694_v29 = vmul.f32 0.1, %v608_v27 }
 0x16b   : > { %v726_v34 = vsel %vm662_vm11, %v608_v27, %v694_v29 }
 0x16c   : > { %v758_v35 = vpack.c.bf16 %v726_v34, %v726_v34 }
 0x16e   : > { %v834_v38 = vunpack.c.l.b16 %v758_v35  ;;  %v610_v39 = vpop.f32.mrf.mxu0  ;;  %v2310_v35 = vld [vmem:[%s2525_s7] ss:$0 sm:$0xff] }
 0x16f   : > { %v611_v41 = vadd.f32 %v2201_v46, %v610_v39  ;;  %v946_v21 = vpop.f32.mrf.mxu1 }
 0x170   : > { %v857_v42 = vpack.c.b16 %v834_v38, %v833_v37  ;;  %v947_v32 = vadd.f32 %v2301_v31, %v946_v21 }
 0x171   : > { %v695_v43 = vmul.f32 0.1, %v611_v41  ;;  %vm663_vm12 = vcmp.ge.f32.partialorder %v611_v41, 0.0 }
 0x172   : > { %1054 = vrot.lane.b32.xlu2 %v857_v42, %s1974_s27  ;;  %1618 = vmatmul.msk.bf16.gmra.mxu1 %vm507_vm0, %v857_v42  ;;  %v1263_v34 = vadd.f32 1.0, %v947_v32 }
 0x173   : > { %v727_v47 = vsel %vm663_vm12, %v611_v41, %v695_v43 }
 0x174   : > { %v1041_v44 = vpop.permute.xlu0 %1040  ;;  %v759_v50 = vpack.c.bf16 %v727_v47, %v727_v47  ;;  %v1295_v38 = vmul.f32 %v1263_v34, %v1231_v36 }
 0x175   : > { %1643 = vmatmul.msk.bf16.gmra.mxu2 %vm507_vm0, %v1041_v44 }
 0x176   : > { %v612_v45 = vpop.f32.mrf.mxu0  ;;  %v835_v54 = vunpack.c.l.b16 %v759_v50 }
 0x177   : > { %v613_v48 = vadd.f32 %v2201_v46, %v612_v45  ;;  %v1232_v45 = vld [vmem:[%s2139_s24 + $0x8] sm:$0xff] }
 0x179   : > { %vm664_vm13 = vcmp.ge.f32.partialorder %v613_v48, 0.0  ;;  %v696_v49 = vmul.f32 0.1, %v613_v48 }
 0x17a   : > { %1064 = vrot.lane.b32.xlu2 %v2248_v53, %s1974_s27 }
 0x17b   : > { %v728_v51 = vsel %vm664_vm13, %v613_v48, %v696_v49 }
 0x17c   : > { %v760_v52 = vpack.c.bf16 %v728_v51, %v728_v51 }
 0x17e   : > { %v836_v55 = vunpack.c.l.b16 %v760_v52  ;;  %v615_v56 = vpop.f32.mrf.mxu0 }
 0x17f   : > { %v616_v57 = vadd.f32 %v2201_v46, %v615_v56  ;;  %v1233_v56 = vld [vmem:[%s2139_s24 + $0x10] sm:$0xff] }
 0x180   : > { %v858_v58 = vpack.c.b16 %v836_v55, %v835_v54 }
 0x181   : > { %v697_v59 = vmul.f32 0.1, %v616_v57  ;;  %vm665_vm14 = vcmp.ge.f32.partialorder %v616_v57, 0.0 }
 0x182   : > { %1056 = vrot.lane.b32.xlu1 %v858_v58, %s1974_s27  ;;  %1619 = vmatmul.msk.bf16.gmra.mxu1 %vm507_vm0, %v858_v58 }
 0x183   : > { %v729_v62 = vsel %vm665_vm14, %v616_v57, %v697_v59 }
 0x184   : > { %v1043_v60 = vpop.permute.xlu1 %1042  ;;  %v761_v0 = vpack.c.bf16 %v729_v62, %v729_v62 }
 0x185   : > { %1644 = vmatmul.msk.bf16.gmra.mxu2 %vm507_vm0, %v1043_v60 }
 0x186   : > { %v617_v61 = vpop.f32.mrf.mxu0  ;;  %v837_v3 = vunpack.c.l.b16 %v761_v0 }
 0x187   : > { %v618_v53 = vadd.f32 %v2201_v46, %v617_v61 }
 0x189   : > { %vm666_vm15 = vcmp.ge.f32.partialorder %v618_v53, 0.0  ;;  %v698_v63 = vmul.f32 0.1, %v618_v53 }
 0x18a   : > { %1066 = vrot.lane.b32.xlu1 %v2260_v16, %s1974_s27 }
 0x18b   : > { %v730_v1 = vsel %vm666_vm15, %v618_v53, %v698_v63 }
 0x18c   : > { %v762_v2 = vpack.c.bf16 %v730_v1, %v730_v1  ;;  %v1047_v20 = vpop.permute.xlu2 %1046  ;;  %v1234_v1 = vld [vmem:[%s2139_s24 + $0x18] sm:$0xff] }
 0x18e   : > { %v838_v4 = vunpack.c.l.b16 %v762_v2  ;;  %v620_v5 = vpop.f32.mrf.mxu0 }
 0x18f   : > { %v621_v6 = vadd.f32 %v2201_v46, %v620_v5 }
 0x190   : > { %v859_v7 = vpack.c.b16 %v838_v4, %v837_v3 }
 0x191   : > { %v699_v8 = vmul.f32 0.1, %v621_v6  ;;  %vm667_vm1 = vcmp.ge.f32.partialorder %v621_v6, 0.0 }
 0x192   : > { %1058 = vrot.lane.b32.xlu0 %v859_v7, %s1974_s27  ;;  %1620 = vmatmul.msk.bf16.gmra.mxu1 %vm507_vm0, %v859_v7  ;;  %v2337_v7 = vpop.f32.mrf.mxu3 }
 0x193   : > { %v731_v10 = vsel %vm667_vm1, %v621_v6, %v699_v8 }
 0x194   : > { %v1045_v9 = vpop.permute.xlu1 %1044  ;;  %v763_v13 = vpack.c.bf16 %v731_v10, %v731_v10 }
 0x195   : > { %1645 = vmatmul.msk.bf16.gmra.mxu2 %vm507_vm0, %v1045_v9 }
 0x196   : > { %v622_v11 = vpop.f32.mrf.mxu0  ;;  %v839_v17 = vunpack.c.l.b16 %v763_v13 }
 0x197   : > { %v623_v12 = vadd.f32 %v2201_v46, %v622_v11  ;;  %v948_v46 = vpop.f32.mrf.mxu1 }
 0x198   : > { %v949_v39 = vadd.f32 %v2301_v31, %v948_v46  ;;  %v1236_v46 = vld [vmem:[%s2139_s24 + $0x28] sm:$0xff] }
 0x199   : > { %vm668_vm2 = vcmp.ge.f32.partialorder %v623_v12, 0.0  ;;  %v700_v14 = vmul.f32 0.1, %v623_v12 }
 0x19a   : > { %1068 = vrot.lane.b32.xlu0 %v864_v40, %s1974_s27  ;;  %v1264_v42 = vadd.f32 1.0, %v949_v39 }
 0x19b   : > { %v732_v16 = vsel %vm668_vm2, %v623_v12, %v700_v14  ;;  %v1235_v12 = vld [vmem:[%s2139_s24 + $0x20] sm:$0xff] }
 0x19c   : > { %v764_v18 = vpack.c.bf16 %v732_v16, %v732_v16  ;;  %v1049_v22 = vpop.permute.xlu2 %1048  ;;  %v1296_v48 = vmul.f32 %v1264_v42, %v1232_v45 }
 0x19e   : > { %v840_v19 = vunpack.c.l.b16 %v764_v18 }
 0x19f   : > { %v951_v24 = vpop.f32.mrf.mxu1 }
 0x1a0   : > { %v860_v15 = vpack.c.b16 %v840_v19, %v839_v17  ;;  %v952_v49 = vadd.f32 %v2301_v31, %v951_v24 }
 0x1a2   : > { %1621 = vmatmul.msk.bf16.gmra.mxu1 %vm507_vm0, %v860_v15  ;;  %1060 = vrot.lane.b32.xlu2 %v860_v15, %s1974_s27  ;;  %v1265_v54 = vadd.f32 1.0, %v952_v49  ;;  %v2345_v15 = vpop.f32.mrf.mxu3 }
 0x1a4   : > { %v1297_v59 = vmul.f32 %v1265_v54, %v1233_v56 }
 0x1a5   : > { %1646 = vmatmul.msk.bf16.gmra.mxu2 %vm507_vm0, %v1047_v20 }
 0x1a7   : > { %v953_v26 = vpop.f32.mrf.mxu1 }
 0x1a8   : > { %v954_v60 = vadd.f32 %v2301_v31, %v953_v26 }
 0x1aa   : > { %v1266_v63 = vadd.f32 1.0, %v954_v60 }
 0x1ac   : > { %v1298_v3 = vmul.f32 %v1266_v63, %v1234_v1 }
 0x1af   : > { %v956_v29 = vpop.f32.mrf.mxu1 }
 0x1b0   : > { %v957_v4 = vadd.f32 %v2301_v31, %v956_v29  ;;  %v2355_v34 = vpop.f32.mrf.mxu3 }
 0x1b2   : > { %v1267_v10 = vadd.f32 1.0, %v957_v4 }
 0x1b4   : > { %v1299_v14 = vmul.f32 %v1267_v10, %v1235_v12 }
 0x1b5   : > { %1647 = vmatmul.msk.bf16.gmra.mxu2 %vm507_vm0, %v1049_v22 }
 0x1b7   : > { %v958_v33 = vpop.f32.mrf.mxu1 }
 0x1b8   : > { %v959_v16 = vadd.f32 %v2301_v31, %v958_v33  ;;  %v1237_v33 = vld [vmem:[%s2139_s24 + $0x30] sm:$0xff]  ;;  %v2364_v45 = vpop.f32.mrf.mxu3 }
 0x1ba   : > { %v1268_v21 = vadd.f32 1.0, %v959_v16 }
 0x1bc   : > { %v1300_v24 = vmul.f32 %v1268_v21, %v1236_v46  ;;  %v1242_v21 = vld [vmem:[%s2139_s24 + $0x58] sm:$0xff] }
 0x1bf   : > { %v961_v43 = vpop.f32.mrf.mxu1 }
 0x1c4   : > { %v1051_v23 = vpop.permute.xlu0 %1050 }
 0x1c5   : > { %1648 = vmatmul.msk.bf16.gmra.mxu2 %vm507_vm0, %v1051_v23 }
 0x1c7   : > { %v963_v57 = vpop.f32.mrf.mxu1 }
 0x1cc   : > { %v1063_v25 = vpop.permute.xlu0 %1062  ;;  %v1055_v27 = vpop.permute.xlu2 %1054 }
 0x1cd   : > { %1654 = vmatmul.msk.bf16.vlgmr.msra.gmra.mxu3 %vm507_vm0, %v1063_v25  ;;  %v962_v25 = vadd.f32 %v2301_v31, %v961_v43  ;;  %v1238_v43 = vld [vmem:[%s2139_s24 + $0x38] sm:$0xff] }
 0x1cf   : > { %v966_v5 = vpop.f32.mrf.mxu1  ;;  %v1269_v29 = vadd.f32 1.0, %v962_v25 }
 0x1d0   : > { %v967_v49 = vadd.f32 %v2301_v31, %v966_v5 }
 0x1d4   : > { %v1053_v28 = vpop.permute.xlu1 %1052  ;;  %v1065_v30 = vpop.permute.xlu2 %1064 }
 0x1d5   : > { %1649 = vmatmul.msk.bf16.gmra.mxu2 %vm507_vm0, %v1053_v28 }
 0x1d7   : > { %v968_v18 = vpop.f32.mrf.mxu1 }
 0x1dd   : > { %1655 = vmatmul.msk.bf16.gmra.mxu3 %vm507_vm0, %v1065_v30 }
 0x1df   : > { %v971_v30 = vpop.f32.mrf.mxu1 }
 0x1e5   : > { %1650 = vmatmul.msk.bf16.gmra.mxu2 %vm507_vm0, %v1055_v27 }
 0x1e8   : > { %v1151_v37 = vpop.f32.mrf.mxu2 }
 0x1e9   : > { %v1152_v40 = vadd.f32 %v2310_v35, %v1151_v37  ;;  %v1301_v37 = vmul.f32 %v1269_v29, %v1237_v33  ;;  %v1243_v29 = vld [vmem:[%s2139_s24 + $0x60] sm:$0xff] }
 0x1eb   : > { %v1327_v41 = vadd.f32 %v1295_v38, %v1152_v40  ;;  %v964_v38 = vadd.f32 %v2301_v31, %v963_v57 }
 0x1ed   : > { %v1359_v44 = vmax.f32 %v1327_v41, 0.0  ;;  %v1270_v41 = vadd.f32 1.0, %v964_v38 }
 0x1ef   : > { %1391 = vst.msk [vmem:[%s2318_s26] sm:$0xff] %vm507_vm0, %v1359_v44  ;;  %v973_v44 = vpop.f32.mrf.mxu1 }
 0x1f0   : > { %v1153_v47 = vpop.f32.mrf.mxu2 }
 0x1f1   : > { %v1154_v50 = vadd.f32 %v2310_v35, %v1153_v47 }
 0x1f3   : > { %v1328_v51 = vadd.f32 %v1296_v48, %v1154_v50  ;;  %v1302_v48 = vmul.f32 %v1270_v41, %v1238_v43  ;;  %v1255_v43 = vld [vmem:[%s2139_s24 + $0xc0] sm:$0xff] }
 0x1f4   : > { %v1057_v52 = vpop.permute.xlu1 %1056 }
 0x1f5   : > { %v1360_v55 = vmax.f32 %v1328_v51, 0.0  ;;  %1651 = vmatmul.msk.bf16.gmra.mxu2 %vm507_vm0, %v1057_v52  ;;  %v1271_v52 = vadd.f32 1.0, %v967_v49 }
 0x1f7   : > { %1392 = vst.msk [vmem:[%s2318_s26 + $0x8] sm:$0xff] %vm507_vm0, %v1360_v55  ;;  %v1239_v55 = vld [vmem:[%s2139_s24 + $0x40] sm:$0xff] }
 0x1f8   : > { %v1156_v58 = vpop.f32.mrf.mxu2  ;;  %v1303_v57 = vmul.f32 %v1271_v52, %v1239_v55 }
 0x1f9   : > { %v1157_v61 = vadd.f32 %v2310_v35, %v1156_v58  ;;  %v969_v58 = vadd.f32 %v2301_v31, %v968_v18 }
 0x1fb   : > { %v1329_v62 = vadd.f32 %v1297_v59, %v1157_v61  ;;  %v976_v59 = vpop.f32.mrf.mxu1  ;;  %v2373_v61 = vpop.f32.mrf.mxu3 }
 0x1fc   : > { %v1067_v53 = vpop.permute.xlu1 %1066  ;;  %v1061_v28 = vpop.permute.xlu2 %1060 }
 0x1fd   : > { %v1361_v0 = vmax.f32 %v1329_v62, 0.0  ;;  %1656 = vmatmul.msk.bf16.gmra.mxu3 %vm507_vm0, %v1067_v53  ;;  %v1272_v53 = vadd.f32 1.0, %v969_v58 }
 0x1ff   : > { %1393 = vst.msk [vmem:[%s2318_s26 + $0x10] sm:$0xff] %vm507_vm0, %v1361_v0  ;;  %v1240_v0 = vld [vmem:[%s2139_s24 + $0x48] sm:$0xff] }
 0x200   : > { %v1158_v2 = vpop.f32.mrf.mxu2 }
 0x201   : > { %v1159_v6 = vadd.f32 %v2310_v35, %v1158_v2  ;;  %v1304_v2 = vmul.f32 %v1272_v53, %v1240_v0 }
 0x203   : > { %v1330_v8 = vadd.f32 %v1298_v3, %v1159_v6  ;;  %v972_v3 = vadd.f32 %v2301_v31, %v971_v30  ;;  %v978_v5 = vpop.f32.mrf.mxu1 }
 0x204   : > { %v1059_v9 = vpop.permute.xlu0 %1058  ;;  %v979_v38 = vadd.f32 %v2301_v31, %v978_v5 }
 0x205   : > { %v1362_v11 = vmax.f32 %v1330_v8, 0.0  ;;  %1652 = vmatmul.msk.bf16.gmra.mxu2 %vm507_vm0, %v1059_v9  ;;  %v2380_v8 = vpop.f32.mrf.mxu3  ;;  %v1273_v9 = vadd.f32 1.0, %v972_v3 }
 0x207   : > { %1394 = vst.msk [vmem:[%s2318_s26 + $0x18] sm:$0xff] %vm507_vm0, %v1362_v11  ;;  %v1241_v11 = vld [vmem:[%s2139_s24 + $0x50] sm:$0xff] }
 0x208   : > { %v1161_v13 = vpop.f32.mrf.mxu2 }
 0x209   : > { %v1162_v17 = vadd.f32 %v2310_v35, %v1161_v13  ;;  %v1305_v13 = vmul.f32 %v1273_v9, %v1241_v11 }
 0x20b   : > { %v1331_v19 = vadd.f32 %v1299_v14, %v1162_v17  ;;  %v974_v14 = vadd.f32 %v2301_v31, %v973_v44 }
 0x20c   : > { %v1069_v20 = vpop.permute.xlu0 %1068 }
 0x20d   : > { %v1363_v22 = vmax.f32 %v1331_v19, 0.0  ;;  %1657 = vmatmul.msk.bf16.gmra.mxu3 %vm507_vm0, %v1069_v20  ;;  %v1274_v18 = vadd.f32 1.0, %v974_v14  ;;  %v981_v19 = vpop.f32.mrf.mxu1 }
 0x20e   : > { %v982_v52 = vadd.f32 %v2301_v31, %v981_v19 }
 0x20f   : > { %1395 = vst.msk [vmem:[%s2318_s26 + $0x20] sm:$0xff] %vm507_vm0, %v1363_v22  ;;  %v2388_v22 = vpop.f32.mrf.mxu3 }
 0x210   : > { %v1163_v23 = vpop.f32.mrf.mxu2 }
 0x211   : > { %v1164_v26 = vadd.f32 %v2310_v35, %v1163_v23  ;;  %v1306_v23 = vmul.f32 %v1274_v18, %v1242_v21  ;;  %v1246_v18 = vld [vmem:[%s2139_s24 + $0x78] sm:$0xff] }
 0x213   : > { %v1332_v27 = vadd.f32 %v1300_v24, %v1164_v26  ;;  %v977_v24 = vadd.f32 %v2301_v31, %v976_v59 }
 0x215   : > { %v1364_v32 = vmax.f32 %v1332_v27, 0.0  ;;  %1653 = vmatmul.msk.bf16.gmra.mxu2 %vm507_vm0, %v1061_v28  ;;  %v1275_v27 = vadd.f32 1.0, %v977_v24  ;;  %v983_v30 = vpop.f32.mrf.mxu1 }
 0x216   : > { %v984_v5 = vadd.f32 %v2301_v31, %v983_v30 }
 0x217   : > { %1396 = vst.msk [vmem:[%s2318_s26 + $0x28] sm:$0xff] %vm507_vm0, %v1364_v32  ;;  %v1007_v32 = vadd.f32 %v2301_v31, %v2337_v7  ;;  %v2399_v33 = vpop.f32.mrf.mxu3  ;;  %v1009_v7 = vadd.f32 %v2301_v31, %v2345_v15  ;;  %v1245_v15 = vld [vmem:[%s2139_s24 + $0x70] sm:$0xff] }
 0x218   : > { %v1166_v36 = vpop.f32.mrf.mxu2  ;;  %v1278_v14 = vadd.f32 1.0, %v984_v5 }
 0x219   : > { %v1167_v39 = vadd.f32 %v2310_v35, %v1166_v36  ;;  %v1287_v41 = vadd.f32 1.0, %v1007_v32  ;;  %v1288_v59 = vadd.f32 1.0, %v1009_v7  ;;  %v1258_v32 = vld [vmem:[%s2139_s24 + $0xd8] sm:$0xff] }
 0x21b   : > { %v1333_v40 = vadd.f32 %v1301_v37, %v1167_v39  ;;  %v1307_v37 = vmul.f32 %v1275_v27, %v1243_v29 }
 0x21d   : > { %v1365_v42 = vmax.f32 %v1333_v40, 0.0 }
 0x21f   : > { %1397 = vst.msk [vmem:[%s2318_s26 + $0x30] sm:$0xff] %vm507_vm0, %v1365_v42  ;;  %v1276_v42 = vadd.f32 1.0, %v979_v38 }
 0x220   : > { %v1168_v47 = vpop.f32.mrf.mxu2 }
 0x221   : > { %v1169_v50 = vadd.f32 %v2310_v35, %v1168_v47  ;;  %v1244_v47 = vld [vmem:[%s2139_s24 + $0x68] sm:$0xff] }
 0x223   : > { %v1334_v51 = vadd.f32 %v1302_v48, %v1169_v50  ;;  %v1319_v48 = vmul.f32 %v1287_v41, %v1255_v43 }
 0x225   : > { %v1366_v54 = vmax.f32 %v1334_v51, 0.0  ;;  %v1308_v51 = vmul.f32 %v1276_v42, %v1244_v47 }
 0x227   : > { %1398 = vst.msk [vmem:[%s2318_s26 + $0x38] sm:$0xff] %vm507_vm0, %v1366_v54 }
 0x228   : > { %v1171_v56 = vpop.f32.mrf.mxu2 }
 0x229   : > { %v1172_v60 = vadd.f32 %v2310_v35, %v1171_v56  ;;  %v986_v56 = vpop.f32.mrf.mxu1 }
 0x22a   : > { %v987_v24 = vadd.f32 %v2301_v31, %v986_v56 }
 0x22b   : > { %v1335_v62 = vadd.f32 %v1303_v57, %v1172_v60  ;;  %v1277_v60 = vadd.f32 1.0, %v982_v52  ;;  %v1248_v52 = vld [vmem:[%s2139_s24 + $0x88] sm:$0xff] }
 0x22c   : > { %v1279_v30 = vadd.f32 1.0, %v987_v24 }
 0x22d   : > { %v1367_v63 = vmax.f32 %v1335_v62, 0.0  ;;  %v1256_v62 = vld [vmem:[%s2139_s24 + $0xc8] sm:$0xff] }
 0x22e   : > { %v1320_v0 = vmul.f32 %v1288_v59, %v1256_v62 }
 0x22f   : > { %1399 = vst.msk [vmem:[%s2318_s26 + $0x40] sm:$0xff] %vm507_vm0, %v1367_v63 }
 0x230   : > { %v1173_v1 = vpop.f32.mrf.mxu2 }
 0x231   : > { %v1174_v4 = vadd.f32 %v2310_v35, %v1173_v1  ;;  %v1012_v1 = vadd.f32 %v2301_v31, %v2355_v34  ;;  %v1257_v34 = vld [vmem:[%s2139_s24 + $0xd0] sm:$0xff] }
 0x233   : > { %v1336_v6 = vadd.f32 %v1304_v2, %v1174_v4  ;;  %v1309_v4 = vmul.f32 %v1277_v60, %v1245_v15 }
 0x235   : > { %v1368_v10 = vmax.f32 %v1336_v6, 0.0 }
 0x237   : > { %1400 = vst.msk [vmem:[%s2318_s26 + $0x48] sm:$0xff] %vm507_vm0, %v1368_v10 }
 0x238   : > { %v1176_v12 = vpop.f32.mrf.mxu2 }
 0x239   : > { %v1177_v16 = vadd.f32 %v2310_v35, %v1176_v12  ;;  %v1289_v12 = vadd.f32 1.0, %v1012_v1 }
 0x23b   : > { %v1337_v17 = vadd.f32 %v1305_v13, %v1177_v16  ;;  %v988_v13 = vpop.f32.mrf.mxu1  ;;  %v1321_v19 = vmul.f32 %v1289_v12, %v1257_v34 }
 0x23c   : > { %v989_v43 = vadd.f32 %v2301_v31, %v988_v13 }
 0x23d   : > { %v1369_v20 = vmax.f32 %v1337_v17, 0.0 }
 0x23f   : > { %1401 = vst.msk [vmem:[%s2318_s26 + $0x50] sm:$0xff] %vm507_vm0, %v1369_v20  ;;  %v1014_v20 = vadd.f32 %v2301_v31, %v2364_v45 }
 0x240   : > { %v1178_v46 = vpop.f32.mrf.mxu2 }
 0x241   : > { %v1179_v25 = vadd.f32 %v2310_v35, %v1178_v46  ;;  %v1290_v29 = vadd.f32 1.0, %v1014_v20 }
 0x243   : > { %v1338_v26 = vadd.f32 %v1306_v23, %v1179_v25  ;;  %v1310_v23 = vmul.f32 %v1278_v14, %v1246_v18  ;;  %v991_v38 = vpop.f32.mrf.mxu1 }
 0x245   : > { %v1370_v28 = vmax.f32 %v1338_v26, 0.0 }
 0x247   : > { %1402 = vst.msk [vmem:[%s2318_s26 + $0x58] sm:$0xff] %vm507_vm0, %v1370_v28 }
 0x248   : > { %v1181_v36 = vpop.f32.mrf.mxu2 }
 0x249   : > { %v1182_v39 = vadd.f32 %v2310_v35, %v1181_v36 }
 0x24b   : > { %v1339_v40 = vadd.f32 %v1307_v37, %v1182_v39  ;;  %v1247_v37 = vld [vmem:[%s2139_s24 + $0x80] sm:$0xff]  ;;  %v1322_v39 = vmul.f32 %v1290_v29, %v1258_v32 }
 0x24c   : > { %v1311_v42 = vmul.f32 %v1279_v30, %v1247_v37 }
 0x24d   : > { %v1371_v44 = vmax.f32 %v1339_v40, 0.0 }
 0x24f   : > { %1403 = vst.msk [vmem:[%s2318_s26 + $0x60] sm:$0xff] %vm507_vm0, %v1371_v44 }
 0x250   : > { %v1183_v49 = vpop.f32.mrf.mxu2  ;;  %v1211_v50 = vpop.f32.mrf.mxu3 }
 0x251   : > { %v1184_v54 = vadd.f32 %v2310_v35, %v1183_v49  ;;  %v1212_v55 = vadd.f32 %v2310_v35, %v1211_v50  ;;  %v1280_v49 = vadd.f32 1.0, %v989_v43 }
 0x253   : > { %v1340_v57 = vadd.f32 %v1308_v51, %v1184_v54  ;;  %v1351_v58 = vadd.f32 %v1319_v48, %v1212_v55  ;;  %v993_v54 = vpop.f32.mrf.mxu1  ;;  %v1312_v56 = vmul.f32 %v1280_v49, %v1248_v52 }
 0x254   : > { %v994_v1 = vadd.f32 %v2301_v31, %v993_v54 }
 0x255   : > { %v1372_v53 = vmax.f32 %v1340_v57, 0.0  ;;  %v1383_v63 = vmax.f32 %v1351_v58, 0.0  ;;  %v992_v57 = vadd.f32 %v2301_v31, %v991_v38 }
 0x257   : > { %1404 = vst.msk [vmem:[%s2318_s26 + $0x68] sm:$0xff] %vm507_vm0, %v1372_v53  ;;  %v1281_v60 = vadd.f32 1.0, %v992_v57  ;;  %v1249_v53 = vld [vmem:[%s2139_s24 + $0x90] sm:$0xff] }
 0x258   : > { %1415 = vst.msk [vmem:[%s2318_s26 + $0xc0] sm:$0xff] %vm507_vm0, %v1383_v63  ;;  %v1186_v2 = vpop.f32.mrf.mxu2  ;;  %v1213_v3 = vpop.f32.mrf.mxu3  ;;  %v1017_v63 = vadd.f32 %v2301_v31, %v2373_v61  ;;  %v1019_v61 = vadd.f32 %v2301_v31, %v2380_v8  ;;  %v1251_v8 = vld [vmem:[%s2139_s24 + $0xa0] sm:$0xff] }
 0x259   : > { %v1187_v6 = vadd.f32 %v2310_v35, %v1186_v2  ;;  %v1214_v9 = vadd.f32 %v2310_v35, %v1213_v3 }
 0x25a   : > { %v1291_v5 = vadd.f32 1.0, %v1017_v63 }
 0x25b   : > { %v1341_v10 = vadd.f32 %v1309_v4, %v1187_v6  ;;  %v1352_v11 = vadd.f32 %v1320_v0, %v1214_v9  ;;  %v1313_v0 = vmul.f32 %v1281_v60, %v1249_v53  ;;  %v996_v3 = vpop.f32.mrf.mxu1  ;;  %v1259_v6 = vld [vmem:[%s2139_s24 + $0xe0] sm:$0xff]  ;;  %v1282_v9 = vadd.f32 1.0, %v994_v1  ;;  %v1253_v53 = vld [vmem:[%s2139_s24 + $0xb0] sm:$0xff] }
 0x25c   : > { %v1323_v12 = vmul.f32 %v1291_v5, %v1259_v6 }
 0x25d   : > { %v1373_v16 = vmax.f32 %v1341_v10, 0.0  ;;  %v1384_v17 = vmax.f32 %v1352_v11, 0.0  ;;  %v1250_v11 = vld [vmem:[%s2139_s24 + $0x98] sm:$0xff] }
 0x25e   : > { %v1314_v34 = vmul.f32 %v1282_v9, %v1250_v11 }
 0x25f   : > { %1405 = vst.msk [vmem:[%s2318_s26 + $0x70] sm:$0xff] %vm507_vm0, %v1373_v16  ;;  %v997_v16 = vadd.f32 %v2301_v31, %v996_v3 }
 0x260   : > { %1416 = vst.msk [vmem:[%s2318_s26 + $0xc8] sm:$0xff] %vm507_vm0, %v1384_v17  ;;  %v1188_v21 = vpop.f32.mrf.mxu2  ;;  %v1216_v46 = vpop.f32.mrf.mxu3 }
 0x261   : > { %v1189_v25 = vadd.f32 %v2310_v35, %v1188_v21  ;;  %v1217_v26 = vadd.f32 %v2310_v35, %v1216_v46  ;;  %v1292_v21 = vadd.f32 1.0, %v1019_v61  ;;  %v1283_v24 = vadd.f32 1.0, %v997_v16  ;;  %v1254_v61 = vld [vmem:[%s2139_s24 + $0xb8] sm:$0xff] }
 0x263   : > { %v1342_v27 = vadd.f32 %v1310_v23, %v1189_v25  ;;  %v1353_v28 = vadd.f32 %v1321_v19, %v1217_v26  ;;  %v998_v46 = vpop.f32.mrf.mxu1  ;;  %v1260_v23 = vld [vmem:[%s2139_s24 + $0xe8] sm:$0xff]  ;;  %v1315_v32 = vmul.f32 %v1283_v24, %v1251_v8 }
 0x265   : > { %v1374_v36 = vmax.f32 %v1342_v27, 0.0  ;;  %v1385_v45 = vmax.f32 %v1353_v28, 0.0  ;;  %v1324_v27 = vmul.f32 %v1292_v21, %v1260_v23  ;;  %v1022_v28 = vadd.f32 %v2301_v31, %v2388_v22 }
 0x267   : > { %1406 = vst.msk [vmem:[%s2318_s26 + $0x78] sm:$0xff] %vm507_vm0, %v1374_v36  ;;  %v999_v36 = vadd.f32 %v2301_v31, %v998_v46 }
 0x268   : > { %1417 = vst.msk [vmem:[%s2318_s26 + $0xd0] sm:$0xff] %vm507_vm0, %v1385_v45  ;;  %v1191_v40 = vpop.f32.mrf.mxu2  ;;  %v1218_v41 = vpop.f32.mrf.mxu3 }
 0x269   : > { %v1192_v44 = vadd.f32 %v2310_v35, %v1191_v40  ;;  %v1219_v47 = vadd.f32 %v2310_v35, %v1218_v41  ;;  %v1293_v40 = vadd.f32 1.0, %v1022_v28  ;;  %v1284_v22 = vadd.f32 1.0, %v999_v36 }
 0x26b   : > { %v1343_v48 = vadd.f32 %v1311_v42, %v1192_v44  ;;  %v1354_v7 = vadd.f32 %v1322_v39, %v1219_v47  ;;  %v1001_v41 = vpop.f32.mrf.mxu1  ;;  %v1261_v42 = vld [vmem:[%s2139_s24 + $0xf0] sm:$0xff]  ;;  %v1252_v47 = vld [vmem:[%s2139_s24 + $0xa8] sm:$0xff] }
 0x26c   : > { %v1002_v52 = vadd.f32 %v2301_v31, %v1001_v41 }
 0x26d   : > { %v1375_v50 = vmax.f32 %v1343_v48, 0.0  ;;  %v1386_v51 = vmax.f32 %v1354_v7, 0.0  ;;  %v1325_v48 = vmul.f32 %v1293_v40, %v1261_v42  ;;  %v1024_v7 = vadd.f32 %v2301_v31, %v2399_v33 }
 0x26e   : > { %v1285_v60 = vadd.f32 1.0, %v1002_v52 }
 0x26f   : > { %1407 = vst.msk [vmem:[%s2318_s26 + $0x80] sm:$0xff] %vm507_vm0, %v1375_v50 }
 0x270   : > { %1418 = vst.msk [vmem:[%s2318_s26 + $0xd8] sm:$0xff] %vm507_vm0, %v1386_v51  ;;  %v1193_v55 = vpop.f32.mrf.mxu2  ;;  %v1316_v51 = vmul.f32 %v1284_v22, %v1252_v47 }
 0x271   : > { %v1194_v58 = vadd.f32 %v2310_v35, %v1193_v55 }
 0x273   : > { %v1344_v59 = vadd.f32 %v1312_v56, %v1194_v58  ;;  %v1294_v58 = vadd.f32 1.0, %v1024_v7  ;;  %v1003_v63 = vpop.f32.mrf.mxu1 }
 0x274   : > { %v1004_v3 = vadd.f32 %v2301_v31, %v1003_v63 }
 0x275   : > { %v1376_v62 = vmax.f32 %v1344_v59, 0.0  ;;  %v1262_v59 = vld [vmem:[%s2139_s24 + $0xf8] sm:$0xff] }
 0x277   : > { %1408 = vst.msk [vmem:[%s2318_s26 + $0x88] sm:$0xff] %vm507_vm0, %v1376_v62 }
 0x278   : > { %v1196_v15 = vpop.f32.mrf.mxu2 }
 0x279   : > { %v1197_v2 = vadd.f32 %v2310_v35, %v1196_v15  ;;  %v1326_v15 = vmul.f32 %v1294_v58, %v1262_v59 }
 0x27b   : > { %v1345_v4 = vadd.f32 %v1313_v0, %v1197_v2  ;;  %v1317_v2 = vmul.f32 %v1285_v60, %v1253_v53 }
 0x27d   : > { %v1377_v10 = vmax.f32 %v1345_v4, 0.0 }
 0x27f   : > { %1409 = vst.msk [vmem:[%s2318_s26 + $0x90] sm:$0xff] %vm507_vm0, %v1377_v10  ;;  %v1286_v10 = vadd.f32 1.0, %v1004_v3 }
 0x280   : > { %v1198_v13 = vpop.f32.mrf.mxu2  ;;  %v1221_v14 = vpop.f32.mrf.mxu3 }
 0x281   : > { %v1199_v17 = vadd.f32 %v2310_v35, %v1198_v13  ;;  %v1222_v18 = vadd.f32 %v2310_v35, %v1221_v14  ;;  %v1318_v14 = vmul.f32 %v1286_v10, %v1254_v61 }
 0x283   : > { %v1346_v19 = vadd.f32 %v1314_v34, %v1199_v17  ;;  %v1355_v20 = vadd.f32 %v1323_v12, %v1222_v18 }
 0x285   : > { %v1378_v25 = vmax.f32 %v1346_v19, 0.0  ;;  %v1387_v26 = vmax.f32 %v1355_v20, 0.0 }
 0x287   : > { %1410 = vst.msk [vmem:[%s2318_s26 + $0x98] sm:$0xff] %vm507_vm0, %v1378_v25 }
 0x288   : > { %1419 = vst.msk [vmem:[%s2318_s26 + $0xe0] sm:$0xff] %vm507_vm0, %v1387_v26  ;;  %v1201_v29 = vpop.f32.mrf.mxu2  ;;  %v1223_v30 = vpop.f32.mrf.mxu3 }
 0x289   : > { %v1202_v45 = vadd.f32 %v2310_v35, %v1201_v29  ;;  %v1224_v37 = vadd.f32 %v2310_v35, %v1223_v30 }
 0x28b   : > { %v1347_v38 = vadd.f32 %v1315_v32, %v1202_v45  ;;  %v1356_v39 = vadd.f32 %v1324_v27, %v1224_v37 }
 0x28d   : > { %v1379_v43 = vmax.f32 %v1347_v38, 0.0  ;;  %v1388_v44 = vmax.f32 %v1356_v39, 0.0 }
 0x28f   : > { %1411 = vst.msk [vmem:[%s2318_s26 + $0xa0] sm:$0xff] %vm507_vm0, %v1379_v43 }
 0x290   : > { %1420 = vst.msk [vmem:[%s2318_s26 + $0xe8] sm:$0xff] %vm507_vm0, %v1388_v44  ;;  %v1203_v49 = vpop.f32.mrf.mxu2  ;;  %v1226_v50 = vpop.f32.mrf.mxu3 }
 0x291   : > { %v1204_v54 = vadd.f32 %v2310_v35, %v1203_v49  ;;  %v1227_v55 = vadd.f32 %v2310_v35, %v1226_v50 }
 0x293   : > { %v1348_v56 = vadd.f32 %v1316_v51, %v1204_v54  ;;  %v1357_v57 = vadd.f32 %v1325_v48, %v1227_v55 }
 0x295   : > { %v1380_v62 = vmax.f32 %v1348_v56, 0.0  ;;  %v1389_v33 = vmax.f32 %v1357_v57, 0.0 }
 0x297   : > { %1412 = vst.msk [vmem:[%s2318_s26 + $0xa8] sm:$0xff] %vm507_vm0, %v1380_v62 }
 0x298   : > { %1421 = vst.msk [vmem:[%s2318_s26 + $0xf0] sm:$0xff] %vm507_vm0, %v1389_v33  ;;  %v1206_v0 = vpop.f32.mrf.mxu2  ;;  %v1228_v1 = vpop.f32.mrf.mxu3 }
 0x299   : > { %v1207_v4 = vadd.f32 %v2310_v35, %v1206_v0  ;;  %v1229_v5 = vadd.f32 %v2310_v35, %v1228_v1 }
 0x29b   : > { %v1349_v6 = vadd.f32 %v1317_v2, %v1207_v4  ;;  %v1358_v9 = vadd.f32 %v1326_v15, %v1229_v5 }
 0x29d   : > { %v1381_v11 = vmax.f32 %v1349_v6, 0.0  ;;  %v1390_v12 = vmax.f32 %v1358_v9, 0.0 }
 0x29f   : > { %1413 = vst.msk [vmem:[%s2318_s26 + $0xb0] sm:$0xff] %vm507_vm0, %v1381_v11 }
 0x2a0   : > { %1422 = vst.msk [vmem:[%s2318_s26 + $0xf8] sm:$0xff] %vm507_vm0, %v1390_v12  ;;  %v1208_v13 = vpop.f32.mrf.mxu2 }
 0x2a1   : > { %v1209_v34 = vadd.f32 %v2310_v35, %v1208_v13 }
 0x2a3   : > { %v1350_v31 = vadd.f32 %v1318_v14, %v1209_v34 }
 0x2a5   : > { %v1382_v16 = vmax.f32 %v1350_v31, 0.0 }
 0x2a7   : > { %1414 = vst.msk [vmem:[%s2318_s26 + $0xb8] sm:$0xff] %vm507_vm0, %v1382_v16 }
 0x2a8 PF: > { %p22_p4 = scmp.ge.s32.totalorder %s2077_s13, 4   ;;  %s2541_s27 = smov %s1957_s28 }
 0x2a9   : > { %s2542_s28 = smov %s1961_s29  ;;  %s2543_s29 = smov %s2089_s18 }
 0x2aa   : > { %s2544_s30 = smov %s2077_s13  ;;  %24 = sbr.rel (!%p22_p4) target bundleno = 11 (0xb), region = 117 }
 0x2af   :  { %1445 = vsyncpa [#allocation3], 1 }
 0x2b0   :  { %1447 = vsyncpa [#allocation3 + $0x1], 1 }
 0x2b1   :  { %1448 = vsyncpa [#allocation5], 1 }
 0x2b2   :  { %1450 = vsyncpa [#allocation5 + $0x1], 1 }
 0x2b3   :  { %1451 = vsyncpa [#allocation8], 1 }

// kernel: caamb_forward.6
= control target key start
LH: loop header
LB: loop body
LE: loop exit
PB: predicated region body
PF: predicated region fallthrough
CT: control target
= control target key end

     0   :  { %s1710_s27 = smov 0   ;;  %s2103_s0 = inlined_call_operand.vmem [shape: bf16[512,64], index: 0, kind: input, shape index: {}]   ;;  %s2104_s1 = inlined_call_operand.vmem [shape: f32[512,64], index: 1, kind: input, shape index: {}]   ;;  %s2105_s2 = inlined_call_operand.vmem [shape: bf16[64,128], index: 2, kind: input, shape index: {}]   ;;  %s2106_s3 = inlined_call_operand.vmem [shape: f32[1,128], index: 3, kind: input, shape index: {}]   ;;  %s2107_s4 = inlined_call_operand.vmem [shape: bf16[64,64], index: 4, kind: input, shape index: {}]   ;;  %s2108_s5 = inlined_call_operand.vmem [shape: f32[1,64], index: 5, kind: input, shape index: {}]   ;;  %s2109_s6 = inlined_call_operand.vmem [shape: bf16[64,64], index: 6, kind: input, shape index: {}]   ;;  %s2110_s7 = inlined_call_operand.vmem [shape: f32[1,64], index: 7, kind: input, shape index: {}]   ;;  %s2111_s8 = inlined_call_operand.vmem [shape: f32[512,64], index: 8, kind: output, shape index: {}]  }
   0x1 LB: > { %s1432_s28 = sadd.s32 4294967295, %s1662_s27   ;;  %p1436_p0 = scmp.ge.s32.totalorder %s1662_s27, 1  ;;  %s1662_s27 = sphi %s1710_s27, %s18_s27  }
   0x2   : > { %p274_p1 = scmp.lt.s32.totalorder %s1662_s27, 3 }
   0x4   : > { %p275_p2 = pnand %p1436_p0, %p274_p1 }
   0x5   : > { %s1437_s9 = sshll.u32 (!%p275_p2), %s1432_s28, 5  ;;  %s1664_s10 = smov (!%p275_p2), 64  }
   0x6   : > { %278 = sbr.rel (%p275_p2) target bundleno = 610 (0x262), region = 52  ;;  %p314_p3 = scmp.lt.s32.totalorder (!%p275_p2), %s1437_s9, 63 }
   0xb   : > { %v1544_v0 = vld [vmem:[%s2105_s2 + $0x18] sm:$0xff]  ;;  %v1543_v1 = vld [vmem:[%s2105_s2 + $0x10] sm:$0xff]  ;;  %s2113_s9 = smov (!%p314_p3, %s1437_s9), 63  ;;  %v1542_v2 = vld [vmem:[%s2105_s2 + $0x8] sm:$0xff]  ;;  %vm416_vm0 = vcmask 523264  }
   0xc   : > { %469 = vmatpush.bf16.msra.mxu0 %v1544_v0  ;;  %1632 = vmatpush.bf16.msra.mxu3 %v1544_v0  ;;  %s1440_s12 = sshll.u32 %s2113_s9, 3  ;;  %v1541_v3 = vld [vmem:[%s2105_s2] sm:$0xff]  ;;  %v1548_v31 = vld [vmem:[%s2107_s4 + $0x18] sm:$0xff]  ;;  %v1547_v32 = vld [vmem:[%s2107_s4 + $0x10] sm:$0xff]  ;;  %s1438_s20 = sshll.u32 %s2113_s9, 2 }
   0xd   : > { %s1735_s17 = scalar_lea.vmem %s2104_s1, %s1440_s12  ;;  %850 = vmatpush.bf16.msra.mxu1 %v1548_v31  ;;  %v1546_v36 = vld [vmem:[%s2107_s4 + $0x8] sm:$0xff]  ;;  %v1545_v40 = vld [vmem:[%s2107_s4] sm:$0xff]  ;;  %s1912_s25 = scalar_lea.vmem %s2103_s0, %s1438_s20 }
   0xe   : > { %v332_v4 = vld [vmem:[%s1735_s17] sm:$0xff]  ;;  %v333_v5 = vld [vmem:[%s1735_s17 + $0x8] sm:$0xff]  ;;  %v334_v7 = vld [vmem:[%s1735_s17 + $0x10] sm:$0xff] }
   0xf   : > { %v364_v6 = vpack.c.bf16 %v333_v5, %v332_v4  ;;  %v335_v8 = vld [vmem:[%s1735_s17 + $0x18] sm:$0xff]  ;;  %v336_v10 = vld [vmem:[%s1735_s17 + $0x20] sm:$0xff]  ;;  %v337_v11 = vld [vmem:[%s1735_s17 + $0x28] sm:$0xff] }
  0x10   : > { %470 = vmatpush.bf16.msra.mxu0 %v1543_v1  ;;  %1633 = vmatpush.bf16.msra.mxu3 %v1543_v1  ;;  %v365_v9 = vpack.c.bf16 %v335_v8, %v334_v7  ;;  %v366_v12 = vpack.c.bf16 %v337_v11, %v336_v10  ;;  %v338_v13 = vld [vmem:[%s1735_s17 + $0x30] sm:$0xff]  ;;  %v339_v14 = vld [vmem:[%s1735_s17 + $0x38] sm:$0xff]  ;;  %v340_v16 = vld [vmem:[%s1735_s17 + $0x40] sm:$0xff] }
  0x11   : > { %v367_v15 = vpack.c.bf16 %v339_v14, %v338_v13  ;;  %v341_v17 = vld [vmem:[%s1735_s17 + $0x48] sm:$0xff]  ;;  %v356_v19 = vld [vmem:[%s1735_s17 + $0xc0] sm:$0xff]  ;;  %v342_v22 = vld [vmem:[%s1735_s17 + $0x50] sm:$0xff]  ;;  %851 = vmatpush.bf16.msra.mxu1 %v1547_v32 }
  0x12   : > { %v368_v18 = vpack.c.bf16 %v341_v17, %v340_v16  ;;  %v357_v20 = vld [vmem:[%s1735_s17 + $0xc8] sm:$0xff]  ;;  %v343_v23 = vld [vmem:[%s1735_s17 + $0x58] sm:$0xff]  ;;  %v358_v25 = vld [vmem:[%s1735_s17 + $0xd0] sm:$0xff] }
  0x13   : > { %v376_v21 = vpack.c.bf16 %v357_v20, %v356_v19  ;;  %v369_v24 = vpack.c.bf16 %v343_v23, %v342_v22  ;;  %v359_v26 = vld [vmem:[%s1735_s17 + $0xd8] sm:$0xff]  ;;  %v344_v28 = vld [vmem:[%s1735_s17 + $0x60] sm:$0xff]  ;;  %v345_v29 = vld [vmem:[%s1735_s17 + $0x68] sm:$0xff] }
  0x14   : > { %471 = vmatpush.bf16.msra.mxu0 %v1542_v2  ;;  %1634 = vmatpush.bf16.msra.mxu3 %v1542_v2  ;;  %v377_v27 = vpack.c.bf16 %v359_v26, %v358_v25  ;;  %v370_v30 = vpack.c.bf16 %v345_v29, %v344_v28  ;;  %v360_v33 = vld [vmem:[%s1735_s17 + $0xe0] sm:$0xff]  ;;  %v361_v34 = vld [vmem:[%s1735_s17 + $0xe8] sm:$0xff]  ;;  %v346_v37 = vld [vmem:[%s1735_s17 + $0x70] sm:$0xff] }
  0x15   : > { %v378_v35 = vpack.c.bf16 %v361_v34, %v360_v33  ;;  %v347_v38 = vld [vmem:[%s1735_s17 + $0x78] sm:$0xff]  ;;  %852 = vmatpush.bf16.msra.mxu1 %v1546_v36  ;;  %v362_v41 = vld [vmem:[%s1735_s17 + $0xf0] sm:$0xff]  ;;  %v348_v44 = vld [vmem:[%s1735_s17 + $0x80] sm:$0xff] }
  0x16   : > { %v371_v39 = vpack.c.bf16 %v347_v38, %v346_v37  ;;  %v363_v42 = vld [vmem:[%s1735_s17 + $0xf8] sm:$0xff]  ;;  %v349_v45 = vld [vmem:[%s1735_s17 + $0x88] sm:$0xff]  ;;  %v1793_v46 = vld [vmem:[%s2106_s3] ss:$0 sm:$0xff] }
  0x17   : > { %v379_v43 = vpack.c.bf16 %v363_v42, %v362_v41  ;;  %v372_v47 = vpack.c.bf16 %v349_v45, %v348_v44  ;;  %v350_v55 = vld [vmem:[%s1735_s17 + $0x90] sm:$0xff]  ;;  %v351_v56 = vld [vmem:[%s1735_s17 + $0x98] sm:$0xff]  ;;  %v352_v8 = vld [vmem:[%s1735_s17 + $0xa0] sm:$0xff] }
  0x18   : > { %472 = vmatpush.bf16.msra.mxu0 %v1541_v3  ;;  %1635 = vmatpush.bf16.msra.mxu3 %v1541_v3  ;;  %v373_v60 = vpack.c.bf16 %v351_v56, %v350_v55  ;;  %v355_v25 = vld [vmem:[%s1735_s17 + $0xb8] sm:$0xff] }
  0x19   : > { %853 = vmatpush.bf16.msra.mxu1 %v1545_v40 }
  0x1b   : > { %1459 = vmatmul.msk.bf16.vlgmr.msra.gmra.mxu0 %vm416_vm0, %v364_v6  ;;  %1471 = vmatmul.msk.bf16.vlgmr.msra.gmra.mxu3 %vm416_vm0, %v376_v21 }
  0x1c   : > { %1636 = vmatpush.bf16.msrb.mxu3 %v1548_v31 }
  0x20   : > { %1637 = vmatpush.bf16.msrb.mxu3 %v1547_v32 }
  0x24   : > { %1638 = vmatpush.bf16.msrb.mxu3 %v1546_v36 }
  0x28   : > { %1639 = vmatpush.bf16.msrb.mxu3 %v1545_v40 }
  0x2b   : > { %1460 = vmatmul.msk.bf16.gmra.mxu0 %vm416_vm0, %v365_v9  ;;  %1472 = vmatmul.msk.bf16.gmra.mxu3 %vm416_vm0, %v377_v27  ;;  %v353_v9 = vld [vmem:[%s1735_s17 + $0xa8] sm:$0xff] }
  0x3b   : > { %1461 = vmatmul.msk.bf16.gmra.mxu0 %vm416_vm0, %v366_v12  ;;  %1473 = vmatmul.msk.bf16.gmra.mxu3 %vm416_vm0, %v378_v35  ;;  %v374_v12 = vpack.c.bf16 %v353_v9, %v352_v8  ;;  %v1552_v8 = vld [vmem:[%s2109_s6 + $0x18] sm:$0xff] }
  0x3c   : > { %1055 = vmatpush.bf16.msra.mxu2 %v1552_v8  ;;  %1640 = vmatpush.bf16.msra.mxu3 %v1552_v8 }
  0x4b   : > { %1462 = vmatmul.msk.bf16.gmra.mxu0 %vm416_vm0, %v367_v15  ;;  %1474 = vmatmul.msk.bf16.gmra.mxu3 %vm416_vm0, %v379_v43 }
  0x5b   : > { %1463 = vmatmul.msk.bf16.gmra.mxu0 %vm416_vm0, %v368_v18 }
  0x6b   : > { %1464 = vmatmul.msk.bf16.gmra.mxu0 %vm416_vm0, %v369_v24  ;;  %v354_v24 = vld [vmem:[%s1735_s17 + $0xb0] sm:$0xff] }
  0x6c   : > { %v375_v28 = vpack.c.bf16 %v355_v25, %v354_v24 }
  0x7b   : > { %1465 = vmatmul.msk.bf16.gmra.mxu0 %vm416_vm0, %v370_v30 }
  0x8b   : > { %1466 = vmatmul.msk.bf16.gmra.mxu0 %vm416_vm0, %v371_v39 }
  0x98   : > { %v474_v48 = vpop.f32.mrf.mxu0 }
  0x99   : > { %v475_v49 = vadd.f32 %v1793_v46, %v474_v48 }
  0x9b   : > { %1467 = vmatmul.msk.bf16.gmra.mxu0 %vm416_vm0, %v372_v47  ;;  %v586_v50 = vmul.f32 0.1, %v475_v49  ;;  %vm554_vm1 = vcmp.ge.f32.partialorder %v475_v49, 0.0 }
  0x9d   : > { %v618_v53 = vsel %vm554_vm1, %v475_v49, %v586_v50 }
  0x9e   : > { %v650_v57 = vpack.c.bf16 %v618_v53, %v618_v53  ;;  %v534_v50 = vpop.f32.mrf.mxu3 }
  0xa0   : > { %v476_v51 = vpop.f32.mrf.mxu0  ;;  %v726_v62 = vunpack.c.l.b16 %v650_v57 }
  0xa1   : > { %v477_v52 = vadd.f32 %v1793_v46, %v476_v51 }
  0xa3   : > { %vm555_vm2 = vcmp.ge.f32.partialorder %v477_v52, 0.0  ;;  %v587_v54 = vmul.f32 0.1, %v477_v52 }
  0xa5   : > { %v619_v58 = vsel %vm555_vm2, %v477_v52, %v587_v54 }
  0xa6   : > { %v651_v59 = vpack.c.bf16 %v619_v58, %v619_v58 }
  0xa8   : > { %v479_v61 = vpop.f32.mrf.mxu0  ;;  %v727_v63 = vunpack.c.l.b16 %v651_v59 }
  0xa9   : > { %v480_v0 = vadd.f32 %v1793_v46, %v479_v61  ;;  %v536_v61 = vpop.f32.mrf.mxu3 }
  0xaa   : > { %v758_v1 = vpack.c.b16 %v727_v63, %v726_v62  ;;  %v537_v63 = vadd.f32 %v1793_v46, %v536_v61 }
  0xab   : > { %1468 = vmatmul.msk.bf16.gmra.mxu0 %vm416_vm0, %v373_v60  ;;  %v588_v2 = vmul.f32 0.1, %v480_v0  ;;  %vm556_vm3 = vcmp.ge.f32.partialorder %v480_v0, 0.0  ;;  %v535_v60 = vadd.f32 %v1793_v46, %v534_v50 }
  0xac   : > { %947 = vrot.lane.b32.xlu0 %v758_v1, %s1664_s10  ;;  %1491 = vmatmul.msk.bf16.vlgmr.msra.gmra.mxu1 %vm416_vm0, %v758_v1  ;;  %vm579_vm12 = vcmp.ge.f32.partialorder %v537_v63, 0.0 }
  0xad   : > { %v620_v4 = vsel %vm556_vm3, %v480_v0, %v588_v2  ;;  %vm578_vm11 = vcmp.ge.f32.partialorder %v535_v60, 0.0  ;;  %v610_v1 = vmul.f32 0.1, %v535_v60  ;;  %v611_v2 = vmul.f32 0.1, %v537_v63 }
  0xae   : > { %v652_v7 = vpack.c.bf16 %v620_v4, %v620_v4 }
  0xb0   : > { %v481_v3 = vpop.f32.mrf.mxu0  ;;  %v728_v13 = vunpack.c.l.b16 %v652_v7 }
  0xb1   : > { %v482_v5 = vadd.f32 %v1793_v46, %v481_v3  ;;  %v642_v3 = vsel %vm578_vm11, %v535_v60, %v610_v1 }
  0xb3   : > { %vm557_vm4 = vcmp.ge.f32.partialorder %v482_v5, 0.0  ;;  %v589_v6 = vmul.f32 0.1, %v482_v5 }
  0xb5   : > { %v621_v10 = vsel %vm557_vm4, %v482_v5, %v589_v6  ;;  %v674_v5 = vpack.c.bf16 %v642_v3, %v642_v3  ;;  %v643_v6 = vsel %vm579_vm12, %v537_v63, %v611_v2 }
  0xb6   : > { %v653_v11 = vpack.c.bf16 %v621_v10, %v621_v10  ;;  %v675_v7 = vpack.c.bf16 %v643_v6, %v643_v6 }
  0xb7   : > { %v750_v9 = vunpack.c.l.b16 %v674_v5 }
  0xb8   : > { %v729_v14 = vunpack.c.l.b16 %v653_v11  ;;  %v484_v15 = vpop.f32.mrf.mxu0  ;;  %v751_v11 = vunpack.c.l.b16 %v675_v7 }
  0xb9   : > { %v485_v16 = vadd.f32 %v1793_v46, %v484_v15 }
  0xba   : > { %v759_v17 = vpack.c.b16 %v729_v14, %v728_v13  ;;  %v1551_v14 = vld [vmem:[%s2109_s6 + $0x10] sm:$0xff]  ;;  %v1835_v15 = vpack.c.b16 %v751_v11, %v750_v9 }
  0xbb   : > { %1469 = vmatmul.msk.bf16.gmra.mxu0 %vm416_vm0, %v374_v12  ;;  %v590_v18 = vmul.f32 0.1, %v485_v16  ;;  %vm558_vm5 = vcmp.ge.f32.partialorder %v485_v16, 0.0  ;;  %1056 = vmatpush.bf16.msra.mxu2 %v1551_v14 }
  0xbc   : > { %949 = vrot.lane.b32.xlu0 %v759_v17, %s1664_s10  ;;  %1492 = vmatmul.msk.bf16.gmra.mxu1 %vm416_vm0, %v759_v17 }
  0xbd   : > { %v622_v21 = vsel %vm558_vm5, %v485_v16, %v590_v18  ;;  %1503 = vmatmul.msk.bf16.vlgmr.msrb.gmra.mxu3 %vm416_vm0, %v1835_v15 }
  0xbe   : > { %v654_v23 = vpack.c.bf16 %v622_v21, %v622_v21  ;;  %1641 = vmatpush.bf16.msra.mxu3 %v1551_v14  ;;  %v1550_v21 = vld [vmem:[%s2109_s6 + $0x8] sm:$0xff] }
  0xbf   : > { %1057 = vmatpush.bf16.msra.mxu2 %v1550_v21 }
  0xc0   : > { %v486_v19 = vpop.f32.mrf.mxu0  ;;  %v730_v30 = vunpack.c.l.b16 %v654_v23 }
  0xc1   : > { %v487_v20 = vadd.f32 %v1793_v46, %v486_v19 }
  0xc2   : > { %1642 = vmatpush.bf16.msra.mxu3 %v1550_v21 }
  0xc3   : > { %vm559_vm6 = vcmp.ge.f32.partialorder %v487_v20, 0.0  ;;  %v591_v22 = vmul.f32 0.1, %v487_v20 }
  0xc5   : > { %v623_v26 = vsel %vm559_vm6, %v487_v20, %v591_v22  ;;  %v539_v20 = vpop.f32.mrf.mxu3 }
  0xc6   : > { %v655_v27 = vpack.c.bf16 %v623_v26, %v623_v26  ;;  %v540_v25 = vadd.f32 %v1793_v46, %v539_v20 }
  0xc8   : > { %v489_v29 = vpop.f32.mrf.mxu0  ;;  %v731_v31 = vunpack.c.l.b16 %v655_v27  ;;  %vm580_vm15 = vcmp.ge.f32.partialorder %v540_v25, 0.0 }
  0xc9   : > { %v490_v32 = vadd.f32 %v1793_v46, %v489_v29  ;;  %v1549_v29 = vld [vmem:[%s2109_s6] sm:$0xff] }
  0xca   : > { %v760_v33 = vpack.c.b16 %v731_v31, %v730_v30  ;;  %1058 = vmatpush.bf16.msra.mxu2 %v1549_v29  ;;  %1643 = vmatpush.bf16.msra.mxu3 %v1549_v29 }
  0xcb   : > { %1470 = vmatmul.msk.bf16.gmra.mxu0 %vm416_vm0, %v375_v28  ;;  %v592_v34 = vmul.f32 0.1, %v490_v32  ;;  %vm560_vm7 = vcmp.ge.f32.partialorder %v490_v32, 0.0  ;;  %v612_v28 = vmul.f32 0.1, %v540_v25 }
  0xcc   : > { %951 = vrot.lane.b32.xlu1 %v760_v33, %s1664_s10  ;;  %1493 = vmatmul.msk.bf16.gmra.mxu1 %vm416_vm0, %v760_v33 }
  0xcd   : > { %v624_v36 = vsel %vm560_vm7, %v490_v32, %v592_v34  ;;  %v644_v31 = vsel %vm580_vm15, %v540_v25, %v612_v28  ;;  %v541_v32 = vpop.f32.mrf.mxu3 }
  0xce   : > { %v656_v39 = vpack.c.bf16 %v624_v36, %v624_v36  ;;  %v542_v33 = vadd.f32 %v1793_v46, %v541_v32 }
  0xd0   : > { %v491_v35 = vpop.f32.mrf.mxu0  ;;  %v732_v42 = vunpack.c.l.b16 %v656_v39  ;;  %vm581_vm2 = vcmp.ge.f32.partialorder %v542_v33, 0.0 }
  0xd1   : > { %v492_v37 = vadd.f32 %v1793_v46, %v491_v35  ;;  %v676_v35 = vpack.c.bf16 %v644_v31, %v644_v31 }
  0xd3   : > { %vm561_vm8 = vcmp.ge.f32.partialorder %v492_v37, 0.0  ;;  %v593_v38 = vmul.f32 0.1, %v492_v37 }
  0xd5   : > { %v625_v40 = vsel %vm561_vm8, %v492_v37, %v593_v38  ;;  %v613_v38 = vmul.f32 0.1, %v542_v33 }
  0xd6   : > { %v657_v41 = vpack.c.bf16 %v625_v40, %v625_v40 }
  0xd7   : > { %v645_v40 = vsel %vm581_vm2, %v542_v33, %v613_v38 }
  0xd8   : > { %v733_v43 = vunpack.c.l.b16 %v657_v41  ;;  %v494_v44 = vpop.f32.mrf.mxu0 }
  0xd9   : > { %v495_v45 = vadd.f32 %v1793_v46, %v494_v44 }
  0xda   : > { %v761_v47 = vpack.c.b16 %v733_v43, %v732_v42  ;;  %v752_v42 = vunpack.c.l.b16 %v676_v35  ;;  %v677_v43 = vpack.c.bf16 %v645_v40, %v645_v40 }
  0xdb   : > { %v594_v48 = vmul.f32 0.1, %v495_v45  ;;  %vm562_vm9 = vcmp.ge.f32.partialorder %v495_v45, 0.0 }
  0xdc   : > { %953 = vrot.lane.b32.xlu1 %v761_v47, %s1664_s10  ;;  %1494 = vmatmul.msk.bf16.gmra.mxu1 %vm416_vm0, %v761_v47  ;;  %v753_v47 = vunpack.c.l.b16 %v677_v43 }
  0xdd   : > { %v626_v52 = vsel %vm562_vm9, %v495_v45, %v594_v48  ;;  %v544_v48 = vpop.f32.mrf.mxu3 }
  0xde   : > { %v658_v54 = vpack.c.bf16 %v626_v52, %v626_v52  ;;  %v545_v52 = vadd.f32 %v1793_v46, %v544_v48 }
  0xe0   : > { %v496_v49 = vpop.f32.mrf.mxu0  ;;  %v734_v58 = vunpack.c.l.b16 %v658_v54  ;;  %vm582_vm4 = vcmp.ge.f32.partialorder %v545_v52, 0.0 }
  0xe1   : > { %v497_v51 = vadd.f32 %v1793_v46, %v496_v49 }
  0xe3   : > { %vm563_vm10 = vcmp.ge.f32.partialorder %v497_v51, 0.0  ;;  %v595_v53 = vmul.f32 0.1, %v497_v51 }
  0xe5   : > { %v627_v55 = vsel %vm563_vm10, %v497_v51, %v595_v53  ;;  %v1852_v53 = vpack.c.b16 %v753_v47, %v752_v42 }
  0xe6   : > { %v659_v56 = vpack.c.bf16 %v627_v55, %v627_v55 }
  0xe7   : > { %1504 = vmatmul.msk.bf16.gmra.mxu3 %vm416_vm0, %v1852_v53 }
  0xe8   : > { %v499_v57 = vpop.f32.mrf.mxu0  ;;  %v735_v59 = vunpack.c.l.b16 %v659_v56  ;;  %v614_v56 = vmul.f32 0.1, %v545_v52 }
  0xe9   : > { %v500_v62 = vadd.f32 %v1793_v46, %v499_v57 }
  0xea   : > { %v762_v0 = vpack.c.b16 %v735_v59, %v734_v58  ;;  %v646_v58 = vsel %vm582_vm4, %v545_v52, %v614_v56  ;;  %v546_v59 = vpop.f32.mrf.mxu3 }
  0xeb   : > { %v596_v4 = vmul.f32 0.1, %v500_v62  ;;  %vm564_vm13 = vcmp.ge.f32.partialorder %v500_v62, 0.0  ;;  %v547_v60 = vadd.f32 %v1793_v46, %v546_v59 }
  0xec   : > { %955 = vrot.lane.b32.xlu2 %v762_v0, %s1664_s10  ;;  %1495 = vmatmul.msk.bf16.gmra.mxu1 %vm416_vm0, %v762_v0 }
  0xed   : > { %v628_v12 = vsel %vm564_vm13, %v500_v62, %v596_v4  ;;  %v678_v62 = vpack.c.bf16 %v646_v58, %v646_v58  ;;  %vm583_vm6 = vcmp.ge.f32.partialorder %v547_v60, 0.0  ;;  %v615_v1 = vmul.f32 0.1, %v547_v60 }
  0xee   : > { %v660_v17 = vpack.c.bf16 %v628_v12, %v628_v12 }
  0xef   : > { %v647_v3 = vsel %vm583_vm6, %v547_v60, %v615_v1  ;;  %v754_v5 = vunpack.c.l.b16 %v678_v62 }
  0xf0   : > { %v501_v10 = vpop.f32.mrf.mxu0  ;;  %v736_v22 = vunpack.c.l.b16 %v660_v17  ;;  %v679_v6 = vpack.c.bf16 %v647_v3, %v647_v3 }
  0xf1   : > { %v502_v13 = vadd.f32 %v1793_v46, %v501_v10 }
  0xf2   : > { %v755_v9 = vunpack.c.l.b16 %v679_v6  ;;  %v549_v10 = vpop.f32.mrf.mxu3 }
  0xf3   : > { %vm565_vm14 = vcmp.ge.f32.partialorder %v502_v13, 0.0  ;;  %v597_v16 = vmul.f32 0.1, %v502_v13  ;;  %v550_v14 = vadd.f32 %v1793_v46, %v549_v10 }
  0xf5   : > { %v629_v18 = vsel %vm565_vm14, %v502_v13, %v597_v16  ;;  %v1864_v16 = vpack.c.b16 %v755_v9, %v754_v5  ;;  %vm584_vm8 = vcmp.ge.f32.partialorder %v550_v14, 0.0 }
  0xf6   : > { %v661_v19 = vpack.c.bf16 %v629_v18, %v629_v18 }
  0xf7   : > { %1505 = vmatmul.msk.bf16.gmra.mxu3 %vm416_vm0, %v1864_v16 }
  0xf8   : > { %v737_v23 = vunpack.c.l.b16 %v661_v19  ;;  %v504_v24 = vpop.f32.mrf.mxu0  ;;  %v616_v19 = vmul.f32 0.1, %v550_v14 }
  0xf9   : > { %v505_v26 = vadd.f32 %v1793_v46, %v504_v24 }
  0xfa   : > { %v763_v27 = vpack.c.b16 %v737_v23, %v736_v22  ;;  %v648_v20 = vsel %vm584_vm8, %v550_v14, %v616_v19  ;;  %v551_v22 = vpop.f32.mrf.mxu3 }
  0xfb   : > { %v598_v30 = vmul.f32 0.1, %v505_v26  ;;  %vm566_vm1 = vcmp.ge.f32.partialorder %v505_v26, 0.0  ;;  %v552_v23 = vadd.f32 %v1793_v46, %v551_v22  ;;  %v680_v25 = vpack.c.bf16 %v648_v20, %v648_v20 }
  0xfc   : > { %957 = vrot.lane.b32.xlu2 %v763_v27, %s1664_s10  ;;  %1496 = vmatmul.msk.bf16.gmra.mxu1 %vm416_vm0, %v763_v27 }
  0xfd   : > { %v630_v36 = vsel %vm566_vm1, %v505_v26, %v598_v30  ;;  %vm585_vm10 = vcmp.ge.f32.partialorder %v552_v23, 0.0  ;;  %v617_v28 = vmul.f32 0.1, %v552_v23  ;;  %v756_v32 = vunpack.c.l.b16 %v680_v25 }
  0xfe   : > { %v662_v41 = vpack.c.bf16 %v630_v36, %v630_v36 }
  0xff   : > { %v649_v30 = vsel %vm585_vm10, %v552_v23, %v617_v28 }
 0x100   : > { %v506_v34 = vpop.f32.mrf.mxu0  ;;  %v738_v49 = vunpack.c.l.b16 %v662_v41  ;;  %v681_v33 = vpack.c.bf16 %v649_v30, %v649_v30 }
 0x101   : > { %v507_v37 = vadd.f32 %v1793_v46, %v506_v34 }
 0x102   : > { %v757_v36 = vunpack.c.l.b16 %v681_v33  ;;  %v1554_v33 = vld [vmem:[%s1912_s25] sm:$0xff]  }
 0x103   : > { %vm567_vm3 = vcmp.ge.f32.partialorder %v507_v37, 0.0  ;;  %v599_v39 = vmul.f32 0.1, %v507_v37 }
 0x104   : > { %v773_v40 = vpack.c.b16 %v757_v36, %v756_v32 }
 0x105   : > { %v631_v44 = vsel %vm567_vm3, %v507_v37, %v599_v39 }
 0x106   : > { %v663_v45 = vpack.c.bf16 %v631_v44, %v631_v44 }
 0x107   : > { %1506 = vmatmul.msk.bf16.gmra.mxu3 %vm416_vm0, %v773_v40 }
 0x108   : > { %v739_v50 = vunpack.c.l.b16 %v663_v45  ;;  %v509_v51 = vpop.f32.mrf.mxu0 }
 0x109   : > { %v510_v54 = vadd.f32 %v1793_v46, %v509_v51 }
 0x10a   : > { %v764_v55 = vpack.c.b16 %v739_v50, %v738_v49 }
 0x10b   : > { %v600_v57 = vmul.f32 0.1, %v510_v54  ;;  %vm568_vm5 = vcmp.ge.f32.partialorder %v510_v54, 0.0 }
 0x10c   : > { %959 = vrot.lane.b32.xlu0 %v764_v55, %s1664_s10  ;;  %1497 = vmatmul.msk.bf16.gmra.mxu1 %vm416_vm0, %v764_v55 }
 0x10d   : > { %v632_v63 = vsel %vm568_vm5, %v510_v54, %v600_v57 }
 0x10e   : > { %v664_v4 = vpack.c.bf16 %v632_v63, %v632_v63 }
 0x110   : > { %v511_v61 = vpop.f32.mrf.mxu0  ;;  %v740_v11 = vunpack.c.l.b16 %v664_v4 }
 0x111   : > { %v512_v0 = vadd.f32 %v1793_v46, %v511_v61 }
 0x113   : > { %vm569_vm7 = vcmp.ge.f32.partialorder %v512_v0, 0.0  ;;  %v601_v2 = vmul.f32 0.1, %v512_v0 }
 0x114   : > { %971 = vrot.lane.b32.xlu0 %v1835_v15, %s1664_s10 }
 0x115   : > { %v633_v7 = vsel %vm569_vm7, %v512_v0, %v601_v2 }
 0x116   : > { %v665_v8 = vpack.c.bf16 %v633_v7, %v633_v7 }
 0x118   : > { %v741_v12 = vunpack.c.l.b16 %v665_v8  ;;  %v514_v13 = vpop.f32.mrf.mxu0 }
 0x119   : > { %v515_v17 = vadd.f32 %v1793_v46, %v514_v13 }
 0x11a   : > { %v765_v18 = vpack.c.b16 %v741_v12, %v740_v11 }
 0x11b   : > { %v602_v15 = vmul.f32 0.1, %v515_v17  ;;  %vm570_vm9 = vcmp.ge.f32.partialorder %v515_v17, 0.0 }
 0x11c   : > { %961 = vrot.lane.b32.xlu1 %v765_v18, %s1664_s10  ;;  %1498 = vmatmul.msk.bf16.gmra.mxu1 %vm416_vm0, %v765_v18 }
 0x11d   : > { %v634_v26 = vsel %vm570_vm9, %v515_v17, %v602_v15 }
 0x11e   : > { %v948_v21 = vpop.permute.xlu0 %947  ;;  %v666_v31 = vpack.c.bf16 %v634_v26, %v634_v26 }
 0x11f   : > { %1523 = vmatmul.msk.bf16.vlgmr.msra.gmra.mxu2 %vm416_vm0, %v948_v21 }
 0x120   : > { %v516_v24 = vpop.f32.mrf.mxu0  ;;  %v742_v37 = vunpack.c.l.b16 %v666_v31  ;;  %v1906_v31 = vld [vmem:[%s2108_s5] ss:$0 sm:$0xff] }
 0x121   : > { %v517_v27 = vadd.f32 %v1793_v46, %v516_v24 }
 0x123   : > { %vm571_vm11 = vcmp.ge.f32.partialorder %v517_v27, 0.0  ;;  %v603_v29 = vmul.f32 0.1, %v517_v27 }
 0x125   : > { %v635_v34 = vsel %vm571_vm11, %v517_v27, %v603_v29 }
 0x126   : > { %v667_v35 = vpack.c.bf16 %v635_v34, %v635_v34 }
 0x128   : > { %v743_v38 = vunpack.c.l.b16 %v667_v35  ;;  %v519_v39 = vpop.f32.mrf.mxu0  ;;  %v1555_v35 = vunpack.c.l.bf16 %v1554_v33 }
 0x129   : > { %v520_v41 = vadd.f32 %v1793_v46, %v519_v39  ;;  %v855_v21 = vpop.f32.mrf.mxu1 }
 0x12a   : > { %v766_v42 = vpack.c.b16 %v743_v38, %v742_v37  ;;  %v856_v32 = vadd.f32 %v1906_v31, %v855_v21  ;;  %v1920_v37 = vld [vmem:[%s2110_s7] ss:$0 sm:$0xff] }
 0x12b   : > { %v604_v43 = vmul.f32 0.1, %v520_v41  ;;  %vm572_vm12 = vcmp.ge.f32.partialorder %v520_v41, 0.0 }
 0x12c   : > { %963 = vrot.lane.b32.xlu2 %v766_v42, %s1664_s10  ;;  %1499 = vmatmul.msk.bf16.gmra.mxu1 %vm416_vm0, %v766_v42  ;;  %v1204_v36 = vadd.f32 1.0, %v856_v32 }
 0x12d   : > { %v636_v47 = vsel %vm572_vm12, %v520_v41, %v604_v43  ;;  %v1556_v43 = vunpack.c.h.bf16 %v1554_v33 }
 0x12e   : > { %v950_v44 = vpop.permute.xlu0 %949  ;;  %v668_v50 = vpack.c.bf16 %v636_v47, %v636_v47  ;;  %v1236_v39 = vmul.f32 %v1555_v35, %v1204_v36 }
 0x12f   : > { %1524 = vmatmul.msk.bf16.gmra.mxu2 %vm416_vm0, %v950_v44 }
 0x130   : > { %v521_v45 = vpop.f32.mrf.mxu0  ;;  %v744_v54 = vunpack.c.l.b16 %v668_v50 }
 0x131   : > { %v522_v48 = vadd.f32 %v1793_v46, %v521_v45  ;;  %v857_v22 = vpop.f32.mrf.mxu1 }
 0x133   : > { %vm573_vm13 = vcmp.ge.f32.partialorder %v522_v48, 0.0  ;;  %v605_v49 = vmul.f32 0.1, %v522_v48 }
 0x134   : > { %973 = vrot.lane.b32.xlu2 %v1852_v53, %s1664_s10 }
 0x135   : > { %v637_v51 = vsel %vm573_vm13, %v522_v48, %v605_v49 }
 0x136   : > { %v669_v52 = vpack.c.bf16 %v637_v51, %v637_v51 }
 0x138   : > { %v745_v55 = vunpack.c.l.b16 %v669_v52  ;;  %v524_v56 = vpop.f32.mrf.mxu0  ;;  %v1617_v52 = vld [vmem:[%s1912_s25 + $0x8] sm:$0xff]  }
 0x139   : > { %v525_v57 = vadd.f32 %v1793_v46, %v524_v56  ;;  %v860_v24 = vpop.f32.mrf.mxu1  ;;  %v1559_v56 = vunpack.c.l.bf16 %v1617_v52 }
 0x13a   : > { %v767_v58 = vpack.c.b16 %v745_v55, %v744_v54  ;;  %v861_v50 = vadd.f32 %v1906_v31, %v860_v24 }
 0x13b   : > { %v606_v59 = vmul.f32 0.1, %v525_v57  ;;  %vm574_vm14 = vcmp.ge.f32.partialorder %v525_v57, 0.0 }
 0x13c   : > { %965 = vrot.lane.b32.xlu1 %v767_v58, %s1664_s10  ;;  %1500 = vmatmul.msk.bf16.gmra.mxu1 %vm416_vm0, %v767_v58 }
 0x13d   : > { %v638_v62 = vsel %vm574_vm14, %v525_v57, %v606_v59  ;;  %v1206_v57 = vadd.f32 1.0, %v861_v50 }
 0x13e   : > { %v952_v60 = vpop.permute.xlu1 %951  ;;  %v670_v0 = vpack.c.bf16 %v638_v62, %v638_v62 }
 0x13f   : > { %1525 = vmatmul.msk.bf16.gmra.mxu2 %vm416_vm0, %v952_v60 }
 0x140   : > { %v526_v61 = vpop.f32.mrf.mxu0  ;;  %v746_v3 = vunpack.c.l.b16 %v670_v0 }
 0x141   : > { %v527_v53 = vadd.f32 %v1793_v46, %v526_v61  ;;  %v862_v26 = vpop.f32.mrf.mxu1  ;;  %v1238_v61 = vmul.f32 %v1559_v56, %v1206_v57  ;;  %v1620_v56 = vld [vmem:[%s1912_s25 + $0x20] sm:$0xff]  }
 0x142   : > { %v863_v62 = vadd.f32 %v1906_v31, %v862_v26 }
 0x143   : > { %vm575_vm15 = vcmp.ge.f32.partialorder %v527_v53, 0.0  ;;  %v607_v63 = vmul.f32 0.1, %v527_v53 }
 0x144   : > { %975 = vrot.lane.b32.xlu1 %v1864_v16, %s1664_s10 }
 0x145   : > { %v639_v1 = vsel %vm575_vm15, %v527_v53, %v607_v63 }
 0x146   : > { %v671_v2 = vpack.c.bf16 %v639_v1, %v639_v1  ;;  %v956_v20 = vpop.permute.xlu2 %955  ;;  %v1560_v1 = vunpack.c.h.bf16 %v1617_v52 }
 0x148   : > { %v747_v4 = vunpack.c.l.b16 %v671_v2  ;;  %v529_v5 = vpop.f32.mrf.mxu0  ;;  %v1207_v2 = vadd.f32 1.0, %v863_v62 }
 0x149   : > { %v530_v6 = vadd.f32 %v1793_v46, %v529_v5  ;;  %v865_v29 = vpop.f32.mrf.mxu1 }
 0x14a   : > { %v768_v7 = vpack.c.b16 %v747_v4, %v746_v3  ;;  %v1239_v5 = vmul.f32 %v1560_v1, %v1207_v2 }
 0x14b   : > { %v608_v8 = vmul.f32 0.1, %v530_v6  ;;  %vm576_vm1 = vcmp.ge.f32.partialorder %v530_v6, 0.0 }
 0x14c   : > { %967 = vrot.lane.b32.xlu0 %v768_v7, %s1664_s10  ;;  %1501 = vmatmul.msk.bf16.gmra.mxu1 %vm416_vm0, %v768_v7 }
 0x14d   : > { %v640_v10 = vsel %vm576_vm1, %v530_v6, %v608_v8  ;;  %v866_v6 = vadd.f32 %v1906_v31, %v865_v29 }
 0x14e   : > { %v954_v9 = vpop.permute.xlu1 %953  ;;  %v672_v13 = vpack.c.bf16 %v640_v10, %v640_v10  ;;  %v1947_v10 = vpop.f32.mrf.mxu3 }
 0x14f   : > { %1526 = vmatmul.msk.bf16.gmra.mxu2 %vm416_vm0, %v954_v9  ;;  %v1618_v9 = vld [vmem:[%s1912_s25 + $0x10] sm:$0xff]  }
 0x150   : > { %v531_v11 = vpop.f32.mrf.mxu0  ;;  %v748_v17 = vunpack.c.l.b16 %v672_v13  ;;  %v1563_v13 = vunpack.c.l.bf16 %v1618_v9 }
 0x151   : > { %v532_v12 = vadd.f32 %v1793_v46, %v531_v11  ;;  %v867_v34 = vpop.f32.mrf.mxu1 }
 0x153   : > { %vm577_vm2 = vcmp.ge.f32.partialorder %v532_v12, 0.0  ;;  %v609_v14 = vmul.f32 0.1, %v532_v12 }
 0x154   : > { %977 = vrot.lane.b32.xlu0 %v773_v40, %s1664_s10  ;;  %v858_v40 = vadd.f32 %v1906_v31, %v857_v22 }
 0x155   : > { %v641_v16 = vsel %vm577_vm2, %v532_v12, %v609_v14  ;;  %v1208_v14 = vadd.f32 1.0, %v866_v6 }
 0x156   : > { %v673_v18 = vpack.c.bf16 %v641_v16, %v641_v16  ;;  %v958_v46 = vpop.permute.xlu2 %957  ;;  %v1205_v44 = vadd.f32 1.0, %v858_v40 }
 0x158   : > { %v749_v19 = vunpack.c.l.b16 %v673_v18  ;;  %v1237_v49 = vmul.f32 %v1556_v43, %v1205_v44  ;;  %v1240_v18 = vmul.f32 %v1563_v13, %v1208_v14 }
 0x159   : > { %v870_v45 = vpop.f32.mrf.mxu1 }
 0x15a   : > { %v769_v15 = vpack.c.b16 %v749_v19, %v748_v17  ;;  %v868_v19 = vadd.f32 %v1906_v31, %v867_v34 }
 0x15c   : > { %1502 = vmatmul.msk.bf16.gmra.mxu1 %vm416_vm0, %v769_v15  ;;  %969 = vrot.lane.b32.xlu2 %v769_v15, %s1664_s10  ;;  %s1929_s10 = scalar_lea.vmem %s2111_s8, %s1440_s12  ;;  %v1209_v24 = vadd.f32 1.0, %v868_v19 }
 0x15f   : > { %1527 = vmatmul.msk.bf16.gmra.mxu2 %vm416_vm0, %v956_v20 }
 0x161   : > { %v872_v59 = vpop.f32.mrf.mxu1 }
 0x169   : > { %v875_v7 = vpop.f32.mrf.mxu1 }
 0x16f   : > { %1528 = vmatmul.msk.bf16.gmra.mxu2 %vm416_vm0, %v958_v46  ;;  %v1954_v46 = vpop.f32.mrf.mxu3 }
 0x171   : > { %v877_v20 = vpop.f32.mrf.mxu1 }
 0x179   : > { %v880_v36 = vpop.f32.mrf.mxu1 }
 0x17e   : > { %v960_v23 = vpop.permute.xlu0 %959 }
 0x17f   : > { %1529 = vmatmul.msk.bf16.gmra.mxu2 %vm416_vm0, %v960_v23  ;;  %v1564_v23 = vunpack.c.h.bf16 %v1618_v9 }
 0x186   : > { %v972_v25 = vpop.permute.xlu0 %971  ;;  %v964_v27 = vpop.permute.xlu2 %963 }
 0x187   : > { %1535 = vmatmul.msk.bf16.vlgmr.msra.gmra.mxu3 %vm416_vm0, %v972_v25 }
 0x18e   : > { %v962_v28 = vpop.permute.xlu1 %961  ;;  %v974_v30 = vpop.permute.xlu2 %973 }
 0x18f   : > { %1530 = vmatmul.msk.bf16.gmra.mxu2 %vm416_vm0, %v962_v28  ;;  %v871_v28 = vadd.f32 %v1906_v31, %v870_v45 }
 0x191   : > { %v1210_v35 = vadd.f32 1.0, %v871_v28 }
 0x197   : > { %1536 = vmatmul.msk.bf16.gmra.mxu3 %vm416_vm0, %v974_v30  ;;  %v1619_v30 = vld [vmem:[%s1912_s25 + $0x18] sm:$0xff]  }
 0x198   : > { %v1567_v34 = vunpack.c.l.bf16 %v1619_v30  ;;  %v1568_v45 = vunpack.c.h.bf16 %v1619_v30 }
 0x19f   : > { %1531 = vmatmul.msk.bf16.gmra.mxu2 %vm416_vm0, %v964_v27  ;;  %v1241_v27 = vmul.f32 %v1564_v23, %v1209_v24 }
 0x1a2   : > { %v1060_v38 = vpop.f32.mrf.mxu2 }
 0x1a3   : > { %v1061_v41 = vadd.f32 %v1920_v37, %v1060_v38 }
 0x1a5   : > { %v1268_v42 = vadd.f32 %v1236_v39, %v1061_v41  ;;  %v1963_v39 = vpop.f32.mrf.mxu3  ;;  %v1242_v41 = vmul.f32 %v1567_v34, %v1210_v35 }
 0x1a7   : > { %v1300_v47 = vmax.f32 %v1268_v42, 0.0  ;;  %v873_v42 = vadd.f32 %v1906_v31, %v872_v59 }
 0x1a9   : > { %1332 = vst.msk [vmem:[%s1929_s10] sm:$0xff] %vm416_vm0, %v1300_v47  ;;  %v1211_v47 = vadd.f32 1.0, %v873_v42 }
 0x1aa   : > { %v1062_v48 = vpop.f32.mrf.mxu2 }
 0x1ab   : > { %v1063_v51 = vadd.f32 %v1920_v37, %v1062_v48  ;;  %v1243_v52 = vmul.f32 %v1568_v45, %v1211_v47  ;;  %v1628_v47 = vld [vmem:[%s1912_s25 + $0x60] sm:$0xff]  }
 0x1ad   : > { %v1269_v54 = vadd.f32 %v1237_v49, %v1063_v51  ;;  %v882_v49 = vpop.f32.mrf.mxu1  ;;  %v1971_v50 = vpop.f32.mrf.mxu3 }
 0x1ae   : > { %v966_v55 = vpop.permute.xlu1 %965 }
 0x1af   : > { %v1301_v58 = vmax.f32 %v1269_v54, 0.0  ;;  %1532 = vmatmul.msk.bf16.gmra.mxu2 %vm416_vm0, %v966_v55  ;;  %v876_v54 = vadd.f32 %v1906_v31, %v875_v7 }
 0x1b1   : > { %1333 = vst.msk [vmem:[%s1929_s10 + $0x8] sm:$0xff] %vm416_vm0, %v1301_v58  ;;  %v1571_v58 = vunpack.c.l.bf16 %v1620_v56  ;;  %v1212_v59 = vadd.f32 1.0, %v876_v54 }
 0x1b2   : > { %v1065_v60 = vpop.f32.mrf.mxu2 }
 0x1b3   : > { %v1066_v53 = vadd.f32 %v1920_v37, %v1065_v60  ;;  %v1244_v62 = vmul.f32 %v1571_v58, %v1212_v59 }
 0x1b5   : > { %v1270_v63 = vadd.f32 %v1238_v61, %v1066_v53  ;;  %v878_v53 = vadd.f32 %v1906_v31, %v877_v20  ;;  %v1980_v1 = vpop.f32.mrf.mxu3  ;;  %v883_v20 = vadd.f32 %v1906_v31, %v882_v49 }
 0x1b6   : > { %v976_v0 = vpop.permute.xlu1 %975  ;;  %v970_v33 = vpop.permute.xlu2 %969 }
 0x1b7   : > { %v1302_v3 = vmax.f32 %v1270_v63, 0.0  ;;  %1537 = vmatmul.msk.bf16.gmra.mxu3 %vm416_vm0, %v976_v0  ;;  %v885_v63 = vpop.f32.mrf.mxu1  ;;  %v1215_v24 = vadd.f32 1.0, %v883_v20 }
 0x1b8   : > { %v886_v30 = vadd.f32 %v1906_v31, %v885_v63  ;;  %v1623_v63 = vld [vmem:[%s1912_s25 + $0x38] sm:$0xff]  }
 0x1b9   : > { %1334 = vst.msk [vmem:[%s1929_s10 + $0x10] sm:$0xff] %vm416_vm0, %v1302_v3  ;;  %v1572_v3 = vunpack.c.h.bf16 %v1620_v56 }
 0x1ba   : > { %v1067_v4 = vpop.f32.mrf.mxu2 }
 0x1bb   : > { %v1068_v8 = vadd.f32 %v1920_v37, %v1067_v4  ;;  %v1213_v4 = vadd.f32 1.0, %v878_v53 }
 0x1bd   : > { %v1271_v11 = vadd.f32 %v1239_v5, %v1068_v8  ;;  %v1245_v7 = vmul.f32 %v1572_v3, %v1213_v4  ;;  %v881_v8 = vadd.f32 %v1906_v31, %v880_v36  ;;  %v1987_v14 = vpop.f32.mrf.mxu3  ;;  %v1216_v36 = vadd.f32 1.0, %v886_v30 }
 0x1be   : > { %v968_v12 = vpop.permute.xlu0 %967  ;;  %v1604_v4 = vunpack.c.h.bf16 %v1628_v47  ;;  %v923_v30 = vadd.f32 %v1906_v31, %v1971_v50 }
 0x1bf   : > { %v1303_v16 = vmax.f32 %v1271_v11, 0.0  ;;  %1533 = vmatmul.msk.bf16.gmra.mxu2 %vm416_vm0, %v968_v12  ;;  %v1621_v11 = vld [vmem:[%s1912_s25 + $0x28] sm:$0xff]   ;;  %v887_v12 = vpop.f32.mrf.mxu1 }
 0x1c0   : > { %v1576_v23 = vunpack.c.h.bf16 %v1621_v11  ;;  %v888_v45 = vadd.f32 %v1906_v31, %v887_v12 }
 0x1c1   : > { %1335 = vst.msk [vmem:[%s1929_s10 + $0x18] sm:$0xff] %vm416_vm0, %v1303_v16  ;;  %v1575_v16 = vunpack.c.l.bf16 %v1621_v11  ;;  %v921_v11 = vadd.f32 %v1906_v31, %v1963_v39 }
 0x1c2   : > { %v1070_v17 = vpop.f32.mrf.mxu2 }
 0x1c3   : > { %v1071_v15 = vadd.f32 %v1920_v37, %v1070_v17  ;;  %v1214_v17 = vadd.f32 1.0, %v881_v8 }
 0x1c5   : > { %v1272_v21 = vadd.f32 %v1240_v18, %v1071_v15  ;;  %v1246_v15 = vmul.f32 %v1575_v16, %v1214_v17 }
 0x1c6   : > { %v978_v22 = vpop.permute.xlu0 %977 }
 0x1c7   : > { %v1304_v25 = vmax.f32 %v1272_v21, 0.0  ;;  %1538 = vmatmul.msk.bf16.gmra.mxu3 %vm416_vm0, %v978_v22 }
 0x1c9   : > { %1336 = vst.msk [vmem:[%s1929_s10 + $0x20] sm:$0xff] %vm416_vm0, %v1304_v25  ;;  %v890_v25 = vpop.f32.mrf.mxu1 }
 0x1ca   : > { %v1072_v26 = vpop.f32.mrf.mxu2 }
 0x1cb   : > { %v1073_v29 = vadd.f32 %v1920_v37, %v1072_v26 }
 0x1cd   : > { %v1273_v32 = vadd.f32 %v1241_v27, %v1073_v29  ;;  %v1993_v27 = vpop.f32.mrf.mxu3  ;;  %v1247_v29 = vmul.f32 %v1576_v23, %v1215_v24  ;;  %v1230_v23 = vadd.f32 1.0, %v921_v11  ;;  %v1584_v24 = vunpack.c.h.bf16 %v1623_v63 }
 0x1ce   : > { %v926_v11 = vadd.f32 %v1906_v31, %v1980_v1  ;;  %v928_v1 = vadd.f32 %v1906_v31, %v1987_v14 }
 0x1cf   : > { %v1305_v38 = vmax.f32 %v1273_v32, 0.0  ;;  %1534 = vmatmul.msk.bf16.gmra.mxu2 %vm416_vm0, %v970_v33  ;;  %v1622_v33 = vld [vmem:[%s1912_s25 + $0x30] sm:$0xff]  }
 0x1d0   : > { %v1579_v35 = vunpack.c.l.bf16 %v1622_v33  ;;  %v1580_v54 = vunpack.c.h.bf16 %v1622_v33 }
 0x1d1   : > { %1337 = vst.msk [vmem:[%s1929_s10 + $0x28] sm:$0xff] %vm416_vm0, %v1305_v38 }
 0x1d2   : > { %v1075_v40 = vpop.f32.mrf.mxu2 }
 0x1d3   : > { %v1076_v43 = vadd.f32 %v1920_v37, %v1075_v40  ;;  %v892_v40 = vpop.f32.mrf.mxu1 }
 0x1d4   : > { %v893_v17 = vadd.f32 %v1906_v31, %v892_v40  ;;  %v1624_v40 = vld [vmem:[%s1912_s25 + $0x40] sm:$0xff]  }
 0x1d5   : > { %v1274_v44 = vadd.f32 %v1242_v41, %v1076_v43  ;;  %v916_v41 = vadd.f32 %v1906_v31, %v1947_v10  ;;  %v2004_v42 = vpop.f32.mrf.mxu3  ;;  %v918_v10 = vadd.f32 %v1906_v31, %v1954_v46 }
 0x1d7   : > { %v1306_v48 = vmax.f32 %v1274_v44, 0.0  ;;  %v1248_v44 = vmul.f32 %v1579_v35, %v1216_v36 }
 0x1d9   : > { %1338 = vst.msk [vmem:[%s1929_s10 + $0x30] sm:$0xff] %vm416_vm0, %v1306_v48 }
 0x1da   : > { %v1077_v51 = vpop.f32.mrf.mxu2 }
 0x1db   : > { %v1078_v55 = vadd.f32 %v1920_v37, %v1077_v51  ;;  %v1603_v51 = vunpack.c.l.bf16 %v1628_v47  ;;  %v1587_v47 = vunpack.c.l.bf16 %v1624_v40 }
 0x1dd   : > { %v1275_v57 = vadd.f32 %v1243_v52, %v1078_v55  ;;  %v1228_v52 = vadd.f32 1.0, %v916_v41  ;;  %v1217_v55 = vadd.f32 1.0, %v888_v45  ;;  %v1231_v45 = vadd.f32 1.0, %v923_v30 }
 0x1df   : > { %v1307_v60 = vmax.f32 %v1275_v57, 0.0  ;;  %v1260_v57 = vmul.f32 %v1603_v51, %v1228_v52 }
 0x1e1   : > { %1339 = vst.msk [vmem:[%s1929_s10 + $0x38] sm:$0xff] %vm416_vm0, %v1307_v60  ;;  %v1249_v60 = vmul.f32 %v1580_v54, %v1217_v55 }
 0x1e2   : > { %v1080_v61 = vpop.f32.mrf.mxu2 }
 0x1e3   : > { %v1081_v0 = vadd.f32 %v1920_v37, %v1080_v61  ;;  %v891_v61 = vadd.f32 %v1906_v31, %v890_v25  ;;  %v1219_v25 = vadd.f32 1.0, %v893_v17 }
 0x1e5   : > { %v1276_v2 = vadd.f32 %v1244_v62, %v1081_v0  ;;  %v895_v0 = vpop.f32.mrf.mxu1  ;;  %v1218_v46 = vadd.f32 1.0, %v891_v61  ;;  %v1588_v61 = vunpack.c.h.bf16 %v1624_v40 }
 0x1e6   : > { %v896_v35 = vadd.f32 %v1906_v31, %v895_v0 }
 0x1e7   : > { %v1308_v5 = vmax.f32 %v1276_v2, 0.0 }
 0x1e8   : > { %v1220_v50 = vadd.f32 1.0, %v896_v35 }
 0x1e9   : > { %1340 = vst.msk [vmem:[%s1929_s10 + $0x40] sm:$0xff] %vm416_vm0, %v1308_v5  ;;  %v1229_v5 = vadd.f32 1.0, %v918_v10 }
 0x1ea   : > { %v1082_v6 = vpop.f32.mrf.mxu2 }
 0x1eb   : > { %v1083_v9 = vadd.f32 %v1920_v37, %v1082_v6  ;;  %v1583_v6 = vunpack.c.l.bf16 %v1623_v63 }
 0x1ed   : > { %v1277_v13 = vadd.f32 %v1245_v7, %v1083_v9  ;;  %v1261_v9 = vmul.f32 %v1604_v4, %v1229_v5  ;;  %v1250_v16 = vmul.f32 %v1583_v6, %v1218_v46  ;;  %v897_v39 = vpop.f32.mrf.mxu1  ;;  %v1625_v6 = vld [vmem:[%s1912_s25 + $0x48] sm:$0xff]  }
 0x1ef   : > { %v1309_v18 = vmax.f32 %v1277_v13, 0.0 }
 0x1f1   : > { %1341 = vst.msk [vmem:[%s1929_s10 + $0x48] sm:$0xff] %vm416_vm0, %v1309_v18  ;;  %v1629_v18 = vld [vmem:[%s1912_s25 + $0x68] sm:$0xff]  }
 0x1f2   : > { %v1085_v19 = vpop.f32.mrf.mxu2 }
 0x1f3   : > { %v1086_v21 = vadd.f32 %v1920_v37, %v1085_v19 }
 0x1f5   : > { %v1278_v22 = vadd.f32 %v1246_v15, %v1086_v21  ;;  %v900_v51 = vpop.f32.mrf.mxu1 }
 0x1f6   : > { %v901_v4 = vadd.f32 %v1906_v31, %v900_v51  ;;  %v1631_v51 = vld [vmem:[%s1912_s25 + $0x78] sm:$0xff]  }
 0x1f7   : > { %v1310_v26 = vmax.f32 %v1278_v22, 0.0  ;;  %v1607_v22 = vunpack.c.l.bf16 %v1629_v18 }
 0x1f9   : > { %1342 = vst.msk [vmem:[%s1929_s10 + $0x50] sm:$0xff] %vm416_vm0, %v1310_v26 }
 0x1fa   : > { %v1087_v28 = vpop.f32.mrf.mxu2 }
 0x1fb   : > { %v1088_v32 = vadd.f32 %v1920_v37, %v1087_v28 }
 0x1fd   : > { %v1279_v34 = vadd.f32 %v1247_v29, %v1088_v32  ;;  %v1262_v29 = vmul.f32 %v1607_v22, %v1230_v23  ;;  %v902_v0 = vpop.f32.mrf.mxu1  ;;  %v1592_v22 = vunpack.c.h.bf16 %v1625_v6 }
 0x1fe   : > { %v903_v17 = vadd.f32 %v1906_v31, %v902_v0 }
 0x1ff   : > { %v1311_v38 = vmax.f32 %v1279_v34, 0.0  ;;  %v1251_v34 = vmul.f32 %v1584_v24, %v1219_v25 }
 0x200   : > { %v1223_v23 = vadd.f32 1.0, %v903_v17 }
 0x201   : > { %1343 = vst.msk [vmem:[%s1929_s10 + $0x58] sm:$0xff] %vm416_vm0, %v1311_v38 }
 0x202   : > { %v1090_v43 = vpop.f32.mrf.mxu2 }
 0x203   : > { %v1091_v48 = vadd.f32 %v1920_v37, %v1090_v43 }
 0x205   : > { %v1280_v49 = vadd.f32 %v1248_v44, %v1091_v48  ;;  %v1608_v44 = vunpack.c.h.bf16 %v1629_v18 }
 0x207   : > { %v1312_v56 = vmax.f32 %v1280_v49, 0.0  ;;  %v1263_v52 = vmul.f32 %v1608_v44, %v1231_v45 }
 0x209   : > { %1344 = vst.msk [vmem:[%s1929_s10 + $0x60] sm:$0xff] %vm416_vm0, %v1312_v56  ;;  %v1252_v56 = vmul.f32 %v1587_v47, %v1220_v50  ;;  %v931_v47 = vadd.f32 %v1906_v31, %v1993_v27 }
 0x20a   : > { %v1092_v58 = vpop.f32.mrf.mxu2  ;;  %v1120_v59 = vpop.f32.mrf.mxu3 }
 0x20b   : > { %v1093_v62 = vadd.f32 %v1920_v37, %v1092_v58  ;;  %v1121_v53 = vadd.f32 %v1920_v37, %v1120_v59 }
 0x20d   : > { %v1281_v2 = vadd.f32 %v1249_v60, %v1093_v62  ;;  %v1292_v3 = vadd.f32 %v1260_v57, %v1121_v53  ;;  %v898_v57 = vadd.f32 %v1906_v31, %v897_v39 }
 0x20f   : > { %v1313_v7 = vmax.f32 %v1281_v2, 0.0  ;;  %v1324_v8 = vmax.f32 %v1292_v3, 0.0  ;;  %v1221_v62 = vadd.f32 1.0, %v898_v57 }
 0x211   : > { %1345 = vst.msk [vmem:[%s1929_s10 + $0x68] sm:$0xff] %vm416_vm0, %v1313_v7  ;;  %v1253_v3 = vmul.f32 %v1588_v61, %v1221_v62  ;;  %v1591_v7 = vunpack.c.l.bf16 %v1625_v6 }
 0x212   : > { %1356 = vst.msk [vmem:[%s1929_s10 + $0xc0] sm:$0xff] %vm416_vm0, %v1324_v8  ;;  %v1095_v12 = vpop.f32.mrf.mxu2  ;;  %v1122_v13 = vpop.f32.mrf.mxu3  ;;  %v1222_v8 = vadd.f32 1.0, %v901_v4 }
 0x213   : > { %v1096_v19 = vadd.f32 %v1920_v37, %v1095_v12  ;;  %v1123_v15 = vadd.f32 %v1920_v37, %v1122_v13 }
 0x214   : > { %v1254_v13 = vmul.f32 %v1591_v7, %v1222_v8 }
 0x215   : > { %v1282_v20 = vadd.f32 %v1250_v16, %v1096_v19  ;;  %v1293_v21 = vadd.f32 %v1261_v9, %v1123_v15  ;;  %v1630_v16 = vld [vmem:[%s1912_s25 + $0x70] sm:$0xff]   ;;  %v905_v19 = vpop.f32.mrf.mxu1 }
 0x217   : > { %v1314_v26 = vmax.f32 %v1282_v20, 0.0  ;;  %v1325_v28 = vmax.f32 %v1293_v21, 0.0  ;;  %v1611_v20 = vunpack.c.l.bf16 %v1630_v16  ;;  %v1232_v21 = vadd.f32 1.0, %v926_v11 }
 0x219   : > { %1346 = vst.msk [vmem:[%s1929_s10 + $0x70] sm:$0xff] %vm416_vm0, %v1314_v26  ;;  %v1264_v24 = vmul.f32 %v1611_v20, %v1232_v21 }
 0x21a   : > { %1357 = vst.msk [vmem:[%s1929_s10 + $0xc8] sm:$0xff] %vm416_vm0, %v1325_v28  ;;  %v1097_v32 = vpop.f32.mrf.mxu2  ;;  %v1125_v33 = vpop.f32.mrf.mxu3  ;;  %v1255_v28 = vmul.f32 %v1592_v22, %v1223_v23 }
 0x21b   : > { %v1098_v36 = vadd.f32 %v1920_v37, %v1097_v32  ;;  %v1126_v38 = vadd.f32 %v1920_v37, %v1125_v33  ;;  %v1626_v33 = vld [vmem:[%s1912_s25 + $0x50] sm:$0xff]  }
 0x21d   : > { %v1283_v41 = vadd.f32 %v1251_v34, %v1098_v36  ;;  %v1294_v43 = vadd.f32 %v1262_v29, %v1126_v38  ;;  %v906_v29 = vadd.f32 %v1906_v31, %v905_v19  ;;  %v1612_v36 = vunpack.c.h.bf16 %v1630_v16  ;;  %v907_v40 = vpop.f32.mrf.mxu1 }
 0x21e   : > { %v1233_v38 = vadd.f32 1.0, %v928_v1 }
 0x21f   : > { %v1315_v48 = vmax.f32 %v1283_v41, 0.0  ;;  %v1326_v49 = vmax.f32 %v1294_v43, 0.0  ;;  %v1595_v41 = vunpack.c.l.bf16 %v1626_v33  ;;  %v1224_v14 = vadd.f32 1.0, %v906_v29 }
 0x220   : > { %v1265_v45 = vmul.f32 %v1612_v36, %v1233_v38 }
 0x221   : > { %1347 = vst.msk [vmem:[%s1929_s10 + $0x78] sm:$0xff] %vm416_vm0, %v1315_v48 }
 0x222   : > { %1358 = vst.msk [vmem:[%s1929_s10 + $0xd0] sm:$0xff] %vm416_vm0, %v1326_v49  ;;  %v1100_v54 = vpop.f32.mrf.mxu2  ;;  %v1127_v55 = vpop.f32.mrf.mxu3  ;;  %v1256_v49 = vmul.f32 %v1595_v41, %v1224_v14 }
 0x223   : > { %v1101_v10 = vadd.f32 %v1920_v37, %v1100_v54  ;;  %v1128_v58 = vadd.f32 %v1920_v37, %v1127_v55 }
 0x225   : > { %v1284_v59 = vadd.f32 %v1252_v56, %v1101_v10  ;;  %v1295_v60 = vadd.f32 %v1263_v52, %v1128_v58  ;;  %v908_v52 = vadd.f32 %v1906_v31, %v907_v40  ;;  %v1615_v10 = vunpack.c.l.bf16 %v1631_v51  ;;  %v910_v27 = vpop.f32.mrf.mxu1 }
 0x226   : > { %v1234_v58 = vadd.f32 1.0, %v931_v47  ;;  %v911_v4 = vadd.f32 %v1906_v31, %v910_v27 }
 0x227   : > { %v1316_v53 = vmax.f32 %v1284_v59, 0.0  ;;  %v1327_v63 = vmax.f32 %v1295_v60, 0.0  ;;  %v1596_v59 = vunpack.c.h.bf16 %v1626_v33  ;;  %v1225_v60 = vadd.f32 1.0, %v908_v52 }
 0x229   : > { %1348 = vst.msk [vmem:[%s1929_s10 + $0x80] sm:$0xff] %vm416_vm0, %v1316_v53  ;;  %v1266_v53 = vmul.f32 %v1615_v10, %v1234_v58 }
 0x22a   : > { %1359 = vst.msk [vmem:[%s1929_s10 + $0xd8] sm:$0xff] %vm416_vm0, %v1327_v63  ;;  %v1102_v2 = vpop.f32.mrf.mxu2  ;;  %v933_v63 = vadd.f32 %v1906_v31, %v2004_v42  ;;  %v1226_v42 = vadd.f32 1.0, %v911_v4 }
 0x22b   : > { %v1103_v5 = vadd.f32 %v1920_v37, %v1102_v2 }
 0x22c   : > { %v1235_v11 = vadd.f32 1.0, %v933_v63 }
 0x22d   : > { %v1285_v46 = vadd.f32 %v1253_v3, %v1103_v5  ;;  %v1257_v3 = vmul.f32 %v1596_v59, %v1225_v60  ;;  %v912_v17 = vpop.f32.mrf.mxu1 }
 0x22e   : > { %v913_v21 = vadd.f32 %v1906_v31, %v912_v17 }
 0x22f   : > { %v1317_v9 = vmax.f32 %v1285_v46, 0.0  ;;  %v1627_v46 = vld [vmem:[%s1912_s25 + $0x58] sm:$0xff]  }
 0x230   : > { %v1600_v1 = vunpack.c.h.bf16 %v1627_v46 }
 0x231   : > { %1349 = vst.msk [vmem:[%s1929_s10 + $0x88] sm:$0xff] %vm416_vm0, %v1317_v9  ;;  %v1616_v9 = vunpack.c.h.bf16 %v1631_v51 }
 0x232   : > { %v1105_v12 = vpop.f32.mrf.mxu2 }
 0x233   : > { %v1106_v18 = vadd.f32 %v1920_v37, %v1105_v12  ;;  %v1599_v12 = vunpack.c.l.bf16 %v1627_v46 }
 0x235   : > { %v1286_v15 = vadd.f32 %v1254_v13, %v1106_v18  ;;  %v1267_v18 = vmul.f32 %v1616_v9, %v1235_v11  ;;  %v1258_v20 = vmul.f32 %v1599_v12, %v1226_v42 }
 0x237   : > { %v1318_v39 = vmax.f32 %v1286_v15, 0.0 }
 0x239   : > { %1350 = vst.msk [vmem:[%s1929_s10 + $0x90] sm:$0xff] %vm416_vm0, %v1318_v39 }
 0x23a   : > { %v1107_v25 = vpop.f32.mrf.mxu2  ;;  %v1130_v26 = vpop.f32.mrf.mxu3 }
 0x23b   : > { %v1108_v30 = vadd.f32 %v1920_v37, %v1107_v25  ;;  %v1131_v32 = vadd.f32 %v1920_v37, %v1130_v26  ;;  %v1227_v25 = vadd.f32 1.0, %v913_v21 }
 0x23d   : > { %v1287_v34 = vadd.f32 %v1255_v28, %v1108_v30  ;;  %v1296_v35 = vadd.f32 %v1264_v24, %v1131_v32  ;;  %v1259_v30 = vmul.f32 %v1600_v1, %v1227_v25 }
 0x23f   : > { %v1319_v43 = vmax.f32 %v1287_v34, 0.0  ;;  %v1328_v44 = vmax.f32 %v1296_v35, 0.0 }
 0x241   : > { %1351 = vst.msk [vmem:[%s1929_s10 + $0x98] sm:$0xff] %vm416_vm0, %v1319_v43 }
 0x242   : > { %1360 = vst.msk [vmem:[%s1929_s10 + $0xe0] sm:$0xff] %vm416_vm0, %v1328_v44  ;;  %v1110_v50 = vpop.f32.mrf.mxu2  ;;  %v1132_v48 = vpop.f32.mrf.mxu3 }
 0x243   : > { %v1111_v54 = vadd.f32 %v1920_v37, %v1110_v50  ;;  %v1133_v55 = vadd.f32 %v1920_v37, %v1132_v48 }
 0x245   : > { %v1288_v56 = vadd.f32 %v1256_v49, %v1111_v54  ;;  %v1297_v57 = vadd.f32 %v1265_v45, %v1133_v55 }
 0x247   : > { %v1320_v61 = vmax.f32 %v1288_v56, 0.0  ;;  %v1329_v62 = vmax.f32 %v1297_v57, 0.0 }
 0x249   : > { %1352 = vst.msk [vmem:[%s1929_s10 + $0xa0] sm:$0xff] %vm416_vm0, %v1320_v61 }
 0x24a   : > { %1361 = vst.msk [vmem:[%s1929_s10 + $0xe8] sm:$0xff] %vm416_vm0, %v1329_v62  ;;  %v1112_v0 = vpop.f32.mrf.mxu2  ;;  %v1135_v2 = vpop.f32.mrf.mxu3 }
 0x24b   : > { %v1113_v5 = vadd.f32 %v1920_v37, %v1112_v0  ;;  %v1136_v6 = vadd.f32 %v1920_v37, %v1135_v2 }
 0x24d   : > { %v1289_v7 = vadd.f32 %v1257_v3, %v1113_v5  ;;  %v1298_v8 = vadd.f32 %v1266_v53, %v1136_v6 }
 0x24f   : > { %v1321_v13 = vmax.f32 %v1289_v7, 0.0  ;;  %v1330_v16 = vmax.f32 %v1298_v8, 0.0 }
 0x251   : > { %1353 = vst.msk [vmem:[%s1929_s10 + $0xa8] sm:$0xff] %vm416_vm0, %v1321_v13 }
 0x252   : > { %1362 = vst.msk [vmem:[%s1929_s10 + $0xf0] sm:$0xff] %vm416_vm0, %v1330_v16  ;;  %v1115_v19 = vpop.f32.mrf.mxu2  ;;  %v1137_v15 = vpop.f32.mrf.mxu3 }
 0x253   : > { %v1116_v22 = vadd.f32 %v1920_v37, %v1115_v19  ;;  %v1138_v23 = vadd.f32 %v1920_v37, %v1137_v15 }
 0x255   : > { %v1290_v39 = vadd.f32 %v1258_v20, %v1116_v22  ;;  %v1299_v24 = vadd.f32 %v1267_v18, %v1138_v23 }
 0x257   : > { %v1322_v26 = vmax.f32 %v1290_v39, 0.0  ;;  %v1331_v28 = vmax.f32 %v1299_v24, 0.0 }
 0x259   : > { %1354 = vst.msk [vmem:[%s1929_s10 + $0xb0] sm:$0xff] %vm416_vm0, %v1322_v26 }
 0x25a   : > { %1363 = vst.msk [vmem:[%s1929_s10 + $0xf8] sm:$0xff] %vm416_vm0, %v1331_v28  ;;  %v1117_v29 = vpop.f32.mrf.mxu2 }
 0x25b   : > { %v1118_v32 = vadd.f32 %v1920_v37, %v1117_v29 }
 0x25d   : > { %v1291_v31 = vadd.f32 %v1259_v30, %v1118_v32 }
 0x25f   : > { %v1323_v33 = vmax.f32 %v1291_v31, 0.0 }
 0x261   : > { %1355 = vst.msk [vmem:[%s1929_s10 + $0xb8] sm:$0xff] %vm416_vm0, %v1323_v33 }
 0x262 PF: > { %s18_s27 = sadd.s32 1, %s1662_s27  }
 0x263   : > { %p15_p4 = scmp.ge.s32.totalorder %s18_s27, 4  }
 0x265   :  { %17 = sbr.rel (!%p15_p4) target bundleno = 1 (0x1), region = 85 }

// kernel: caamb_forward.5
= control target key start
LH: loop header
LB: loop body
LE: loop exit
PB: predicated region body
PF: predicated region fallthrough
CT: control target
= control target key end

     0   :  { %s3189_s12 = smov 0   ;;  %s4096_s0 = inlined_call_operand.vmem [shape: f32[2,18,18,64], index: 0, kind: input, shape index: {}]   ;;  %s4097_s1 = inlined_call_operand.vmem [shape: bf16[3,3,64,64], index: 1, kind: input, shape index: {}]   ;;  %s4098_s2 = inlined_call_operand.vmem [shape: f32[1,64], index: 2, kind: input, shape index: {}]   ;;  %s4099_s3 = inlined_call_operand.vmem [shape: bf16[2,256,64], index: 3, kind: output, shape index: {}]  }
   0x1 LB: > { %s2548_s13 = sadd.s32 4294967295, %s3167_s12   ;;  %p2552_p0 = scmp.ge.s32.totalorder %s3167_s12, 1  ;;  %s3167_s12 = sphi %s3189_s12, %s13_s12  }
   0x2   : > { %p137_p1 = scmp.lt.s32.totalorder %s3167_s12, 3 }
   0x4   : > { %p138_p2 = pnand %p2552_p0, %p137_p1 }
   0x6   : > { %141 = sbr.rel (%p138_p2) target bundleno = 740 (0x2e4), region = 32 }
   0xb   : > { %v3110_v0 = vld [vmem:[%s4097_s1 + $0x38] sm:$0xff]  ;;  %p161_p3 = scmp.lt.s32.totalorder %s2548_s13, 1  ;;  %v3109_v1 = vld [vmem:[%s4097_s1 + $0x30] sm:$0xff]  ;;  %v3108_v2 = vld [vmem:[%s4097_s1 + $0x28] sm:$0xff]  ;;  %vm309_vm0 = vcmask 523264   ;;  %vm2460_vm1 = vcmask 519168  }
   0xc   : > { %3139 = vmatpush.bf16.msra.mxu1 %v3110_v0  ;;  %3140 = vmatpush.bf16.msra.mxu2 %v3110_v0  ;;  %v3107_v3 = vld [vmem:[%s4097_s1 + $0x20] sm:$0xff]  ;;  %v3114_v12 = vld [vmem:[%s4097_s1 + $0x58] sm:$0xff]  ;;  %v3113_v20 = vld [vmem:[%s4097_s1 + $0x50] sm:$0xff] }
   0xd   : > { %s4138_s13 = smov (!%p161_p3, %s2548_s13), 1  ;;  %3141 = vmatpush.bf16.msra.mxu3 %v3110_v0  ;;  %362 = vmatpush.bf16.msra.mxu0 %v3110_v0  ;;  %v3118_v13 = vld [vmem:[%s4097_s1 + $0x78] sm:$0xff]  ;;  %v3117_v21 = vld [vmem:[%s4097_s1 + $0x70] sm:$0xff]  ;;  %v3112_v24 = vld [vmem:[%s4097_s1 + $0x48] sm:$0xff] }
   0xe   : > { %s3151_s18 = smul.u32 432, %s4138_s13  ;;  %v3106_v18 = vld [vmem:[%s4097_s1 + $0x18] sm:$0xff]  ;;  %v3105_v22 = vld [vmem:[%s4097_s1 + $0x10] sm:$0xff]  ;;  %v3116_v25 = vld [vmem:[%s4097_s1 + $0x68] sm:$0xff]  ;;  %s3102_s19 = sshll.u32 %s4138_s13, 7 }
   0xf   : > { %v3122_v19 = vld [vmem:[%s4097_s1 + $0x98] sm:$0xff]  ;;  %v3121_v23 = vld [vmem:[%s4097_s1 + $0x90] sm:$0xff]  ;;  %v3104_v26 = vld [vmem:[%s4097_s1 + $0x8] sm:$0xff]  ;;  %s3901_s22 = scalar_lea.vmem %s4099_s3, %s3102_s19 }
  0x10   : > { %3142 = vmatpush.bf16.msra.mxu1 %v3109_v1  ;;  %3143 = vmatpush.bf16.msra.mxu2 %v3109_v1  ;;  %s3212_s23 = scalar_lea.vmem %s4096_s0, %s3151_s18  ;;  %v3120_v27 = vld [vmem:[%s4097_s1 + $0x88] sm:$0xff]  ;;  %v3111_v40 = vld [vmem:[%s4097_s1 + $0x40] sm:$0xff]  ;;  %v3130_v56 = vld [vmem:[%s4097_s1 + $0xd8] sm:$0xff] }
  0x11   : > { %3144 = vmatpush.bf16.msra.mxu3 %v3109_v1  ;;  %363 = vmatpush.bf16.msra.mxu0 %v3109_v1  ;;  %v236_v4 = vld [vmem:[%s3212_s23 + $0x61] sm:$0xff]  ;;  %v237_v5 = vld [vmem:[%s3212_s23 + $0x69] sm:$0xff]  ;;  %v238_v28 = vld [vmem:[%s3212_s23 + $0x79] sm:$0xff] }
  0x12   : > { %v244_v6 = vld [vmem:[%s3212_s23 + $0xc1] sm:$0xff]  ;;  %v245_v7 = vld [vmem:[%s3212_s23 + $0xc9] sm:$0xff]  ;;  %v3231_v14 = vpack.c.bf16 %v237_v5, %v236_v4  ;;  %v246_v30 = vld [vmem:[%s3212_s23 + $0xd9] sm:$0xff] }
  0x13   : > { %v252_v8 = vld [vmem:[%s3212_s23 + $0x121] sm:$0xff]  ;;  %v253_v9 = vld [vmem:[%s3212_s23 + $0x129] sm:$0xff]  ;;  %v3233_v15 = vpack.c.bf16 %v245_v7, %v244_v6  ;;  %v254_v32 = vld [vmem:[%s3212_s23 + $0x139] sm:$0xff] }
  0x14   : > { %3145 = vmatpush.bf16.msra.mxu1 %v3108_v2  ;;  %3146 = vmatpush.bf16.msra.mxu2 %v3108_v2  ;;  %v228_v10 = vld [vmem:[%s3212_s23 + $0x1] sm:$0xff]  ;;  %v229_v11 = vld [vmem:[%s3212_s23 + $0x9] sm:$0xff]  ;;  %v3235_v16 = vpack.c.bf16 %v253_v9, %v252_v8  ;;  %v230_v34 = vld [vmem:[%s3212_s23 + $0x19] sm:$0xff] }
  0x15   : > { %3147 = vmatpush.bf16.msra.mxu3 %v3108_v2  ;;  %364 = vmatpush.bf16.msra.mxu0 %v3108_v2  ;;  %v260_v17 = vpack.c.bf16 %v229_v11, %v228_v10  ;;  %v239_v29 = vld [vmem:[%s3212_s23 + $0x81] sm:$0xff]  ;;  %v240_v44 = vld [vmem:[%s3212_s23 + $0x91] sm:$0xff]  ;;  %v241_v45 = vld [vmem:[%s3212_s23 + $0x99] sm:$0xff] }
  0x16   : > { %v247_v31 = vld [vmem:[%s3212_s23 + $0xe1] sm:$0xff]  ;;  %v3282_v36 = vpack.c.bf16 %v239_v29, %v238_v28  ;;  %v248_v46 = vld [vmem:[%s3212_s23 + $0xf1] sm:$0xff]  ;;  %v249_v47 = vld [vmem:[%s3212_s23 + $0xf9] sm:$0xff]  ;;  %v3318_v52 = vpack.c.bf16 %v241_v45, %v240_v44 }
  0x17   : > { %v255_v33 = vld [vmem:[%s3212_s23 + $0x141] sm:$0xff]  ;;  %v3284_v37 = vpack.c.bf16 %v247_v31, %v246_v30  ;;  %v256_v48 = vld [vmem:[%s3212_s23 + $0x151] sm:$0xff]  ;;  %v257_v49 = vld [vmem:[%s3212_s23 + $0x159] sm:$0xff]  ;;  %v3320_v53 = vpack.c.bf16 %v249_v47, %v248_v46 }
  0x18   : > { %3148 = vmatpush.bf16.msra.mxu1 %v3107_v3  ;;  %3149 = vmatpush.bf16.msra.mxu2 %v3107_v3  ;;  %v231_v35 = vld [vmem:[%s3212_s23 + $0x21] sm:$0xff]  ;;  %v3286_v38 = vpack.c.bf16 %v255_v33, %v254_v32  ;;  %v232_v50 = vld [vmem:[%s3212_s23 + $0x31] sm:$0xff]  ;;  %v233_v51 = vld [vmem:[%s3212_s23 + $0x39] sm:$0xff]  ;;  %v3322_v54 = vpack.c.bf16 %v257_v49, %v256_v48 }
  0x19   : > { %3150 = vmatpush.bf16.msra.mxu3 %v3107_v3  ;;  %365 = vmatpush.bf16.msra.mxu0 %v3107_v3  ;;  %v3288_v39 = vpack.c.bf16 %v231_v35, %v230_v34  ;;  %v3115_v41 = vld [vmem:[%s4097_s1 + $0x60] sm:$0xff]  ;;  %v262_v55 = vpack.c.bf16 %v233_v51, %v232_v50  ;;  %v3134_v57 = vld [vmem:[%s4097_s1 + $0xf8] sm:$0xff]  ;;  %v242_v60 = vld [vmem:[%s3212_s23 + $0xa9] sm:$0xff] }
  0x1a   : > { %v3103_v42 = vld [vmem:[%s4097_s1] sm:$0xff]  ;;  %v3126_v58 = vld [vmem:[%s4097_s1 + $0xb8] sm:$0xff]  ;;  %v250_v62 = vld [vmem:[%s3212_s23 + $0x109] sm:$0xff] }
  0x1b   : > { %2584 = vmatmul.msk.bf16.vlgmr.msra.gmra.mxu1 %vm309_vm0, %v3231_v14  ;;  %2588 = vmatmul.msk.bf16.vlgmr.msra.gmra.mxu2 %vm309_vm0, %v3233_v15  ;;  %v3119_v43 = vld [vmem:[%s4097_s1 + $0x80] sm:$0xff]  ;;  %v3138_v59 = vld [vmem:[%s4097_s1 + $0x118] sm:$0xff]  ;;  %v258_v0 = vld [vmem:[%s3212_s23 + $0x169] sm:$0xff] }
  0x1c   : > { %741 = vmatpush.bf16.msrb.mxu2 %v3114_v12  ;;  %2592 = vmatmul.msk.bf16.vlgmr.msra.gmra.mxu3 %vm309_vm0, %v3235_v16  ;;  %v243_v61 = vld [vmem:[%s3212_s23 + $0xb1] sm:$0xff]  ;;  %v234_v2 = vld [vmem:[%s3212_s23 + $0x49] sm:$0xff]  ;;  %v172_v8 = vld [vmem:[%s3212_s23] sm:$0xff] }
  0x1d   : > { %992 = vmatpush.bf16.msrb.mxu3 %v3118_v13  ;;  %2580 = vmatmul.msk.bf16.vlgmr.msra.gmra.mxu0 %vm309_vm0, %v260_v17  ;;  %v251_v63 = vld [vmem:[%s3212_s23 + $0x111] sm:$0xff]  ;;  %v3351_v4 = vpack.c.bf16 %v243_v61, %v242_v60  ;;  %v173_v9 = vld [vmem:[%s3212_s23 + $0x8] sm:$0xff]  ;;  %v2669_v13 = vld [vmem:[%s3212_s23 + $0x20] sm:$0xff] }
  0x1e   : > { %523 = vmatpush.bf16.msrb.mxu1 %v3106_v18  ;;  %1242 = vmatpush.bf16.msrb.mxu0 %v3122_v19  ;;  %v259_v1 = vld [vmem:[%s3212_s23 + $0x171] sm:$0xff]  ;;  %v3353_v5 = vpack.c.bf16 %v251_v63, %v250_v62  ;;  %v608_v10 = vld [vmem:[%s3212_s23 + $0x2] sm:$0xff]  ;;  %v204_v17 = vpack.c.bf16 %v173_v9, %v172_v8 }
  0x1f   : > { %v235_v3 = vld [vmem:[%s3212_s23 + $0x51] sm:$0xff]  ;;  %v3355_v6 = vpack.c.bf16 %v259_v1, %v258_v0  ;;  %v2672_v28 = vld [vmem:[%s3212_s23 + $0x48] sm:$0xff]  ;;  %v2677_v48 = vld [vmem:[%s3212_s23 + $0x80] sm:$0xff] }
  0x20   : > { %742 = vmatpush.bf16.msrb.mxu2 %v3113_v20  ;;  %v263_v7 = vpack.c.bf16 %v235_v3, %v234_v2  ;;  %v609_v11 = vld [vmem:[%s3212_s23 + $0xa] sm:$0xff]  ;;  %v2668_v12 = vld [vmem:[%s3212_s23 + $0x18] sm:$0xff]  ;;  %v616_v45 = vld [vmem:[%s3212_s23 + $0x62] sm:$0xff] }
  0x21   : > { %993 = vmatpush.bf16.msrb.mxu3 %v3117_v21  ;;  %v640_v18 = vpack.c.bf16 %v609_v11, %v608_v10  ;;  %v891_v19 = vpack.c.bf16 %v2669_v13, %v2668_v12  ;;  %v610_v20 = vld [vmem:[%s3212_s23 + $0x1a] sm:$0xff]  ;;  %v611_v21 = vld [vmem:[%s3212_s23 + $0x22] sm:$0xff]  ;;  %v2673_v29 = vld [vmem:[%s3212_s23 + $0x50] sm:$0xff] }
  0x22   : > { %524 = vmatpush.bf16.msrb.mxu1 %v3105_v22  ;;  %1243 = vmatpush.bf16.msrb.mxu0 %v3121_v23  ;;  %v2670_v22 = vld [vmem:[%s3212_s23 + $0x30] sm:$0xff]  ;;  %v2671_v23 = vld [vmem:[%s3212_s23 + $0x38] sm:$0xff]  ;;  %v3395_v31 = vpack.c.bf16 %v2673_v29, %v2672_v28  ;;  %v619_v60 = vld [vmem:[%s3212_s23 + $0x82] sm:$0xff] }
  0x23   : > { %v3129_v32 = vld [vmem:[%s4097_s1 + $0xd0] sm:$0xff]  ;;  %v2676_v47 = vld [vmem:[%s3212_s23 + $0x78] sm:$0xff]  ;;  %v2680_v13 = vld [vmem:[%s3212_s23 + $0xa8] sm:$0xff] }
  0x24   : > { %743 = vmatpush.bf16.msrb.mxu2 %v3112_v24  ;;  %v3379_v24 = vpack.c.bf16 %v611_v21, %v610_v20  ;;  %v3133_v33 = vld [vmem:[%s4097_s1 + $0xf0] sm:$0xff]  ;;  %v3440_v51 = vpack.c.bf16 %v2677_v48, %v2676_v47  ;;  %v2679_v62 = vld [vmem:[%s3212_s23 + $0x98] sm:$0xff] }
  0x25   : > { %994 = vmatpush.bf16.msrb.mxu3 %v3116_v25  ;;  %v3381_v25 = vpack.c.bf16 %v2671_v23, %v2670_v22  ;;  %v3125_v34 = vld [vmem:[%s4097_s1 + $0xb0] sm:$0xff]  ;;  %v621_v12 = vld [vmem:[%s3212_s23 + $0x9a] sm:$0xff]  ;;  %v3128_v23 = vld [vmem:[%s4097_s1 + $0xc8] sm:$0xff] }
  0x26   : > { %525 = vmatpush.bf16.msrb.mxu1 %v3104_v26  ;;  %1244 = vmatpush.bf16.msrb.mxu0 %v3120_v27  ;;  %v612_v26 = vld [vmem:[%s3212_s23 + $0x32] sm:$0xff]  ;;  %v613_v27 = vld [vmem:[%s3212_s23 + $0x3a] sm:$0xff]  ;;  %v617_v46 = vld [vmem:[%s3212_s23 + $0x6a] sm:$0xff] }
  0x27   : > { %v3393_v30 = vpack.c.bf16 %v613_v27, %v612_v26  ;;  %v3137_v35 = vld [vmem:[%s4097_s1 + $0x110] sm:$0xff]  ;;  %v3436_v49 = vpack.c.bf16 %v617_v46, %v616_v45  ;;  %v3132_v26 = vld [vmem:[%s4097_s1 + $0xe8] sm:$0xff] }
  0x28   : > { %744 = vmatpush.bf16.msrb.mxu2 %v3111_v40  ;;  %v615_v40 = vld [vmem:[%s3212_s23 + $0x52] sm:$0xff] }
  0x29   : > { %995 = vmatpush.bf16.msrb.mxu3 %v3115_v41  ;;  %v2674_v41 = vld [vmem:[%s3212_s23 + $0x60] sm:$0xff]  ;;  %v2678_v61 = vld [vmem:[%s3212_s23 + $0x90] sm:$0xff] }
  0x2a   : > { %526 = vmatpush.bf16.msrb.mxu1 %v3103_v42  ;;  %1245 = vmatpush.bf16.msrb.mxu0 %v3119_v43  ;;  %v2675_v42 = vld [vmem:[%s3212_s23 + $0x68] sm:$0xff]  ;;  %v3472_v2 = vpack.c.bf16 %v2679_v62, %v2678_v61  ;;  %v620_v11 = vld [vmem:[%s3212_s23 + $0x92] sm:$0xff] }
  0x2b   : > { %2585 = vmatmul.msk.bf16.gmra.mxu1 %vm309_vm0, %v3282_v36  ;;  %2589 = vmatmul.msk.bf16.gmra.mxu2 %vm309_vm0, %v3284_v37  ;;  %v3422_v44 = vpack.c.bf16 %v2675_v42, %v2674_v41  ;;  %v3500_v20 = vpack.c.bf16 %v621_v12, %v620_v11  ;;  %v624_v11 = vld [vmem:[%s3212_s23 + $0xc2] sm:$0xff]  ;;  %v625_v12 = vld [vmem:[%s3212_s23 + $0xca] sm:$0xff] }
  0x2c   : > { %2593 = vmatmul.msk.bf16.gmra.mxu3 %vm309_vm0, %v3286_v38  ;;  %1743 = vmatpush.bf16.msra.mxu2 %v3130_v56 }
  0x2d   : > { %2581 = vmatmul.msk.bf16.gmra.mxu0 %vm309_vm0, %v3288_v39  ;;  %1993 = vmatpush.bf16.msra.mxu3 %v3134_v57 }
  0x2e   : > { %1492 = vmatpush.bf16.msra.mxu1 %v3126_v58  ;;  %2243 = vmatpush.bf16.msra.mxu0 %v3138_v59  ;;  %v618_v59 = vld [vmem:[%s3212_s23 + $0x7a] sm:$0xff] }
  0x30   : > { %1744 = vmatpush.bf16.msra.mxu2 %v3129_v32 }
  0x31   : > { %1994 = vmatpush.bf16.msra.mxu3 %v3133_v33  ;;  %v3136_v33 = vld [vmem:[%s4097_s1 + $0x108] sm:$0xff] }
  0x32   : > { %1493 = vmatpush.bf16.msra.mxu1 %v3125_v34  ;;  %2244 = vmatpush.bf16.msra.mxu0 %v3137_v35  ;;  %v622_v34 = vld [vmem:[%s3212_s23 + $0xaa] sm:$0xff]  ;;  %v623_v35 = vld [vmem:[%s3212_s23 + $0xb2] sm:$0xff] }
  0x33   : > { %v3544_v45 = vpack.c.bf16 %v623_v35, %v622_v34 }
  0x34   : > { %1745 = vmatpush.bf16.msra.mxu2 %v3128_v23 }
  0x35   : > { %1995 = vmatpush.bf16.msra.mxu3 %v3132_v26  ;;  %4109 = vst [vmem:[#allocation6_spill] sm:$0xff] %v3544_v45 }
  0x36   : > { %2245 = vmatpush.bf16.msra.mxu0 %v3136_v33 }
  0x3b   : > { %2586 = vmatmul.msk.bf16.gmra.mxu1 %vm309_vm0, %v3318_v52  ;;  %2590 = vmatmul.msk.bf16.gmra.mxu2 %vm309_vm0, %v3320_v53 }
  0x3c   : > { %2594 = vmatmul.msk.bf16.gmra.mxu3 %vm309_vm0, %v3322_v54 }
  0x3d   : > { %2582 = vmatmul.msk.bf16.gmra.mxu0 %vm309_vm0, %v262_v55 }
  0x4b   : > { %2587 = vmatmul.msk.bf16.gmra.mxu1 %vm309_vm0, %v3351_v4  ;;  %2591 = vmatmul.msk.bf16.gmra.mxu2 %vm309_vm0, %v3353_v5 }
  0x4c   : > { %2595 = vmatmul.msk.bf16.gmra.mxu3 %vm309_vm0, %v3355_v6 }
  0x4d   : > { %2583 = vmatmul.msk.bf16.gmra.mxu0 %vm309_vm0, %v263_v7 }
  0x5b   : > { %2612 = vmatmul.msk.bf16.vlgmr.msrb.gmra.mxu1 %vm309_vm0, %v204_v17  ;;  %2652 = vmatmul.msk.bf16.vlgmr.msrb.gmra.mxu2 %vm309_vm0, %v640_v18  ;;  %v2681_v17 = vld [vmem:[%s3212_s23 + $0xb0] sm:$0xff] }
  0x5c   : > { %2724 = vmatmul.msk.bf16.vlgmr.msrb.gmra.mxu3 %vm309_vm0, %v891_v19 }
  0x5d   : > { %2796 = vmatmul.msk.bf16.vlgmr.msrb.gmra.mxu0 %vm309_vm0, %v3288_v39  ;;  %v614_v39 = vld [vmem:[%s3212_s23 + $0x4a] sm:$0xff] }
  0x5e   : > { %v3420_v43 = vpack.c.bf16 %v615_v40, %v614_v39  ;;  %v2682_v39 = vld [vmem:[%s3212_s23 + $0xc0] sm:$0xff]  ;;  %v2683_v40 = vld [vmem:[%s3212_s23 + $0xc8] sm:$0xff] }
  0x5f   : > { %v3548_v47 = vpack.c.bf16 %v2683_v40, %v2682_v39 }
  0x61   : > { %4110 = vst [vmem:[#allocation7_spill] sm:$0xff] %v3548_v47 }
  0x6b   : > { %2613 = vmatmul.msk.bf16.gmra.mxu1 %vm309_vm0, %v891_v19  ;;  %2653 = vmatmul.msk.bf16.gmra.mxu2 %vm309_vm0, %v3379_v24 }
  0x6c   : > { %2725 = vmatmul.msk.bf16.gmra.mxu3 %vm309_vm0, %v3381_v25 }
  0x6d   : > { %2797 = vmatmul.msk.bf16.gmra.mxu0 %vm309_vm0, %v262_v55 }
  0x7b   : > { %2614 = vmatmul.msk.bf16.gmra.mxu1 %vm309_vm0, %v3381_v25  ;;  %2654 = vmatmul.msk.bf16.gmra.mxu2 %vm309_vm0, %v3393_v30 }
  0x7c   : > { %2726 = vmatmul.msk.bf16.gmra.mxu3 %vm309_vm0, %v3395_v31 }
  0x7d   : > { %2798 = vmatmul.msk.bf16.gmra.mxu0 %vm309_vm0, %v263_v7 }
  0x8b   : > { %2615 = vmatmul.msk.bf16.gmra.mxu1 %vm309_vm0, %v3395_v31  ;;  %2655 = vmatmul.msk.bf16.gmra.mxu2 %vm309_vm0, %v3420_v43 }
  0x8c   : > { %2727 = vmatmul.msk.bf16.gmra.mxu3 %vm309_vm0, %v3422_v44 }
  0x8d   : > { %2799 = vmatmul.msk.bf16.gmra.mxu0 %vm309_vm0, %v3231_v14 }
  0x98   : > { %v3438_v50 = vpop.f32.mrf.mxu1 }
  0x9a   : > { %v3442_v55 = vpop.f32.mrf.mxu0 }
  0x9b   : > { %2616 = vmatmul.msk.bf16.gmra.mxu1 %vm309_vm0, %v3422_v44  ;;  %2656 = vmatmul.msk.bf16.gmra.mxu2 %vm309_vm0, %v3436_v49 }
  0x9c   : > { %2728 = vmatmul.msk.bf16.gmra.mxu3 %vm309_vm0, %v3440_v51 }
  0x9d   : > { %2800 = vmatmul.msk.bf16.gmra.mxu0 %vm309_vm0, %v3282_v36  ;;  %v3468_v36 = vpack.c.bf16 %v619_v60, %v618_v59 }
  0x9e   : > { %v3452_v14 = vpop.f32.mrf.mxu2 }
  0x9f   : > { %v3454_v56 = vpop.f32.mrf.mxu3 }
  0xa0   : > { %v3456_v57 = vpop.f32.mrf.mxu1 }
  0xa2   : > { %v3458_v58 = vpop.f32.mrf.mxu0 }
  0xa6   : > { %v3464_v63 = vpop.f32.mrf.mxu2 }
  0xa7   : > { %v3466_v0 = vpop.f32.mrf.mxu3 }
  0xa8   : > { %v3470_v1 = vpop.f32.mrf.mxu1 }
  0xaa   : > { %v3474_v3 = vpop.f32.mrf.mxu0 }
  0xab   : > { %2617 = vmatmul.msk.bf16.gmra.mxu1 %vm309_vm0, %v3440_v51  ;;  %2657 = vmatmul.msk.bf16.gmra.mxu2 %vm309_vm0, %v3468_v36 }
  0xac   : > { %2729 = vmatmul.msk.bf16.gmra.mxu3 %vm309_vm0, %v3472_v2 }
  0xad   : > { %2801 = vmatmul.msk.bf16.gmra.mxu0 %vm309_vm0, %v3318_v52  ;;  %v3504_v52 = vpack.c.bf16 %v2681_v17, %v2680_v13  ;;  %v2684_v13 = vld [vmem:[%s3212_s23 + $0xd8] sm:$0xff]  ;;  %v2685_v17 = vld [vmem:[%s3212_s23 + $0xe0] sm:$0xff] }
  0xae   : > { %v3484_v7 = vpop.f32.mrf.mxu2 }
  0xaf   : > { %v3486_v8 = vpop.f32.mrf.mxu3 }
  0xb0   : > { %4105 = vst [vmem:[#allocation2_spill] sm:$0xff] %v3486_v8  ;;  %v3488_v9 = vpop.f32.mrf.mxu1 }
  0xb2   : > { %v3490_v10 = vpop.f32.mrf.mxu0 }
  0xb6   : > { %v3496_v18 = vpop.f32.mrf.mxu2 }
  0xb7   : > { %v3498_v19 = vpop.f32.mrf.mxu3 }
  0xb8   : > { %4106 = vst [vmem:[#allocation3_spill] sm:$0xff] %v3498_v19  ;;  %v3502_v21 = vpop.f32.mrf.mxu1 }
  0xba   : > { %v3506_v22 = vpop.f32.mrf.mxu0 }
  0xbb   : > { %2618 = vmatmul.msk.bf16.gmra.mxu1 %vm309_vm0, %v3472_v2  ;;  %2658 = vmatmul.msk.bf16.gmra.mxu2 %vm309_vm0, %v3500_v20 }
  0xbc   : > { %2730 = vmatmul.msk.bf16.gmra.mxu3 %vm309_vm0, %v3504_v52 }
  0xbd   : > { %2802 = vmatmul.msk.bf16.gmra.mxu0 %vm309_vm0, %v3351_v4  ;;  %v3124_v4 = vld [vmem:[%s4097_s1 + $0xa8] sm:$0xff] }
  0xbe   : > { %v3522_v27 = vpop.f32.mrf.mxu2  ;;  %1494 = vmatpush.bf16.msra.mxu1 %v3124_v4  ;;  %v3576_v4 = vpack.c.bf16 %v625_v12, %v624_v11 }
  0xbf   : > { %v3524_v28 = vpop.f32.mrf.mxu3 }
  0xc0   : > { %4107 = vst [vmem:[#allocation4_spill] sm:$0xff] %v3524_v28  ;;  %v3526_v29 = vpop.f32.mrf.mxu1  ;;  %v2687_v28 = vld [vmem:[%s3212_s23 + $0xf8] sm:$0xff] }
  0xc1   : > { %4113 = vst [vmem:[#allocation10_spill] sm:$0xff] %v3576_v4 }
  0xc2   : > { %v3528_v32 = vpop.f32.mrf.mxu0 }
  0xc6   : > { %v3540_v41 = vpop.f32.mrf.mxu2 }
  0xc7   : > { %v3542_v42 = vpop.f32.mrf.mxu3 }
  0xc8   : > { %4108 = vst [vmem:[#allocation5_spill] sm:$0xff] %v3542_v42  ;;  %v3546_v46 = vpop.f32.mrf.mxu1  ;;  %v2686_v42 = vld [vmem:[%s3212_s23 + $0xf0] sm:$0xff] }
  0xca   : > { %v3550_v48 = vpop.f32.mrf.mxu0 }
  0xcb   : > { %2619 = vmatmul.msk.bf16.gmra.mxu1 %vm309_vm0, %v3504_v52  ;;  %2659 = vmatmul.msk.bf16.gmra.mxu2 %vm309_vm0, %v3544_v45  ;;  %v3598_v45 = vpack.c.bf16 %v2687_v28, %v2686_v42 }
  0xcc   : > { %2731 = vmatmul.msk.bf16.gmra.mxu3 %vm309_vm0, %v3548_v47 }
  0xcd   : > { %2803 = vmatmul.msk.bf16.gmra.mxu0 %vm309_vm0, %v3233_v15  ;;  %v3578_v15 = vpack.c.bf16 %v2685_v17, %v2684_v13 }
  0xce   : > { %v3560_v59 = vpop.f32.mrf.mxu2 }
  0xcf   : > { %v3562_v60 = vpop.f32.mrf.mxu3 }
  0xd0   : > { %4111 = vst [vmem:[#allocation8_spill] sm:$0xff] %v3562_v60  ;;  %v3564_v61 = vpop.f32.mrf.mxu1  ;;  %v627_v60 = vld [vmem:[%s3212_s23 + $0xe2] sm:$0xff] }
  0xd2   : > { %v3566_v62 = vpop.f32.mrf.mxu0 }
  0xd6   : > { %v3572_v23 = vpop.f32.mrf.mxu2 }
  0xd7   : > { %v3574_v26 = vpop.f32.mrf.mxu3 }
  0xd8   : > { %4112 = vst [vmem:[#allocation9_spill] sm:$0xff] %v3574_v26  ;;  %v528_v33 = vpop.f32.mrf.mxu1  ;;  %v626_v26 = vld [vmem:[%s3212_s23 + $0xda] sm:$0xff] }
  0xd9   : > { %v529_v34 = vadd.f32 %v528_v33, %v3442_v55  ;;  %v3596_v8 = vpack.c.bf16 %v627_v60, %v626_v26 }
  0xda   : > { %v1247_v35 = vpop.f32.mrf.mxu0 }
  0xdb   : > { %2620 = vmatmul.msk.bf16.gmra.mxu1 %vm309_vm0, %v3548_v47  ;;  %2660 = vmatmul.msk.bf16.gmra.mxu2 %vm309_vm0, %v3576_v4 }
  0xdc   : > { %2732 = vmatmul.msk.bf16.gmra.mxu3 %vm309_vm0, %v3578_v15 }
  0xdd   : > { %2804 = vmatmul.msk.bf16.gmra.mxu0 %vm309_vm0, %v3284_v37 }
  0xde   : > { %v746_v39 = vpop.f32.mrf.mxu2 }
  0xdf   : > { %v826_v40 = vadd.f32 %v746_v39, %v529_v34  ;;  %v997_v11 = vpop.f32.mrf.mxu3 }
  0xe0   : > { %v530_v12 = vpop.f32.mrf.mxu1 }
  0xe1   : > { %v1077_v55 = vadd.f32 %v997_v11, %v826_v40  ;;  %v531_v13 = vadd.f32 %v530_v12, %v3458_v58  ;;  %v628_v40 = vld [vmem:[%s3212_s23 + $0xf2] sm:$0xff]  ;;  %v629_v11 = vld [vmem:[%s3212_s23 + $0xfa] sm:$0xff]  ;;  %v2688_v12 = vld [vmem:[%s3212_s23 + $0x108] sm:$0xff] }
  0xe2   : > { %v1249_v17 = vpop.f32.mrf.mxu0 }
  0xe3   : > { %v3590_v33 = vadd.f32 %v1247_v35, %v1077_v55  ;;  %v2689_v55 = vld [vmem:[%s3212_s23 + $0x110] sm:$0xff] }
  0xe6   : > { %v748_v4 = vpop.f32.mrf.mxu2 }
  0xe7   : > { %v827_v47 = vadd.f32 %v748_v4, %v531_v13  ;;  %v999_v19 = vpop.f32.mrf.mxu3 }
  0xe8   : > { %v533_v37 = vpop.f32.mrf.mxu1 }
  0xe9   : > { %v1078_v34 = vadd.f32 %v999_v19, %v827_v47  ;;  %v534_v39 = vadd.f32 %v533_v37, %v3474_v3 }
  0xea   : > { %v1252_v58 = vpop.f32.mrf.mxu0 }
  0xeb   : > { %2621 = vmatmul.msk.bf16.gmra.mxu1 %vm309_vm0, %v3578_v15  ;;  %2661 = vmatmul.msk.bf16.gmra.mxu2 %vm309_vm0, %v3596_v8  ;;  %v3605_v4 = vadd.f32 %v1249_v17, %v1078_v34  ;;  %v3618_v34 = vpack.c.bf16 %v629_v11, %v628_v40  ;;  %v3123_v11 = vld [vmem:[%s4097_s1 + $0xa0] sm:$0xff] }
  0xec   : > { %2733 = vmatmul.msk.bf16.gmra.mxu3 %vm309_vm0, %v3598_v45  ;;  %1495 = vmatpush.bf16.msra.mxu1 %v3123_v11 }
  0xed   : > { %4114 = vst [vmem:[#allocation11_spill] sm:$0xff] %v3605_v4  ;;  %2805 = vmatmul.msk.bf16.gmra.mxu0 %vm309_vm0, %v3320_v53  ;;  %v3620_v4 = vpack.c.bf16 %v2689_v55, %v2688_v12  ;;  %v3135_v12 = vld [vmem:[%s4097_s1 + $0x100] sm:$0xff] }
  0xee   : > { %v751_v19 = vpop.f32.mrf.mxu2  ;;  %2246 = vmatpush.bf16.msra.mxu0 %v3135_v12 }
  0xef   : > { %v828_v3 = vadd.f32 %v751_v19, %v534_v39  ;;  %v1002_v28 = vpop.f32.mrf.mxu3 }
  0xf0   : > { %v535_v42 = vpop.f32.mrf.mxu1 }
  0xf1   : > { %v1079_v47 = vadd.f32 %v1002_v28, %v828_v3  ;;  %v536_v60 = vadd.f32 %v535_v42, %v3490_v10 }
  0xf2   : > { %v1254_v26 = vpop.f32.mrf.mxu0 }
  0xf3   : > { %v3612_v35 = vadd.f32 %v1252_v58, %v1079_v47  ;;  %v3127_v58 = vld [vmem:[%s4097_s1 + $0xc0] sm:$0xff] }
  0xf4   : > { %1746 = vmatpush.bf16.msra.mxu2 %v3127_v58 }
  0xf6   : > { %v753_v13 = vpop.f32.mrf.mxu2 }
  0xf7   : > { %v829_v17 = vadd.f32 %v753_v13, %v536_v60  ;;  %v1004_v37 = vpop.f32.mrf.mxu3  ;;  %v630_v13 = vld [vmem:[%s3212_s23 + $0x10a] sm:$0xff] }
  0xf8   : > { %v538_v53 = vpop.f32.mrf.mxu1 }
  0xf9   : > { %v1080_v39 = vadd.f32 %v1004_v37, %v829_v17  ;;  %v539_v19 = vadd.f32 %v538_v53, %v3506_v22  ;;  %v3131_v22 = vld [vmem:[%s4097_s1 + $0xe0] sm:$0xff]  ;;  %v631_v17 = vld [vmem:[%s3212_s23 + $0x112] sm:$0xff]  ;;  %v2691_v53 = vld [vmem:[%s3212_s23 + $0x128] sm:$0xff] }
  0xfa   : > { %v1257_v3 = vpop.f32.mrf.mxu0  ;;  %1996 = vmatpush.bf16.msra.mxu3 %v3131_v22  ;;  %v2690_v37 = vld [vmem:[%s3212_s23 + $0x120] sm:$0xff]  ;;  %v3652_v58 = vpack.c.bf16 %v631_v17, %v630_v13 }
  0xfb   : > { %2622 = vmatmul.msk.bf16.gmra.mxu1 %vm309_vm0, %v3598_v45  ;;  %2662 = vmatmul.msk.bf16.gmra.mxu2 %vm309_vm0, %v3618_v34  ;;  %v3627_v10 = vadd.f32 %v1254_v26, %v1080_v39 }
  0xfc   : > { %2734 = vmatmul.msk.bf16.gmra.mxu3 %vm309_vm0, %v3620_v4 }
  0xfd   : > { %2806 = vmatmul.msk.bf16.gmra.mxu0 %vm309_vm0, %v3353_v5 }
  0xfe   : > { %v756_v28 = vpop.f32.mrf.mxu2 }
  0xff   : > { %v830_v42 = vadd.f32 %v756_v28, %v539_v19  ;;  %v1007_v47 = vpop.f32.mrf.mxu3  ;;  %v3654_v28 = vpack.c.bf16 %v2691_v53, %v2690_v37  ;;  %v632_v53 = vld [vmem:[%s3212_s23 + $0x122] sm:$0xff] }
 0x100   : > { %v540_v60 = vpop.f32.mrf.mxu1 }
 0x101   : > { %v1081_v26 = vadd.f32 %v1007_v47, %v830_v42  ;;  %v541_v5 = vadd.f32 %v540_v60, %v3528_v32 }
 0x102   : > { %v1259_v40 = vpop.f32.mrf.mxu0 }
 0x103   : > { %v3646_v55 = vadd.f32 %v1257_v3, %v1081_v26 }
 0x105   : > { %4115 = vst [vmem:[#allocation12_spill] sm:$0xff] %v3646_v55 }
 0x106   : > { %v758_v39 = vpop.f32.mrf.mxu2 }
 0x107   : > { %v831_v19 = vadd.f32 %v758_v39, %v541_v5  ;;  %v1009_v32 = vpop.f32.mrf.mxu3  ;;  %v633_v39 = vld [vmem:[%s3212_s23 + $0x12a] sm:$0xff] }
 0x108   : > { %v543_v22 = vpop.f32.mrf.mxu1 }
 0x109   : > { %v1082_v42 = vadd.f32 %v1009_v32, %v831_v19  ;;  %v544_v47 = vadd.f32 %v543_v22, %v3550_v48  ;;  %v2693_v19 = vld [vmem:[%s3212_s23 + $0x140] sm:$0xff] }
 0x10a   : > { %v1262_v60 = vpop.f32.mrf.mxu0 }
 0x10b   : > { %2623 = vmatmul.msk.bf16.gmra.mxu1 %vm309_vm0, %v3620_v4  ;;  %2663 = vmatmul.msk.bf16.gmra.mxu2 %vm309_vm0, %v3652_v58  ;;  %v3661_v3 = vadd.f32 %v1259_v40, %v1082_v42  ;;  %v2692_v40 = vld [vmem:[%s3212_s23 + $0x138] sm:$0xff] }
 0x10c   : > { %2735 = vmatmul.msk.bf16.gmra.mxu3 %vm309_vm0, %v3654_v28  ;;  %v3676_v55 = vpack.c.bf16 %v2693_v19, %v2692_v40  ;;  %v634_v40 = vld [vmem:[%s3212_s23 + $0x13a] sm:$0xff]  ;;  %v635_v19 = vld [vmem:[%s3212_s23 + $0x142] sm:$0xff] }
 0x10d   : > { %4116 = vst [vmem:[#allocation13_spill] sm:$0xff] %v3661_v3  ;;  %2807 = vmatmul.msk.bf16.gmra.mxu0 %vm309_vm0, %v3235_v16  ;;  %v3674_v3 = vpack.c.bf16 %v633_v39, %v632_v53 }
 0x10e   : > { %v761_v26 = vpop.f32.mrf.mxu2 }
 0x10f   : > { %v832_v48 = vadd.f32 %v761_v26, %v544_v47  ;;  %v1012_v5 = vpop.f32.mrf.mxu3 }
 0x110   : > { %v545_v11 = vpop.f32.mrf.mxu1 }
 0x111   : > { %v1083_v12 = vadd.f32 %v1012_v5, %v832_v48  ;;  %v546_v13 = vadd.f32 %v545_v11, %v3566_v62 }
 0x112   : > { %v1264_v17 = vpop.f32.mrf.mxu0 }
 0x113   : > { %v3668_v37 = vadd.f32 %v1262_v60, %v1083_v12 }
 0x116   : > { %v763_v32 = vpop.f32.mrf.mxu2 }
 0x117   : > { %v833_v22 = vadd.f32 %v763_v32, %v546_v13  ;;  %v1014_v42 = vpop.f32.mrf.mxu3  ;;  %v2694_v32 = vld [vmem:[%s3212_s23 + $0x150] sm:$0xff] }
 0x118   : > { %v548_v16 = vpop.f32.mrf.mxu1 }
 0x119   : > { %v1084_v47 = vadd.f32 %v1014_v42, %v833_v22  ;;  %v549_v60 = vadd.f32 %v548_v16, %v3438_v50  ;;  %v2695_v22 = vld [vmem:[%s3212_s23 + $0x158] sm:$0xff] }
 0x11a   : > { %v1267_v26 = vpop.f32.mrf.mxu0  ;;  %v3698_v16 = vpack.c.bf16 %v2695_v22, %v2694_v32  ;;  %v637_v32 = vld [vmem:[%s3212_s23 + $0x15a] sm:$0xff]  ;;  %v2696_v22 = vld [vmem:[%s3212_s23 + $0x168] sm:$0xff] }
 0x11b   : > { %2624 = vmatmul.msk.bf16.gmra.mxu1 %vm309_vm0, %v3654_v28  ;;  %2664 = vmatmul.msk.bf16.gmra.mxu2 %vm309_vm0, %v3674_v3  ;;  %v3682_v62 = vadd.f32 %v1264_v17, %v1084_v47 }
 0x11c   : > { %2736 = vmatmul.msk.bf16.gmra.mxu3 %vm309_vm0, %v3676_v55 }
 0x11d   : > { %4117 = vst [vmem:[#allocation14_spill] sm:$0xff] %v3682_v62  ;;  %2808 = vmatmul.msk.bf16.gmra.mxu0 %vm309_vm0, %v3286_v38  ;;  %v3696_v38 = vpack.c.bf16 %v635_v19, %v634_v40 }
 0x11e   : > { %v766_v48 = vpop.f32.mrf.mxu2 }
 0x11f   : > { %v834_v5 = vadd.f32 %v766_v48, %v549_v60  ;;  %v1017_v11 = vpop.f32.mrf.mxu3 }
 0x120   : > { %v550_v12 = vpop.f32.mrf.mxu1 }
 0x121   : > { %v1085_v13 = vadd.f32 %v1017_v11, %v834_v5  ;;  %v551_v17 = vadd.f32 %v550_v12, %v3456_v57 }
 0x122   : > { %v1269_v53 = vpop.f32.mrf.mxu0 }
 0x123   : > { %v3689_v39 = vadd.f32 %v1267_v26, %v1085_v13 }
 0x126   : > { %v768_v42 = vpop.f32.mrf.mxu2 }
 0x127   : > { %v835_v47 = vadd.f32 %v768_v42, %v551_v17  ;;  %v1019_v62 = vpop.f32.mrf.mxu3  ;;  %v636_v17 = vld [vmem:[%s3212_s23 + $0x152] sm:$0xff] }
 0x128   : > { %v553_v50 = vpop.f32.mrf.mxu1  ;;  %v2697_v42 = vld [vmem:[%s3212_s23 + $0x170] sm:$0xff] }
 0x129   : > { %v1086_v60 = vadd.f32 %v1019_v62, %v835_v47  ;;  %v554_v26 = vadd.f32 %v553_v50, %v3470_v1  ;;  %v3720_v50 = vpack.c.bf16 %v2697_v42, %v2696_v22  ;;  %v2698_v22 = vld [vmem:[%s3212_s23 + $0x180] sm:$0xff] }
 0x12a   : > { %v1272_v48 = vpop.f32.mrf.mxu0 }
 0x12b   : > { %2625 = vmatmul.msk.bf16.gmra.mxu1 %vm309_vm0, %v3676_v55  ;;  %2665 = vmatmul.msk.bf16.gmra.mxu2 %vm309_vm0, %v3696_v38  ;;  %v3704_v57 = vadd.f32 %v1269_v53, %v1086_v60 }
 0x12c   : > { %2737 = vmatmul.msk.bf16.gmra.mxu3 %vm309_vm0, %v3698_v16 }
 0x12d   : > { %4118 = vst [vmem:[#allocation15_spill] sm:$0xff] %v3704_v57  ;;  %2809 = vmatmul.msk.bf16.gmra.mxu0 %vm309_vm0, %v3322_v54  ;;  %v3718_v54 = vpack.c.bf16 %v637_v32, %v636_v17 }
 0x12e   : > { %v771_v62 = vpop.f32.mrf.mxu2 }
 0x12f   : > { %v836_v5 = vadd.f32 %v771_v62, %v554_v26  ;;  %v1022_v11 = vpop.f32.mrf.mxu3 }
 0x130   : > { %v555_v12 = vpop.f32.mrf.mxu1 }
 0x131   : > { %v1087_v13 = vadd.f32 %v1022_v11, %v836_v5  ;;  %v556_v53 = vadd.f32 %v555_v12, %v3488_v9 }
 0x132   : > { %v1274_v40 = vpop.f32.mrf.mxu0 }
 0x133   : > { %v3711_v19 = vadd.f32 %v1272_v48, %v1087_v13 }
 0x135   : > { %4119 = vst [vmem:[#allocation16_spill] sm:$0xff] %v3711_v19 }
 0x136   : > { %v773_v47 = vpop.f32.mrf.mxu2 }
 0x137   : > { %v837_v60 = vadd.f32 %v773_v47, %v556_v53  ;;  %v1024_v57 = vpop.f32.mrf.mxu3  ;;  %v639_v53 = vld [vmem:[%s3212_s23 + $0x172] sm:$0xff]  ;;  %v2699_v47 = vld [vmem:[%s3212_s23 + $0x188] sm:$0xff] }
 0x138   : > { %v558_v1 = vpop.f32.mrf.mxu1 }
 0x139   : > { %v1088_v26 = vadd.f32 %v1024_v57, %v837_v60  ;;  %v559_v48 = vadd.f32 %v558_v1, %v3502_v21  ;;  %v2770_v60 = vld [vmem:[%s3212_s23 + $0x181] sm:$0xff] }
 0x13a   : > { %v1277_v62 = vpop.f32.mrf.mxu0 }
 0x13b   : > { %2626 = vmatmul.msk.bf16.gmra.mxu1 %vm309_vm0, %v3698_v16  ;;  %2666 = vmatmul.msk.bf16.gmra.mxu2 %vm309_vm0, %v3718_v54  ;;  %v3726_v9 = vadd.f32 %v1274_v40, %v1088_v26  ;;  %v638_v40 = vld [vmem:[%s3212_s23 + $0x16a] sm:$0xff] }
 0x13c   : > { %2738 = vmatmul.msk.bf16.gmra.mxu3 %vm309_vm0, %v3720_v50  ;;  %v2771_v26 = vld [vmem:[%s3212_s23 + $0x189] sm:$0xff]  ;;  %v3742_v21 = vpack.c.bf16 %v639_v53, %v638_v40 }
 0x13d   : > { %4120 = vst [vmem:[#allocation17_spill] sm:$0xff] %v3726_v9  ;;  %2810 = vmatmul.msk.bf16.gmra.mxu0 %vm309_vm0, %v3355_v6 }
 0x13e   : > { %v776_v57 = vpop.f32.mrf.mxu2 }
 0x13f   : > { %v838_v5 = vadd.f32 %v776_v57, %v559_v48  ;;  %v1027_v11 = vpop.f32.mrf.mxu3  ;;  %v906_v48 = vpack.c.bf16 %v2699_v47, %v2698_v22  ;;  %v1156_v57 = vpack.c.bf16 %v2771_v26, %v2770_v60  ;;  %v2956_v47 = vld [vmem:[%s3212_s23 + $0x31] sm:$0xff]  ;;  %v2957_v60 = vld [vmem:[%s3212_s23 + $0x39] sm:$0xff] }
 0x140   : > { %v560_v12 = vpop.f32.mrf.mxu1 }
 0x141   : > { %v1089_v13 = vadd.f32 %v1027_v11, %v838_v5  ;;  %v561_v42 = vadd.f32 %v560_v12, %v3526_v29 }
 0x142   : > { %v1279_v17 = vpop.f32.mrf.mxu0 }
 0x143   : > { %v3733_v32 = vadd.f32 %v1277_v62, %v1089_v13 }
 0x146   : > { %v778_v9 = vpop.f32.mrf.mxu2 }
 0x147   : > { %v839_v6 = vadd.f32 %v778_v9, %v561_v42  ;;  %v1029_v19 = vpop.f32.mrf.mxu3 }
 0x148   : > { %v563_v1 = vpop.f32.mrf.mxu1 }
 0x149   : > { %v1090_v5 = vadd.f32 %v1029_v19, %v839_v6  ;;  %v564_v9 = vadd.f32 %v563_v1, %v3546_v46 }
 0x14a   : > { %v1282_v62 = vpop.f32.mrf.mxu0 }
 0x14b   : > { %2627 = vmatmul.msk.bf16.gmra.mxu1 %vm309_vm0, %v3720_v50  ;;  %2667 = vmatmul.msk.bf16.gmra.mxu2 %vm309_vm0, %v3742_v21  ;;  %v3748_v29 = vadd.f32 %v1279_v17, %v1090_v5  ;;  %v1892_v5 = vpack.c.bf16 %v2957_v60, %v2956_v47 }
 0x14c   : > { %2739 = vmatmul.msk.bf16.gmra.mxu3 %vm309_vm0, %v906_v48 }
 0x14d   : > { %2811 = vmatmul.msk.bf16.gmra.mxu0 %vm309_vm0, %v1156_v57 }
 0x14e   : > { %v781_v11 = vpop.f32.mrf.mxu2 }
 0x14f   : > { %v840_v12 = vadd.f32 %v781_v11, %v564_v9  ;;  %v1032_v19 = vpop.f32.mrf.mxu3 }
 0x150   : > { %v565_v13 = vpop.f32.mrf.mxu1 }
 0x151   : > { %v1091_v40 = vadd.f32 %v1032_v19, %v840_v12  ;;  %v566_v42 = vadd.f32 %v565_v13, %v3564_v61 }
 0x152   : > { %v1284_v53 = vpop.f32.mrf.mxu0 }
 0x153   : > { %v3753_v22 = vadd.f32 %v1282_v62, %v1091_v40 }
 0x156   : > { %v783_v17 = vpop.f32.mrf.mxu2 }
 0x157   : > { %v841_v26 = vadd.f32 %v783_v17, %v566_v42  ;;  %v1034_v6 = vpop.f32.mrf.mxu3 }
 0x158   : > { %v568_v48 = vpop.f32.mrf.mxu1 }
 0x159   : > { %v1092_v57 = vadd.f32 %v1034_v6, %v841_v26  ;;  %v569_v61 = vadd.f32 %v568_v48, %v3452_v14 }
 0x15a   : > { %v1287_v46 = vpop.f32.mrf.mxu0 }
 0x15b   : > { %2868 = vmatmul.msk.bf16.vlgmr.msra.gmra.mxu1 %vm309_vm0, %v3379_v24  ;;  %2940 = vmatmul.msk.bf16.vlgmr.msra.gmra.mxu2 %vm309_vm0, %v3381_v25  ;;  %v3762_v1 = vadd.f32 %v1284_v53, %v1092_v57  ;;  %v2958_v25 = vld [vmem:[%s3212_s23 + $0x49] sm:$0xff]  ;;  %v2959_v53 = vld [vmem:[%s3212_s23 + $0x51] sm:$0xff] }
 0x15c   : > { %3012 = vmatmul.msk.bf16.vlgmr.msra.gmra.mxu3 %vm309_vm0, %v1892_v5  ;;  %v1893_v26 = vpack.c.bf16 %v2959_v53, %v2958_v25 }
 0x15d   : > { %3084 = vmatmul.msk.bf16.vlgmr.msra.gmra.mxu0 %vm309_vm0, %v3393_v30 }
 0x15e   : > { %v786_v62 = vpop.f32.mrf.mxu2 }
 0x15f   : > { %v842_v9 = vadd.f32 %v786_v62, %v569_v61  ;;  %v1037_v11 = vpop.f32.mrf.mxu3 }
 0x160   : > { %v570_v12 = vpop.f32.mrf.mxu1 }
 0x161   : > { %v1093_v19 = vadd.f32 %v1037_v11, %v842_v9  ;;  %v571_v24 = vadd.f32 %v570_v12, %v3464_v63  ;;  %v2961_v12 = vld [vmem:[%s3212_s23 + $0x69] sm:$0xff] }
 0x162   : > { %v1289_v13 = vpop.f32.mrf.mxu0 }
 0x163   : > { %v3768_v40 = vadd.f32 %v1287_v46, %v1093_v19 }
 0x166   : > { %v788_v42 = vpop.f32.mrf.mxu2 }
 0x167   : > { %v843_v47 = vadd.f32 %v788_v42, %v571_v24  ;;  %v1039_v60 = vpop.f32.mrf.mxu3 }
 0x168   : > { %v573_v17 = vpop.f32.mrf.mxu1 }
 0x169   : > { %v1094_v6 = vadd.f32 %v1039_v60, %v843_v47  ;;  %v574_v63 = vadd.f32 %v573_v17, %v3484_v7 }
 0x16a   : > { %v1292_v14 = vpop.f32.mrf.mxu0 }
 0x16b   : > { %2869 = vmatmul.msk.bf16.gmra.mxu1 %vm309_vm0, %v3393_v30  ;;  %2941 = vmatmul.msk.bf16.gmra.mxu2 %vm309_vm0, %v3395_v31  ;;  %v3777_v48 = vadd.f32 %v1289_v13, %v1094_v6  ;;  %v2960_v31 = vld [vmem:[%s3212_s23 + $0x61] sm:$0xff] }
 0x16c   : > { %3013 = vmatmul.msk.bf16.gmra.mxu3 %vm309_vm0, %v1893_v26  ;;  %v1894_v53 = vpack.c.bf16 %v2961_v12, %v2960_v31 }
 0x16d   : > { %3085 = vmatmul.msk.bf16.gmra.mxu0 %vm309_vm0, %v3420_v43 }
 0x16e   : > { %v791_v5 = vpop.f32.mrf.mxu2 }
 0x16f   : > { %v844_v57 = vadd.f32 %v791_v5, %v574_v63  ;;  %v1042_v46 = vpop.f32.mrf.mxu3 }
 0x170   : > { %v575_v61 = vpop.f32.mrf.mxu1 }
 0x171   : > { %v1095_v62 = vadd.f32 %v1042_v46, %v844_v57  ;;  %v576_v30 = vadd.f32 %v575_v61, %v3496_v18  ;;  %v2963_v57 = vld [vmem:[%s3212_s23 + $0x81] sm:$0xff] }
 0x172   : > { %v1294_v9 = vpop.f32.mrf.mxu0 }
 0x173   : > { %v3783_v11 = vadd.f32 %v1292_v14, %v1095_v62 }
 0x176   : > { %v793_v19 = vpop.f32.mrf.mxu2 }
 0x177   : > { %v845_v13 = vadd.f32 %v793_v19, %v576_v30  ;;  %v1044_v24 = vpop.f32.mrf.mxu3 }
 0x178   : > { %v578_v25 = vpop.f32.mrf.mxu1 }
 0x179   : > { %v1096_v42 = vadd.f32 %v1044_v24, %v845_v13  ;;  %v579_v18 = vadd.f32 %v578_v25, %v3522_v27 }
 0x17a   : > { %v1297_v7 = vpop.f32.mrf.mxu0 }
 0x17b   : > { %2870 = vmatmul.msk.bf16.gmra.mxu1 %vm309_vm0, %v3420_v43  ;;  %2942 = vmatmul.msk.bf16.gmra.mxu2 %vm309_vm0, %v3422_v44  ;;  %v3792_v47 = vadd.f32 %v1294_v9, %v1096_v42  ;;  %v2962_v44 = vld [vmem:[%s3212_s23 + $0x79] sm:$0xff] }
 0x17c   : > { %3014 = vmatmul.msk.bf16.gmra.mxu3 %vm309_vm0, %v1894_v53  ;;  %v1895_v30 = vpack.c.bf16 %v2963_v57, %v2962_v44 }
 0x17d   : > { %3086 = vmatmul.msk.bf16.gmra.mxu0 %vm309_vm0, %v3436_v49 }
 0x17e   : > { %v796_v60 = vpop.f32.mrf.mxu2 }
 0x17f   : > { %v846_v17 = vadd.f32 %v796_v60, %v579_v18  ;;  %v1047_v26 = vpop.f32.mrf.mxu3  ;;  %v2965_v18 = vld [vmem:[%s3212_s23 + $0x99] sm:$0xff] }
 0x180   : > { %v580_v6 = vpop.f32.mrf.mxu1 }
 0x181   : > { %v1097_v14 = vadd.f32 %v1047_v26, %v846_v17  ;;  %v581_v43 = vadd.f32 %v580_v6, %v3540_v41 }
 0x182   : > { %v1299_v63 = vpop.f32.mrf.mxu0 }
 0x183   : > { %v3798_v5 = vadd.f32 %v1297_v7, %v1097_v14 }
 0x186   : > { %v798_v46 = vpop.f32.mrf.mxu2 }
 0x187   : > { %v847_v61 = vadd.f32 %v798_v46, %v581_v43  ;;  %v1049_v62 = vpop.f32.mrf.mxu3 }
 0x188   : > { %v583_v9 = vpop.f32.mrf.mxu1 }
 0x189   : > { %v1098_v31 = vadd.f32 %v1049_v62, %v847_v61  ;;  %v584_v41 = vadd.f32 %v583_v9, %v3560_v59 }
 0x18a   : > { %v1302_v27 = vpop.f32.mrf.mxu0 }
 0x18b   : > { %2871 = vmatmul.msk.bf16.gmra.mxu1 %vm309_vm0, %v3436_v49  ;;  %2943 = vmatmul.msk.bf16.gmra.mxu2 %vm309_vm0, %v3440_v51  ;;  %v3807_v12 = vadd.f32 %v1299_v63, %v1098_v31  ;;  %v2964_v51 = vld [vmem:[%s3212_s23 + $0x91] sm:$0xff] }
 0x18c   : > { %3015 = vmatmul.msk.bf16.gmra.mxu3 %vm309_vm0, %v1895_v30  ;;  %v1896_v14 = vpack.c.bf16 %v2965_v18, %v2964_v51  ;;  %v2967_v31 = vld [vmem:[%s3212_s23 + $0xb1] sm:$0xff] }
 0x18d   : > { %3087 = vmatmul.msk.bf16.gmra.mxu0 %vm309_vm0, %v3468_v36 }
 0x18e   : > { %v801_v19 = vpop.f32.mrf.mxu2 }
 0x18f   : > { %v848_v13 = vadd.f32 %v801_v19, %v584_v41  ;;  %v1052_v24 = vpop.f32.mrf.mxu3 }
 0x190   : > { %v585_v25 = vpop.f32.mrf.mxu1 }
 0x191   : > { %v1099_v53 = vadd.f32 %v1052_v24, %v848_v13  ;;  %v586_v49 = vadd.f32 %v585_v25, %v3572_v23 }
 0x192   : > { %v1304_v42 = vpop.f32.mrf.mxu0 }
 0x193   : > { %v3813_v7 = vadd.f32 %v1302_v27, %v1099_v53 }
 0x196   : > { %v803_v60 = vpop.f32.mrf.mxu2 }
 0x197   : > { %v849_v17 = vadd.f32 %v803_v60, %v586_v49  ;;  %v1054_v26 = vpop.f32.mrf.mxu3 }
 0x198   : > { %v588_v6 = vpop.f32.mrf.mxu1 }
 0x199   : > { %v1100_v63 = vadd.f32 %v1054_v26, %v849_v17  ;;  %v589_v23 = vadd.f32 %v588_v6, %v3454_v56 }
 0x19a   : > { %v1307_v59 = vpop.f32.mrf.mxu0 }
 0x19b   : > { %2872 = vmatmul.msk.bf16.gmra.mxu1 %vm309_vm0, %v3468_v36  ;;  %2944 = vmatmul.msk.bf16.gmra.mxu2 %vm309_vm0, %v3472_v2  ;;  %v3822_v43 = vadd.f32 %v1304_v42, %v1100_v63  ;;  %v2966_v2 = vld [vmem:[%s3212_s23 + $0xa9] sm:$0xff]  ;;  %v4122_v42 = vld [vmem:[#allocation2_spill] sm:$0xff] }
 0x19c   : > { %3016 = vmatmul.msk.bf16.gmra.mxu3 %vm309_vm0, %v1896_v14  ;;  %v1897_v24 = vpack.c.bf16 %v2967_v31, %v2966_v2  ;;  %v4125_v31 = vld [vmem:[#allocation10_spill] sm:$0xff] }
 0x19d   : > { %3088 = vmatmul.msk.bf16.gmra.mxu0 %vm309_vm0, %v3500_v20 }
 0x19e   : > { %v806_v44 = vpop.f32.mrf.mxu2 }
 0x19f   : > { %v850_v57 = vadd.f32 %v806_v44, %v589_v23  ;;  %v1057_v46 = vpop.f32.mrf.mxu3 }
 0x1a0   : > { %v590_v61 = vpop.f32.mrf.mxu1 }
 0x1a1   : > { %v1101_v62 = vadd.f32 %v1057_v46, %v850_v57  ;;  %v591_v36 = vadd.f32 %v590_v61, %v3466_v0  ;;  %v4121_v0 = vld [vmem:[#allocation6_spill] sm:$0xff] }
 0x1a2   : > { %v1309_v9 = vpop.f32.mrf.mxu0 }
 0x1a3   : > { %v3828_v30 = vadd.f32 %v1307_v59, %v1101_v62  ;;  %v2969_v59 = vld [vmem:[%s3212_s23 + $0xc9] sm:$0xff] }
 0x1a6   : > { %v808_v27 = vpop.f32.mrf.mxu2 }
 0x1a7   : > { %v851_v41 = vadd.f32 %v808_v27, %v591_v36  ;;  %v1059_v19 = vpop.f32.mrf.mxu3  ;;  %v4124_v36 = vld [vmem:[#allocation7_spill] sm:$0xff]  ;;  %v4126_v27 = vld [vmem:[#allocation4_spill] sm:$0xff] }
 0x1a8   : > { %v593_v13 = vpop.f32.mrf.mxu1 }
 0x1a9   : > { %v1102_v25 = vadd.f32 %v1059_v19, %v851_v41  ;;  %v594_v49 = vadd.f32 %v593_v13, %v4122_v42 }
 0x1aa   : > { %v1312_v56 = vpop.f32.mrf.mxu0 }
 0x1ab   : > { %2873 = vmatmul.msk.bf16.gmra.mxu1 %vm309_vm0, %v3500_v20  ;;  %2945 = vmatmul.msk.bf16.gmra.mxu2 %vm309_vm0, %v3504_v52  ;;  %v3837_v53 = vadd.f32 %v1309_v9, %v1102_v25  ;;  %v4123_v20 = vld [vmem:[#allocation3_spill] sm:$0xff] }
 0x1ac   : > { %3017 = vmatmul.msk.bf16.gmra.mxu3 %vm309_vm0, %v1897_v24  ;;  %v2968_v52 = vld [vmem:[%s3212_s23 + $0xc1] sm:$0xff] }
 0x1ad   : > { %3089 = vmatmul.msk.bf16.gmra.mxu0 %vm309_vm0, %v4121_v0  ;;  %v1898_v61 = vpack.c.bf16 %v2969_v59, %v2968_v52 }
 0x1ae   : > { %v811_v51 = vpop.f32.mrf.mxu2 }
 0x1af   : > { %v852_v18 = vadd.f32 %v811_v51, %v594_v49  ;;  %v1062_v60 = vpop.f32.mrf.mxu3 }
 0x1b0   : > { %v595_v17 = vpop.f32.mrf.mxu1 }
 0x1b1   : > { %v1103_v26 = vadd.f32 %v1062_v60, %v852_v18  ;;  %v596_v63 = vadd.f32 %v595_v17, %v4123_v20  ;;  %v2970_v18 = vld [vmem:[%s3212_s23 + $0xd9] sm:$0xff]  ;;  %v2971_v60 = vld [vmem:[%s3212_s23 + $0xe1] sm:$0xff] }
 0x1b2   : > { %v1314_v6 = vpop.f32.mrf.mxu0 }
 0x1b3   : > { %v3843_v14 = vadd.f32 %v1312_v56, %v1103_v26 }
 0x1b6   : > { %v813_v23 = vpop.f32.mrf.mxu2 }
 0x1b7   : > { %v853_v44 = vadd.f32 %v813_v23, %v596_v63  ;;  %v1064_v57 = vpop.f32.mrf.mxu3  ;;  %v1899_v63 = vpack.c.bf16 %v2971_v60, %v2970_v18 }
 0x1b8   : > { %v598_v46 = vpop.f32.mrf.mxu1 }
 0x1b9   : > { %v1104_v62 = vadd.f32 %v1064_v57, %v853_v44  ;;  %v599_v41 = vadd.f32 %v598_v46, %v4126_v27  ;;  %v4128_v44 = vld [vmem:[#allocation8_spill] sm:$0xff] }
 0x1ba   : > { %v1317_v9 = vpop.f32.mrf.mxu0 }
 0x1bb   : > { %2874 = vmatmul.msk.bf16.gmra.mxu1 %vm309_vm0, %v4121_v0  ;;  %2946 = vmatmul.msk.bf16.gmra.mxu2 %vm309_vm0, %v4124_v36  ;;  %v3852_v2 = vadd.f32 %v1314_v6, %v1104_v62  ;;  %v4127_v0 = vld [vmem:[#allocation5_spill] sm:$0xff] }
 0x1bc   : > { %3018 = vmatmul.msk.bf16.gmra.mxu3 %vm309_vm0, %v1898_v61 }
 0x1bd   : > { %3090 = vmatmul.msk.bf16.gmra.mxu0 %vm309_vm0, %v4125_v31 }
 0x1be   : > { %v816_v19 = vpop.f32.mrf.mxu2 }
 0x1bf   : > { %v854_v13 = vadd.f32 %v816_v19, %v599_v41  ;;  %v1067_v24 = vpop.f32.mrf.mxu3 }
 0x1c0   : > { %v600_v25 = vpop.f32.mrf.mxu1 }
 0x1c1   : > { %v1105_v56 = vadd.f32 %v1067_v24, %v854_v13  ;;  %v601_v51 = vadd.f32 %v600_v25, %v4127_v0  ;;  %v2973_v13 = vld [vmem:[%s3212_s23 + $0xf9] sm:$0xff] }
 0x1c2   : > { %v1319_v42 = vpop.f32.mrf.mxu0 }
 0x1c3   : > { %v3858_v49 = vadd.f32 %v1317_v9, %v1105_v56 }
 0x1c6   : > { %v818_v17 = vpop.f32.mrf.mxu2 }
 0x1c7   : > { %v855_v26 = vadd.f32 %v818_v17, %v601_v51  ;;  %v1069_v6 = vpop.f32.mrf.mxu3 }
 0x1c8   : > { %v603_v20 = vpop.f32.mrf.mxu1 }
 0x1c9   : > { %v1106_v52 = vadd.f32 %v1069_v6, %v855_v26  ;;  %v604_v57 = vadd.f32 %v603_v20, %v4128_v44 }
 0x1ca   : > { %v1322_v59 = vpop.f32.mrf.mxu0 }
 0x1cb   : > { %2875 = vmatmul.msk.bf16.gmra.mxu1 %vm309_vm0, %v4125_v31  ;;  %2947 = vmatmul.msk.bf16.gmra.mxu2 %vm309_vm0, %v3578_v15  ;;  %v3867_v23 = vadd.f32 %v1319_v42, %v1106_v52  ;;  %v4129_v31 = vld [vmem:[#allocation9_spill] sm:$0xff] }
 0x1cc   : > { %3019 = vmatmul.msk.bf16.gmra.mxu3 %vm309_vm0, %v1899_v63  ;;  %v2972_v15 = vld [vmem:[%s3212_s23 + $0xf1] sm:$0xff] }
 0x1cd   : > { %3091 = vmatmul.msk.bf16.gmra.mxu0 %vm309_vm0, %v3596_v8  ;;  %v1900_v0 = vpack.c.bf16 %v2973_v13, %v2972_v15 }
 0x1ce   : > { %v821_v46 = vpop.f32.mrf.mxu2 }
 0x1cf   : > { %v856_v61 = vadd.f32 %v821_v46, %v604_v57  ;;  %v1072_v62 = vpop.f32.mrf.mxu3  ;;  %v4130_v57 = vld [vmem:[#allocation11_spill] sm:$0xff] }
 0x1d0   : > { %v605_v9 = vpop.f32.mrf.mxu1 }
 0x1d1   : > { %v1107_v36 = vadd.f32 %v1072_v62, %v856_v61  ;;  %v606_v19 = vadd.f32 %v605_v9, %v4129_v31  ;;  %v2974_v61 = vld [vmem:[%s3212_s23 + $0x109] sm:$0xff]  ;;  %v2975_v62 = vld [vmem:[%s3212_s23 + $0x111] sm:$0xff] }
 0x1d2   : > { %v1324_v27 = vpop.f32.mrf.mxu0 }
 0x1d3   : > { %v3873_v41 = vadd.f32 %v1322_v59, %v1107_v36 }
 0x1d6   : > { %v823_v24 = vpop.f32.mrf.mxu2 }
 0x1d7   : > { %v857_v25 = vadd.f32 %v823_v24, %v606_v19  ;;  %v1074_v56 = vpop.f32.mrf.mxu3  ;;  %v1901_v19 = vpack.c.bf16 %v2975_v62, %v2974_v61 }
 0x1d8   : > { %v1497_v42 = vpop.f32.mrf.mxu1 }
 0x1d9   : > { %v1108_v51 = vadd.f32 %v1074_v56, %v857_v25  ;;  %v1577_v17 = vadd.f32 %v1497_v42, %v3590_v33 }
 0x1da   : > { %v2248_v18 = vpop.f32.mrf.mxu0 }
 0x1db   : > { %2876 = vmatmul.msk.bf16.gmra.mxu1 %vm309_vm0, %v3596_v8  ;;  %2948 = vmatmul.msk.bf16.gmra.mxu2 %vm309_vm0, %v3598_v45  ;;  %v3882_v60 = vadd.f32 %v1324_v27, %v1108_v51  ;;  %v3891_v8 = vld [vmem:[%s4098_s2] ss:$0 sm:$0xff] }
 0x1dc   : > { %3020 = vmatmul.msk.bf16.gmra.mxu3 %vm309_vm0, %v1900_v0 }
 0x1dd   : > { %3092 = vmatmul.msk.bf16.gmra.mxu0 %vm309_vm0, %v3618_v34 }
 0x1de   : > { %v1748_v26 = vpop.f32.mrf.mxu2 }
 0x1df   : > { %v1828_v6 = vadd.f32 %v1748_v26, %v1577_v17  ;;  %v1998_v20 = vpop.f32.mrf.mxu3 }
 0x1e0   : > { %v1499_v63 = vpop.f32.mrf.mxu1 }
 0x1e1   : > { %v2078_v52 = vadd.f32 %v1998_v20, %v1828_v6  ;;  %v1578_v46 = vadd.f32 %v1499_v63, %v4130_v57 }
 0x1e2   : > { %v2250_v45 = vpop.f32.mrf.mxu0 }
 0x1e3   : > { %v2328_v59 = vadd.f32 %v2248_v18, %v2078_v52 }
 0x1e5   : > { %v2364_v44 = vadd.f32 %v3891_v8, %v2328_v59  ;;  %v2977_v59 = vld [vmem:[%s3212_s23 + $0x129] sm:$0xff] }
 0x1e6   : > { %v1750_v33 = vpop.f32.mrf.mxu2 }
 0x1e7   : > { %v2396_v9 = vmax.f32 %v2364_v44, 0.0  ;;  %v1829_v36 = vadd.f32 %v1750_v33, %v1578_v46  ;;  %v2000_v27 = vpop.f32.mrf.mxu3 }
 0x1e8   : > { %v1502_v31 = vpop.f32.mrf.mxu1 }
 0x1e9   : > { %v2428_v15 = vpack.c.bf16 %v2396_v9, %v2396_v9  ;;  %v2079_v13 = vadd.f32 %v2000_v27, %v1829_v36  ;;  %v1579_v42 = vadd.f32 %v1502_v31, %v3612_v35  ;;  %v4131_v31 = vld [vmem:[#allocation12_spill] sm:$0xff] }
 0x1ea   : > { %v2253_v24 = vpop.f32.mrf.mxu0 }
 0x1eb   : > { %2461 = vst.msk [vmem:[%s3901_s22] sm:$0xf] %vm2460_vm1, %v2428_v15  ;;  %v2329_v25 = vadd.f32 %v2250_v45, %v2079_v13  ;;  %2877 = vmatmul.msk.bf16.gmra.mxu1 %vm309_vm0, %v3618_v34  ;;  %2949 = vmatmul.msk.bf16.gmra.mxu2 %vm309_vm0, %v3620_v4  ;;  %v2976_v45 = vld [vmem:[%s3212_s23 + $0x121] sm:$0xff] }
 0x1ec   : > { %3021 = vmatmul.msk.bf16.gmra.mxu3 %vm309_vm0, %v1901_v19  ;;  %v1902_v62 = vpack.c.bf16 %v2977_v59, %v2976_v45 }
 0x1ed   : > { %3093 = vmatmul.msk.bf16.gmra.mxu0 %vm309_vm0, %v3652_v58  ;;  %v2365_v56 = vadd.f32 %v3891_v8, %v2329_v25 }
 0x1ee   : > { %v1753_v0 = vpop.f32.mrf.mxu2 }
 0x1ef   : > { %v2397_v51 = vmax.f32 %v2365_v56, 0.0  ;;  %v1830_v18 = vadd.f32 %v1753_v0, %v1579_v42  ;;  %v2003_v17 = vpop.f32.mrf.mxu3 }
 0x1f0   : > { %v1504_v26 = vpop.f32.mrf.mxu1 }
 0x1f1   : > { %v2429_v34 = vpack.c.bf16 %v2397_v51, %v2397_v51  ;;  %v2080_v6 = vadd.f32 %v2003_v17, %v1830_v18  ;;  %v1580_v52 = vadd.f32 %v1504_v26, %v3627_v10  ;;  %v4132_v18 = vld [vmem:[#allocation13_spill] sm:$0xff] }
 0x1f2   : > { %v2255_v20 = vpop.f32.mrf.mxu0  ;;  %v2978_v26 = vld [vmem:[%s3212_s23 + $0x139] sm:$0xff] }
 0x1f3   : > { %2462 = vst.msk [vmem:[%s3901_s22 + $0x4] sm:$0xf] %vm2460_vm1, %v2429_v34  ;;  %v2330_v4 = vadd.f32 %v2253_v24, %v2080_v6  ;;  %v2979_v34 = vld [vmem:[%s3212_s23 + $0x141] sm:$0xff] }
 0x1f4   : > { %v1903_v45 = vpack.c.bf16 %v2979_v34, %v2978_v26 }
 0x1f5   : > { %v2366_v63 = vadd.f32 %v3891_v8, %v2330_v4 }
 0x1f6   : > { %v1755_v44 = vpop.f32.mrf.mxu2 }
 0x1f7   : > { %v2398_v35 = vmax.f32 %v2366_v63, 0.0  ;;  %v1831_v57 = vadd.f32 %v1755_v44, %v1580_v52  ;;  %v2005_v46 = vpop.f32.mrf.mxu3 }
 0x1f8   : > { %v1507_v61 = vpop.f32.mrf.mxu1 }
 0x1f9   : > { %v2430_v33 = vpack.c.bf16 %v2398_v35, %v2398_v35  ;;  %v2081_v9 = vadd.f32 %v2005_v46, %v1831_v57  ;;  %v1581_v19 = vadd.f32 %v1507_v61, %v4131_v31 }
 0x1fa   : > { %v2258_v36 = vpop.f32.mrf.mxu0 }
 0x1fb   : > { %2463 = vst.msk [vmem:[%s3901_s22 + $0x8] sm:$0xf] %vm2460_vm1, %v2430_v33  ;;  %v2331_v27 = vadd.f32 %v2255_v20, %v2081_v9  ;;  %2878 = vmatmul.msk.bf16.gmra.mxu1 %vm309_vm0, %v3652_v58  ;;  %2950 = vmatmul.msk.bf16.gmra.mxu2 %vm309_vm0, %v3654_v28 }
 0x1fc   : > { %3022 = vmatmul.msk.bf16.gmra.mxu3 %vm309_vm0, %v1902_v62 }
 0x1fd   : > { %3094 = vmatmul.msk.bf16.gmra.mxu0 %vm309_vm0, %v3674_v3  ;;  %v2367_v10 = vadd.f32 %v3891_v8, %v2331_v27 }
 0x1fe   : > { %v1758_v15 = vpop.f32.mrf.mxu2 }
 0x1ff   : > { %v2399_v13 = vmax.f32 %v2367_v10, 0.0  ;;  %v1832_v24 = vadd.f32 %v1758_v15, %v1581_v19  ;;  %v2008_v25 = vpop.f32.mrf.mxu3  ;;  %v4133_v15 = vld [vmem:[#allocation14_spill] sm:$0xff] }
 0x200   : > { %v1509_v56 = vpop.f32.mrf.mxu1 }
 0x201   : > { %v2431_v58 = vpack.c.bf16 %v2399_v13, %v2399_v13  ;;  %v2082_v42 = vadd.f32 %v2008_v25, %v1832_v24  ;;  %v1582_v17 = vadd.f32 %v1509_v56, %v4132_v18  ;;  %v2980_v24 = vld [vmem:[%s3212_s23 + $0x151] sm:$0xff]  ;;  %v2981_v25 = vld [vmem:[%s3212_s23 + $0x159] sm:$0xff] }
 0x202   : > { %v2260_v0 = vpop.f32.mrf.mxu0 }
 0x203   : > { %2464 = vst.msk [vmem:[%s3901_s22 + $0xc] sm:$0xf] %vm2460_vm1, %v2431_v58  ;;  %v2332_v28 = vadd.f32 %v2258_v36, %v2082_v42 }
 0x205   : > { %v2368_v51 = vadd.f32 %v3891_v8, %v2332_v28  ;;  %v1904_v28 = vpack.c.bf16 %v2981_v25, %v2980_v24 }
 0x206   : > { %v1760_v6 = vpop.f32.mrf.mxu2 }
 0x207   : > { %v2400_v20 = vmax.f32 %v2368_v51, 0.0  ;;  %v1833_v4 = vadd.f32 %v1760_v6, %v1582_v17  ;;  %v2010_v63 = vpop.f32.mrf.mxu3 }
 0x208   : > { %v1512_v52 = vpop.f32.mrf.mxu1 }
 0x209   : > { %v2432_v59 = vpack.c.bf16 %v2400_v20, %v2400_v20  ;;  %v2083_v44 = vadd.f32 %v2010_v63, %v1833_v4  ;;  %v1583_v61 = vadd.f32 %v1512_v52, %v3668_v37 }
 0x20a   : > { %v2263_v35 = vpop.f32.mrf.mxu0 }
 0x20b   : > { %2465 = vst.msk [vmem:[%s3901_s22 + $0x10] sm:$0xf] %vm2460_vm1, %v2432_v59  ;;  %v2333_v57 = vadd.f32 %v2260_v0, %v2083_v44  ;;  %2879 = vmatmul.msk.bf16.gmra.mxu1 %vm309_vm0, %v3674_v3  ;;  %2951 = vmatmul.msk.bf16.gmra.mxu2 %vm309_vm0, %v3676_v55 }
 0x20c   : > { %3023 = vmatmul.msk.bf16.gmra.mxu3 %vm309_vm0, %v1903_v45 }
 0x20d   : > { %3095 = vmatmul.msk.bf16.gmra.mxu0 %vm309_vm0, %v3696_v38  ;;  %v2369_v46 = vadd.f32 %v3891_v8, %v2333_v57  ;;  %v4134_v57 = vld [vmem:[#allocation15_spill] sm:$0xff] }
 0x20e   : > { %v1763_v62 = vpop.f32.mrf.mxu2 }
 0x20f   : > { %v2401_v33 = vmax.f32 %v2369_v46, 0.0  ;;  %v1834_v9 = vadd.f32 %v1763_v62, %v1583_v61  ;;  %v2013_v36 = vpop.f32.mrf.mxu3  ;;  %v2982_v61 = vld [vmem:[%s3212_s23 + $0x169] sm:$0xff]  ;;  %v2983_v62 = vld [vmem:[%s3212_s23 + $0x171] sm:$0xff] }
 0x210   : > { %v1514_v27 = vpop.f32.mrf.mxu1 }
 0x211   : > { %v2433_v3 = vpack.c.bf16 %v2401_v33, %v2401_v33  ;;  %v2084_v10 = vadd.f32 %v2013_v36, %v1834_v9  ;;  %v1584_v13 = vadd.f32 %v1514_v27, %v4133_v15 }
 0x212   : > { %v2265_v31 = vpop.f32.mrf.mxu0 }
 0x213   : > { %2466 = vst.msk [vmem:[%s3901_s22 + $0x14] sm:$0xf] %vm2460_vm1, %v2433_v3  ;;  %v2334_v55 = vadd.f32 %v2263_v35, %v2084_v10  ;;  %v1905_v3 = vpack.c.bf16 %v2983_v62, %v2982_v61 }
 0x215   : > { %v2370_v19 = vadd.f32 %v3891_v8, %v2334_v55 }
 0x216   : > { %v1765_v56 = vpop.f32.mrf.mxu2 }
 0x217   : > { %v2402_v37 = vmax.f32 %v2370_v19, 0.0  ;;  %v1835_v58 = vadd.f32 %v1765_v56, %v1584_v13  ;;  %v2015_v42 = vpop.f32.mrf.mxu3  ;;  %v4135_v13 = vld [vmem:[#allocation16_spill] sm:$0xff] }
 0x218   : > { %v1517_v0 = vpop.f32.mrf.mxu1 }
 0x219   : > { %v2434_v51 = vpack.c.bf16 %v2402_v37, %v2402_v37  ;;  %v2085_v18 = vadd.f32 %v2015_v42, %v1835_v58  ;;  %v1585_v6 = vadd.f32 %v1517_v0, %v3689_v39 }
 0x21a   : > { %v2268_v17 = vpop.f32.mrf.mxu0 }
 0x21b   : > { %2467 = vst.msk [vmem:[%s3901_s22 + $0x18] sm:$0xf] %vm2460_vm1, %v2434_v51  ;;  %v2335_v26 = vadd.f32 %v2265_v31, %v2085_v18  ;;  %2880 = vmatmul.msk.bf16.gmra.mxu1 %vm309_vm0, %v3696_v38  ;;  %2952 = vmatmul.msk.bf16.gmra.mxu2 %vm309_vm0, %v3698_v16  ;;  %v2841_v51 = vld [vmem:[%s3212_s23 + $0x172] sm:$0xff]  ;;  %v2912_v18 = vld [vmem:[%s3212_s23 + $0x180] sm:$0xff] }
 0x21c   : > { %3024 = vmatmul.msk.bf16.gmra.mxu3 %vm309_vm0, %v1904_v28  ;;  %v2840_v28 = vld [vmem:[%s3212_s23 + $0x16a] sm:$0xff] }
 0x21d   : > { %3096 = vmatmul.msk.bf16.gmra.mxu0 %vm309_vm0, %v3718_v54  ;;  %v2371_v34 = vadd.f32 %v3891_v8, %v2335_v26  ;;  %v2984_v26 = vld [vmem:[%s3212_s23 + $0x181] sm:$0xff] }
 0x21e   : > { %v1768_v20 = vpop.f32.mrf.mxu2 }
 0x21f   : > { %v2403_v4 = vmax.f32 %v2371_v34, 0.0  ;;  %v1836_v63 = vadd.f32 %v1768_v20, %v1585_v6  ;;  %v2018_v52 = vpop.f32.mrf.mxu3  ;;  %v4136_v6 = vld [vmem:[#allocation17_spill] sm:$0xff] }
 0x220   : > { %v1519_v45 = vpop.f32.mrf.mxu1 }
 0x221   : > { %v2435_v38 = vpack.c.bf16 %v2403_v4, %v2403_v4  ;;  %v2086_v59 = vadd.f32 %v2018_v52, %v1836_v63  ;;  %v1586_v46 = vadd.f32 %v1519_v45, %v4134_v57  ;;  %v2985_v4 = vld [vmem:[%s3212_s23 + $0x189] sm:$0xff] }
 0x222   : > { %v2270_v44 = vpop.f32.mrf.mxu0  ;;  %v3056_v63 = vld [vmem:[%s3212_s23 + $0x182] sm:$0xff]  ;;  %v3057_v52 = vld [vmem:[%s3212_s23 + $0x18a] sm:$0xff] }
 0x223   : > { %2468 = vst.msk [vmem:[%s3901_s22 + $0x1c] sm:$0xf] %vm2460_vm1, %v2435_v38  ;;  %v2336_v16 = vadd.f32 %v2268_v17, %v2086_v59  ;;  %v2913_v17 = vld [vmem:[%s3212_s23 + $0x188] sm:$0xff]  ;;  %v2156_v61 = vpack.c.bf16 %v3057_v52, %v3056_v63 }
 0x225   : > { %v2372_v35 = vadd.f32 %v3891_v8, %v2336_v16  ;;  %v1405_v16 = vpack.c.bf16 %v2841_v51, %v2840_v28 }
 0x226   : > { %v1770_v33 = vpop.f32.mrf.mxu2 }
 0x227   : > { %v2404_v39 = vmax.f32 %v2372_v35, 0.0  ;;  %v1837_v9 = vadd.f32 %v1770_v33, %v1586_v46  ;;  %v2020_v36 = vpop.f32.mrf.mxu3  ;;  %v1656_v35 = vpack.c.bf16 %v2913_v17, %v2912_v18  ;;  %v1906_v46 = vpack.c.bf16 %v2985_v4, %v2984_v26 }
 0x228   : > { %v1522_v27 = vpop.f32.mrf.mxu1 }
 0x229   : > { %v2436_v10 = vpack.c.bf16 %v2404_v39, %v2404_v39  ;;  %v2087_v31 = vadd.f32 %v2020_v36, %v1837_v9  ;;  %v1587_v24 = vadd.f32 %v1522_v27, %v4135_v13 }
 0x22a   : > { %v2273_v55 = vpop.f32.mrf.mxu0 }
 0x22b   : > { %2469 = vst.msk [vmem:[%s3901_s22 + $0x20] sm:$0xf] %vm2460_vm1, %v2436_v10  ;;  %v2337_v19 = vadd.f32 %v2270_v44, %v2087_v31  ;;  %2881 = vmatmul.msk.bf16.gmra.mxu1 %vm309_vm0, %v3718_v54  ;;  %2953 = vmatmul.msk.bf16.gmra.mxu2 %vm309_vm0, %v3720_v50 }
 0x22c   : > { %3025 = vmatmul.msk.bf16.gmra.mxu3 %vm309_vm0, %v1905_v3 }
 0x22d   : > { %3097 = vmatmul.msk.bf16.gmra.mxu0 %vm309_vm0, %v3742_v21  ;;  %v2373_v15 = vadd.f32 %v3891_v8, %v2337_v19 }
 0x22e   : > { %v1773_v25 = vpop.f32.mrf.mxu2 }
 0x22f   : > { %v2405_v56 = vmax.f32 %v2373_v15, 0.0  ;;  %v1838_v54 = vadd.f32 %v1773_v25, %v1587_v24  ;;  %v2023_v37 = vpop.f32.mrf.mxu3 }
 0x230   : > { %v1524_v50 = vpop.f32.mrf.mxu1 }
 0x231   : > { %v2437_v58 = vpack.c.bf16 %v2405_v56, %v2405_v56  ;;  %v2088_v42 = vadd.f32 %v2023_v37, %v1838_v54  ;;  %v1588_v20 = vadd.f32 %v1524_v50, %v4136_v6  ;;  %v2914_v56 = vld [vmem:[%s3212_s23 + $0x198] sm:$0xff]  ;;  %v2915_v54 = vld [vmem:[%s3212_s23 + $0x1a0] sm:$0xff] }
 0x232   : > { %v2275_v0 = vpop.f32.mrf.mxu0  ;;  %v2986_v37 = vld [vmem:[%s3212_s23 + $0x199] sm:$0xff]  ;;  %v1657_v17 = vpack.c.bf16 %v2915_v54, %v2914_v56 }
 0x233   : > { %2470 = vst.msk [vmem:[%s3901_s22 + $0x24] sm:$0xf] %vm2460_vm1, %v2437_v58  ;;  %v2338_v21 = vadd.f32 %v2273_v55, %v2088_v42  ;;  %v2987_v58 = vld [vmem:[%s3212_s23 + $0x1a1] sm:$0xff] }
 0x234   : > { %v3058_v42 = vld [vmem:[%s3212_s23 + $0x19a] sm:$0xff] }
 0x235   : > { %v2374_v34 = vadd.f32 %v3891_v8, %v2338_v21 }
 0x236   : > { %v1775_v45 = vpop.f32.mrf.mxu2 }
 0x237   : > { %v2406_v38 = vmax.f32 %v2374_v34, 0.0  ;;  %v1839_v59 = vadd.f32 %v1775_v45, %v1588_v20  ;;  %v2025_v44 = vpop.f32.mrf.mxu3  ;;  %v1907_v34 = vpack.c.bf16 %v2987_v58, %v2986_v37 }
 0x238   : > { %v1527_v57 = vpop.f32.mrf.mxu1 }
 0x239   : > { %v2438_v62 = vpack.c.bf16 %v2406_v38, %v2406_v38  ;;  %v2089_v33 = vadd.f32 %v2025_v44, %v1839_v59  ;;  %v1589_v27 = vadd.f32 %v1527_v57, %v3733_v32 }
 0x23a   : > { %v2278_v39 = vpop.f32.mrf.mxu0 }
 0x23b   : > { %2471 = vst.msk [vmem:[%s3901_s22 + $0x28] sm:$0xf] %vm2460_vm1, %v2438_v62  ;;  %v2339_v9 = vadd.f32 %v2275_v0, %v2089_v33  ;;  %2882 = vmatmul.msk.bf16.gmra.mxu1 %vm309_vm0, %v1405_v16  ;;  %2954 = vmatmul.msk.bf16.gmra.mxu2 %vm309_vm0, %v1656_v35  ;;  %v3059_v0 = vld [vmem:[%s3212_s23 + $0x1a2] sm:$0xff] }
 0x23c   : > { %3026 = vmatmul.msk.bf16.gmra.mxu3 %vm309_vm0, %v1906_v46  ;;  %v2157_v6 = vpack.c.bf16 %v3059_v0, %v3058_v42 }
 0x23d   : > { %3098 = vmatmul.msk.bf16.gmra.mxu0 %vm309_vm0, %v2156_v61  ;;  %v2375_v36 = vadd.f32 %v3891_v8, %v2339_v9 }
 0x23e   : > { %v1778_v3 = vpop.f32.mrf.mxu2 }
 0x23f   : > { %v2407_v10 = vmax.f32 %v2375_v36, 0.0  ;;  %v1840_v31 = vadd.f32 %v1778_v3, %v1589_v27  ;;  %v2028_v55 = vpop.f32.mrf.mxu3 }
 0x240   : > { %v1529_v19 = vpop.f32.mrf.mxu1 }
 0x241   : > { %v2439_v15 = vpack.c.bf16 %v2407_v10, %v2407_v10  ;;  %v2090_v13 = vadd.f32 %v2028_v55, %v1840_v31  ;;  %v1590_v32 = vadd.f32 %v1529_v19, %v3748_v29 }
 0x242   : > { %v2280_v24 = vpop.f32.mrf.mxu0 }
 0x243   : > { %2472 = vst.msk [vmem:[%s3901_s22 + $0x2c] sm:$0xf] %vm2460_vm1, %v2439_v15  ;;  %v2340_v25 = vadd.f32 %v2278_v39, %v2090_v13 }
 0x245   : > { %v2376_v50 = vadd.f32 %v3891_v8, %v2340_v25 }
 0x246   : > { %v1780_v21 = vpop.f32.mrf.mxu2 }
 0x247   : > { %v2408_v28 = vmax.f32 %v2376_v50, 0.0  ;;  %v1841_v51 = vadd.f32 %v1780_v21, %v1590_v32  ;;  %v2030_v18 = vpop.f32.mrf.mxu3 }
 0x248   : > { %v1532_v26 = vpop.f32.mrf.mxu1 }
 0x249   : > { %v2440_v20 = vpack.c.bf16 %v2408_v28, %v2408_v28  ;;  %v2091_v4 = vadd.f32 %v2030_v18, %v1841_v51  ;;  %v1591_v45 = vadd.f32 %v1532_v26, %v3753_v22 }
 0x24a   : > { %v2283_v63 = vpop.f32.mrf.mxu0 }
 0x24b   : > { %2473 = vst.msk [vmem:[%s3901_s22 + $0x30] sm:$0xf] %vm2460_vm1, %v2440_v20  ;;  %v2341_v52 = vadd.f32 %v2280_v24, %v2091_v4  ;;  %2883 = vmatmul.msk.bf16.gmra.mxu1 %vm309_vm0, %v2156_v61  ;;  %2955 = vmatmul.msk.bf16.gmra.mxu2 %vm309_vm0, %v1657_v17 }
 0x24c   : > { %3027 = vmatmul.msk.bf16.gmra.mxu3 %vm309_vm0, %v1907_v34 }
 0x24d   : > { %3099 = vmatmul.msk.bf16.gmra.mxu0 %vm309_vm0, %v2157_v6  ;;  %v2377_v29 = vadd.f32 %v3891_v8, %v2341_v52 }
 0x24e   : > { %v1783_v38 = vpop.f32.mrf.mxu2 }
 0x24f   : > { %v2409_v59 = vmax.f32 %v2377_v29, 0.0  ;;  %v1842_v44 = vadd.f32 %v1783_v38, %v1591_v45  ;;  %v2033_v16 = vpop.f32.mrf.mxu3 }
 0x250   : > { %v1534_v35 = vpop.f32.mrf.mxu1 }
 0x251   : > { %v2441_v57 = vpack.c.bf16 %v2409_v59, %v2409_v59  ;;  %v2092_v46 = vadd.f32 %v2033_v16, %v1842_v44  ;;  %v1592_v39 = vadd.f32 %v1534_v35, %v3762_v1 }
 0x252   : > { %v2285_v62 = vpop.f32.mrf.mxu0 }
 0x253   : > { %2474 = vst.msk [vmem:[%s3901_s22 + $0x34] sm:$0xf] %vm2460_vm1, %v2441_v57  ;;  %v2342_v61 = vadd.f32 %v2283_v63, %v2092_v46 }
 0x255   : > { %v2378_v33 = vadd.f32 %v3891_v8, %v2342_v61 }
 0x256   : > { %v1785_v9 = vpop.f32.mrf.mxu2 }
 0x257   : > { %v2410_v36 = vmax.f32 %v2378_v33, 0.0  ;;  %v1843_v27 = vadd.f32 %v1785_v9, %v1592_v39  ;;  %v2035_v22 = vpop.f32.mrf.mxu3 }
 0x258   : > { %v1537_v3 = vpop.f32.mrf.mxu1 }
 0x259   : > { %v2442_v10 = vpack.c.bf16 %v2410_v36, %v2410_v36  ;;  %v2093_v31 = vadd.f32 %v2035_v22, %v1843_v27  ;;  %v1593_v13 = vadd.f32 %v1537_v3, %v3768_v40 }
 0x25a   : > { %v2288_v55 = vpop.f32.mrf.mxu0 }
 0x25b   : > { %2475 = vst.msk [vmem:[%s3901_s22 + $0x38] sm:$0xf] %vm2460_vm1, %v2442_v10  ;;  %v2343_v19 = vadd.f32 %v2285_v62, %v2093_v31 }
 0x25d   : > { %v2379_v15 = vadd.f32 %v3891_v8, %v2343_v19 }
 0x25e   : > { %v1788_v24 = vpop.f32.mrf.mxu2 }
 0x25f   : > { %v2411_v25 = vmax.f32 %v2379_v15, 0.0  ;;  %v1844_v56 = vadd.f32 %v1788_v24, %v1593_v13  ;;  %v2038_v1 = vpop.f32.mrf.mxu3 }
 0x260   : > { %v1539_v54 = vpop.f32.mrf.mxu1 }
 0x261   : > { %v2443_v37 = vpack.c.bf16 %v2411_v25, %v2411_v25  ;;  %v2094_v50 = vadd.f32 %v2038_v1, %v1844_v56  ;;  %v1594_v0 = vadd.f32 %v1539_v54, %v3777_v48 }
 0x262   : > { %v2290_v32 = vpop.f32.mrf.mxu0 }
 0x263   : > { %2476 = vst.msk [vmem:[%s3901_s22 + $0x3c] sm:$0xf] %vm2460_vm1, %v2443_v37  ;;  %v2344_v58 = vadd.f32 %v2288_v55, %v2094_v50 }
 0x265   : > { %v2380_v42 = vadd.f32 %v3891_v8, %v2344_v58 }
 0x266   : > { %v1790_v21 = vpop.f32.mrf.mxu2 }
 0x267   : > { %v2412_v28 = vmax.f32 %v2380_v42, 0.0  ;;  %v1845_v51 = vadd.f32 %v1790_v21, %v1594_v0  ;;  %v2040_v40 = vpop.f32.mrf.mxu3 }
 0x268   : > { %v1542_v18 = vpop.f32.mrf.mxu1 }
 0x269   : > { %v2444_v17 = vpack.c.bf16 %v2412_v28, %v2412_v28  ;;  %v2095_v26 = vadd.f32 %v2040_v40, %v1845_v51  ;;  %v1595_v4 = vadd.f32 %v1542_v18, %v3783_v11 }
 0x26a   : > { %v2293_v34 = vpop.f32.mrf.mxu0 }
 0x26b   : > { %2477 = vst.msk [vmem:[%s3901_s22 + $0x40] sm:$0xf] %vm2460_vm1, %v2444_v17  ;;  %v2345_v6 = vadd.f32 %v2290_v32, %v2095_v26 }
 0x26d   : > { %v2381_v20 = vadd.f32 %v3891_v8, %v2345_v6 }
 0x26e   : > { %v1793_v63 = vpop.f32.mrf.mxu2 }
 0x26f   : > { %v2413_v52 = vmax.f32 %v2381_v20, 0.0  ;;  %v1846_v29 = vadd.f32 %v1793_v63, %v1595_v4  ;;  %v2043_v48 = vpop.f32.mrf.mxu3 }
 0x270   : > { %v1544_v45 = vpop.f32.mrf.mxu1 }
 0x271   : > { %v2445_v38 = vpack.c.bf16 %v2413_v52, %v2413_v52  ;;  %v2096_v59 = vadd.f32 %v2043_v48, %v1846_v29  ;;  %v1596_v57 = vadd.f32 %v1544_v45, %v3792_v47 }
 0x272   : > { %v2295_v44 = vpop.f32.mrf.mxu0 }
 0x273   : > { %2478 = vst.msk [vmem:[%s3901_s22 + $0x44] sm:$0xf] %vm2460_vm1, %v2445_v38  ;;  %v2346_v16 = vadd.f32 %v2293_v34, %v2096_v59 }
 0x275   : > { %v2382_v35 = vadd.f32 %v3891_v8, %v2346_v16 }
 0x276   : > { %v1795_v46 = vpop.f32.mrf.mxu2 }
 0x277   : > { %v2414_v62 = vmax.f32 %v2382_v35, 0.0  ;;  %v1847_v61 = vadd.f32 %v1795_v46, %v1596_v57  ;;  %v2045_v11 = vpop.f32.mrf.mxu3 }
 0x278   : > { %v1547_v33 = vpop.f32.mrf.mxu1 }
 0x279   : > { %v2446_v39 = vpack.c.bf16 %v2414_v62, %v2414_v62  ;;  %v2097_v9 = vadd.f32 %v2045_v11, %v1847_v61  ;;  %v1597_v3 = vadd.f32 %v1547_v33, %v3798_v5 }
 0x27a   : > { %v2298_v36 = vpop.f32.mrf.mxu0 }
 0x27b   : > { %2479 = vst.msk [vmem:[%s3901_s22 + $0x48] sm:$0xf] %vm2460_vm1, %v2446_v39  ;;  %v2347_v27 = vadd.f32 %v2295_v44, %v2097_v9 }
 0x27d   : > { %v2383_v22 = vadd.f32 %v3891_v8, %v2347_v27 }
 0x27e   : > { %v1798_v10 = vpop.f32.mrf.mxu2 }
 0x27f   : > { %v2415_v31 = vmax.f32 %v2383_v22, 0.0  ;;  %v1848_v55 = vadd.f32 %v1798_v10, %v1597_v3  ;;  %v2048_v47 = vpop.f32.mrf.mxu3 }
 0x280   : > { %v1549_v19 = vpop.f32.mrf.mxu1 }
 0x281   : > { %v2447_v15 = vpack.c.bf16 %v2415_v31, %v2415_v31  ;;  %v2098_v13 = vadd.f32 %v2048_v47, %v1848_v55  ;;  %v1598_v1 = vadd.f32 %v1549_v19, %v3807_v12 }
 0x282   : > { %v2300_v24 = vpop.f32.mrf.mxu0 }
 0x283   : > { %2480 = vst.msk [vmem:[%s3901_s22 + $0x4c] sm:$0xf] %vm2460_vm1, %v2447_v15  ;;  %v2348_v25 = vadd.f32 %v2298_v36, %v2098_v13 }
 0x285   : > { %v2384_v56 = vadd.f32 %v3891_v8, %v2348_v25 }
 0x286   : > { %v1800_v54 = vpop.f32.mrf.mxu2 }
 0x287   : > { %v2416_v37 = vmax.f32 %v2384_v56, 0.0  ;;  %v1849_v50 = vadd.f32 %v1800_v54, %v1598_v1  ;;  %v2050_v5 = vpop.f32.mrf.mxu3 }
 0x288   : > { %v1552_v32 = vpop.f32.mrf.mxu1 }
 0x289   : > { %v2448_v58 = vpack.c.bf16 %v2416_v37, %v2416_v37  ;;  %v2099_v42 = vadd.f32 %v2050_v5, %v1849_v50  ;;  %v1599_v51 = vadd.f32 %v1552_v32, %v3813_v7 }
 0x28a   : > { %v2303_v0 = vpop.f32.mrf.mxu0 }
 0x28b   : > { %2481 = vst.msk [vmem:[%s3901_s22 + $0x50] sm:$0xf] %vm2460_vm1, %v2448_v58  ;;  %v2349_v21 = vadd.f32 %v2300_v24, %v2099_v42 }
 0x28d   : > { %v2385_v28 = vadd.f32 %v3891_v8, %v2349_v21 }
 0x28e   : > { %v1803_v40 = vpop.f32.mrf.mxu2 }
 0x28f   : > { %v2417_v18 = vmax.f32 %v2385_v28, 0.0  ;;  %v1850_v17 = vadd.f32 %v1803_v40, %v1599_v51  ;;  %v2053_v12 = vpop.f32.mrf.mxu3 }
 0x290   : > { %v1554_v26 = vpop.f32.mrf.mxu1 }
 0x291   : > { %v2449_v34 = vpack.c.bf16 %v2417_v18, %v2417_v18  ;;  %v2100_v6 = vadd.f32 %v2053_v12, %v1850_v17  ;;  %v1600_v52 = vadd.f32 %v1554_v26, %v3822_v43 }
 0x292   : > { %v2305_v20 = vpop.f32.mrf.mxu0 }
 0x293   : > { %2482 = vst.msk [vmem:[%s3901_s22 + $0x54] sm:$0xf] %vm2460_vm1, %v2449_v34  ;;  %v2350_v4 = vadd.f32 %v2303_v0, %v2100_v6 }
 0x295   : > { %v2386_v63 = vadd.f32 %v3891_v8, %v2350_v4 }
 0x296   : > { %v1805_v29 = vpop.f32.mrf.mxu2 }
 0x297   : > { %v2418_v48 = vmax.f32 %v2386_v63, 0.0  ;;  %v1851_v45 = vadd.f32 %v1805_v29, %v1600_v52  ;;  %v2055_v7 = vpop.f32.mrf.mxu3 }
 0x298   : > { %v1557_v38 = vpop.f32.mrf.mxu1 }
 0x299   : > { %v2450_v59 = vpack.c.bf16 %v2418_v48, %v2418_v48  ;;  %v2101_v44 = vadd.f32 %v2055_v7, %v1851_v45  ;;  %v1601_v46 = vadd.f32 %v1557_v38, %v3828_v30 }
 0x29a   : > { %v2308_v16 = vpop.f32.mrf.mxu0 }
 0x29b   : > { %2483 = vst.msk [vmem:[%s3901_s22 + $0x58] sm:$0xf] %vm2460_vm1, %v2450_v59  ;;  %v2351_v35 = vadd.f32 %v2305_v20, %v2101_v44 }
 0x29d   : > { %v2387_v57 = vadd.f32 %v3891_v8, %v2351_v35 }
 0x29e   : > { %v1808_v62 = vpop.f32.mrf.mxu2 }
 0x29f   : > { %v2419_v61 = vmax.f32 %v2387_v57, 0.0  ;;  %v1852_v11 = vadd.f32 %v1808_v62, %v1601_v46  ;;  %v2058_v43 = vpop.f32.mrf.mxu3 }
 0x2a0   : > { %v1559_v33 = vpop.f32.mrf.mxu1 }
 0x2a1   : > { %v2451_v39 = vpack.c.bf16 %v2419_v61, %v2419_v61  ;;  %v2102_v9 = vadd.f32 %v2058_v43, %v1852_v11  ;;  %v1602_v3 = vadd.f32 %v1559_v33, %v3837_v53 }
 0x2a2   : > { %v2310_v36 = vpop.f32.mrf.mxu0 }
 0x2a3   : > { %2484 = vst.msk [vmem:[%s3901_s22 + $0x5c] sm:$0xf] %vm2460_vm1, %v2451_v39  ;;  %v2352_v27 = vadd.f32 %v2308_v16, %v2102_v9 }
 0x2a5   : > { %v2388_v22 = vadd.f32 %v3891_v8, %v2352_v27 }
 0x2a6   : > { %v1810_v10 = vpop.f32.mrf.mxu2 }
 0x2a7   : > { %v2420_v31 = vmax.f32 %v2388_v22, 0.0  ;;  %v1853_v55 = vadd.f32 %v1810_v10, %v1602_v3  ;;  %v2060_v30 = vpop.f32.mrf.mxu3 }
 0x2a8   : > { %v1562_v47 = vpop.f32.mrf.mxu1 }
 0x2a9   : > { %v2452_v19 = vpack.c.bf16 %v2420_v31, %v2420_v31  ;;  %v2103_v15 = vadd.f32 %v2060_v30, %v1853_v55  ;;  %v1603_v56 = vadd.f32 %v1562_v47, %v3843_v14 }
 0x2aa   : > { %v2313_v13 = vpop.f32.mrf.mxu0 }
 0x2ab   : > { %2485 = vst.msk [vmem:[%s3901_s22 + $0x60] sm:$0xf] %vm2460_vm1, %v2452_v19  ;;  %v2353_v24 = vadd.f32 %v2310_v36, %v2103_v15 }
 0x2ad   : > { %v2389_v25 = vadd.f32 %v3891_v8, %v2353_v24 }
 0x2ae   : > { %v1813_v1 = vpop.f32.mrf.mxu2 }
 0x2af   : > { %v2421_v54 = vmax.f32 %v2389_v25, 0.0  ;;  %v1854_v37 = vadd.f32 %v1813_v1, %v1603_v56  ;;  %v2063_v53 = vpop.f32.mrf.mxu3 }
 0x2b0   : > { %v1564_v50 = vpop.f32.mrf.mxu1 }
 0x2b1   : > { %v2453_v5 = vpack.c.bf16 %v2421_v54, %v2421_v54  ;;  %v2104_v32 = vadd.f32 %v2063_v53, %v1854_v37  ;;  %v1604_v21 = vadd.f32 %v1564_v50, %v3852_v2 }
 0x2b2   : > { %v2315_v58 = vpop.f32.mrf.mxu0 }
 0x2b3   : > { %2486 = vst.msk [vmem:[%s3901_s22 + $0x64] sm:$0xf] %vm2460_vm1, %v2453_v5  ;;  %v2354_v42 = vadd.f32 %v2313_v13, %v2104_v32 }
 0x2b5   : > { %v2390_v0 = vadd.f32 %v3891_v8, %v2354_v42 }
 0x2b6   : > { %v1815_v28 = vpop.f32.mrf.mxu2 }
 0x2b7   : > { %v2422_v51 = vmax.f32 %v2390_v0, 0.0  ;;  %v1855_v40 = vadd.f32 %v1815_v28, %v1604_v21  ;;  %v2065_v14 = vpop.f32.mrf.mxu3 }
 0x2b8   : > { %v1567_v18 = vpop.f32.mrf.mxu1 }
 0x2b9   : > { %v2454_v17 = vpack.c.bf16 %v2422_v51, %v2422_v51  ;;  %v2105_v12 = vadd.f32 %v2065_v14, %v1855_v40  ;;  %v1605_v20 = vadd.f32 %v1567_v18, %v3858_v49 }
 0x2ba   : > { %v2318_v34 = vpop.f32.mrf.mxu0 }
 0x2bb   : > { %2487 = vst.msk [vmem:[%s3901_s22 + $0x68] sm:$0xf] %vm2460_vm1, %v2454_v17  ;;  %v2355_v26 = vadd.f32 %v2315_v58, %v2105_v12 }
 0x2bd   : > { %v2391_v6 = vadd.f32 %v3891_v8, %v2355_v26 }
 0x2be   : > { %v1818_v4 = vpop.f32.mrf.mxu2 }
 0x2bf   : > { %v2423_v63 = vmax.f32 %v2391_v6, 0.0  ;;  %v1856_v52 = vadd.f32 %v1818_v4, %v1605_v20  ;;  %v2068_v2 = vpop.f32.mrf.mxu3 }
 0x2c0   : > { %v1569_v29 = vpop.f32.mrf.mxu1 }
 0x2c1   : > { %v2455_v48 = vpack.c.bf16 %v2423_v63, %v2423_v63  ;;  %v2106_v45 = vadd.f32 %v2068_v2, %v1856_v52  ;;  %v1606_v59 = vadd.f32 %v1569_v29, %v3867_v23 }
 0x2c2   : > { %v2320_v44 = vpop.f32.mrf.mxu0 }
 0x2c3   : > { %2488 = vst.msk [vmem:[%s3901_s22 + $0x6c] sm:$0xf] %vm2460_vm1, %v2455_v48  ;;  %v2356_v7 = vadd.f32 %v2318_v34, %v2106_v45 }
 0x2c5   : > { %v2392_v38 = vadd.f32 %v3891_v8, %v2356_v7 }
 0x2c6   : > { %v1820_v16 = vpop.f32.mrf.mxu2 }
 0x2c7   : > { %v2424_v35 = vmax.f32 %v2392_v38, 0.0  ;;  %v1857_v57 = vadd.f32 %v1820_v16, %v1606_v59  ;;  %v2070_v49 = vpop.f32.mrf.mxu3 }
 0x2c8   : > { %v1572_v46 = vpop.f32.mrf.mxu1 }
 0x2c9   : > { %v2456_v62 = vpack.c.bf16 %v2424_v35, %v2424_v35  ;;  %v2107_v61 = vadd.f32 %v2070_v49, %v1857_v57  ;;  %v1607_v33 = vadd.f32 %v1572_v46, %v3873_v41 }
 0x2ca   : > { %v2323_v27 = vpop.f32.mrf.mxu0 }
 0x2cb   : > { %2489 = vst.msk [vmem:[%s3901_s22 + $0x70] sm:$0xf] %vm2460_vm1, %v2456_v62  ;;  %v2357_v11 = vadd.f32 %v2320_v44, %v2107_v61 }
 0x2cd   : > { %v2393_v43 = vadd.f32 %v3891_v8, %v2357_v11 }
 0x2ce   : > { %v1823_v39 = vpop.f32.mrf.mxu2 }
 0x2cf   : > { %v2425_v9 = vmax.f32 %v2393_v43, 0.0  ;;  %v1858_v36 = vadd.f32 %v1823_v39, %v1607_v33  ;;  %v2073_v23 = vpop.f32.mrf.mxu3 }
 0x2d0   : > { %v1574_v10 = vpop.f32.mrf.mxu1 }
 0x2d1   : > { %v2457_v22 = vpack.c.bf16 %v2425_v9, %v2425_v9  ;;  %v2108_v3 = vadd.f32 %v2073_v23, %v1858_v36  ;;  %v1608_v30 = vadd.f32 %v1574_v10, %v3882_v60 }
 0x2d2   : > { %v2325_v25 = vpop.f32.mrf.mxu0 }
 0x2d3   : > { %2490 = vst.msk [vmem:[%s3901_s22 + $0x74] sm:$0xf] %vm2460_vm1, %v2457_v22  ;;  %v2358_v31 = vadd.f32 %v2323_v27, %v2108_v3 }
 0x2d5   : > { %v2394_v55 = vadd.f32 %v3891_v8, %v2358_v31 }
 0x2d6   : > { %v1825_v47 = vpop.f32.mrf.mxu2 }
 0x2d7   : > { %v2426_v19 = vmax.f32 %v2394_v55, 0.0  ;;  %v1859_v41 = vadd.f32 %v1825_v47, %v1608_v30  ;;  %v2075_v15 = vpop.f32.mrf.mxu3 }
 0x2d9   : > { %v2458_v13 = vpack.c.bf16 %v2426_v19, %v2426_v19  ;;  %v2109_v24 = vadd.f32 %v2075_v15, %v1859_v41 }
 0x2db   : > { %2491 = vst.msk [vmem:[%s3901_s22 + $0x78] sm:$0xf] %vm2460_vm1, %v2458_v13  ;;  %v2359_v56 = vadd.f32 %v2325_v25, %v2109_v24 }
 0x2dd   : > { %v2395_v1 = vadd.f32 %v3891_v8, %v2359_v56 }
 0x2df   : > { %v2427_v54 = vmax.f32 %v2395_v1, 0.0 }
 0x2e1   : > { %v2459_v37 = vpack.c.bf16 %v2427_v54, %v2427_v54 }
 0x2e3   : > { %2492 = vst.msk [vmem:[%s3901_s22 + $0x7c] sm:$0xf] %vm2460_vm1, %v2459_v37 }
 0x2e4 PF: > { %s13_s12 = sadd.s32 1, %s3167_s12  }
 0x2e5   : > { %p10_p4 = scmp.ge.s32.totalorder %s13_s12, 4  }
 0x2e7   :  { %12 = sbr.rel (!%p10_p4) target bundleno = 1 (0x1), region = 72 }

// kernel: caamb_forward.7
= control target key start
LH: loop header
LB: loop body
LE: loop exit
PB: predicated region body
PF: predicated region fallthrough
CT: control target
= control target key end

     0   :  { %9 = vsyncpa [#allocation3], 0  ;;  %s4383_s0 = inlined_call_operand.vmem [shape: f32[2,18,18,64], index: 0, kind: input, shape index: {}]   ;;  %s4384_s1 = inlined_call_operand.vmem [shape: bf16[3,3,64,64], index: 1, kind: input, shape index: {}]   ;;  %s4385_s2 = inlined_call_operand.vmem [shape: f32[1,64], index: 2, kind: input, shape index: {}]   ;;  %s4386_s3 = inlined_call_operand.vmem [shape: f32[2,256,64], index: 3, kind: input, shape index: {}]   ;;  %s4387_s4 = inlined_call_operand.hbm [shape: f32[2,256,64], index: 4, kind: output, shape index: {}]  }
   0x1   :  { %11 = vsyncpa [#allocation3 + $0x1], 0  ;;  %s3368_s15 = smov 0   ;;  %s3370_s16 = smov 0  }
   0x2   :  { %s3372_s17 = smov 0   ;;  %s3374_s18 = smov 0  }
   0x3 LB: > { %s3389_s19 = sadd.s32 4294967295, %s3339_s18   ;;  %s2627_s20 = sadd.s32 4294967294, %s3339_s18   ;;  %s3339_s18 = sphi %s3374_s18, %s4430_s18   ;;  %s3335_s17 = sphi %s3372_s17, %s4429_s17   ;;  %s3331_s16 = sphi %s3370_s16, %s4428_s16   ;;  %s3327_s15 = sphi %s3368_s15, %s4427_s15  }
   0x4   : > { %s3393_s21 = sadd.s32 1, %s3339_s18   ;;  %s118_s22 = sadd.s32 1, %s3335_s17 }
   0x5   : > { %s115_s23 = ssub.s32 %s3339_s18, %s3393_s21  ;;  %p128_p0 = scmp.ne.s32.totalorder %s3335_s17, %s3331_s16 }
   0x6   : > { %p116_p1 = scmp.eq.s32.totalorder %s115_s23, 0  ;;  %p129_p2 = scmp.eq.s32.totalorder %s3389_s19, 1 }
   0x7   : > { %p134_p3 = scmp.ne.s32.totalorder %s3331_s16, %s3327_s15  ;;  %p135_p4 = scmp.eq.s32.totalorder %s2627_s20, 1 }
   0x8   : > { %s3404_s24 = scalar_select %p116_p1, %s3335_s17, %s118_s22  }
   0x9   : > { %p3406_p5 = por %p129_p2, %p128_p0  ;;  %p3410_p6 = por %p135_p4, %p134_p3 }
   0xa   : > { %p2630_p7 = scmp.ge.s32.totalorder %s3339_s18, 1  ;;  %p175_p8 = scmp.lt.s32.totalorder %s3339_s18, 3 }
   0xc   : > { %p176_p9 = pnand %p2630_p7, %p175_p8 }
   0xe   : > { %179 = sbr.rel (%p176_p9) target bundleno = 749 (0x2ed), region = 36 }
  0x13   : > { %v3192_v0 = vld [vmem:[%s4384_s1 + $0x38] sm:$0xff]  ;;  %p206_p10 = scmp.lt.s32.totalorder %s3389_s19, 1  ;;  %v3191_v1 = vld [vmem:[%s4384_s1 + $0x30] sm:$0xff]  ;;  %v3190_v2 = vld [vmem:[%s4384_s1 + $0x28] sm:$0xff]  ;;  %vm354_vm0 = vcmask 523264   ;;  %s203_s28 = sand.u32 1, %s3331_s16  }
  0x14   : > { %3222 = vmatpush.bf16.msra.mxu1 %v3192_v0  ;;  %3223 = vmatpush.bf16.msra.mxu2 %v3192_v0  ;;  %v3189_v3 = vld [vmem:[%s4384_s1 + $0x20] sm:$0xff]  ;;  %v3196_v12 = vld [vmem:[%s4384_s1 + $0x58] sm:$0xff]  ;;  %v3195_v20 = vld [vmem:[%s4384_s1 + $0x50] sm:$0xff]  ;;  %s2631_s9 = sshll.u32 %s203_s28, 8  ;;  %s3297_s30 = scalar_lea.hbm %s4387_s4, 512 }
  0x15   : > { %s3424_s5 = scalar_select %p206_p10, %s3389_s19, 1  ;;  %3224 = vmatpush.bf16.msra.mxu3 %v3192_v0  ;;  %407 = vmatpush.bf16.msra.mxu0 %v3192_v0  ;;  %v3200_v13 = vld [vmem:[%s4384_s1 + $0x78] sm:$0xff]  ;;  %v3199_v21 = vld [vmem:[%s4384_s1 + $0x70] sm:$0xff]  ;;  %v3194_v24 = vld [vmem:[%s4384_s1 + $0x48] sm:$0xff] }
  0x16   : > { %v3188_v18 = vld [vmem:[%s4384_s1 + $0x18] sm:$0xff]  ;;  %v3187_v22 = vld [vmem:[%s4384_s1 + $0x10] sm:$0xff]  ;;  %v3198_v25 = vld [vmem:[%s4384_s1 + $0x68] sm:$0xff] }
  0x17   : > { %s3234_s6 = smul.u32 432, %s3424_s5  ;;  %v3204_v19 = vld [vmem:[%s4384_s1 + $0x98] sm:$0xff]  ;;  %v3203_v23 = vld [vmem:[%s4384_s1 + $0x90] sm:$0xff]  ;;  %v3186_v26 = vld [vmem:[%s4384_s1 + $0x8] sm:$0xff]  ;;  %s3184_s27 = sshll.u32 %s3424_s5, 8 }
  0x18   : > { %3225 = vmatpush.bf16.msra.mxu1 %v3191_v1  ;;  %3226 = vmatpush.bf16.msra.mxu2 %v3191_v1  ;;  %v3202_v27 = vld [vmem:[%s4384_s1 + $0x88] sm:$0xff]  ;;  %v3193_v40 = vld [vmem:[%s4384_s1 + $0x40] sm:$0xff]  ;;  %v3212_v56 = vld [vmem:[%s4384_s1 + $0xd8] sm:$0xff]  ;;  %s4124_s5 = scalar_lea.vmem [#allocation2], %s2631_s9 }
  0x19   : > { %s3433_s11 = scalar_lea.vmem %s4383_s0, %s3234_s6  ;;  %3227 = vmatpush.bf16.msra.mxu3 %v3191_v1  ;;  %408 = vmatpush.bf16.msra.mxu0 %v3191_v1  ;;  %v3197_v41 = vld [vmem:[%s4384_s1 + $0x60] sm:$0xff]  ;;  %v3216_v57 = vld [vmem:[%s4384_s1 + $0xf8] sm:$0xff]  ;;  %s4110_s6 = scalar_lea.vmem %s4386_s3, %s3184_s27 }
  0x1a   : > { %v281_v4 = vld [vmem:[%s3433_s11 + $0x61] sm:$0xff]  ;;  %v282_v5 = vld [vmem:[%s3433_s11 + $0x69] sm:$0xff]  ;;  %v283_v28 = vld [vmem:[%s3433_s11 + $0x79] sm:$0xff]  ;;  %s2550_s14 = sshll.u32 %s4124_s5, 4  ;;  %s2551_s14 = int_to_ptr.vmem [resolvable:$true] %s2550_s14 }
  0x1b   : > { %v289_v6 = vld [vmem:[%s3433_s11 + $0xc1] sm:$0xff]  ;;  %v290_v7 = vld [vmem:[%s3433_s11 + $0xc9] sm:$0xff]  ;;  %v3452_v14 = vpack.c.bf16 %v282_v5, %v281_v4  ;;  %v291_v30 = vld [vmem:[%s3433_s11 + $0xd9] sm:$0xff] }
  0x1c   : > { %3228 = vmatpush.bf16.msra.mxu1 %v3190_v2  ;;  %3229 = vmatpush.bf16.msra.mxu2 %v3190_v2  ;;  %v297_v8 = vld [vmem:[%s3433_s11 + $0x121] sm:$0xff]  ;;  %v298_v9 = vld [vmem:[%s3433_s11 + $0x129] sm:$0xff]  ;;  %v3454_v15 = vpack.c.bf16 %v290_v7, %v289_v6  ;;  %v299_v32 = vld [vmem:[%s3433_s11 + $0x139] sm:$0xff] }
  0x1d   : > { %3230 = vmatpush.bf16.msra.mxu3 %v3190_v2  ;;  %409 = vmatpush.bf16.msra.mxu0 %v3190_v2  ;;  %v273_v10 = vld [vmem:[%s3433_s11 + $0x1] sm:$0xff]  ;;  %v274_v11 = vld [vmem:[%s3433_s11 + $0x9] sm:$0xff]  ;;  %v3456_v16 = vpack.c.bf16 %v298_v9, %v297_v8  ;;  %v275_v34 = vld [vmem:[%s3433_s11 + $0x19] sm:$0xff] }
  0x1e   : > { %v305_v17 = vpack.c.bf16 %v274_v11, %v273_v10  ;;  %v284_v29 = vld [vmem:[%s3433_s11 + $0x81] sm:$0xff]  ;;  %v285_v44 = vld [vmem:[%s3433_s11 + $0x91] sm:$0xff]  ;;  %v286_v45 = vld [vmem:[%s3433_s11 + $0x99] sm:$0xff] }
  0x1f   : > { %v292_v31 = vld [vmem:[%s3433_s11 + $0xe1] sm:$0xff]  ;;  %v3503_v36 = vpack.c.bf16 %v284_v29, %v283_v28  ;;  %v293_v46 = vld [vmem:[%s3433_s11 + $0xf1] sm:$0xff]  ;;  %v294_v47 = vld [vmem:[%s3433_s11 + $0xf9] sm:$0xff]  ;;  %v3539_v52 = vpack.c.bf16 %v286_v45, %v285_v44 }
  0x20   : > { %3231 = vmatpush.bf16.msra.mxu1 %v3189_v3  ;;  %3232 = vmatpush.bf16.msra.mxu2 %v3189_v3  ;;  %v300_v33 = vld [vmem:[%s3433_s11 + $0x141] sm:$0xff]  ;;  %v3505_v37 = vpack.c.bf16 %v292_v31, %v291_v30  ;;  %v301_v48 = vld [vmem:[%s3433_s11 + $0x151] sm:$0xff]  ;;  %v302_v49 = vld [vmem:[%s3433_s11 + $0x159] sm:$0xff]  ;;  %v3541_v53 = vpack.c.bf16 %v294_v47, %v293_v46 }
  0x21   : > { %3233 = vmatpush.bf16.msra.mxu3 %v3189_v3  ;;  %410 = vmatpush.bf16.msra.mxu0 %v3189_v3  ;;  %v276_v35 = vld [vmem:[%s3433_s11 + $0x21] sm:$0xff]  ;;  %v3507_v38 = vpack.c.bf16 %v300_v33, %v299_v32  ;;  %v277_v50 = vld [vmem:[%s3433_s11 + $0x31] sm:$0xff]  ;;  %v278_v51 = vld [vmem:[%s3433_s11 + $0x39] sm:$0xff]  ;;  %v3543_v54 = vpack.c.bf16 %v302_v49, %v301_v48 }
  0x22   : > { %v3509_v39 = vpack.c.bf16 %v276_v35, %v275_v34  ;;  %v3185_v42 = vld [vmem:[%s4384_s1] sm:$0xff]  ;;  %v307_v55 = vpack.c.bf16 %v278_v51, %v277_v50  ;;  %v3208_v58 = vld [vmem:[%s4384_s1 + $0xb8] sm:$0xff]  ;;  %v287_v60 = vld [vmem:[%s3433_s11 + $0xa9] sm:$0xff] }
  0x23   : > { %2663 = vmatmul.msk.bf16.vlgmr.msra.gmra.mxu1 %vm354_vm0, %v3452_v14  ;;  %2667 = vmatmul.msk.bf16.vlgmr.msra.gmra.mxu2 %vm354_vm0, %v3454_v15  ;;  %v3201_v43 = vld [vmem:[%s4384_s1 + $0x80] sm:$0xff]  ;;  %v3220_v59 = vld [vmem:[%s4384_s1 + $0x118] sm:$0xff]  ;;  %v295_v62 = vld [vmem:[%s3433_s11 + $0x109] sm:$0xff] }
  0x24   : > { %786 = vmatpush.bf16.msrb.mxu2 %v3196_v12  ;;  %2671 = vmatmul.msk.bf16.vlgmr.msra.gmra.mxu3 %vm354_vm0, %v3456_v16  ;;  %v288_v61 = vld [vmem:[%s3433_s11 + $0xb1] sm:$0xff]  ;;  %v303_v0 = vld [vmem:[%s3433_s11 + $0x169] sm:$0xff]  ;;  %v217_v8 = vld [vmem:[%s3433_s11] sm:$0xff] }
  0x25   : > { %1037 = vmatpush.bf16.msrb.mxu3 %v3200_v13  ;;  %2659 = vmatmul.msk.bf16.vlgmr.msra.gmra.mxu0 %vm354_vm0, %v305_v17  ;;  %v296_v63 = vld [vmem:[%s3433_s11 + $0x111] sm:$0xff]  ;;  %v279_v2 = vld [vmem:[%s3433_s11 + $0x49] sm:$0xff]  ;;  %v3572_v4 = vpack.c.bf16 %v288_v61, %v287_v60  ;;  %v2748_v13 = vld [vmem:[%s3433_s11 + $0x20] sm:$0xff] }
  0x26   : > { %568 = vmatpush.bf16.msrb.mxu1 %v3188_v18  ;;  %1287 = vmatpush.bf16.msrb.mxu0 %v3204_v19  ;;  %v304_v1 = vld [vmem:[%s3433_s11 + $0x171] sm:$0xff]  ;;  %v3574_v5 = vpack.c.bf16 %v296_v63, %v295_v62  ;;  %v218_v9 = vld [vmem:[%s3433_s11 + $0x8] sm:$0xff]  ;;  %v2756_v48 = vld [vmem:[%s3433_s11 + $0x80] sm:$0xff] }
  0x27   : > { %v280_v3 = vld [vmem:[%s3433_s11 + $0x51] sm:$0xff]  ;;  %v3576_v6 = vpack.c.bf16 %v304_v1, %v303_v0  ;;  %v653_v10 = vld [vmem:[%s3433_s11 + $0x2] sm:$0xff]  ;;  %v249_v17 = vpack.c.bf16 %v218_v9, %v217_v8 }
  0x28   : > { %787 = vmatpush.bf16.msrb.mxu2 %v3195_v20  ;;  %v308_v7 = vpack.c.bf16 %v280_v3, %v279_v2  ;;  %v654_v11 = vld [vmem:[%s3433_s11 + $0xa] sm:$0xff]  ;;  %v2747_v12 = vld [vmem:[%s3433_s11 + $0x18] sm:$0xff]  ;;  %v661_v45 = vld [vmem:[%s3433_s11 + $0x62] sm:$0xff] }
  0x29   : > { %1038 = vmatpush.bf16.msrb.mxu3 %v3199_v21  ;;  %v685_v18 = vpack.c.bf16 %v654_v11, %v653_v10  ;;  %v936_v19 = vpack.c.bf16 %v2748_v13, %v2747_v12  ;;  %v655_v20 = vld [vmem:[%s3433_s11 + $0x1a] sm:$0xff]  ;;  %v656_v21 = vld [vmem:[%s3433_s11 + $0x22] sm:$0xff]  ;;  %v2752_v29 = vld [vmem:[%s3433_s11 + $0x50] sm:$0xff] }
  0x2a   : > { %569 = vmatpush.bf16.msrb.mxu1 %v3187_v22  ;;  %1288 = vmatpush.bf16.msrb.mxu0 %v3203_v23  ;;  %v2749_v22 = vld [vmem:[%s3433_s11 + $0x30] sm:$0xff]  ;;  %v2750_v23 = vld [vmem:[%s3433_s11 + $0x38] sm:$0xff]  ;;  %v2751_v28 = vld [vmem:[%s3433_s11 + $0x48] sm:$0xff] }
  0x2b   : > { %v3616_v31 = vpack.c.bf16 %v2752_v29, %v2751_v28  ;;  %v3211_v32 = vld [vmem:[%s4384_s1 + $0xd0] sm:$0xff]  ;;  %v2755_v47 = vld [vmem:[%s3433_s11 + $0x78] sm:$0xff]  ;;  %v664_v60 = vld [vmem:[%s3433_s11 + $0x82] sm:$0xff] }
  0x2c   : > { %788 = vmatpush.bf16.msrb.mxu2 %v3194_v24  ;;  %v3600_v24 = vpack.c.bf16 %v656_v21, %v655_v20  ;;  %v3215_v33 = vld [vmem:[%s4384_s1 + $0xf0] sm:$0xff]  ;;  %v3661_v51 = vpack.c.bf16 %v2756_v48, %v2755_v47  ;;  %v2758_v62 = vld [vmem:[%s3433_s11 + $0x98] sm:$0xff]  ;;  %v2759_v13 = vld [vmem:[%s3433_s11 + $0xa8] sm:$0xff] }
  0x2d   : > { %1039 = vmatpush.bf16.msrb.mxu3 %v3198_v25  ;;  %v3602_v25 = vpack.c.bf16 %v2750_v23, %v2749_v22  ;;  %v3207_v34 = vld [vmem:[%s4384_s1 + $0xb0] sm:$0xff]  ;;  %v666_v12 = vld [vmem:[%s3433_s11 + $0x9a] sm:$0xff]  ;;  %v3210_v23 = vld [vmem:[%s4384_s1 + $0xc8] sm:$0xff] }
  0x2e   : > { %570 = vmatpush.bf16.msrb.mxu1 %v3186_v26  ;;  %1289 = vmatpush.bf16.msrb.mxu0 %v3202_v27  ;;  %v657_v26 = vld [vmem:[%s3433_s11 + $0x32] sm:$0xff]  ;;  %v658_v27 = vld [vmem:[%s3433_s11 + $0x3a] sm:$0xff]  ;;  %v662_v46 = vld [vmem:[%s3433_s11 + $0x6a] sm:$0xff] }
  0x2f   : > { %v3614_v30 = vpack.c.bf16 %v658_v27, %v657_v26  ;;  %v3219_v35 = vld [vmem:[%s4384_s1 + $0x110] sm:$0xff]  ;;  %v3657_v49 = vpack.c.bf16 %v662_v46, %v661_v45  ;;  %v3214_v26 = vld [vmem:[%s4384_s1 + $0xe8] sm:$0xff] }
  0x30   : > { %789 = vmatpush.bf16.msrb.mxu2 %v3193_v40  ;;  %v660_v40 = vld [vmem:[%s3433_s11 + $0x52] sm:$0xff] }
  0x31   : > { %1040 = vmatpush.bf16.msrb.mxu3 %v3197_v41  ;;  %v2753_v41 = vld [vmem:[%s3433_s11 + $0x60] sm:$0xff]  ;;  %v2757_v61 = vld [vmem:[%s3433_s11 + $0x90] sm:$0xff] }
  0x32   : > { %571 = vmatpush.bf16.msrb.mxu1 %v3185_v42  ;;  %1290 = vmatpush.bf16.msrb.mxu0 %v3201_v43  ;;  %v2754_v42 = vld [vmem:[%s3433_s11 + $0x68] sm:$0xff]  ;;  %v3693_v2 = vpack.c.bf16 %v2758_v62, %v2757_v61  ;;  %v665_v11 = vld [vmem:[%s3433_s11 + $0x92] sm:$0xff] }
  0x33   : > { %2664 = vmatmul.msk.bf16.gmra.mxu1 %vm354_vm0, %v3503_v36  ;;  %2668 = vmatmul.msk.bf16.gmra.mxu2 %vm354_vm0, %v3505_v37  ;;  %v3643_v44 = vpack.c.bf16 %v2754_v42, %v2753_v41  ;;  %v3721_v20 = vpack.c.bf16 %v666_v12, %v665_v11  ;;  %v669_v11 = vld [vmem:[%s3433_s11 + $0xc2] sm:$0xff]  ;;  %v670_v12 = vld [vmem:[%s3433_s11 + $0xca] sm:$0xff] }
  0x34   : > { %2672 = vmatmul.msk.bf16.gmra.mxu3 %vm354_vm0, %v3507_v38  ;;  %1788 = vmatpush.bf16.msra.mxu2 %v3212_v56 }
  0x35   : > { %2660 = vmatmul.msk.bf16.gmra.mxu0 %vm354_vm0, %v3509_v39  ;;  %2038 = vmatpush.bf16.msra.mxu3 %v3216_v57 }
  0x36   : > { %1537 = vmatpush.bf16.msra.mxu1 %v3208_v58  ;;  %2288 = vmatpush.bf16.msra.mxu0 %v3220_v59  ;;  %v663_v59 = vld [vmem:[%s3433_s11 + $0x7a] sm:$0xff] }
  0x38   : > { %1789 = vmatpush.bf16.msra.mxu2 %v3211_v32 }
  0x39   : > { %2039 = vmatpush.bf16.msra.mxu3 %v3215_v33  ;;  %v3218_v33 = vld [vmem:[%s4384_s1 + $0x108] sm:$0xff] }
  0x3a   : > { %1538 = vmatpush.bf16.msra.mxu1 %v3207_v34  ;;  %2289 = vmatpush.bf16.msra.mxu0 %v3219_v35  ;;  %v667_v34 = vld [vmem:[%s3433_s11 + $0xaa] sm:$0xff]  ;;  %v668_v35 = vld [vmem:[%s3433_s11 + $0xb2] sm:$0xff] }
  0x3b   : > { %v3765_v45 = vpack.c.bf16 %v668_v35, %v667_v34 }
  0x3c   : > { %1790 = vmatpush.bf16.msra.mxu2 %v3210_v23 }
  0x3d   : > { %2040 = vmatpush.bf16.msra.mxu3 %v3214_v26  ;;  %4399 = vst [vmem:[#allocation9_spill] sm:$0xff] %v3765_v45 }
  0x3e   : > { %2290 = vmatpush.bf16.msra.mxu0 %v3218_v33 }
  0x43   : > { %2665 = vmatmul.msk.bf16.gmra.mxu1 %vm354_vm0, %v3539_v52  ;;  %2669 = vmatmul.msk.bf16.gmra.mxu2 %vm354_vm0, %v3541_v53 }
  0x44   : > { %2673 = vmatmul.msk.bf16.gmra.mxu3 %vm354_vm0, %v3543_v54 }
  0x45   : > { %2661 = vmatmul.msk.bf16.gmra.mxu0 %vm354_vm0, %v307_v55 }
  0x53   : > { %2666 = vmatmul.msk.bf16.gmra.mxu1 %vm354_vm0, %v3572_v4  ;;  %2670 = vmatmul.msk.bf16.gmra.mxu2 %vm354_vm0, %v3574_v5 }
  0x54   : > { %2674 = vmatmul.msk.bf16.gmra.mxu3 %vm354_vm0, %v3576_v6 }
  0x55   : > { %2662 = vmatmul.msk.bf16.gmra.mxu0 %vm354_vm0, %v308_v7 }
  0x63   : > { %2691 = vmatmul.msk.bf16.vlgmr.msrb.gmra.mxu1 %vm354_vm0, %v249_v17  ;;  %2731 = vmatmul.msk.bf16.vlgmr.msrb.gmra.mxu2 %vm354_vm0, %v685_v18  ;;  %v2760_v17 = vld [vmem:[%s3433_s11 + $0xb0] sm:$0xff] }
  0x64   : > { %2803 = vmatmul.msk.bf16.vlgmr.msrb.gmra.mxu3 %vm354_vm0, %v936_v19 }
  0x65   : > { %2875 = vmatmul.msk.bf16.vlgmr.msrb.gmra.mxu0 %vm354_vm0, %v3509_v39  ;;  %v659_v39 = vld [vmem:[%s3433_s11 + $0x4a] sm:$0xff] }
  0x66   : > { %v3641_v43 = vpack.c.bf16 %v660_v40, %v659_v39  ;;  %v2761_v39 = vld [vmem:[%s3433_s11 + $0xc0] sm:$0xff]  ;;  %v2762_v40 = vld [vmem:[%s3433_s11 + $0xc8] sm:$0xff] }
  0x67   : > { %v3769_v47 = vpack.c.bf16 %v2762_v40, %v2761_v39 }
  0x69   : > { %4400 = vst [vmem:[#allocation10_spill] sm:$0xff] %v3769_v47 }
  0x73   : > { %2692 = vmatmul.msk.bf16.gmra.mxu1 %vm354_vm0, %v936_v19  ;;  %2732 = vmatmul.msk.bf16.gmra.mxu2 %vm354_vm0, %v3600_v24 }
  0x74   : > { %2804 = vmatmul.msk.bf16.gmra.mxu3 %vm354_vm0, %v3602_v25 }
  0x75   : > { %2876 = vmatmul.msk.bf16.gmra.mxu0 %vm354_vm0, %v307_v55 }
  0x83   : > { %2693 = vmatmul.msk.bf16.gmra.mxu1 %vm354_vm0, %v3602_v25  ;;  %2733 = vmatmul.msk.bf16.gmra.mxu2 %vm354_vm0, %v3614_v30 }
  0x84   : > { %2805 = vmatmul.msk.bf16.gmra.mxu3 %vm354_vm0, %v3616_v31 }
  0x85   : > { %2877 = vmatmul.msk.bf16.gmra.mxu0 %vm354_vm0, %v308_v7 }
  0x93   : > { %2694 = vmatmul.msk.bf16.gmra.mxu1 %vm354_vm0, %v3616_v31  ;;  %2734 = vmatmul.msk.bf16.gmra.mxu2 %vm354_vm0, %v3641_v43 }
  0x94   : > { %2806 = vmatmul.msk.bf16.gmra.mxu3 %vm354_vm0, %v3643_v44 }
  0x95   : > { %2878 = vmatmul.msk.bf16.gmra.mxu0 %vm354_vm0, %v3452_v14 }
  0xa0   : > { %v3659_v50 = vpop.f32.mrf.mxu1 }
  0xa2   : > { %v3663_v55 = vpop.f32.mrf.mxu0 }
  0xa3   : > { %2695 = vmatmul.msk.bf16.gmra.mxu1 %vm354_vm0, %v3643_v44  ;;  %2735 = vmatmul.msk.bf16.gmra.mxu2 %vm354_vm0, %v3657_v49 }
  0xa4   : > { %2807 = vmatmul.msk.bf16.gmra.mxu3 %vm354_vm0, %v3661_v51 }
  0xa5   : > { %2879 = vmatmul.msk.bf16.gmra.mxu0 %vm354_vm0, %v3503_v36  ;;  %v3689_v36 = vpack.c.bf16 %v664_v60, %v663_v59 }
  0xa6   : > { %v3673_v14 = vpop.f32.mrf.mxu2 }
  0xa7   : > { %v3675_v56 = vpop.f32.mrf.mxu3 }
  0xa8   : > { %v3677_v57 = vpop.f32.mrf.mxu1 }
  0xaa   : > { %v3679_v58 = vpop.f32.mrf.mxu0 }
  0xae   : > { %v3685_v63 = vpop.f32.mrf.mxu2 }
  0xaf   : > { %v3687_v0 = vpop.f32.mrf.mxu3 }
  0xb0   : > { %v3691_v1 = vpop.f32.mrf.mxu1 }
  0xb2   : > { %v3695_v3 = vpop.f32.mrf.mxu0 }
  0xb3   : > { %2696 = vmatmul.msk.bf16.gmra.mxu1 %vm354_vm0, %v3661_v51  ;;  %2736 = vmatmul.msk.bf16.gmra.mxu2 %vm354_vm0, %v3689_v36 }
  0xb4   : > { %2808 = vmatmul.msk.bf16.gmra.mxu3 %vm354_vm0, %v3693_v2 }
  0xb5   : > { %2880 = vmatmul.msk.bf16.gmra.mxu0 %vm354_vm0, %v3539_v52  ;;  %v3725_v52 = vpack.c.bf16 %v2760_v17, %v2759_v13  ;;  %v2763_v13 = vld [vmem:[%s3433_s11 + $0xd8] sm:$0xff]  ;;  %v2764_v17 = vld [vmem:[%s3433_s11 + $0xe0] sm:$0xff] }
  0xb6   : > { %v3705_v7 = vpop.f32.mrf.mxu2 }
  0xb7   : > { %v3707_v8 = vpop.f32.mrf.mxu3 }
  0xb8   : > { %4395 = vst [vmem:[#allocation5_spill] sm:$0xff] %v3707_v8  ;;  %v3709_v9 = vpop.f32.mrf.mxu1 }
  0xba   : > { %v3711_v10 = vpop.f32.mrf.mxu0 }
  0xbe   : > { %v3717_v18 = vpop.f32.mrf.mxu2 }
  0xbf   : > { %v3719_v19 = vpop.f32.mrf.mxu3 }
  0xc0   : > { %4396 = vst [vmem:[#allocation6_spill] sm:$0xff] %v3719_v19  ;;  %v3723_v21 = vpop.f32.mrf.mxu1 }
  0xc2   : > { %v3727_v22 = vpop.f32.mrf.mxu0 }
  0xc3   : > { %2697 = vmatmul.msk.bf16.gmra.mxu1 %vm354_vm0, %v3693_v2  ;;  %2737 = vmatmul.msk.bf16.gmra.mxu2 %vm354_vm0, %v3721_v20 }
  0xc4   : > { %2809 = vmatmul.msk.bf16.gmra.mxu3 %vm354_vm0, %v3725_v52 }
  0xc5   : > { %2881 = vmatmul.msk.bf16.gmra.mxu0 %vm354_vm0, %v3572_v4  ;;  %v3206_v4 = vld [vmem:[%s4384_s1 + $0xa8] sm:$0xff] }
  0xc6   : > { %v3743_v27 = vpop.f32.mrf.mxu2  ;;  %1539 = vmatpush.bf16.msra.mxu1 %v3206_v4  ;;  %v3797_v4 = vpack.c.bf16 %v670_v12, %v669_v11 }
  0xc7   : > { %v3745_v28 = vpop.f32.mrf.mxu3 }
  0xc8   : > { %4397 = vst [vmem:[#allocation7_spill] sm:$0xff] %v3745_v28  ;;  %v3747_v29 = vpop.f32.mrf.mxu1  ;;  %v2766_v28 = vld [vmem:[%s3433_s11 + $0xf8] sm:$0xff] }
  0xc9   : > { %4403 = vst [vmem:[#allocation13_spill] sm:$0xff] %v3797_v4 }
  0xca   : > { %v3749_v32 = vpop.f32.mrf.mxu0 }
  0xce   : > { %v3761_v41 = vpop.f32.mrf.mxu2 }
  0xcf   : > { %v3763_v42 = vpop.f32.mrf.mxu3 }
  0xd0   : > { %4398 = vst [vmem:[#allocation8_spill] sm:$0xff] %v3763_v42  ;;  %v3767_v46 = vpop.f32.mrf.mxu1  ;;  %v2765_v42 = vld [vmem:[%s3433_s11 + $0xf0] sm:$0xff] }
  0xd2   : > { %v3771_v48 = vpop.f32.mrf.mxu0 }
  0xd3   : > { %2698 = vmatmul.msk.bf16.gmra.mxu1 %vm354_vm0, %v3725_v52  ;;  %2738 = vmatmul.msk.bf16.gmra.mxu2 %vm354_vm0, %v3765_v45  ;;  %v3819_v45 = vpack.c.bf16 %v2766_v28, %v2765_v42 }
  0xd4   : > { %2810 = vmatmul.msk.bf16.gmra.mxu3 %vm354_vm0, %v3769_v47 }
  0xd5   : > { %2882 = vmatmul.msk.bf16.gmra.mxu0 %vm354_vm0, %v3454_v15  ;;  %v3799_v15 = vpack.c.bf16 %v2764_v17, %v2763_v13 }
  0xd6   : > { %v3781_v59 = vpop.f32.mrf.mxu2 }
  0xd7   : > { %v3783_v60 = vpop.f32.mrf.mxu3 }
  0xd8   : > { %4401 = vst [vmem:[#allocation11_spill] sm:$0xff] %v3783_v60  ;;  %v3785_v61 = vpop.f32.mrf.mxu1  ;;  %v672_v60 = vld [vmem:[%s3433_s11 + $0xe2] sm:$0xff] }
  0xda   : > { %v3787_v62 = vpop.f32.mrf.mxu0 }
  0xde   : > { %v3793_v23 = vpop.f32.mrf.mxu2 }
  0xdf   : > { %v3795_v26 = vpop.f32.mrf.mxu3 }
  0xe0   : > { %4402 = vst [vmem:[#allocation12_spill] sm:$0xff] %v3795_v26  ;;  %v573_v33 = vpop.f32.mrf.mxu1  ;;  %v671_v26 = vld [vmem:[%s3433_s11 + $0xda] sm:$0xff] }
  0xe1   : > { %v574_v34 = vadd.f32 %v573_v33, %v3663_v55  ;;  %v3817_v8 = vpack.c.bf16 %v672_v60, %v671_v26 }
  0xe2   : > { %v1292_v35 = vpop.f32.mrf.mxu0 }
  0xe3   : > { %2699 = vmatmul.msk.bf16.gmra.mxu1 %vm354_vm0, %v3769_v47  ;;  %2739 = vmatmul.msk.bf16.gmra.mxu2 %vm354_vm0, %v3797_v4 }
  0xe4   : > { %2811 = vmatmul.msk.bf16.gmra.mxu3 %vm354_vm0, %v3799_v15 }
  0xe5   : > { %2883 = vmatmul.msk.bf16.gmra.mxu0 %vm354_vm0, %v3505_v37 }
  0xe6   : > { %v791_v39 = vpop.f32.mrf.mxu2 }
  0xe7   : > { %v871_v40 = vadd.f32 %v791_v39, %v574_v34  ;;  %v1042_v11 = vpop.f32.mrf.mxu3 }
  0xe8   : > { %v575_v12 = vpop.f32.mrf.mxu1 }
  0xe9   : > { %v1122_v55 = vadd.f32 %v1042_v11, %v871_v40  ;;  %v576_v13 = vadd.f32 %v575_v12, %v3679_v58  ;;  %v673_v40 = vld [vmem:[%s3433_s11 + $0xf2] sm:$0xff]  ;;  %v674_v11 = vld [vmem:[%s3433_s11 + $0xfa] sm:$0xff]  ;;  %v2767_v12 = vld [vmem:[%s3433_s11 + $0x108] sm:$0xff] }
  0xea   : > { %v1294_v17 = vpop.f32.mrf.mxu0 }
  0xeb   : > { %v3811_v33 = vadd.f32 %v1292_v35, %v1122_v55  ;;  %v2768_v55 = vld [vmem:[%s3433_s11 + $0x110] sm:$0xff] }
  0xee   : > { %v793_v4 = vpop.f32.mrf.mxu2 }
  0xef   : > { %v872_v47 = vadd.f32 %v793_v4, %v576_v13  ;;  %v1044_v19 = vpop.f32.mrf.mxu3 }
  0xf0   : > { %v578_v37 = vpop.f32.mrf.mxu1 }
  0xf1   : > { %v1123_v34 = vadd.f32 %v1044_v19, %v872_v47  ;;  %v579_v39 = vadd.f32 %v578_v37, %v3695_v3 }
  0xf2   : > { %v1297_v58 = vpop.f32.mrf.mxu0 }
  0xf3   : > { %2700 = vmatmul.msk.bf16.gmra.mxu1 %vm354_vm0, %v3799_v15  ;;  %2740 = vmatmul.msk.bf16.gmra.mxu2 %vm354_vm0, %v3817_v8  ;;  %v3826_v4 = vadd.f32 %v1294_v17, %v1123_v34  ;;  %v3839_v34 = vpack.c.bf16 %v674_v11, %v673_v40  ;;  %v3205_v11 = vld [vmem:[%s4384_s1 + $0xa0] sm:$0xff] }
  0xf4   : > { %2812 = vmatmul.msk.bf16.gmra.mxu3 %vm354_vm0, %v3819_v45  ;;  %1540 = vmatpush.bf16.msra.mxu1 %v3205_v11 }
  0xf5   : > { %4404 = vst [vmem:[#allocation14_spill] sm:$0xff] %v3826_v4  ;;  %2884 = vmatmul.msk.bf16.gmra.mxu0 %vm354_vm0, %v3541_v53  ;;  %v3841_v4 = vpack.c.bf16 %v2768_v55, %v2767_v12  ;;  %v3217_v12 = vld [vmem:[%s4384_s1 + $0x100] sm:$0xff] }
  0xf6   : > { %v796_v19 = vpop.f32.mrf.mxu2  ;;  %2291 = vmatpush.bf16.msra.mxu0 %v3217_v12 }
  0xf7   : > { %v873_v3 = vadd.f32 %v796_v19, %v579_v39  ;;  %v1047_v28 = vpop.f32.mrf.mxu3 }
  0xf8   : > { %v580_v42 = vpop.f32.mrf.mxu1 }
  0xf9   : > { %v1124_v47 = vadd.f32 %v1047_v28, %v873_v3  ;;  %v581_v60 = vadd.f32 %v580_v42, %v3711_v10 }
  0xfa   : > { %v1299_v26 = vpop.f32.mrf.mxu0 }
  0xfb   : > { %v3833_v35 = vadd.f32 %v1297_v58, %v1124_v47  ;;  %v3209_v58 = vld [vmem:[%s4384_s1 + $0xc0] sm:$0xff] }
  0xfc   : > { %1791 = vmatpush.bf16.msra.mxu2 %v3209_v58 }
  0xfe   : > { %v798_v13 = vpop.f32.mrf.mxu2 }
  0xff   : > { %v874_v17 = vadd.f32 %v798_v13, %v581_v60  ;;  %v1049_v37 = vpop.f32.mrf.mxu3  ;;  %v675_v13 = vld [vmem:[%s3433_s11 + $0x10a] sm:$0xff] }
 0x100   : > { %v583_v53 = vpop.f32.mrf.mxu1 }
 0x101   : > { %v1125_v39 = vadd.f32 %v1049_v37, %v874_v17  ;;  %v584_v19 = vadd.f32 %v583_v53, %v3727_v22  ;;  %v3213_v22 = vld [vmem:[%s4384_s1 + $0xe0] sm:$0xff]  ;;  %v676_v17 = vld [vmem:[%s3433_s11 + $0x112] sm:$0xff]  ;;  %v2770_v53 = vld [vmem:[%s3433_s11 + $0x128] sm:$0xff] }
 0x102   : > { %v1302_v3 = vpop.f32.mrf.mxu0  ;;  %2041 = vmatpush.bf16.msra.mxu3 %v3213_v22  ;;  %v2769_v37 = vld [vmem:[%s3433_s11 + $0x120] sm:$0xff]  ;;  %v3873_v58 = vpack.c.bf16 %v676_v17, %v675_v13 }
 0x103   : > { %2701 = vmatmul.msk.bf16.gmra.mxu1 %vm354_vm0, %v3819_v45  ;;  %2741 = vmatmul.msk.bf16.gmra.mxu2 %vm354_vm0, %v3839_v34  ;;  %v3848_v10 = vadd.f32 %v1299_v26, %v1125_v39 }
 0x104   : > { %2813 = vmatmul.msk.bf16.gmra.mxu3 %vm354_vm0, %v3841_v4 }
 0x105   : > { %2885 = vmatmul.msk.bf16.gmra.mxu0 %vm354_vm0, %v3574_v5 }
 0x106   : > { %v801_v28 = vpop.f32.mrf.mxu2 }
 0x107   : > { %v875_v42 = vadd.f32 %v801_v28, %v584_v19  ;;  %v1052_v47 = vpop.f32.mrf.mxu3  ;;  %v3875_v28 = vpack.c.bf16 %v2770_v53, %v2769_v37  ;;  %v677_v53 = vld [vmem:[%s3433_s11 + $0x122] sm:$0xff] }
 0x108   : > { %v585_v60 = vpop.f32.mrf.mxu1 }
 0x109   : > { %v1126_v26 = vadd.f32 %v1052_v47, %v875_v42  ;;  %v586_v5 = vadd.f32 %v585_v60, %v3749_v32 }
 0x10a   : > { %v1304_v40 = vpop.f32.mrf.mxu0 }
 0x10b   : > { %v3867_v55 = vadd.f32 %v1302_v3, %v1126_v26 }
 0x10d   : > { %4405 = vst [vmem:[#allocation15_spill] sm:$0xff] %v3867_v55 }
 0x10e   : > { %v803_v39 = vpop.f32.mrf.mxu2 }
 0x10f   : > { %v876_v19 = vadd.f32 %v803_v39, %v586_v5  ;;  %v1054_v32 = vpop.f32.mrf.mxu3  ;;  %v678_v39 = vld [vmem:[%s3433_s11 + $0x12a] sm:$0xff] }
 0x110   : > { %v588_v22 = vpop.f32.mrf.mxu1 }
 0x111   : > { %v1127_v42 = vadd.f32 %v1054_v32, %v876_v19  ;;  %v589_v47 = vadd.f32 %v588_v22, %v3771_v48  ;;  %v2772_v19 = vld [vmem:[%s3433_s11 + $0x140] sm:$0xff] }
 0x112   : > { %v1307_v60 = vpop.f32.mrf.mxu0 }
 0x113   : > { %2702 = vmatmul.msk.bf16.gmra.mxu1 %vm354_vm0, %v3841_v4  ;;  %2742 = vmatmul.msk.bf16.gmra.mxu2 %vm354_vm0, %v3873_v58  ;;  %v3882_v3 = vadd.f32 %v1304_v40, %v1127_v42  ;;  %v2771_v40 = vld [vmem:[%s3433_s11 + $0x138] sm:$0xff] }
 0x114   : > { %2814 = vmatmul.msk.bf16.gmra.mxu3 %vm354_vm0, %v3875_v28  ;;  %v3897_v55 = vpack.c.bf16 %v2772_v19, %v2771_v40  ;;  %v679_v40 = vld [vmem:[%s3433_s11 + $0x13a] sm:$0xff]  ;;  %v680_v19 = vld [vmem:[%s3433_s11 + $0x142] sm:$0xff] }
 0x115   : > { %4406 = vst [vmem:[#allocation16_spill] sm:$0xff] %v3882_v3  ;;  %2886 = vmatmul.msk.bf16.gmra.mxu0 %vm354_vm0, %v3456_v16  ;;  %v3895_v3 = vpack.c.bf16 %v678_v39, %v677_v53 }
 0x116   : > { %v806_v26 = vpop.f32.mrf.mxu2 }
 0x117   : > { %v877_v48 = vadd.f32 %v806_v26, %v589_v47  ;;  %v1057_v5 = vpop.f32.mrf.mxu3 }
 0x118   : > { %v590_v11 = vpop.f32.mrf.mxu1 }
 0x119   : > { %v1128_v12 = vadd.f32 %v1057_v5, %v877_v48  ;;  %v591_v13 = vadd.f32 %v590_v11, %v3787_v62 }
 0x11a   : > { %v1309_v17 = vpop.f32.mrf.mxu0 }
 0x11b   : > { %v3889_v37 = vadd.f32 %v1307_v60, %v1128_v12 }
 0x11e   : > { %v808_v32 = vpop.f32.mrf.mxu2 }
 0x11f   : > { %v878_v22 = vadd.f32 %v808_v32, %v591_v13  ;;  %v1059_v42 = vpop.f32.mrf.mxu3  ;;  %v2773_v32 = vld [vmem:[%s3433_s11 + $0x150] sm:$0xff] }
 0x120   : > { %v593_v16 = vpop.f32.mrf.mxu1 }
 0x121   : > { %v1129_v47 = vadd.f32 %v1059_v42, %v878_v22  ;;  %v594_v60 = vadd.f32 %v593_v16, %v3659_v50  ;;  %v2774_v22 = vld [vmem:[%s3433_s11 + $0x158] sm:$0xff] }
 0x122   : > { %v1312_v26 = vpop.f32.mrf.mxu0  ;;  %v3919_v16 = vpack.c.bf16 %v2774_v22, %v2773_v32  ;;  %v682_v32 = vld [vmem:[%s3433_s11 + $0x15a] sm:$0xff]  ;;  %v2775_v22 = vld [vmem:[%s3433_s11 + $0x168] sm:$0xff] }
 0x123   : > { %2703 = vmatmul.msk.bf16.gmra.mxu1 %vm354_vm0, %v3875_v28  ;;  %2743 = vmatmul.msk.bf16.gmra.mxu2 %vm354_vm0, %v3895_v3  ;;  %v3903_v62 = vadd.f32 %v1309_v17, %v1129_v47 }
 0x124   : > { %2815 = vmatmul.msk.bf16.gmra.mxu3 %vm354_vm0, %v3897_v55 }
 0x125   : > { %4407 = vst [vmem:[#allocation17_spill] sm:$0xff] %v3903_v62  ;;  %2887 = vmatmul.msk.bf16.gmra.mxu0 %vm354_vm0, %v3507_v38  ;;  %v3917_v38 = vpack.c.bf16 %v680_v19, %v679_v40 }
 0x126   : > { %v811_v48 = vpop.f32.mrf.mxu2 }
 0x127   : > { %v879_v5 = vadd.f32 %v811_v48, %v594_v60  ;;  %v1062_v11 = vpop.f32.mrf.mxu3 }
 0x128   : > { %v595_v12 = vpop.f32.mrf.mxu1 }
 0x129   : > { %v1130_v13 = vadd.f32 %v1062_v11, %v879_v5  ;;  %v596_v17 = vadd.f32 %v595_v12, %v3677_v57 }
 0x12a   : > { %v1314_v53 = vpop.f32.mrf.mxu0 }
 0x12b   : > { %v3910_v39 = vadd.f32 %v1312_v26, %v1130_v13 }
 0x12e   : > { %v813_v42 = vpop.f32.mrf.mxu2 }
 0x12f   : > { %v880_v47 = vadd.f32 %v813_v42, %v596_v17  ;;  %v1064_v62 = vpop.f32.mrf.mxu3  ;;  %v681_v17 = vld [vmem:[%s3433_s11 + $0x152] sm:$0xff] }
 0x130   : > { %v598_v50 = vpop.f32.mrf.mxu1  ;;  %v2776_v42 = vld [vmem:[%s3433_s11 + $0x170] sm:$0xff] }
 0x131   : > { %v1131_v60 = vadd.f32 %v1064_v62, %v880_v47  ;;  %v599_v26 = vadd.f32 %v598_v50, %v3691_v1  ;;  %v950_v50 = vpack.c.bf16 %v2776_v42, %v2775_v22  ;;  %v2777_v22 = vld [vmem:[%s3433_s11 + $0x180] sm:$0xff] }
 0x132   : > { %v1317_v48 = vpop.f32.mrf.mxu0 }
 0x133   : > { %2704 = vmatmul.msk.bf16.gmra.mxu1 %vm354_vm0, %v3897_v55  ;;  %2744 = vmatmul.msk.bf16.gmra.mxu2 %vm354_vm0, %v3917_v38  ;;  %v3925_v57 = vadd.f32 %v1314_v53, %v1131_v60 }
 0x134   : > { %2816 = vmatmul.msk.bf16.gmra.mxu3 %vm354_vm0, %v3919_v16 }
 0x135   : > { %4408 = vst [vmem:[#allocation18_spill] sm:$0xff] %v3925_v57  ;;  %2888 = vmatmul.msk.bf16.gmra.mxu0 %vm354_vm0, %v3543_v54  ;;  %v3939_v54 = vpack.c.bf16 %v682_v32, %v681_v17 }
 0x136   : > { %v816_v62 = vpop.f32.mrf.mxu2 }
 0x137   : > { %v881_v5 = vadd.f32 %v816_v62, %v599_v26  ;;  %v1067_v11 = vpop.f32.mrf.mxu3 }
 0x138   : > { %v600_v12 = vpop.f32.mrf.mxu1 }
 0x139   : > { %v1132_v13 = vadd.f32 %v1067_v11, %v881_v5  ;;  %v601_v53 = vadd.f32 %v600_v12, %v3709_v9 }
 0x13a   : > { %v1319_v40 = vpop.f32.mrf.mxu0 }
 0x13b   : > { %v3932_v19 = vadd.f32 %v1317_v48, %v1132_v13 }
 0x13d   : > { %4409 = vst [vmem:[#allocation19_spill] sm:$0xff] %v3932_v19 }
 0x13e   : > { %v818_v47 = vpop.f32.mrf.mxu2 }
 0x13f   : > { %v882_v60 = vadd.f32 %v818_v47, %v601_v53  ;;  %v1069_v57 = vpop.f32.mrf.mxu3  ;;  %v683_v53 = vld [vmem:[%s3433_s11 + $0x16a] sm:$0xff] }
 0x140   : > { %v603_v1 = vpop.f32.mrf.mxu1  ;;  %v2778_v47 = vld [vmem:[%s3433_s11 + $0x188] sm:$0xff] }
 0x141   : > { %v1133_v26 = vadd.f32 %v1069_v57, %v882_v60  ;;  %v604_v48 = vadd.f32 %v603_v1, %v3723_v21  ;;  %v2849_v60 = vld [vmem:[%s3433_s11 + $0x181] sm:$0xff] }
 0x142   : > { %v1322_v62 = vpop.f32.mrf.mxu0 }
 0x143   : > { %2705 = vmatmul.msk.bf16.gmra.mxu1 %vm354_vm0, %v3919_v16  ;;  %2745 = vmatmul.msk.bf16.gmra.mxu2 %vm354_vm0, %v3939_v54  ;;  %v3945_v9 = vadd.f32 %v1319_v40, %v1133_v26  ;;  %v684_v40 = vld [vmem:[%s3433_s11 + $0x172] sm:$0xff]  ;;  %v2850_v26 = vld [vmem:[%s3433_s11 + $0x189] sm:$0xff] }
 0x144   : > { %2817 = vmatmul.msk.bf16.gmra.mxu3 %vm354_vm0, %v950_v50  ;;  %v3960_v21 = vpack.c.bf16 %v684_v40, %v683_v53 }
 0x145   : > { %4410 = vst [vmem:[#allocation20_spill] sm:$0xff] %v3945_v9  ;;  %2889 = vmatmul.msk.bf16.gmra.mxu0 %vm354_vm0, %v3576_v6 }
 0x146   : > { %v821_v57 = vpop.f32.mrf.mxu2 }
 0x147   : > { %v883_v5 = vadd.f32 %v821_v57, %v604_v48  ;;  %v1072_v11 = vpop.f32.mrf.mxu3  ;;  %v951_v48 = vpack.c.bf16 %v2778_v47, %v2777_v22  ;;  %v1201_v57 = vpack.c.bf16 %v2850_v26, %v2849_v60  ;;  %v3036_v47 = vld [vmem:[%s3433_s11 + $0x39] sm:$0xff] }
 0x148   : > { %v605_v12 = vpop.f32.mrf.mxu1 }
 0x149   : > { %v1134_v13 = vadd.f32 %v1072_v11, %v883_v5  ;;  %v606_v42 = vadd.f32 %v605_v12, %v3747_v29 }
 0x14a   : > { %v1324_v17 = vpop.f32.mrf.mxu0 }
 0x14b   : > { %v3951_v32 = vadd.f32 %v1322_v62, %v1134_v13 }
 0x14e   : > { %v823_v9 = vpop.f32.mrf.mxu2 }
 0x14f   : > { %v884_v6 = vadd.f32 %v823_v9, %v606_v42  ;;  %v1074_v19 = vpop.f32.mrf.mxu3  ;;  %v3035_v42 = vld [vmem:[%s3433_s11 + $0x31] sm:$0xff] }
 0x150   : > { %v608_v1 = vpop.f32.mrf.mxu1 }
 0x151   : > { %v1135_v5 = vadd.f32 %v1074_v19, %v884_v6  ;;  %v609_v9 = vadd.f32 %v608_v1, %v3767_v46 }
 0x152   : > { %v1327_v62 = vpop.f32.mrf.mxu0 }
 0x153   : > { %2706 = vmatmul.msk.bf16.gmra.mxu1 %vm354_vm0, %v950_v50  ;;  %2746 = vmatmul.msk.bf16.gmra.mxu2 %vm354_vm0, %v3960_v21  ;;  %v3965_v29 = vadd.f32 %v1324_v17, %v1135_v5 }
 0x154   : > { %2818 = vmatmul.msk.bf16.gmra.mxu3 %vm354_vm0, %v951_v48  ;;  %v1937_v48 = vpack.c.bf16 %v3036_v47, %v3035_v42 }
 0x155   : > { %2890 = vmatmul.msk.bf16.gmra.mxu0 %vm354_vm0, %v1201_v57 }
 0x156   : > { %v826_v11 = vpop.f32.mrf.mxu2 }
 0x157   : > { %v885_v12 = vadd.f32 %v826_v11, %v609_v9  ;;  %v1077_v13 = vpop.f32.mrf.mxu3 }
 0x158   : > { %v610_v19 = vpop.f32.mrf.mxu1 }
 0x159   : > { %v1136_v53 = vadd.f32 %v1077_v13, %v885_v12  ;;  %v611_v50 = vadd.f32 %v610_v19, %v3785_v61 }
 0x15a   : > { %v1329_v40 = vpop.f32.mrf.mxu0 }
 0x15b   : > { %v3970_v22 = vadd.f32 %v1327_v62, %v1136_v53  ;;  %v3038_v53 = vld [vmem:[%s3433_s11 + $0x51] sm:$0xff] }
 0x15e   : > { %v828_v17 = vpop.f32.mrf.mxu2 }
 0x15f   : > { %v886_v60 = vadd.f32 %v828_v17, %v611_v50  ;;  %v1079_v26 = vpop.f32.mrf.mxu3 }
 0x160   : > { %v613_v6 = vpop.f32.mrf.mxu1 }
 0x161   : > { %v1137_v57 = vadd.f32 %v1079_v26, %v886_v60  ;;  %v614_v61 = vadd.f32 %v613_v6, %v3673_v14 }
 0x162   : > { %v1332_v46 = vpop.f32.mrf.mxu0 }
 0x163   : > { %2947 = vmatmul.msk.bf16.vlgmr.msra.gmra.mxu1 %vm354_vm0, %v3600_v24  ;;  %3019 = vmatmul.msk.bf16.vlgmr.msra.gmra.mxu2 %vm354_vm0, %v3602_v25  ;;  %v3979_v1 = vadd.f32 %v1329_v40, %v1137_v57  ;;  %v3037_v25 = vld [vmem:[%s3433_s11 + $0x49] sm:$0xff] }
 0x164   : > { %3091 = vmatmul.msk.bf16.vlgmr.msra.gmra.mxu3 %vm354_vm0, %v1937_v48  ;;  %v1938_v17 = vpack.c.bf16 %v3038_v53, %v3037_v25 }
 0x165   : > { %3163 = vmatmul.msk.bf16.vlgmr.msra.gmra.mxu0 %vm354_vm0, %v3614_v30 }
 0x166   : > { %v831_v5 = vpop.f32.mrf.mxu2 }
 0x167   : > { %v887_v62 = vadd.f32 %v831_v5, %v614_v61  ;;  %v1082_v9 = vpop.f32.mrf.mxu3 }
 0x168   : > { %v615_v11 = vpop.f32.mrf.mxu1 }
 0x169   : > { %v1138_v12 = vadd.f32 %v1082_v9, %v887_v62  ;;  %v616_v24 = vadd.f32 %v615_v11, %v3685_v63  ;;  %v3040_v9 = vld [vmem:[%s3433_s11 + $0x69] sm:$0xff] }
 0x16a   : > { %v1334_v13 = vpop.f32.mrf.mxu0 }
 0x16b   : > { %v3985_v19 = vadd.f32 %v1332_v46, %v1138_v12 }
 0x16e   : > { %v833_v40 = vpop.f32.mrf.mxu2 }
 0x16f   : > { %v888_v50 = vadd.f32 %v833_v40, %v616_v24  ;;  %v1084_v42 = vpop.f32.mrf.mxu3 }
 0x170   : > { %v618_v47 = vpop.f32.mrf.mxu1 }
 0x171   : > { %v1139_v60 = vadd.f32 %v1084_v42, %v888_v50  ;;  %v619_v63 = vadd.f32 %v618_v47, %v3705_v7 }
 0x172   : > { %v1337_v14 = vpop.f32.mrf.mxu0 }
 0x173   : > { %2948 = vmatmul.msk.bf16.gmra.mxu1 %vm354_vm0, %v3614_v30  ;;  %3020 = vmatmul.msk.bf16.gmra.mxu2 %vm354_vm0, %v3616_v31  ;;  %v3994_v26 = vadd.f32 %v1334_v13, %v1139_v60  ;;  %v3039_v31 = vld [vmem:[%s3433_s11 + $0x61] sm:$0xff] }
 0x174   : > { %3092 = vmatmul.msk.bf16.gmra.mxu3 %vm354_vm0, %v1938_v17  ;;  %v1939_v25 = vpack.c.bf16 %v3040_v9, %v3039_v31 }
 0x175   : > { %3164 = vmatmul.msk.bf16.gmra.mxu0 %vm354_vm0, %v3641_v43 }
 0x176   : > { %v836_v6 = vpop.f32.mrf.mxu2 }
 0x177   : > { %v889_v48 = vadd.f32 %v836_v6, %v619_v63  ;;  %v1087_v57 = vpop.f32.mrf.mxu3  ;;  %v3042_v6 = vld [vmem:[%s3433_s11 + $0x81] sm:$0xff] }
 0x178   : > { %v620_v46 = vpop.f32.mrf.mxu1 }
 0x179   : > { %v1140_v61 = vadd.f32 %v1087_v57, %v889_v48  ;;  %v621_v30 = vadd.f32 %v620_v46, %v3717_v18 }
 0x17a   : > { %v1339_v5 = vpop.f32.mrf.mxu0 }
 0x17b   : > { %v4000_v62 = vadd.f32 %v1337_v14, %v1140_v61 }
 0x17e   : > { %v838_v11 = vpop.f32.mrf.mxu2 }
 0x17f   : > { %v890_v12 = vadd.f32 %v838_v11, %v621_v30  ;;  %v1089_v13 = vpop.f32.mrf.mxu3 }
 0x180   : > { %v623_v24 = vpop.f32.mrf.mxu1 }
 0x181   : > { %v1141_v53 = vadd.f32 %v1089_v13, %v890_v12  ;;  %v624_v18 = vadd.f32 %v623_v24, %v3743_v27 }
 0x182   : > { %v1342_v7 = vpop.f32.mrf.mxu0 }
 0x183   : > { %2949 = vmatmul.msk.bf16.gmra.mxu1 %vm354_vm0, %v3641_v43  ;;  %3021 = vmatmul.msk.bf16.gmra.mxu2 %vm354_vm0, %v3643_v44  ;;  %v4009_v40 = vadd.f32 %v1339_v5, %v1141_v53  ;;  %v3041_v44 = vld [vmem:[%s3433_s11 + $0x79] sm:$0xff] }
 0x184   : > { %3093 = vmatmul.msk.bf16.gmra.mxu3 %vm354_vm0, %v1939_v25  ;;  %v1940_v5 = vpack.c.bf16 %v3042_v6, %v3041_v44 }
 0x185   : > { %3165 = vmatmul.msk.bf16.gmra.mxu0 %vm354_vm0, %v3657_v49 }
 0x186   : > { %v841_v50 = vpop.f32.mrf.mxu2 }
 0x187   : > { %v891_v42 = vadd.f32 %v841_v50, %v624_v18  ;;  %v1092_v47 = vpop.f32.mrf.mxu3 }
 0x188   : > { %v625_v17 = vpop.f32.mrf.mxu1 }
 0x189   : > { %v1142_v60 = vadd.f32 %v1092_v47, %v891_v42  ;;  %v626_v43 = vadd.f32 %v625_v17, %v3761_v41 }
 0x18a   : > { %v1344_v14 = vpop.f32.mrf.mxu0 }
 0x18b   : > { %v4015_v63 = vadd.f32 %v1342_v7, %v1142_v60  ;;  %v3044_v7 = vld [vmem:[%s3433_s11 + $0x99] sm:$0xff] }
 0x18e   : > { %v843_v48 = vpop.f32.mrf.mxu2 }
 0x18f   : > { %v892_v57 = vadd.f32 %v843_v48, %v626_v43  ;;  %v1094_v46 = vpop.f32.mrf.mxu3 }
 0x190   : > { %v628_v61 = vpop.f32.mrf.mxu1 }
 0x191   : > { %v1143_v30 = vadd.f32 %v1094_v46, %v892_v57  ;;  %v629_v41 = vadd.f32 %v628_v61, %v3781_v59 }
 0x192   : > { %v1347_v27 = vpop.f32.mrf.mxu0 }
 0x193   : > { %2950 = vmatmul.msk.bf16.gmra.mxu1 %vm354_vm0, %v3657_v49  ;;  %3022 = vmatmul.msk.bf16.gmra.mxu2 %vm354_vm0, %v3661_v51  ;;  %v4024_v31 = vadd.f32 %v1344_v14, %v1143_v30  ;;  %v3043_v51 = vld [vmem:[%s3433_s11 + $0x91] sm:$0xff] }
 0x194   : > { %3094 = vmatmul.msk.bf16.gmra.mxu3 %vm354_vm0, %v1940_v5  ;;  %v1941_v17 = vpack.c.bf16 %v3044_v7, %v3043_v51  ;;  %v3046_v5 = vld [vmem:[%s3433_s11 + $0xb1] sm:$0xff] }
 0x195   : > { %3166 = vmatmul.msk.bf16.gmra.mxu0 %vm354_vm0, %v3689_v36 }
 0x196   : > { %v846_v9 = vpop.f32.mrf.mxu2 }
 0x197   : > { %v893_v11 = vadd.f32 %v846_v9, %v629_v41  ;;  %v1097_v12 = vpop.f32.mrf.mxu3 }
 0x198   : > { %v630_v13 = vpop.f32.mrf.mxu1 }
 0x199   : > { %v1144_v24 = vadd.f32 %v1097_v12, %v893_v11  ;;  %v631_v49 = vadd.f32 %v630_v13, %v3793_v23 }
 0x19a   : > { %v1349_v25 = vpop.f32.mrf.mxu0 }
 0x19b   : > { %v4030_v53 = vadd.f32 %v1347_v27, %v1144_v24  ;;  %v4412_v24 = vld [vmem:[#allocation5_spill] sm:$0xff] }
 0x19e   : > { %v848_v18 = vpop.f32.mrf.mxu2 }
 0x19f   : > { %v894_v50 = vadd.f32 %v848_v18, %v631_v49  ;;  %v1099_v42 = vpop.f32.mrf.mxu3 }
 0x1a0   : > { %v633_v47 = vpop.f32.mrf.mxu1 }
 0x1a1   : > { %v1145_v60 = vadd.f32 %v1099_v42, %v894_v50  ;;  %v634_v23 = vadd.f32 %v633_v47, %v3675_v56 }
 0x1a2   : > { %v1352_v59 = vpop.f32.mrf.mxu0 }
 0x1a3   : > { %2951 = vmatmul.msk.bf16.gmra.mxu1 %vm354_vm0, %v3689_v36  ;;  %3023 = vmatmul.msk.bf16.gmra.mxu2 %vm354_vm0, %v3693_v2  ;;  %v4039_v14 = vadd.f32 %v1349_v25, %v1145_v60  ;;  %v3045_v2 = vld [vmem:[%s3433_s11 + $0xa9] sm:$0xff] }
 0x1a4   : > { %3095 = vmatmul.msk.bf16.gmra.mxu3 %vm354_vm0, %v1941_v17  ;;  %v1942_v11 = vpack.c.bf16 %v3046_v5, %v3045_v2  ;;  %v3048_v60 = vld [vmem:[%s3433_s11 + $0xc9] sm:$0xff]  ;;  %v4415_v2 = vld [vmem:[#allocation13_spill] sm:$0xff] }
 0x1a5   : > { %3167 = vmatmul.msk.bf16.gmra.mxu0 %vm354_vm0, %v3721_v20  ;;  %v4416_v5 = vld [vmem:[#allocation7_spill] sm:$0xff] }
 0x1a6   : > { %v851_v43 = vpop.f32.mrf.mxu2 }
 0x1a7   : > { %v895_v44 = vadd.f32 %v851_v43, %v634_v23  ;;  %v1102_v6 = vpop.f32.mrf.mxu3 }
 0x1a8   : > { %v635_v48 = vpop.f32.mrf.mxu1 }
 0x1a9   : > { %v1146_v57 = vadd.f32 %v1102_v6, %v895_v44  ;;  %v636_v36 = vadd.f32 %v635_v48, %v3687_v0  ;;  %v4411_v0 = vld [vmem:[#allocation9_spill] sm:$0xff] }
 0x1aa   : > { %v1354_v46 = vpop.f32.mrf.mxu0 }
 0x1ab   : > { %v4045_v61 = vadd.f32 %v1352_v59, %v1146_v57 }
 0x1ae   : > { %v853_v30 = vpop.f32.mrf.mxu2 }
 0x1af   : > { %v896_v27 = vadd.f32 %v853_v30, %v636_v36  ;;  %v1104_v41 = vpop.f32.mrf.mxu3 }
 0x1b0   : > { %v638_v9 = vpop.f32.mrf.mxu1 }
 0x1b1   : > { %v1147_v12 = vadd.f32 %v1104_v41, %v896_v27  ;;  %v639_v25 = vadd.f32 %v638_v9, %v4412_v24 }
 0x1b2   : > { %v1357_v56 = vpop.f32.mrf.mxu0 }
 0x1b3   : > { %2952 = vmatmul.msk.bf16.gmra.mxu1 %vm354_vm0, %v3721_v20  ;;  %3024 = vmatmul.msk.bf16.gmra.mxu2 %vm354_vm0, %v3725_v52  ;;  %v4054_v13 = vadd.f32 %v1354_v46, %v1147_v12  ;;  %v4413_v20 = vld [vmem:[#allocation6_spill] sm:$0xff] }
 0x1b4   : > { %3096 = vmatmul.msk.bf16.gmra.mxu3 %vm354_vm0, %v1942_v11  ;;  %v3047_v52 = vld [vmem:[%s3433_s11 + $0xc1] sm:$0xff] }
 0x1b5   : > { %3168 = vmatmul.msk.bf16.gmra.mxu0 %vm354_vm0, %v4411_v0  ;;  %v1943_v6 = vpack.c.bf16 %v3048_v60, %v3047_v52  ;;  %v4414_v46 = vld [vmem:[#allocation10_spill] sm:$0xff] }
 0x1b6   : > { %v856_v49 = vpop.f32.mrf.mxu2 }
 0x1b7   : > { %v897_v51 = vadd.f32 %v856_v49, %v639_v25  ;;  %v1107_v7 = vpop.f32.mrf.mxu3  ;;  %v3049_v49 = vld [vmem:[%s3433_s11 + $0xd9] sm:$0xff] }
 0x1b8   : > { %v640_v18 = vpop.f32.mrf.mxu1 }
 0x1b9   : > { %v1148_v50 = vadd.f32 %v1107_v7, %v897_v51  ;;  %v641_v17 = vadd.f32 %v640_v18, %v4413_v20  ;;  %v3050_v51 = vld [vmem:[%s3433_s11 + $0xe1] sm:$0xff] }
 0x1ba   : > { %v1359_v42 = vpop.f32.mrf.mxu0  ;;  %v1944_v20 = vpack.c.bf16 %v3050_v51, %v3049_v49 }
 0x1bb   : > { %v4060_v47 = vadd.f32 %v1357_v56, %v1148_v50 }
 0x1be   : > { %v858_v59 = vpop.f32.mrf.mxu2 }
 0x1bf   : > { %v898_v23 = vadd.f32 %v858_v59, %v641_v17  ;;  %v1109_v43 = vpop.f32.mrf.mxu3  ;;  %v4418_v59 = vld [vmem:[#allocation11_spill] sm:$0xff] }
 0x1c0   : > { %v643_v44 = vpop.f32.mrf.mxu1 }
 0x1c1   : > { %v1149_v48 = vadd.f32 %v1109_v43, %v898_v23  ;;  %v644_v30 = vadd.f32 %v643_v44, %v4416_v5 }
 0x1c2   : > { %v1362_v57 = vpop.f32.mrf.mxu0 }
 0x1c3   : > { %2953 = vmatmul.msk.bf16.gmra.mxu1 %vm354_vm0, %v4411_v0  ;;  %3025 = vmatmul.msk.bf16.gmra.mxu2 %vm354_vm0, %v4414_v46  ;;  %v4069_v36 = vadd.f32 %v1359_v42, %v1149_v48  ;;  %v4417_v0 = vld [vmem:[#allocation8_spill] sm:$0xff] }
 0x1c4   : > { %3097 = vmatmul.msk.bf16.gmra.mxu3 %vm354_vm0, %v1943_v6 }
 0x1c5   : > { %3169 = vmatmul.msk.bf16.gmra.mxu0 %vm354_vm0, %v4415_v2 }
 0x1c6   : > { %v861_v27 = vpop.f32.mrf.mxu2 }
 0x1c7   : > { %v899_v41 = vadd.f32 %v861_v27, %v644_v30  ;;  %v1112_v9 = vpop.f32.mrf.mxu3  ;;  %v3052_v27 = vld [vmem:[%s3433_s11 + $0xf9] sm:$0xff] }
 0x1c8   : > { %v645_v11 = vpop.f32.mrf.mxu1 }
 0x1c9   : > { %v1150_v12 = vadd.f32 %v1112_v9, %v899_v41  ;;  %v646_v25 = vadd.f32 %v645_v11, %v4417_v0 }
 0x1ca   : > { %v1364_v56 = vpop.f32.mrf.mxu0 }
 0x1cb   : > { %v4075_v24 = vadd.f32 %v1362_v57, %v1150_v12 }
 0x1ce   : > { %v863_v7 = vpop.f32.mrf.mxu2 }
 0x1cf   : > { %v900_v18 = vadd.f32 %v863_v7, %v646_v25  ;;  %v1114_v50 = vpop.f32.mrf.mxu3 }
 0x1d0   : > { %v648_v42 = vpop.f32.mrf.mxu1 }
 0x1d1   : > { %v1151_v17 = vadd.f32 %v1114_v50, %v900_v18  ;;  %v649_v23 = vadd.f32 %v648_v42, %v4418_v59  ;;  %v4115_v42 = vld [vmem:[%s4385_s2] ss:$0 sm:$0xff]  ;;  %v4420_v59 = vld [vmem:[#allocation14_spill] sm:$0xff] }
 0x1d2   : > { %v1367_v52 = vpop.f32.mrf.mxu0 }
 0x1d3   : > { %2954 = vmatmul.msk.bf16.gmra.mxu1 %vm354_vm0, %v4415_v2  ;;  %3026 = vmatmul.msk.bf16.gmra.mxu2 %vm354_vm0, %v3799_v15  ;;  %v4084_v60 = vadd.f32 %v1364_v56, %v1151_v17  ;;  %v4419_v2 = vld [vmem:[#allocation12_spill] sm:$0xff]  ;;  %v2441_v17 = vld [vmem:[%s4110_s6] sm:$0xff] }
 0x1d4   : > { %3098 = vmatmul.msk.bf16.gmra.mxu3 %vm354_vm0, %v1944_v20  ;;  %v3051_v15 = vld [vmem:[%s3433_s11 + $0xf1] sm:$0xff] }
 0x1d5   : > { %3170 = vmatmul.msk.bf16.gmra.mxu0 %vm354_vm0, %v3817_v8  ;;  %v1945_v56 = vpack.c.bf16 %v3052_v27, %v3051_v15 }
 0x1d6   : > { %v866_v43 = vpop.f32.mrf.mxu2 }
 0x1d7   : > { %v901_v44 = vadd.f32 %v866_v43, %v649_v23  ;;  %v1117_v6 = vpop.f32.mrf.mxu3  ;;  %v3053_v43 = vld [vmem:[%s3433_s11 + $0x109] sm:$0xff] }
 0x1d8   : > { %v650_v48 = vpop.f32.mrf.mxu1 }
 0x1d9   : > { %v1152_v57 = vadd.f32 %v1117_v6, %v901_v44  ;;  %v651_v30 = vadd.f32 %v650_v48, %v4419_v2  ;;  %v3054_v44 = vld [vmem:[%s3433_s11 + $0x111] sm:$0xff] }
 0x1da   : > { %v1369_v46 = vpop.f32.mrf.mxu0 }
 0x1db   : > { %v4090_v5 = vadd.f32 %v1367_v52, %v1152_v57 }
 0x1de   : > { %v868_v41 = vpop.f32.mrf.mxu2 }
 0x1df   : > { %v902_v9 = vadd.f32 %v868_v41, %v651_v30  ;;  %v1119_v11 = vpop.f32.mrf.mxu3  ;;  %v1946_v30 = vpack.c.bf16 %v3054_v44, %v3053_v43 }
 0x1e0   : > { %v1542_v12 = vpop.f32.mrf.mxu1 }
 0x1e1   : > { %v1153_v0 = vadd.f32 %v1119_v11, %v902_v9  ;;  %v1622_v51 = vadd.f32 %v1542_v12, %v3811_v33  ;;  %v2442_v9 = vld [vmem:[%s4110_s6 + $0x8] sm:$0xff] }
 0x1e2   : > { %v2293_v25 = vpop.f32.mrf.mxu0 }
 0x1e3   : > { %2955 = vmatmul.msk.bf16.gmra.mxu1 %vm354_vm0, %v3817_v8  ;;  %3027 = vmatmul.msk.bf16.gmra.mxu2 %vm354_vm0, %v3819_v45  ;;  %v4099_v49 = vadd.f32 %v1369_v46, %v1153_v0 }
 0x1e4   : > { %3099 = vmatmul.msk.bf16.gmra.mxu3 %vm354_vm0, %v1945_v56 }
 0x1e5   : > { %3171 = vmatmul.msk.bf16.gmra.mxu0 %vm354_vm0, %v3839_v34 }
 0x1e6   : > { %v1793_v7 = vpop.f32.mrf.mxu2 }
 0x1e7   : > { %v1873_v18 = vadd.f32 %v1793_v7, %v1622_v51  ;;  %v2043_v50 = vpop.f32.mrf.mxu3 }
 0x1e8   : > { %v1544_v8 = vpop.f32.mrf.mxu1 }
 0x1e9   : > { %v2123_v45 = vadd.f32 %v2043_v50, %v1873_v18  ;;  %v1623_v23 = vadd.f32 %v1544_v8, %v4420_v59  ;;  %v2443_v50 = vld [vmem:[%s4110_s6 + $0x10] sm:$0xff] }
 0x1ea   : > { %v2295_v33 = vpop.f32.mrf.mxu0 }
 0x1eb   : > { %v2373_v20 = vadd.f32 %v2293_v25, %v2123_v45 }
 0x1ed   : > { %v2409_v52 = vadd.f32 %v4115_v42, %v2373_v20  ;;  %v3056_v20 = vld [vmem:[%s3433_s11 + $0x129] sm:$0xff] }
 0x1ee   : > { %v1795_v6 = vpop.f32.mrf.mxu2 }
 0x1ef   : > { %v2473_v48 = vadd.f32 %v2441_v17, %v2409_v52  ;;  %v1874_v57 = vadd.f32 %v1795_v6, %v1623_v23  ;;  %v2045_v46 = vpop.f32.mrf.mxu3 }
 0x1f0   : > { %v1547_v2 = vpop.f32.mrf.mxu1 }
 0x1f1   : > { %2505 = vst.msk [vmem:[%s4124_s5] sm:$0xff] %vm354_vm0, %v2473_v48  ;;  %v2124_v15 = vadd.f32 %v2045_v46, %v1874_v57  ;;  %v1624_v12 = vadd.f32 %v1547_v2, %v3833_v35  ;;  %v4421_v46 = vld [vmem:[#allocation15_spill] sm:$0xff] }
 0x1f2   : > { %v2298_v27 = vpop.f32.mrf.mxu0 }
 0x1f3   : > { %v2374_v41 = vadd.f32 %v2295_v33, %v2124_v15  ;;  %2956 = vmatmul.msk.bf16.gmra.mxu1 %vm354_vm0, %v3839_v34  ;;  %3028 = vmatmul.msk.bf16.gmra.mxu2 %vm354_vm0, %v3841_v4  ;;  %v3055_v33 = vld [vmem:[%s3433_s11 + $0x121] sm:$0xff] }
 0x1f4   : > { %3100 = vmatmul.msk.bf16.gmra.mxu3 %vm354_vm0, %v1946_v30  ;;  %v1947_v43 = vpack.c.bf16 %v3056_v20, %v3055_v33 }
 0x1f5   : > { %3172 = vmatmul.msk.bf16.gmra.mxu0 %vm354_vm0, %v3873_v58  ;;  %v2410_v11 = vadd.f32 %v4115_v42, %v2374_v41 }
 0x1f6   : > { %v1798_v56 = vpop.f32.mrf.mxu2 }
 0x1f7   : > { %v2474_v0 = vadd.f32 %v2442_v9, %v2410_v11  ;;  %v1875_v25 = vadd.f32 %v1798_v56, %v1624_v12  ;;  %v2048_v34 = vpop.f32.mrf.mxu3  ;;  %v2445_v12 = vld [vmem:[%s4110_s6 + $0x20] sm:$0xff] }
 0x1f8   : > { %v1549_v51 = vpop.f32.mrf.mxu1 }
 0x1f9   : > { %2506 = vst.msk [vmem:[%s4124_s5 + $0x8] sm:$0xff] %vm354_vm0, %v2474_v0  ;;  %v2125_v4 = vadd.f32 %v2048_v34, %v1875_v25  ;;  %v1625_v45 = vadd.f32 %v1549_v51, %v3848_v10  ;;  %v2444_v10 = vld [vmem:[%s4110_s6 + $0x18] sm:$0xff]  ;;  %v3058_v51 = vld [vmem:[%s3433_s11 + $0x141] sm:$0xff] }
 0x1fa   : > { %v2300_v7 = vpop.f32.mrf.mxu0  ;;  %v4422_v0 = vld [vmem:[#allocation16_spill] sm:$0xff] }
 0x1fb   : > { %v2375_v18 = vadd.f32 %v2298_v27, %v2125_v4  ;;  %v3057_v34 = vld [vmem:[%s3433_s11 + $0x139] sm:$0xff] }
 0x1fd   : > { %v2411_v8 = vadd.f32 %v4115_v42, %v2375_v18 }
 0x1fe   : > { %v1800_v35 = vpop.f32.mrf.mxu2 }
 0x1ff   : > { %v2475_v17 = vadd.f32 %v2443_v50, %v2411_v8  ;;  %v1876_v52 = vadd.f32 %v1800_v35, %v1625_v45  ;;  %v2050_v59 = vpop.f32.mrf.mxu3  ;;  %v1948_v45 = vpack.c.bf16 %v3058_v51, %v3057_v34 }
 0x200   : > { %v1552_v23 = vpop.f32.mrf.mxu1 }
 0x201   : > { %2507 = vst.msk [vmem:[%s4124_s5 + $0x10] sm:$0xff] %vm354_vm0, %v2475_v17  ;;  %v2126_v44 = vadd.f32 %v2050_v59, %v1876_v52  ;;  %v1626_v2 = vadd.f32 %v1552_v23, %v4421_v46  ;;  %v2446_v17 = vld [vmem:[%s4110_s6 + $0x28] sm:$0xff] }
 0x202   : > { %v2303_v6 = vpop.f32.mrf.mxu0 }
 0x203   : > { %v2376_v48 = vadd.f32 %v2300_v7, %v2126_v44  ;;  %2957 = vmatmul.msk.bf16.gmra.mxu1 %vm354_vm0, %v3873_v58  ;;  %3029 = vmatmul.msk.bf16.gmra.mxu2 %vm354_vm0, %v3875_v28 }
 0x204   : > { %3101 = vmatmul.msk.bf16.gmra.mxu3 %vm354_vm0, %v1947_v43 }
 0x205   : > { %3173 = vmatmul.msk.bf16.gmra.mxu0 %vm354_vm0, %v3895_v3  ;;  %v2412_v57 = vadd.f32 %v4115_v42, %v2376_v48 }
 0x206   : > { %v1803_v30 = vpop.f32.mrf.mxu2 }
 0x207   : > { %v2476_v15 = vadd.f32 %v2444_v10, %v2412_v57  ;;  %v1877_v27 = vadd.f32 %v1803_v30, %v1626_v2  ;;  %v2053_v58 = vpop.f32.mrf.mxu3  ;;  %v2447_v57 = vld [vmem:[%s4110_s6 + $0x30] sm:$0xff]  ;;  %v4423_v2 = vld [vmem:[#allocation17_spill] sm:$0xff] }
 0x208   : > { %v1554_v41 = vpop.f32.mrf.mxu1 }
 0x209   : > { %2508 = vst.msk [vmem:[%s4124_s5 + $0x18] sm:$0xff] %vm354_vm0, %v2476_v15  ;;  %v2127_v28 = vadd.f32 %v2053_v58, %v1877_v27  ;;  %v1627_v25 = vadd.f32 %v1554_v41, %v4422_v0  ;;  %v3059_v15 = vld [vmem:[%s3433_s11 + $0x151] sm:$0xff]  ;;  %v3060_v27 = vld [vmem:[%s3433_s11 + $0x159] sm:$0xff] }
 0x20a   : > { %v2305_v9 = vpop.f32.mrf.mxu0 }
 0x20b   : > { %v2377_v11 = vadd.f32 %v2303_v6, %v2127_v28 }
 0x20d   : > { %v2413_v56 = vadd.f32 %v4115_v42, %v2377_v11  ;;  %v1949_v11 = vpack.c.bf16 %v3060_v27, %v3059_v15  ;;  %v2450_v27 = vld [vmem:[%s4110_s6 + $0x48] sm:$0xff] }
 0x20e   : > { %v1805_v4 = vpop.f32.mrf.mxu2 }
 0x20f   : > { %v2477_v7 = vadd.f32 %v2445_v12, %v2413_v56  ;;  %v1878_v18 = vadd.f32 %v1805_v4, %v1627_v25  ;;  %v2055_v50 = vpop.f32.mrf.mxu3  ;;  %v2448_v25 = vld [vmem:[%s4110_s6 + $0x38] sm:$0xff] }
 0x210   : > { %v1557_v8 = vpop.f32.mrf.mxu1 }
 0x211   : > { %2509 = vst.msk [vmem:[%s4124_s5 + $0x20] sm:$0xff] %vm354_vm0, %v2477_v7  ;;  %v2128_v33 = vadd.f32 %v2055_v50, %v1878_v18  ;;  %v1628_v59 = vadd.f32 %v1557_v8, %v3889_v37 }
 0x212   : > { %v2308_v20 = vpop.f32.mrf.mxu0 }
 0x213   : > { %v2378_v35 = vadd.f32 %v2305_v9, %v2128_v33  ;;  %2958 = vmatmul.msk.bf16.gmra.mxu1 %vm354_vm0, %v3895_v3  ;;  %3030 = vmatmul.msk.bf16.gmra.mxu2 %vm354_vm0, %v3897_v55  ;;  %v2449_v33 = vld [vmem:[%s4110_s6 + $0x40] sm:$0xff] }
 0x214   : > { %3102 = vmatmul.msk.bf16.gmra.mxu3 %vm354_vm0, %v1948_v45 }
 0x215   : > { %3174 = vmatmul.msk.bf16.gmra.mxu0 %vm354_vm0, %v3917_v38  ;;  %v2414_v52 = vadd.f32 %v4115_v42, %v2378_v35  ;;  %v2989_v35 = vld [vmem:[%s3433_s11 + $0x168] sm:$0xff] }
 0x216   : > { %v1808_v23 = vpop.f32.mrf.mxu2 }
 0x217   : > { %v2478_v43 = vadd.f32 %v2446_v17, %v2414_v52  ;;  %v1879_v44 = vadd.f32 %v1808_v23, %v1628_v59  ;;  %v2058_v3 = vpop.f32.mrf.mxu3  ;;  %v2990_v17 = vld [vmem:[%s3433_s11 + $0x170] sm:$0xff]  ;;  %v4424_v52 = vld [vmem:[#allocation18_spill] sm:$0xff] }
 0x218   : > { %v1559_v6 = vpop.f32.mrf.mxu1  ;;  %v3061_v23 = vld [vmem:[%s3433_s11 + $0x169] sm:$0xff] }
 0x219   : > { %2510 = vst.msk [vmem:[%s4124_s5 + $0x28] sm:$0xff] %vm354_vm0, %v2478_v43  ;;  %v2129_v55 = vadd.f32 %v2058_v3, %v1879_v44  ;;  %v1629_v30 = vadd.f32 %v1559_v6, %v4423_v2  ;;  %v3062_v43 = vld [vmem:[%s3433_s11 + $0x171] sm:$0xff] }
 0x21a   : > { %v2310_v48 = vpop.f32.mrf.mxu0 }
 0x21b   : > { %v2379_v10 = vadd.f32 %v2308_v20, %v2129_v55  ;;  %v2917_v20 = vld [vmem:[%s3433_s11 + $0x152] sm:$0xff] }
 0x21d   : > { %v2415_v46 = vadd.f32 %v4115_v42, %v2379_v10  ;;  %v1700_v10 = vpack.c.bf16 %v2990_v17, %v2989_v35 }
 0x21e   : > { %v1810_v37 = vpop.f32.mrf.mxu2 }
 0x21f   : > { %v2479_v58 = vadd.f32 %v2447_v57, %v2415_v46  ;;  %v1880_v41 = vadd.f32 %v1810_v37, %v1629_v30  ;;  %v2060_v28 = vpop.f32.mrf.mxu3  ;;  %v1950_v46 = vpack.c.bf16 %v3062_v43, %v3061_v23 }
 0x220   : > { %v1562_v9 = vpop.f32.mrf.mxu1 }
 0x221   : > { %2511 = vst.msk [vmem:[%s4124_s5 + $0x30] sm:$0xff] %vm354_vm0, %v2479_v58  ;;  %v2130_v12 = vadd.f32 %v2060_v28, %v1880_v41  ;;  %v1630_v51 = vadd.f32 %v1562_v9, %v3910_v39  ;;  %v4425_v58 = vld [vmem:[#allocation19_spill] sm:$0xff] }
 0x222   : > { %v2313_v56 = vpop.f32.mrf.mxu0 }
 0x223   : > { %v2380_v0 = vadd.f32 %v2310_v48, %v2130_v12  ;;  %2959 = vmatmul.msk.bf16.gmra.mxu1 %vm354_vm0, %v3917_v38  ;;  %3031 = vmatmul.msk.bf16.gmra.mxu2 %vm354_vm0, %v3919_v16 }
 0x224   : > { %3103 = vmatmul.msk.bf16.gmra.mxu3 %vm354_vm0, %v1949_v11 }
 0x225   : > { %3175 = vmatmul.msk.bf16.gmra.mxu0 %vm354_vm0, %v3939_v54  ;;  %v2416_v34 = vadd.f32 %v4115_v42, %v2380_v0  ;;  %v2918_v54 = vld [vmem:[%s3433_s11 + $0x15a] sm:$0xff] }
 0x226   : > { %v1813_v4 = vpop.f32.mrf.mxu2  ;;  %v1449_v48 = vpack.c.bf16 %v2918_v54, %v2917_v20  ;;  %v3136_v20 = vld [vmem:[%s3433_s11 + $0x18a] sm:$0xff] }
 0x227   : > { %v2480_v38 = vadd.f32 %v2448_v25, %v2416_v34  ;;  %v1881_v7 = vadd.f32 %v1813_v4, %v1630_v51  ;;  %v2063_v16 = vpop.f32.mrf.mxu3  ;;  %v2919_v51 = vld [vmem:[%s3433_s11 + $0x16a] sm:$0xff]  ;;  %v2920_v4 = vld [vmem:[%s3433_s11 + $0x172] sm:$0xff] }
 0x228   : > { %v1564_v18 = vpop.f32.mrf.mxu1 }
 0x229   : > { %2512 = vst.msk [vmem:[%s4124_s5 + $0x38] sm:$0xff] %vm354_vm0, %v2480_v38  ;;  %v2131_v50 = vadd.f32 %v2063_v16, %v1881_v7  ;;  %v1631_v59 = vadd.f32 %v1564_v18, %v4424_v52  ;;  %v2991_v38 = vld [vmem:[%s3433_s11 + $0x180] sm:$0xff]  ;;  %v2992_v7 = vld [vmem:[%s3433_s11 + $0x188] sm:$0xff]  ;;  %v1450_v52 = vpack.c.bf16 %v2920_v4, %v2919_v51 }
 0x22a   : > { %v2315_v8 = vpop.f32.mrf.mxu0  ;;  %v3063_v16 = vld [vmem:[%s3433_s11 + $0x181] sm:$0xff] }
 0x22b   : > { %v2381_v45 = vadd.f32 %v2313_v56, %v2131_v50  ;;  %v4426_v50 = vld [vmem:[#allocation20_spill] sm:$0xff] }
 0x22d   : > { %v2417_v39 = vadd.f32 %v4115_v42, %v2381_v45  ;;  %v3064_v45 = vld [vmem:[%s3433_s11 + $0x189] sm:$0xff] }
 0x22e   : > { %v1815_v44 = vpop.f32.mrf.mxu2  ;;  %v1951_v43 = vpack.c.bf16 %v3064_v45, %v3063_v16 }
 0x22f   : > { %v2481_v3 = vadd.f32 %v2449_v33, %v2417_v39  ;;  %v1882_v6 = vadd.f32 %v1815_v44, %v1631_v59  ;;  %v2065_v55 = vpop.f32.mrf.mxu3  ;;  %v3135_v33 = vld [vmem:[%s3433_s11 + $0x182] sm:$0xff]  ;;  %v1701_v59 = vpack.c.bf16 %v2992_v7, %v2991_v38 }
 0x230   : > { %v1567_v57 = vpop.f32.mrf.mxu1  ;;  %v2201_v44 = vpack.c.bf16 %v3136_v20, %v3135_v33 }
 0x231   : > { %2513 = vst.msk [vmem:[%s4124_s5 + $0x40] sm:$0xff] %vm354_vm0, %v2481_v3  ;;  %v2132_v2 = vadd.f32 %v2065_v55, %v1882_v6  ;;  %v1632_v41 = vadd.f32 %v1567_v57, %v4425_v58 }
 0x232   : > { %v2318_v30 = vpop.f32.mrf.mxu0 }
 0x233   : > { %v2382_v15 = vadd.f32 %v2315_v8, %v2132_v2  ;;  %2960 = vmatmul.msk.bf16.gmra.mxu1 %vm354_vm0, %v1449_v48  ;;  %3032 = vmatmul.msk.bf16.gmra.mxu2 %vm354_vm0, %v1700_v10  ;;  %v2452_v48 = vld [vmem:[%s4110_s6 + $0x58] sm:$0xff] }
 0x234   : > { %3104 = vmatmul.msk.bf16.gmra.mxu3 %vm354_vm0, %v1950_v46 }
 0x235   : > { %3176 = vmatmul.msk.bf16.gmra.mxu0 %vm354_vm0, %v3960_v21  ;;  %v2418_v37 = vadd.f32 %v4115_v42, %v2382_v15  ;;  %v2451_v21 = vld [vmem:[%s4110_s6 + $0x50] sm:$0xff] }
 0x236   : > { %v1818_v28 = vpop.f32.mrf.mxu2 }
 0x237   : > { %v2482_v9 = vadd.f32 %v2450_v27, %v2418_v37  ;;  %v1883_v11 = vadd.f32 %v1818_v28, %v1632_v41  ;;  %v2068_v12 = vpop.f32.mrf.mxu3  ;;  %v2453_v28 = vld [vmem:[%s4110_s6 + $0x60] sm:$0xff] }
 0x238   : > { %v1569_v56 = vpop.f32.mrf.mxu1 }
 0x239   : > { %2514 = vst.msk [vmem:[%s4124_s5 + $0x48] sm:$0xff] %vm354_vm0, %v2482_v9  ;;  %v2133_v0 = vadd.f32 %v2068_v12, %v1883_v11  ;;  %v1633_v8 = vadd.f32 %v1569_v56, %v4426_v50  ;;  %v2993_v9 = vld [vmem:[%s3433_s11 + $0x198] sm:$0xff]  ;;  %v2994_v11 = vld [vmem:[%s3433_s11 + $0x1a0] sm:$0xff] }
 0x23a   : > { %v2320_v25 = vpop.f32.mrf.mxu0  ;;  %v3065_v12 = vld [vmem:[%s3433_s11 + $0x199] sm:$0xff]  ;;  %v1702_v7 = vpack.c.bf16 %v2994_v11, %v2993_v9 }
 0x23b   : > { %v2383_v34 = vadd.f32 %v2318_v30, %v2133_v0  ;;  %v3066_v0 = vld [vmem:[%s3433_s11 + $0x1a1] sm:$0xff] }
 0x23d   : > { %v2419_v18 = vadd.f32 %v4115_v42, %v2383_v34  ;;  %v3138_v34 = vld [vmem:[%s3433_s11 + $0x1a2] sm:$0xff] }
 0x23e   : > { %v1820_v54 = vpop.f32.mrf.mxu2 }
 0x23f   : > { %v2483_v35 = vadd.f32 %v2451_v21, %v2419_v18  ;;  %v1884_v17 = vadd.f32 %v1820_v54, %v1633_v8  ;;  %v2070_v39 = vpop.f32.mrf.mxu3  ;;  %v1952_v18 = vpack.c.bf16 %v3066_v0, %v3065_v12  ;;  %v2457_v0 = vld [vmem:[%s4110_s6 + $0x80] sm:$0xff] }
 0x240   : > { %v1572_v23 = vpop.f32.mrf.mxu1 }
 0x241   : > { %2515 = vst.msk [vmem:[%s4124_s5 + $0x50] sm:$0xff] %vm354_vm0, %v2483_v35  ;;  %v2134_v3 = vadd.f32 %v2070_v39, %v1884_v17  ;;  %v1634_v57 = vadd.f32 %v1572_v23, %v3951_v32 }
 0x242   : > { %v2323_v6 = vpop.f32.mrf.mxu0 }
 0x243   : > { %v2384_v55 = vadd.f32 %v2320_v25, %v2134_v3  ;;  %2961 = vmatmul.msk.bf16.gmra.mxu1 %vm354_vm0, %v1450_v52  ;;  %3033 = vmatmul.msk.bf16.gmra.mxu2 %vm354_vm0, %v1701_v59  ;;  %v3137_v25 = vld [vmem:[%s3433_s11 + $0x19a] sm:$0xff]  ;;  %v2455_v3 = vld [vmem:[%s4110_s6 + $0x70] sm:$0xff]  ;;  %s3221_s11 = sshll.u32 %s3389_s19, 8  ;;  %s2538_s19 = scalar_lea.sflag [#allocation3], %s203_s28 }
 0x244   : > { %3105 = vmatmul.msk.bf16.gmra.mxu3 %vm354_vm0, %v1951_v43  ;;  %v2202_v50 = vpack.c.bf16 %v3138_v34, %v3137_v25  ;;  %s2549_s13 = scalar_lea.hbm %s4387_s4, %s3221_s11 }
 0x245   : > { %3177 = vmatmul.msk.bf16.gmra.mxu0 %vm354_vm0, %v2201_v44  ;;  %v2420_v10 = vadd.f32 %v4115_v42, %v2384_v55  ;;  %s2552_s20 = sshll.u32 %s2549_s13, 4  ;;  %s2553_s20 = int_to_ptr.hbm [resolvable:$true] %s2552_s20 }
 0x246   : > { %v1823_v46 = vpop.f32.mrf.mxu2  ;;  %s3291_s22 = sshra.s32 %s2553_s20, 4  ;;  %s3292_s22 = int_to_ptr.hbm [resolvable:$true] %s3291_s22 }
 0x247   : > { %v2484_v2 = vadd.f32 %v2452_v48, %v2420_v10  ;;  %v1885_v30 = vadd.f32 %v1823_v46, %v1634_v57  ;;  %v2073_v15 = vpop.f32.mrf.mxu3  ;;  %s3293_s23 = scalar_lea.hbm %s3292_s22, 256  ;;  %p3298_p0 = scmp.lt.s32.totalorder %s3292_s22, %s4387_s4 }
 0x248   : > { %v1574_v27 = vpop.f32.mrf.mxu1  ;;  %p3294_p11 = scmp.ne.s32.totalorder %s3292_s22, %s3293_s23  ;;  %p3299_p1 = scmp.lt.s32.totalorder %s3297_s30, %s3293_s23 }
 0x249   : > { %2516 = vst.msk [vmem:[%s4124_s5 + $0x58] sm:$0xff] %vm354_vm0, %v2484_v2  ;;  %v2135_v37 = vadd.f32 %v2073_v15, %v1885_v30  ;;  %v1635_v56 = vadd.f32 %v1574_v27, %v3965_v29  ;;  %v2454_v29 = vld [vmem:[%s4110_s6 + $0x68] sm:$0xff]  ;;  %v2456_v27 = vld [vmem:[%s4110_s6 + $0x78] sm:$0xff] }
 0x24a   : > { %v2325_v58 = vpop.f32.mrf.mxu0  ;;  %p3295_p12 = pnand %p3294_p11, %p3406_p5  ;;  %p3300_p2 = por %p3299_p1, %p3298_p0 }
 0x24b   : > { %v2385_v41 = vadd.f32 %v2323_v6, %v2135_v37 }
 0x24c   : > { %p3296_p13 = pneg %p3295_p12 }
 0x24d   : > { %v2421_v32 = vadd.f32 %v4115_v42, %v2385_v41 }
 0x24e   : > { %v1825_v21 = vpop.f32.mrf.mxu2  ;;  %p3301_p3 = pnand %p3300_p2, %p3296_p13 }
 0x24f   : > { %v2485_v51 = vadd.f32 %v2453_v28, %v2421_v32  ;;  %v1886_v4 = vadd.f32 %v1825_v21, %v1635_v56  ;;  %v2075_v38 = vpop.f32.mrf.mxu3 }
 0x250   : > { %v1577_v16 = vpop.f32.mrf.mxu1 }
 0x251   : > { %2517 = vst.msk [vmem:[%s4124_s5 + $0x60] sm:$0xff] %vm354_vm0, %v2485_v51  ;;  %v2136_v8 = vadd.f32 %v2075_v38, %v1886_v4  ;;  %v1636_v54 = vadd.f32 %v1577_v16, %v3970_v22 }
 0x252   : > { %v2328_v45 = vpop.f32.mrf.mxu0 }
 0x253   : > { %v2386_v33 = vadd.f32 %v2325_v58, %v2136_v8  ;;  %2962 = vmatmul.msk.bf16.gmra.mxu1 %vm354_vm0, %v2201_v44  ;;  %3034 = vmatmul.msk.bf16.gmra.mxu2 %vm354_vm0, %v1702_v7 }
 0x254   : > { %3106 = vmatmul.msk.bf16.gmra.mxu3 %vm354_vm0, %v1952_v18 }
 0x255   : > { %3178 = vmatmul.msk.bf16.gmra.mxu0 %vm354_vm0, %v2202_v50  ;;  %v2422_v20 = vadd.f32 %v4115_v42, %v2386_v33  ;;  %v2458_v50 = vld [vmem:[%s4110_s6 + $0x88] sm:$0xff] }
 0x256   : > { %v1828_v35 = vpop.f32.mrf.mxu2 }
 0x257   : > { %v2486_v17 = vadd.f32 %v2454_v29, %v2422_v20  ;;  %v1887_v39 = vadd.f32 %v1828_v35, %v1636_v54  ;;  %v2078_v52 = vpop.f32.mrf.mxu3 }
 0x258   : > { %v1579_v59 = vpop.f32.mrf.mxu1 }
 0x259   : > { %2518 = vst.msk [vmem:[%s4124_s5 + $0x68] sm:$0xff] %vm354_vm0, %v2486_v17  ;;  %v2137_v23 = vadd.f32 %v2078_v52, %v1887_v39  ;;  %v1637_v55 = vadd.f32 %v1579_v59, %v3979_v1  ;;  %v2459_v52 = vld [vmem:[%s4110_s6 + $0x90] sm:$0xff] }
 0x25a   : > { %v2330_v43 = vpop.f32.mrf.mxu0 }
 0x25b   : > { %v2387_v44 = vadd.f32 %v2328_v45, %v2137_v23 }
 0x25d   : > { %v2423_v6 = vadd.f32 %v4115_v42, %v2387_v44 }
 0x25e   : > { %v1830_v48 = vpop.f32.mrf.mxu2 }
 0x25f   : > { %v2487_v10 = vadd.f32 %v2455_v3, %v2423_v6  ;;  %v1888_v22 = vadd.f32 %v1830_v48, %v1637_v55  ;;  %v2080_v57 = vpop.f32.mrf.mxu3 }
 0x260   : > { %v1582_v46 = vpop.f32.mrf.mxu1 }
 0x261   : > { %2519 = vst.msk [vmem:[%s4124_s5 + $0x70] sm:$0xff] %vm354_vm0, %v2487_v10  ;;  %v2138_v2 = vadd.f32 %v2080_v57, %v1888_v22  ;;  %v1638_v58 = vadd.f32 %v1582_v46, %v3985_v19  ;;  %v2460_v22 = vld [vmem:[%s4110_s6 + $0x98] sm:$0xff] }
 0x262   : > { %v2333_v30 = vpop.f32.mrf.mxu0 }
 0x263   : > { %v2388_v15 = vadd.f32 %v2330_v43, %v2138_v2 }
 0x265   : > { %v2424_v37 = vadd.f32 %v4115_v42, %v2388_v15 }
 0x266   : > { %v1833_v41 = vpop.f32.mrf.mxu2 }
 0x267   : > { %v2488_v28 = vadd.f32 %v2456_v27, %v2424_v37  ;;  %v1889_v1 = vadd.f32 %v1833_v41, %v1638_v58  ;;  %v2083_v9 = vpop.f32.mrf.mxu3 }
 0x268   : > { %v1584_v11 = vpop.f32.mrf.mxu1 }
 0x269   : > { %2520 = vst.msk [vmem:[%s4124_s5 + $0x78] sm:$0xff] %vm354_vm0, %v2488_v28  ;;  %v2139_v12 = vadd.f32 %v2083_v9, %v1889_v1  ;;  %v1639_v34 = vadd.f32 %v1584_v11, %v3994_v26  ;;  %v2461_v28 = vld [vmem:[%s4110_s6 + $0xa0] sm:$0xff] }
 0x26a   : > { %v2335_v32 = vpop.f32.mrf.mxu0 }
 0x26b   : > { %v2389_v56 = vadd.f32 %v2333_v30, %v2139_v12 }
 0x26d   : > { %v2425_v25 = vadd.f32 %v4115_v42, %v2389_v56 }
 0x26e   : > { %v1835_v21 = vpop.f32.mrf.mxu2 }
 0x26f   : > { %v2489_v51 = vadd.f32 %v2457_v0, %v2425_v25  ;;  %v1890_v19 = vadd.f32 %v1835_v21, %v1639_v34  ;;  %v2085_v4 = vpop.f32.mrf.mxu3  ;;  %v2462_v21 = vld [vmem:[%s4110_s6 + $0xa8] sm:$0xff] }
 0x270   : > { %v1587_v38 = vpop.f32.mrf.mxu1 }
 0x271   : > { %2521 = vst.msk [vmem:[%s4124_s5 + $0x80] sm:$0xff] %vm354_vm0, %v2489_v51  ;;  %v2140_v7 = vadd.f32 %v2085_v4, %v1890_v19  ;;  %v1640_v45 = vadd.f32 %v1587_v38, %v4000_v62 }
 0x272   : > { %v2338_v16 = vpop.f32.mrf.mxu0 }
 0x273   : > { %v2390_v18 = vadd.f32 %v2335_v32, %v2140_v7 }
 0x275   : > { %v2426_v8 = vadd.f32 %v4115_v42, %v2390_v18 }
 0x276   : > { %v1838_v33 = vpop.f32.mrf.mxu2 }
 0x277   : > { %v2490_v29 = vadd.f32 %v2458_v50, %v2426_v8  ;;  %v1891_v26 = vadd.f32 %v1838_v33, %v1640_v45  ;;  %v2088_v20 = vpop.f32.mrf.mxu3  ;;  %v2463_v45 = vld [vmem:[%s4110_s6 + $0xb0] sm:$0xff] }
 0x278   : > { %v1589_v54 = vpop.f32.mrf.mxu1 }
 0x279   : > { %2522 = vst.msk [vmem:[%s4124_s5 + $0x88] sm:$0xff] %vm354_vm0, %v2490_v29  ;;  %v2141_v35 = vadd.f32 %v2088_v20, %v1891_v26  ;;  %v1641_v23 = vadd.f32 %v1589_v54, %v4009_v40 }
 0x27a   : > { %v2340_v17 = vpop.f32.mrf.mxu0 }
 0x27b   : > { %v2391_v39 = vadd.f32 %v2338_v16, %v2141_v35 }
 0x27d   : > { %v2427_v59 = vadd.f32 %v4115_v42, %v2391_v39 }
 0x27e   : > { %v1840_v43 = vpop.f32.mrf.mxu2 }
 0x27f   : > { %v2491_v44 = vadd.f32 %v2459_v52, %v2427_v59  ;;  %v1892_v62 = vadd.f32 %v1840_v43, %v1641_v23  ;;  %v2090_v3 = vpop.f32.mrf.mxu3  ;;  %v2464_v59 = vld [vmem:[%s4110_s6 + $0xb8] sm:$0xff] }
 0x280   : > { %v1592_v6 = vpop.f32.mrf.mxu1 }
 0x281   : > { %2523 = vst.msk [vmem:[%s4124_s5 + $0x90] sm:$0xff] %vm354_vm0, %v2491_v44  ;;  %v2142_v55 = vadd.f32 %v2090_v3, %v1892_v62  ;;  %v1642_v46 = vadd.f32 %v1592_v6, %v4015_v63 }
 0x282   : > { %v2343_v48 = vpop.f32.mrf.mxu0 }
 0x283   : > { %v2392_v10 = vadd.f32 %v2340_v17, %v2142_v55 }
 0x285   : > { %v2428_v57 = vadd.f32 %v4115_v42, %v2392_v10 }
 0x286   : > { %v1843_v2 = vpop.f32.mrf.mxu2 }
 0x287   : > { %v2492_v30 = vadd.f32 %v2460_v22, %v2428_v57  ;;  %v1893_v40 = vadd.f32 %v1843_v2, %v1642_v46  ;;  %v2093_v15 = vpop.f32.mrf.mxu3  ;;  %v2465_v22 = vld [vmem:[%s4110_s6 + $0xc0] sm:$0xff] }
 0x288   : > { %v1594_v27 = vpop.f32.mrf.mxu1 }
 0x289   : > { %2524 = vst.msk [vmem:[%s4124_s5 + $0x98] sm:$0xff] %vm354_vm0, %v2492_v30  ;;  %v2143_v37 = vadd.f32 %v2093_v15, %v1893_v40  ;;  %v1643_v9 = vadd.f32 %v1594_v27, %v4024_v31 }
 0x28a   : > { %v2345_v58 = vpop.f32.mrf.mxu0 }
 0x28b   : > { %v2393_v41 = vadd.f32 %v2343_v48, %v2143_v37 }
 0x28d   : > { %v2429_v1 = vadd.f32 %v4115_v42, %v2393_v41  ;;  %v2466_v41 = vld [vmem:[%s4110_s6 + $0xc8] sm:$0xff] }
 0x28e   : > { %v1845_v11 = vpop.f32.mrf.mxu2 }
 0x28f   : > { %v2493_v12 = vadd.f32 %v2461_v28, %v2429_v1  ;;  %v1894_v63 = vadd.f32 %v1845_v11, %v1643_v9  ;;  %v2095_v32 = vpop.f32.mrf.mxu3 }
 0x290   : > { %v1597_v56 = vpop.f32.mrf.mxu1 }
 0x291   : > { %2525 = vst.msk [vmem:[%s4124_s5 + $0xa0] sm:$0xff] %vm354_vm0, %v2493_v12  ;;  %v2144_v0 = vadd.f32 %v2095_v32, %v1894_v63  ;;  %v1644_v19 = vadd.f32 %v1597_v56, %v4030_v53 }
 0x292   : > { %v2348_v25 = vpop.f32.mrf.mxu0 }
 0x293   : > { %v2394_v34 = vadd.f32 %v2345_v58, %v2144_v0 }
 0x295   : > { %v2430_v51 = vadd.f32 %v4115_v42, %v2394_v34 }
 0x296   : > { %v1848_v4 = vpop.f32.mrf.mxu2 }
 0x297   : > { %v2494_v38 = vadd.f32 %v2462_v21, %v2430_v51  ;;  %v1895_v31 = vadd.f32 %v1848_v4, %v1644_v19  ;;  %v2098_v7 = vpop.f32.mrf.mxu3 }
 0x298   : > { %v1599_v16 = vpop.f32.mrf.mxu1 }
 0x299   : > { %2526 = vst.msk [vmem:[%s4124_s5 + $0xa8] sm:$0xff] %vm354_vm0, %v2494_v38  ;;  %v2145_v18 = vadd.f32 %v2098_v7, %v1895_v31  ;;  %v1645_v29 = vadd.f32 %v1599_v16, %v4039_v14  ;;  %v2468_v16 = vld [vmem:[%s4110_s6 + $0xd8] sm:$0xff] }
 0x29a   : > { %v2350_v50 = vpop.f32.mrf.mxu0 }
 0x29b   : > { %v2395_v8 = vadd.f32 %v2348_v25, %v2145_v18  ;;  %v2467_v25 = vld [vmem:[%s4110_s6 + $0xd0] sm:$0xff] }
 0x29d   : > { %v2431_v33 = vadd.f32 %v4115_v42, %v2395_v8 }
 0x29e   : > { %v1850_v26 = vpop.f32.mrf.mxu2 }
 0x29f   : > { %v2495_v20 = vadd.f32 %v2463_v45, %v2431_v33  ;;  %v1896_v53 = vadd.f32 %v1850_v26, %v1645_v29  ;;  %v2100_v54 = vpop.f32.mrf.mxu3 }
 0x2a0   : > { %v1602_v35 = vpop.f32.mrf.mxu1 }
 0x2a1   : > { %2527 = vst.msk [vmem:[%s4124_s5 + $0xb0] sm:$0xff] %vm354_vm0, %v2495_v20  ;;  %v2146_v17 = vadd.f32 %v2100_v54, %v1896_v53  ;;  %v1646_v43 = vadd.f32 %v1602_v35, %v4045_v61  ;;  %v2469_v54 = vld [vmem:[%s4110_s6 + $0xe0] sm:$0xff] }
 0x2a2   : > { %v2353_v39 = vpop.f32.mrf.mxu0 }
 0x2a3   : > { %v2396_v52 = vadd.f32 %v2350_v50, %v2146_v17 }
 0x2a5   : > { %v2432_v23 = vadd.f32 %v4115_v42, %v2396_v52 }
 0x2a6   : > { %v1853_v44 = vpop.f32.mrf.mxu2 }
 0x2a7   : > { %v2496_v62 = vadd.f32 %v2464_v59, %v2432_v23  ;;  %v1897_v14 = vadd.f32 %v1853_v44, %v1646_v43  ;;  %v2103_v3 = vpop.f32.mrf.mxu3 }
 0x2a8   : > { %v1604_v6 = vpop.f32.mrf.mxu1 }
 0x2a9   : > { %2528 = vst.msk [vmem:[%s4124_s5 + $0xb8] sm:$0xff] %vm354_vm0, %v2496_v62  ;;  %v2147_v55 = vadd.f32 %v2103_v3, %v1897_v14  ;;  %v1647_v46 = vadd.f32 %v1604_v6, %v4054_v13  ;;  %v2470_v14 = vld [vmem:[%s4110_s6 + $0xe8] sm:$0xff] }
 0x2aa   : > { %v2355_v48 = vpop.f32.mrf.mxu0 }
 0x2ab   : > { %v2397_v10 = vadd.f32 %v2353_v39, %v2147_v55 }
 0x2ad   : > { %v2433_v57 = vadd.f32 %v4115_v42, %v2397_v10 }
 0x2ae   : > { %v1855_v2 = vpop.f32.mrf.mxu2 }
 0x2af   : > { %v2497_v30 = vadd.f32 %v2465_v22, %v2433_v57  ;;  %v1898_v61 = vadd.f32 %v1855_v2, %v1647_v46  ;;  %v2105_v40 = vpop.f32.mrf.mxu3 }
 0x2b0   : > { %v1607_v15 = vpop.f32.mrf.mxu1 }
 0x2b1   : > { %2529 = vst.msk [vmem:[%s4124_s5 + $0xc0] sm:$0xff] %vm354_vm0, %v2497_v30  ;;  %v2148_v27 = vadd.f32 %v2105_v40, %v1898_v61  ;;  %v1648_v1 = vadd.f32 %v1607_v15, %v4060_v47  ;;  %v2471_v30 = vld [vmem:[%s4110_s6 + $0xf0] sm:$0xff] }
 0x2b2   : > { %v2358_v37 = vpop.f32.mrf.mxu0 }
 0x2b3   : > { %v2398_v58 = vadd.f32 %v2355_v48, %v2148_v27 }
 0x2b5   : > { %v2434_v28 = vadd.f32 %v4115_v42, %v2398_v58 }
 0x2b6   : > { %v1858_v9 = vpop.f32.mrf.mxu2 }
 0x2b7   : > { %v2498_v11 = vadd.f32 %v2466_v41, %v2434_v28  ;;  %v1899_v13 = vadd.f32 %v1858_v9, %v1648_v1  ;;  %v2108_v12 = vpop.f32.mrf.mxu3 }
 0x2b8   : > { %v1609_v63 = vpop.f32.mrf.mxu1 }
 0x2b9   : > { %2530 = vst.msk [vmem:[%s4124_s5 + $0xc8] sm:$0xff] %vm354_vm0, %v2498_v11  ;;  %v2149_v32 = vadd.f32 %v2108_v12, %v1899_v13  ;;  %v1649_v21 = vadd.f32 %v1609_v63, %v4069_v36 }
 0x2ba   : > { %v2360_v56 = vpop.f32.mrf.mxu0 }
 0x2bb   : > { %v2399_v0 = vadd.f32 %v2358_v37, %v2149_v32 }
 0x2bd   : > { %v2435_v34 = vadd.f32 %v4115_v42, %v2399_v0 }
 0x2be   : > { %v1860_v51 = vpop.f32.mrf.mxu2 }
 0x2bf   : > { %v2499_v19 = vadd.f32 %v2467_v25, %v2435_v34  ;;  %v1900_v47 = vadd.f32 %v1860_v51, %v1649_v21  ;;  %v2110_v4 = vpop.f32.mrf.mxu3 }
 0x2c0   : > { %v1612_v38 = vpop.f32.mrf.mxu1 }
 0x2c1   : > { %2531 = vst.msk [vmem:[%s4124_s5 + $0xd0] sm:$0xff] %vm354_vm0, %v2499_v19  ;;  %v2150_v31 = vadd.f32 %v2110_v4, %v1900_v47  ;;  %v1650_v8 = vadd.f32 %v1612_v38, %v4075_v24 }
 0x2c2   : > { %v2363_v18 = vpop.f32.mrf.mxu0 }
 0x2c3   : > { %v2400_v7 = vadd.f32 %v2360_v56, %v2150_v31 }
 0x2c5   : > { %v2436_v50 = vadd.f32 %v4115_v42, %v2400_v7 }
 0x2c6   : > { %v1863_v45 = vpop.f32.mrf.mxu2 }
 0x2c7   : > { %v2500_v33 = vadd.f32 %v2468_v16, %v2436_v50  ;;  %v1901_v36 = vadd.f32 %v1863_v45, %v1650_v8  ;;  %v2113_v29 = vpop.f32.mrf.mxu3 }
 0x2c8   : > { %v1614_v26 = vpop.f32.mrf.mxu1 }
 0x2c9   : > { %2532 = vst.msk [vmem:[%s4124_s5 + $0xd8] sm:$0xff] %vm354_vm0, %v2500_v33  ;;  %v2151_v20 = vadd.f32 %v2113_v29, %v1901_v36  ;;  %v1651_v17 = vadd.f32 %v1614_v26, %v4084_v60 }
 0x2ca   : > { %v2365_v39 = vpop.f32.mrf.mxu0 }
 0x2cb   : > { %v2401_v53 = vadd.f32 %v2363_v18, %v2151_v20 }
 0x2cd   : > { %v2437_v35 = vadd.f32 %v4115_v42, %v2401_v53 }
 0x2ce   : > { %v1865_v52 = vpop.f32.mrf.mxu2 }
 0x2cf   : > { %v2501_v24 = vadd.f32 %v2469_v54, %v2437_v35  ;;  %v1902_v59 = vadd.f32 %v1865_v52, %v1651_v17  ;;  %v2115_v23 = vpop.f32.mrf.mxu3 }
 0x2d0   : > { %v1617_v43 = vpop.f32.mrf.mxu1 }
 0x2d1   : > { %2533 = vst.msk [vmem:[%s4124_s5 + $0xe0] sm:$0xff] %vm354_vm0, %v2501_v24  ;;  %v2152_v44 = vadd.f32 %v2115_v23, %v1902_v59  ;;  %v1652_v6 = vadd.f32 %v1617_v43, %v4090_v5 }
 0x2d2   : > { %v2368_v22 = vpop.f32.mrf.mxu0 }
 0x2d3   : > { %v2402_v62 = vadd.f32 %v2365_v39, %v2152_v44 }
 0x2d5   : > { %v2438_v3 = vadd.f32 %v4115_v42, %v2402_v62 }
 0x2d6   : > { %v1868_v55 = vpop.f32.mrf.mxu2 }
 0x2d7   : > { %v2502_v60 = vadd.f32 %v2470_v14, %v2438_v3  ;;  %v1903_v48 = vadd.f32 %v1868_v55, %v1652_v6  ;;  %v2118_v10 = vpop.f32.mrf.mxu3 }
 0x2d8   : > { %v1619_v46 = vpop.f32.mrf.mxu1 }
 0x2d9   : > { %2534 = vst.msk [vmem:[%s4124_s5 + $0xe8] sm:$0xff] %vm354_vm0, %v2502_v60  ;;  %v2153_v57 = vadd.f32 %v2118_v10, %v1903_v48  ;;  %v1653_v40 = vadd.f32 %v1619_v46, %v4099_v49  ;;  %v2472_v49 = vld [vmem:[%s4110_s6 + $0xf8] sm:$0xff] }
 0x2da   : > { %v2370_v41 = vpop.f32.mrf.mxu0 }
 0x2db   : > { %v2403_v2 = vadd.f32 %v2368_v22, %v2153_v57 }
 0x2dd   : > { %v2439_v61 = vadd.f32 %v4115_v42, %v2403_v2 }
 0x2de   : > { %v1870_v5 = vpop.f32.mrf.mxu2 }
 0x2df   : > { %v2503_v15 = vadd.f32 %v2471_v30, %v2439_v61  ;;  %v1904_v27 = vadd.f32 %v1870_v5, %v1653_v40  ;;  %v2120_v37 = vpop.f32.mrf.mxu3 }
 0x2e1   : > { %2535 = vst.msk [vmem:[%s4124_s5 + $0xf0] sm:$0xff] %vm354_vm0, %v2503_v15  ;;  %v2154_v58 = vadd.f32 %v2120_v37, %v1904_v27 }
 0x2e3   : > { %v2404_v28 = vadd.f32 %v2370_v41, %v2154_v58 }
 0x2e5   : > { %v2440_v1 = vadd.f32 %v4115_v42, %v2404_v28 }
 0x2e7   : > { %v2504_v9 = vadd.f32 %v2472_v49, %v2440_v1 }
 0x2e9   : > { %2536 = vst.msk [vmem:[%s4124_s5 + $0xf8] sm:$0xff] %vm354_vm0, %v2504_v9 }
 0x2ea   : > { %3304 = shalt.err (!%p3301_p3)
}
 0x2eb   : > { %s3341_s28 = smov 128   ;;  %s3342_s8 = smov 8  }
 0x2ec   : > { %3235 = dma.vmem_to_hbm [thread:$0]  (%p3406_p5), %s2551_s14, 4096, %s2553_s20, %s2538_s19, %s3341_s28, %s3341_s28, %s3342_s8  }
 0x2ed PF: > { %p3241_p4 = scmp.ge.s32.totalorder %s3339_s18, 2  ;;  %s2567_s9 = sand.u32 1, %s3327_s15  }
 0x2ee   : > { %s2568_s5 = scalar_lea.sflag [#allocation3], %s2567_s9 }
 0x2ef   : > { %p3238_p7 = pnand %p3241_p4, %p3410_p6 }
 0x2f1   : > { %p3239_p8 = pneg %p3238_p7 }
 0x2f3   : > { %3322 = dma.done.wait (%p3239_p8), %s2568_s5, 4096  }
 0x2f4   : > { %3324 = vsyncadd (%p3239_p8), %s2568_s5, 4294963200  ;;  %p14_p9 = scmp.ge.s32.totalorder %s3393_s21, 4   ;;  %s4427_s15 = smov %s3331_s16 }
 0x2f5   : > { %s4428_s16 = smov %s3335_s17  ;;  %s4429_s17 = smov %s3404_s24 }
 0x2f6   : > { %s4430_s18 = smov %s3393_s21  ;;  %16 = sbr.rel (!%p14_p9) target bundleno = 3 (0x3), region = 84 }
 0x2fb   :  { %2574 = vsyncpa [#allocation3], 1 }
 0x2fc   :  { %2576 = vsyncpa [#allocation3 + $0x1], 1 }

</bundles_post_ra>
